<compile_context>
chip_gen: v6e
topology: v6e:2x2x1
jax: 0.10.0
libtpu: 0.0.40
codegen_flags: <defaults>
</compile_context>

<pallas_src>
import jax
import jax.numpy as jnp
from jax.experimental import pallas as pl
from jax.experimental.pallas import tpu as pltpu

EPS = 1e-5
_OFF = 8  # sublane-aligned column offset of the image interior inside the padded scratch


def _shufflenet_branch_kernel(x_ref, w1_ref, w2_ref, b1_ref, b2_ref, o_ref, pad_ref):
    # x_ref:   (Bt, H*W, Cp)  bf16  branch input (Bt images per grid step, channels minor)
    # w1_ref:  (Cp, Cp)       bf16  1x1 conv weight [in, out], BN1 folded into columns
    # w2_ref:  (9, Cp, Cp)    bf16  3x3 conv weight [tap, in, out]; BN2 AND the reused
    #                               second 1x1+BN1 are folded in on the host
    # b1_ref:  (1, Cp)        f32   folded bias for the first 1x1 conv
    # b2_ref:  (1, Cp)        f32   fully-folded bias for the (3x3 + second 1x1) stage
    # o_ref:   (Bt, H*W, Cp)  f32
    # pad_ref: VMEM (Bt, H+2, Wp, Cp) bf16  zero-padded image scratch, persistent
    Bt, HW, Cp = x_ref.shape
    H = pad_ref.shape[1] - 2
    Wp = pad_ref.shape[2]
    W = HW // H

    # ---- 1x1 conv (+ folded BN1) + ReLU: bf16 MXU operands, f32 accumulate ----
    x = x_ref[...].reshape(Bt * HW, Cp)
    y1 = jnp.dot(x, w1_ref[...], preferred_element_type=jnp.float32) + b1_ref[...]
    y1 = jnp.maximum(y1, 0.0)

    # ---- zero the scratch border ONCE; no other store ever touches these regions ----
    # (grid axis is "arbitrary", so one sequential core owns the persistent scratch)
    @pl.when(pl.program_id(0) == 0)
    def _():
        pad_ref[:, 0:1, :, :] = jnp.zeros((Bt, 1, Wp, Cp), jnp.bfloat16)
        pad_ref[:, H + 1:H + 2, :, :] = jnp.zeros((Bt, 1, Wp, Cp), jnp.bfloat16)
        pad_ref[:, :, 0:_OFF, :] = jnp.zeros((Bt, H + 2, _OFF, Cp), jnp.bfloat16)
        pad_ref[:, :, _OFF + W:Wp, :] = jnp.zeros(
            (Bt, H + 2, Wp - _OFF - W, Cp), jnp.bfloat16)

    # ---- interior store at a sublane-aligned column offset (fully overwritten) ----
    pad_ref[:, 1:H + 1, _OFF:_OFF + W, :] = y1.astype(jnp.bfloat16).reshape(Bt, H, W, Cp)

    # ---- dense 3x3 conv (pad=1) with BN2 + second 1x1 + BN1 folded in, then ReLU ----
    # 9 accumulating taps straight from the padded scratch (no im2col buffer).
    acc = None
    for kh in range(3):
        for kw in range(3):
            t = kh * 3 + kw
            c0 = _OFF - 1 + kw
            win = pad_ref[:, kh:kh + H, c0:c0 + W, :].reshape(Bt * HW, Cp)
            d = jnp.dot(win, w2_ref[t], preferred_element_type=jnp.float32)
            acc = d if acc is None else acc + d
    o_ref[...] = jnp.maximum(acc + b2_ref[...], 0.0).reshape(Bt, HW, Cp)


def shufflenet_unit_forward(x_nchw, kparams, block_batch=None):
    """x_nchw: (N, C, H, W) float32. Returns (N, C, H, W) float32."""
    w1_p, w2_p, b1_p, b2_p = kparams
    N, C, H, W = x_nchw.shape
    Cb = C // 2
    Cp = w1_p.shape[0]            # padded channel count (multiple of 128)
    HW = H * W
    Wp = ((_OFF + W + 1 + 7) // 8) * 8   # padded-scratch width (sublane aligned)

    if block_batch is None:
        block_batch = next(b for b in range(min(N, 8), 0, -1) if N % b == 0)
    Bt = block_batch
    assert N % Bt == 0

    # One layout pass NCHW -> NHWC; split/concat then happen on the minor (channel) axis.
    x_nhwc = jnp.transpose(x_nchw, (0, 2, 3, 1)).astype(jnp.float32)
    shortcut = x_nhwc[..., :Cb]
    branch = x_nhwc[..., Cb:].reshape(N, HW, Cb)
    branch_p = jnp.pad(branch, ((0, 0), (0, 0), (0, Cp - Cb))).astype(jnp.bfloat16)

    out_p = pl.pallas_call(
        _shufflenet_branch_kernel,
        out_shape=jax.ShapeDtypeStruct((N, HW, Cp), jnp.float32),
        grid_spec=pltpu.PrefetchScalarGridSpec(
            num_scalar_prefetch=0,
            grid=(N // Bt,),
            in_specs=[
                pl.BlockSpec((Bt, HW, Cp), lambda n: (n, 0, 0)),
                pl.BlockSpec((Cp, Cp), lambda n: (0, 0)),          # constant, never re-fetched
                pl.BlockSpec((9, Cp, Cp), lambda n: (0, 0, 0)),    # constant, never re-fetched
                pl.BlockSpec((1, Cp), lambda n: (0, 0)),
                pl.BlockSpec((1, Cp), lambda n: (0, 0)),
            ],
            out_specs=pl.BlockSpec((Bt, HW, Cp), lambda n: (n, 0, 0)),
            scratch_shapes=[
                pltpu.VMEM((Bt, H + 2, Wp, Cp), jnp.bfloat16),     # zero-padded image
            ],
        ),
        compiler_params=pltpu.CompilerParams(
            # "arbitrary": the persistent scratch border is zeroed only at step 0.
            dimension_semantics=("arbitrary",)),
    )(branch_p, w1_p, w2_p, b1_p, b2_p)

    out_branch = out_p[:, :, :Cb].reshape(N, H, W, Cb)
    out_nhwc = jnp.concatenate([shortcut, out_branch], axis=-1)
    return jnp.transpose(out_nhwc, (0, 3, 1, 2))


def make_params(in_channels, key):
    """Deterministic synthetic parameters (PyTorch-convention shapes)."""
    Cb = in_channels // 2
    ks = jax.random.split(key, 12)
    p = dict(
        # Conv2dBnRelu (1x1)
        w1=0.3 * jax.random.normal(ks[0], (Cb, Cb, 1, 1), jnp.float32),
        b1=0.1 * jax.random.normal(ks[1], (Cb,), jnp.float32),
        g1=1.0 + 0.1 * jax.random.normal(ks[2], (Cb,), jnp.float32),
        be1=0.1 * jax.random.normal(ks[3], (Cb,), jnp.float32),
        m1=0.1 * jax.random.normal(ks[4], (Cb,), jnp.float32),
        v1=1.0 + 0.5 * jax.random.uniform(ks[5], (Cb,), jnp.float32),
        # DepthwiseBn (actually a dense 3x3 conv, pad=1)
        w2=0.1 * jax.random.normal(ks[6], (Cb, Cb, 3, 3), jnp.float32),
        b2=0.1 * jax.random.normal(ks[7], (Cb,), jnp.float32),
        g2=1.0 + 0.1 * jax.random.normal(ks[8], (Cb,), jnp.float32),
        be2=0.1 * jax.random.normal(ks[9], (Cb,), jnp.float32),
        m2=0.1 * jax.random.normal(ks[10], (Cb,), jnp.float32),
        v2=1.0 + 0.5 * jax.random.uniform(ks[11], (Cb,), jnp.float32),
    )
    return p


def fold_params_for_kernel(p):
    """Fold conv bias + eval-mode BN into the conv weights, fold the reused second 1x1
    conv into the 3x3 conv (exact: no nonlinearity between them), zero-pad channels to
    a multiple of 128 lanes, and emit bf16 MXU operands (biases stay f32)."""
    Cb = p["w1"].shape[0]
    Cp = max(128, ((Cb + 127) // 128) * 128)

    s1 = p["g1"] / jnp.sqrt(p["v1"] + EPS)
    b1f = (p["b1"] - p["m1"]) * s1 + p["be1"]
    s2 = p["g2"] / jnp.sqrt(p["v2"] + EPS)
    b2f = (p["b2"] - p["m2"]) * s2 + p["be2"]

    # 1x1 weight: (out,in,1,1) -> (in,out); BN1 scale into output columns.
    w1_io = jnp.transpose(p["w1"][:, :, 0, 0]) * s1[None, :]

    # 3x3 weight: (out,in,3,3) -> (kh,kw,in,out); BN2 scale; then fold the SECOND
    # (reused) 1x1+BN1:  W2' = W2 @ W1,  b' = b2 @ W1 + b1.
    w2_k = jnp.transpose(p["w2"], (2, 3, 1, 0)) * s2[None, None, None, :]
    w2_fold = jnp.einsum("hwic,co->hwio", w2_k, w1_io)
    b_final = b2f @ w1_io + b1f

    w1_p = jnp.zeros((Cp, Cp), jnp.float32).at[:Cb, :Cb].set(w1_io).astype(jnp.bfloat16)
    w2_p = (jnp.zeros((3, 3, Cp, Cp), jnp.float32)
            .at[:, :, :Cb, :Cb].set(w2_fold)
            .reshape(9, Cp, Cp).astype(jnp.bfloat16))
    b1_p = jnp.zeros((1, Cp), jnp.float32).at[0, :Cb].set(b1f)
    b2_p = jnp.zeros((1, Cp), jnp.float32).at[0, :Cb].set(b_final)
    return (w1_p, w2_p, b1_p, b2_p)


def ref_shufflenet_unit(x, p):
    """Pure-JAX f32 reference (mirrors the PyTorch module, eval-mode BN)."""
    dn = ("NCHW", "OIHW", "NCHW")
    hp = jax.lax.Precision.HIGHEST

    def bn(y, g, be, m, v):
        return (y - m[None, :, None, None]) / jnp.sqrt(v[None, :, None, None] + EPS) \
            * g[None, :, None, None] + be[None, :, None, None]

    def conv_bn_relu(z):
        y = jax.lax.conv_general_dilated(z, p["w1"], (1, 1), "VALID",
                                         dimension_numbers=dn, precision=hp)
        y = y + p["b1"][None, :, None, None]
        return jnp.maximum(bn(y, p["g1"], p["be1"], p["m1"], p["v1"]), 0.0)

    def dconv_bn(z):
        y = jax.lax.conv_general_dilated(z, p["w2"], (1, 1), ((1, 1), (1, 1)),
                                         dimension_numbers=dn, precision=hp)
        y = y + p["b2"][None, :, None, None]
        return bn(y, p["g2"], p["be2"], p["m2"], p["v2"])

    C = x.shape[1]
    shortcut, z = x[:, :C // 2], x[:, C // 2:]
    z = conv_bn_relu(z)
    z = dconv_bn(z)
    z = conv_bn_relu(z)
    return jnp.concatenate([shortcut, z], axis=1)


if __name__ == "__main__":
    N, C, H, W = 2, 8, 16, 16     # in_channels must be even; branch width Cb = 4
    key = jax.random.PRNGKey(0)
    k_x, k_p = jax.random.split(key)

    x = jax.random.normal(k_x, (N, C, H, W), jnp.float32)
    raw_params = make_params(C, k_p)
    kparams = fold_params_for_kernel(raw_params)

    fwd = jax.jit(shufflenet_unit_forward)
    out = fwd(x, kparams)
    out = jax.block_until_ready(out)

    ref = jax.block_until_ready(ref_shufflenet_unit(x, raw_params))
    assert out.shape == (N, C, H, W) and out.dtype == jnp.float32
    # bf16 MXU operands (f32 accumulation): expected max abs error ~1e-3; keep margin.
    max_err = float(jnp.max(jnp.abs(out - ref)))
    assert max_err < 2e-2, f"mismatch vs reference: {max_err}"

    print("KERNEL_OK")
</pallas_src>

<mosaic_0001>
module attributes {stable_mosaic.version = 11 : i64} {
  func.func @_shufflenet_branch_kernel(%arg0: i32, %arg1: memref<2x256x128xbf16, #tpu.memory_space<vmem>>, %arg2: memref<128x128xbf16, #tpu.memory_space<vmem>>, %arg3: memref<9x128x128xbf16, #tpu.memory_space<vmem>>, %arg4: memref<1x128xf32, #tpu.memory_space<vmem>>, %arg5: memref<1x128xf32, #tpu.memory_space<vmem>>, %arg6: memref<2x256x128xf32, #tpu.memory_space<vmem>>, %arg7: memref<2x18x32x128xbf16, #tpu.memory_space<vmem>>) attributes {dimension_semantics = [#tpu.dimension_semantics<arbitrary>], iteration_bounds = array<i64: 1>, scalar_prefetch = 0 : i64, scratch_operands = 1 : i64, tpu.core_type = #tpu.core_type<tc>, window_params = [{transform_indices = @transform_0, window_bounds = array<i64: 2, 256, 128>}, {pipeline_mode = #tpu.pipeline_mode<synchronous>, transform_indices = @transform_1, window_bounds = array<i64: 128, 128>}, {pipeline_mode = #tpu.pipeline_mode<synchronous>, transform_indices = @transform_2, window_bounds = array<i64: 9, 128, 128>}, {pipeline_mode = #tpu.pipeline_mode<synchronous>, transform_indices = @transform_3, window_bounds = array<i64: 1, 128>}, {pipeline_mode = #tpu.pipeline_mode<synchronous>, transform_indices = @transform_4, window_bounds = array<i64: 1, 128>}, {transform_indices = @transform_5, window_bounds = array<i64: 2, 256, 128>}]} {
    %c0 = arith.constant 0 : index
    %c0_0 = arith.constant 0 : index
    %c0_1 = arith.constant 0 : index
    %0 = vector.load %arg1[%c0, %c0_0, %c0_1] : memref<2x256x128xbf16, #tpu.memory_space<vmem>>, vector<2x256x128xbf16>
    %1 = vector.shape_cast %0 : vector<2x256x128xbf16> to vector<512x128xbf16>
    %c0_2 = arith.constant 0 : index
    %c0_3 = arith.constant 0 : index
    %2 = vector.load %arg2[%c0_2, %c0_3] : memref<128x128xbf16, #tpu.memory_space<vmem>>, vector<128x128xbf16>
    %cst = arith.constant dense<0.000000e+00> : vector<512x128xf32>
    %3 = tpu.matmul %1, %2, %cst {dimension_numbers = #tpu.dot_dimension_numbers<[1], [0], [0], [1], [0, 0, 1, 1], [], []>} : vector<512x128xbf16>, vector<128x128xbf16>, vector<512x128xf32> -> vector<512x128xf32>
    %c0_4 = arith.constant 0 : index
    %c0_5 = arith.constant 0 : index
    %4 = vector.load %arg4[%c0_4, %c0_5] : memref<1x128xf32, #tpu.memory_space<vmem>>, vector<1x128xf32>
    %5 = vector.broadcast %4 : vector<1x128xf32> to vector<512x128xf32>
    %6 = arith.addf %3, %5 : vector<512x128xf32>
    %cst_6 = arith.constant 0.000000e+00 : f32
    %7 = vector.broadcast %cst_6 : f32 to vector<512x128xf32>
    %8 = arith.maximumf %6, %7 : vector<512x128xf32>
    %c0_i32 = arith.constant 0 : i32
    %9 = arith.cmpi eq, %arg0, %c0_i32 : i32
    %10 = arith.extui %9 : i1 to i32
    %c0_i32_7 = arith.constant 0 : i32
    %11 = arith.cmpi ne, %10, %c0_i32_7 : i32
    scf.if %11 {
      %cst_81 = arith.constant 0.000000e+00 : bf16
      %75 = vector.broadcast %cst_81 : bf16 to vector<2x1x32x128xbf16>
      %c0_82 = arith.constant 0 : index
      %c0_83 = arith.constant 0 : index
      %c0_84 = arith.constant 0 : index
      %c0_85 = arith.constant 0 : index
      %76 = vector.load %arg7[%c0_82, %c0_83, %c0_84, %c0_85] : memref<2x18x32x128xbf16, #tpu.memory_space<vmem>>, vector<2x1x32x128xbf16>
      tpu.vector_store %arg7[%c0_82, %c0_83, %c0_84, %c0_85], %75 {strides = array<i32>} : memref<2x18x32x128xbf16, #tpu.memory_space<vmem>>, vector<2x1x32x128xbf16>,
      %cst_86 = arith.constant 0.000000e+00 : bf16
      %77 = vector.broadcast %cst_86 : bf16 to vector<2x1x32x128xbf16>
      %c0_87 = arith.constant 0 : index
      %c17 = arith.constant 17 : index
      %c0_88 = arith.constant 0 : index
      %c0_89 = arith.constant 0 : index
      %78 = vector.load %arg7[%c0_87, %c17, %c0_88, %c0_89] : memref<2x18x32x128xbf16, #tpu.memory_space<vmem>>, vector<2x1x32x128xbf16>
      tpu.vector_store %arg7[%c0_87, %c17, %c0_88, %c0_89], %77 {strides = array<i32>} : memref<2x18x32x128xbf16, #tpu.memory_space<vmem>>, vector<2x1x32x128xbf16>,
      %cst_90 = arith.constant 0.000000e+00 : bf16
      %79 = vector.broadcast %cst_90 : bf16 to vector<2x18x8x128xbf16>
      %c0_91 = arith.constant 0 : index
      %c0_92 = arith.constant 0 : index
      %c0_93 = arith.constant 0 : index
      %c0_94 = arith.constant 0 : index
      %80 = vector.load %arg7[%c0_91, %c0_92, %c0_93, %c0_94] : memref<2x18x32x128xbf16, #tpu.memory_space<vmem>>, vector<2x18x8x128xbf16>
      tpu.vector_store %arg7[%c0_91, %c0_92, %c0_93, %c0_94], %79 {strides = array<i32>} : memref<2x18x32x128xbf16, #tpu.memory_space<vmem>>, vector<2x18x8x128xbf16>,
      %cst_95 = arith.constant 0.000000e+00 : bf16
      %81 = vector.broadcast %cst_95 : bf16 to vector<2x18x8x128xbf16>
      %c0_96 = arith.constant 0 : index
      %c0_97 = arith.constant 0 : index
      %c24 = arith.constant 24 : index
      %c0_98 = arith.constant 0 : index
      %82 = vector.load %arg7[%c0_96, %c0_97, %c24, %c0_98] : memref<2x18x32x128xbf16, #tpu.memory_space<vmem>>, vector<2x18x8x128xbf16>
      tpu.vector_store %arg7[%c0_96, %c0_97, %c24, %c0_98], %81 {strides = array<i32>} : memref<2x18x32x128xbf16, #tpu.memory_space<vmem>>, vector<2x18x8x128xbf16>,
    } else {
    }
    %12 = arith.truncf %8 : vector<512x128xf32> to vector<512x128xbf16>
    %13 = vector.shape_cast %12 : vector<512x128xbf16> to vector<2x16x16x128xbf16>
    %c0_8 = arith.constant 0 : index
    %c1 = arith.constant 1 : index
    %c8 = arith.constant 8 : index
    %c0_9 = arith.constant 0 : index
    %14 = vector.load %arg7[%c0_8, %c1, %c8, %c0_9] : memref<2x18x32x128xbf16, #tpu.memory_space<vmem>>, vector<2x16x16x128xbf16>
    tpu.vector_store %arg7[%c0_8, %c1, %c8, %c0_9], %13 {strides = array<i32>} : memref<2x18x32x128xbf16, #tpu.memory_space<vmem>>, vector<2x16x16x128xbf16>,
    %c0_10 = arith.constant 0 : index
    %c0_11 = arith.constant 0 : index
    %c7 = arith.constant 7 : index
    %c0_12 = arith.constant 0 : index
    %15 = vector.load %arg7[%c0_10, %c0_11, %c7, %c0_12] : memref<2x18x32x128xbf16, #tpu.memory_space<vmem>>, vector<2x16x16x128xbf16>
    %16 = vector.shape_cast %15 : vector<2x16x16x128xbf16> to vector<512x128xbf16>
    %c0_13 = arith.constant 0 : index
    %c0_14 = arith.constant 0 : index
    %c0_15 = arith.constant 0 : index
    %17 = vector.load %arg3[%c0_13, %c0_14, %c0_15] : memref<9x128x128xbf16, #tpu.memory_space<vmem>>, vector<1x128x128xbf16>
    %18 = vector.shape_cast %17 : vector<1x128x128xbf16> to vector<128x128xbf16>
    %cst_16 = arith.constant dense<0.000000e+00> : vector<512x128xf32>
    %19 = tpu.matmul %16, %18, %cst_16 {dimension_numbers = #tpu.dot_dimension_numbers<[1], [0], [0], [1], [0, 0, 1, 1], [], []>} : vector<512x128xbf16>, vector<128x128xbf16>, vector<512x128xf32> -> vector<512x128xf32>
    %c0_17 = arith.constant 0 : index
    %c0_18 = arith.constant 0 : index
    %c8_19 = arith.constant 8 : index
    %c0_20 = arith.constant 0 : index
    %20 = vector.load %arg7[%c0_17, %c0_18, %c8_19, %c0_20] : memref<2x18x32x128xbf16, #tpu.memory_space<vmem>>, vector<2x16x16x128xbf16>
    %21 = vector.shape_cast %20 : vector<2x16x16x128xbf16> to vector<512x128xbf16>
    %c1_21 = arith.constant 1 : index
    %c0_22 = arith.constant 0 : index
    %c0_23 = arith.constant 0 : index
    %22 = vector.load %arg3[%c1_21, %c0_22, %c0_23] : memref<9x128x128xbf16, #tpu.memory_space<vmem>>, vector<1x128x128xbf16>
    %23 = vector.shape_cast %22 : vector<1x128x128xbf16> to vector<128x128xbf16>
    %cst_24 = arith.constant dense<0.000000e+00> : vector<512x128xf32>
    %24 = tpu.matmul %21, %23, %cst_24 {dimension_numbers = #tpu.dot_dimension_numbers<[1], [0], [0], [1], [0, 0, 1, 1], [], []>} : vector<512x128xbf16>, vector<128x128xbf16>, vector<512x128xf32> -> vector<512x128xf32>
    %25 = arith.addf %19, %24 : vector<512x128xf32>
    %c0_25 = arith.constant 0 : index
    %c0_26 = arith.constant 0 : index
    %c9 = arith.constant 9 : index
    %c0_27 = arith.constant 0 : index
    %26 = vector.load %arg7[%c0_25, %c0_26, %c9, %c0_27] : memref<2x18x32x128xbf16, #tpu.memory_space<vmem>>, vector<2x16x16x128xbf16>
    %27 = vector.shape_cast %26 : vector<2x16x16x128xbf16> to vector<512x128xbf16>
    %c2 = arith.constant 2 : index
    %c0_28 = arith.constant 0 : index
    %c0_29 = arith.constant 0 : index
    %28 = vector.load %arg3[%c2, %c0_28, %c0_29] : memref<9x128x128xbf16, #tpu.memory_space<vmem>>, vector<1x128x128xbf16>
    %29 = vector.shape_cast %28 : vector<1x128x128xbf16> to vector<128x128xbf16>
    %cst_30 = arith.constant dense<0.000000e+00> : vector<512x128xf32>
    %30 = tpu.matmul %27, %29, %cst_30 {dimension_numbers = #tpu.dot_dimension_numbers<[1], [0], [0], [1], [0, 0, 1, 1], [], []>} : vector<512x128xbf16>, vector<128x128xbf16>, vector<512x128xf32> -> vector<512x128xf32>
    %31 = arith.addf %25, %30 : vector<512x128xf32>
    %c0_31 = arith.constant 0 : index
    %c1_32 = arith.constant 1 : index
    %c7_33 = arith.constant 7 : index
    %c0_34 = arith.constant 0 : index
    %32 = vector.load %arg7[%c0_31, %c1_32, %c7_33, %c0_34] : memref<2x18x32x128xbf16, #tpu.memory_space<vmem>>, vector<2x16x16x128xbf16>
    %33 = vector.shape_cast %32 : vector<2x16x16x128xbf16> to vector<512x128xbf16>
    %c3 = arith.constant 3 : index
    %c0_35 = arith.constant 0 : index
    %c0_36 = arith.constant 0 : index
    %34 = vector.load %arg3[%c3, %c0_35, %c0_36] : memref<9x128x128xbf16, #tpu.memory_space<vmem>>, vector<1x128x128xbf16>
    %35 = vector.shape_cast %34 : vector<1x128x128xbf16> to vector<128x128xbf16>
    %cst_37 = arith.constant dense<0.000000e+00> : vector<512x128xf32>
    %36 = tpu.matmul %33, %35, %cst_37 {dimension_numbers = #tpu.dot_dimension_numbers<[1], [0], [0], [1], [0, 0, 1, 1], [], []>} : vector<512x128xbf16>, vector<128x128xbf16>, vector<512x128xf32> -> vector<512x128xf32>
    %37 = arith.addf %31, %36 : vector<512x128xf32>
    %c0_38 = arith.constant 0 : index
    %c1_39 = arith.constant 1 : index
    %c8_40 = arith.constant 8 : index
    %c0_41 = arith.constant 0 : index
    %38 = vector.load %arg7[%c0_38, %c1_39, %c8_40, %c0_41] : memref<2x18x32x128xbf16, #tpu.memory_space<vmem>>, vector<2x16x16x128xbf16>
    %39 = vector.shape_cast %38 : vector<2x16x16x128xbf16> to vector<512x128xbf16>
    %c4 = arith.constant 4 : index
    %c0_42 = arith.constant 0 : index
    %c0_43 = arith.constant 0 : index
    %40 = vector.load %arg3[%c4, %c0_42, %c0_43] : memref<9x128x128xbf16, #tpu.memory_space<vmem>>, vector<1x128x128xbf16>
    %41 = vector.shape_cast %40 : vector<1x128x128xbf16> to vector<128x128xbf16>
    %cst_44 = arith.constant dense<0.000000e+00> : vector<512x128xf32>
    %42 = tpu.matmul %39, %41, %cst_44 {dimension_numbers = #tpu.dot_dimension_numbers<[1], [0], [0], [1], [0, 0, 1, 1], [], []>} : vector<512x128xbf16>, vector<128x128xbf16>, vector<512x128xf32> -> vector<512x128xf32>
    %43 = arith.addf %37, %42 : vector<512x128xf32>
    %c0_45 = arith.constant 0 : index
    %c1_46 = arith.constant 1 : index
    %c9_47 = arith.constant 9 : index
    %c0_48 = arith.constant 0 : index
    %44 = vector.load %arg7[%c0_45, %c1_46, %c9_47, %c0_48] : memref<2x18x32x128xbf16, #tpu.memory_space<vmem>>, vector<2x16x16x128xbf16>
    %45 = vector.shape_cast %44 : vector<2x16x16x128xbf16> to vector<512x128xbf16>
    %c5 = arith.constant 5 : index
    %c0_49 = arith.constant 0 : index
    %c0_50 = arith.constant 0 : index
    %46 = vector.load %arg3[%c5, %c0_49, %c0_50] : memref<9x128x128xbf16, #tpu.memory_space<vmem>>, vector<1x128x128xbf16>
    %47 = vector.shape_cast %46 : vector<1x128x128xbf16> to vector<128x128xbf16>
    %cst_51 = arith.constant dense<0.000000e+00> : vector<512x128xf32>
    %48 = tpu.matmul %45, %47, %cst_51 {dimension_numbers = #tpu.dot_dimension_numbers<[1], [0], [0], [1], [0, 0, 1, 1], [], []>} : vector<512x128xbf16>, vector<128x128xbf16>, vector<512x128xf32> -> vector<512x128xf32>
    %49 = arith.addf %43, %48 : vector<512x128xf32>
    %c0_52 = arith.constant 0 : index
    %c2_53 = arith.constant 2 : index
    %c7_54 = arith.constant 7 : index
    %c0_55 = arith.constant 0 : index
    %50 = vector.load %arg7[%c0_52, %c2_53, %c7_54, %c0_55] : memref<2x18x32x128xbf16, #tpu.memory_space<vmem>>, vector<2x16x16x128xbf16>
    %51 = vector.shape_cast %50 : vector<2x16x16x128xbf16> to vector<512x128xbf16>
    %c6 = arith.constant 6 : index
    %c0_56 = arith.constant 0 : index
    %c0_57 = arith.constant 0 : index
    %52 = vector.load %arg3[%c6, %c0_56, %c0_57] : memref<9x128x128xbf16, #tpu.memory_space<vmem>>, vector<1x128x128xbf16>
    %53 = vector.shape_cast %52 : vector<1x128x128xbf16> to vector<128x128xbf16>
    %cst_58 = arith.constant dense<0.000000e+00> : vector<512x128xf32>
    %54 = tpu.matmul %51, %53, %cst_58 {dimension_numbers = #tpu.dot_dimension_numbers<[1], [0], [0], [1], [0, 0, 1, 1], [], []>} : vector<512x128xbf16>, vector<128x128xbf16>, vector<512x128xf32> -> vector<512x128xf32>
    %55 = arith.addf %49, %54 : vector<512x128xf32>
    %c0_59 = arith.constant 0 : index
    %c2_60 = arith.constant 2 : index
    %c8_61 = arith.constant 8 : index
    %c0_62 = arith.constant 0 : index
    %56 = vector.load %arg7[%c0_59, %c2_60, %c8_61, %c0_62] : memref<2x18x32x128xbf16, #tpu.memory_space<vmem>>, vector<2x16x16x128xbf16>
    %57 = vector.shape_cast %56 : vector<2x16x16x128xbf16> to vector<512x128xbf16>
    %c7_63 = arith.constant 7 : index
    %c0_64 = arith.constant 0 : index
    %c0_65 = arith.constant 0 : index
    %58 = vector.load %arg3[%c7_63, %c0_64, %c0_65] : memref<9x128x128xbf16, #tpu.memory_space<vmem>>, vector<1x128x128xbf16>
    %59 = vector.shape_cast %58 : vector<1x128x128xbf16> to vector<128x128xbf16>
    %cst_66 = arith.constant dense<0.000000e+00> : vector<512x128xf32>
    %60 = tpu.matmul %57, %59, %cst_66 {dimension_numbers = #tpu.dot_dimension_numbers<[1], [0], [0], [1], [0, 0, 1, 1], [], []>} : vector<512x128xbf16>, vector<128x128xbf16>, vector<512x128xf32> -> vector<512x128xf32>
    %61 = arith.addf %55, %60 : vector<512x128xf32>
    %c0_67 = arith.constant 0 : index
    %c2_68 = arith.constant 2 : index
    %c9_69 = arith.constant 9 : index
    %c0_70 = arith.constant 0 : index
    %62 = vector.load %arg7[%c0_67, %c2_68, %c9_69, %c0_70] : memref<2x18x32x128xbf16, #tpu.memory_space<vmem>>, vector<2x16x16x128xbf16>
    %63 = vector.shape_cast %62 : vector<2x16x16x128xbf16> to vector<512x128xbf16>
    %c8_71 = arith.constant 8 : index
    %c0_72 = arith.constant 0 : index
    %c0_73 = arith.constant 0 : index
    %64 = vector.load %arg3[%c8_71, %c0_72, %c0_73] : memref<9x128x128xbf16, #tpu.memory_space<vmem>>, vector<1x128x128xbf16>
    %65 = vector.shape_cast %64 : vector<1x128x128xbf16> to vector<128x128xbf16>
    %cst_74 = arith.constant dense<0.000000e+00> : vector<512x128xf32>
    %66 = tpu.matmul %63, %65, %cst_74 {dimension_numbers = #tpu.dot_dimension_numbers<[1], [0], [0], [1], [0, 0, 1, 1], [], []>} : vector<512x128xbf16>, vector<128x128xbf16>, vector<512x128xf32> -> vector<512x128xf32>
    %67 = arith.addf %61, %66 : vector<512x128xf32>
    %c0_75 = arith.constant 0 : index
    %c0_76 = arith.constant 0 : index
    %68 = vector.load %arg5[%c0_75, %c0_76] : memref<1x128xf32, #tpu.memory_space<vmem>>, vector<1x128xf32>
    %69 = vector.broadcast %68 : vector<1x128xf32> to vector<512x128xf32>
    %70 = arith.addf %67, %69 : vector<512x128xf32>
    %cst_77 = arith.constant 0.000000e+00 : f32
    %71 = vector.broadcast %cst_77 : f32 to vector<512x128xf32>
    %72 = arith.maximumf %70, %71 : vector<512x128xf32>
    %73 = vector.shape_cast %72 : vector<512x128xf32> to vector<2x256x128xf32>
    %c0_78 = arith.constant 0 : index
    %c0_79 = arith.constant 0 : index
    %c0_80 = arith.constant 0 : index
    %74 = vector.load %arg6[%c0_78, %c0_79, %c0_80] : memref<2x256x128xf32, #tpu.memory_space<vmem>>, vector<2x256x128xf32>
    tpu.vector_store %arg6[%c0_78, %c0_79, %c0_80], %73 {strides = array<i32>} : memref<2x256x128xf32, #tpu.memory_space<vmem>>, vector<2x256x128xf32>,
    return
  }
  func.func @transform_0(%arg0: i32) -> (i32, i32, i32) {
    %c0_i32 = arith.constant 0 : i32
    %c0_i32_0 = arith.constant 0 : i32
    %c0_i32_1 = arith.constant 0 : i32
    return %arg0, %c0_i32, %c0_i32_0 : i32, i32, i32
  }
  func.func @transform_1(%arg0: i32) -> (i32, i32) {
    %c0_i32 = arith.constant 0 : i32
    %c0_i32_0 = arith.constant 0 : i32
    %c0_i32_1 = arith.constant 0 : i32
    return %c0_i32, %c0_i32_0 : i32, i32
  }
  func.func @transform_2(%arg0: i32) -> (i32, i32, i32) {
    %c0_i32 = arith.constant 0 : i32
    %c0_i32_0 = arith.constant 0 : i32
    %c0_i32_1 = arith.constant 0 : i32
    %c0_i32_2 = arith.constant 0 : i32
    return %c0_i32, %c0_i32_0, %c0_i32_1 : i32, i32, i32
  }
  func.func @transform_3(%arg0: i32) -> (i32, i32) {
    %c0_i32 = arith.constant 0 : i32
    %c0_i32_0 = arith.constant 0 : i32
    %c0_i32_1 = arith.constant 0 : i32
    return %c0_i32, %c0_i32_0 : i32, i32
  }
  func.func @transform_4(%arg0: i32) -> (i32, i32) {
    %c0_i32 = arith.constant 0 : i32
    %c0_i32_0 = arith.constant 0 : i32
    %c0_i32_1 = arith.constant 0 : i32
    return %c0_i32, %c0_i32_0 : i32, i32
  }
  func.func @transform_5(%arg0: i32) -> (i32, i32, i32) {
    %c0_i32 = arith.constant 0 : i32
    %c0_i32_0 = arith.constant 0 : i32
    %c0_i32_1 = arith.constant 0 : i32
    return %arg0, %c0_i32, %c0_i32_0 : i32, i32, i32
  }
}

</mosaic_0001>

<bundles_post_ra>
// kernel: shufflenet_unit_forward.1
= control target key start
LH: loop header
LB: loop body
LE: loop exit
PB: predicated region body
PF: predicated region fallthrough
CT: control target
= control target key end

     0   :  { %v13526_v39 = vmov 0   ;;  %vm1211_vm0 = vsmask.f32 256  ;;  %vm1212_vm1 = vsmask.f32 4368  ;;  %s17829_s1 = inlined_call_operand.vmem [shape: bf16[128,128], index: 1, kind: input, shape index: {}]   ;;  %s17830_s0 = inlined_call_operand.vmem [shape: bf16[2,256,128], index: 0, kind: input, shape index: {}]   ;;  %s17831_s2 = inlined_call_operand.vmem [shape: bf16[9,128,128], index: 2, kind: input, shape index: {}]   ;;  %s17832_s3 = inlined_call_operand.vmem [shape: f32[1,128], index: 3, kind: input, shape index: {}]   ;;  %s17833_s4 = inlined_call_operand.vmem [shape: f32[1,128], index: 4, kind: input, shape index: {}]   ;;  %s17834_s5 = inlined_call_operand.vmem [shape: f32[2,256,128], index: 5, kind: output, shape index: {}]  }
   0x1   :  { %v13249_v0 = vld [vmem:[%s17829_s1 + $0x38] sm:$0xff]   ;;  %v13250_v1 = vld [vmem:[%s17829_s1 + $0x30] sm:$0xff]   ;;  %v13251_v2 = vld [vmem:[%s17829_s1 + $0x28] sm:$0xff]   ;;  %706 = vst [vmem:[#allocation2 + $0x4] sm:$0xf] %v13526_v39 }
   0x2   :  { %12448 = vmatprep.subr.bf16.mxu0 %v13249_v0  ;;  %v13252_v3 = vld [vmem:[%s17829_s1 + $0x20] sm:$0xff]   ;;  %v13253_v5 = vld [vmem:[%s17829_s1 + $0x18] sm:$0xff]   ;;  %v13254_v6 = vld [vmem:[%s17829_s1 + $0x10] sm:$0xff]   ;;  %707 = vst [vmem:[#allocation2 + $0x8] sm:$0xf] %v13526_v39 }
   0x3   :  { %12449 = vmatpush3.bf16.msra.mxu0 %v13249_v0  ;;  %v13257_v4 = vld [vmem:[%s17830_s0] sm:$0xff]   ;;  %v13255_v7 = vld [vmem:[%s17829_s1 + $0x8] sm:$0xff]   ;;  %v13259_v10 = vld [vmem:[%s17830_s0 + $0x10] sm:$0xff]   ;;  %705 = vst [vmem:[#allocation2] sm:$0xf] %v13526_v39 }
   0x4   :  { %12450 = vmatprep.subr.bf16.mxu0 %v13250_v1  ;;  %12464 = vmatprep.mubr.bf16.mxu0 %v13257_v4  ;;  %v13256_v8 = vld [vmem:[%s17829_s1] sm:$0xff]   ;;  %v13258_v9 = vld [vmem:[%s17830_s0 + $0x8] sm:$0xff]   ;;  %v13260_v11 = vld [vmem:[%s17830_s0 + $0x18] sm:$0xff]   ;;  %708 = vst [vmem:[#allocation2 + $0xc] sm:$0xf] %v13526_v39 }
   0x5   :  { %v13261_v12 = vld [vmem:[%s17830_s0 + $0x20] sm:$0xff]   ;;  %v13289_v13 = vld [vmem:[%s17831_s2 + $0x78] sm:$0xff]   ;;  %v13290_v14 = vld [vmem:[%s17831_s2 + $0x70] sm:$0xff]   ;;  %709 = vst [vmem:[#allocation2 + $0x120] sm:$0xf] %v13526_v39 }
   0x6   :  { %12528 = vmatprep.subr.bf16.mxu1 %v13289_v13  ;;  %v13291_v15 = vld [vmem:[%s17831_s2 + $0x68] sm:$0xff]   ;;  %v13292_v16 = vld [vmem:[%s17831_s2 + $0x38] sm:$0xff]   ;;  %v13263_v18 = vld [vmem:[%s17830_s0 + $0x30] sm:$0xff]   ;;  %710 = vst [vmem:[#allocation2 + $0x124] sm:$0xf] %v13526_v39 }
   0x7   :  { %12451 = vmatpush3.bf16.msra.mxu0 %v13250_v1  ;;  %12529 = vmatpush3.bf16.msra.mxu1 %v13289_v13  ;;  %v13262_v17 = vld [vmem:[%s17830_s0 + $0x28] sm:$0xff]   ;;  %v13264_v19 = vld [vmem:[%s17830_s0 + $0x38] sm:$0xff]   ;;  %v13265_v20 = vld [vmem:[%s17830_s0 + $0x40] sm:$0xff]   ;;  %711 = vst [vmem:[#allocation2 + $0x128] sm:$0xf] %v13526_v39 }
   0x8   :  { %12452 = vmatprep.subr.bf16.mxu0 %v13251_v2  ;;  %12530 = vmatprep.subr.bf16.mxu1 %v13290_v14  ;;  %v13266_v21 = vld [vmem:[%s17830_s0 + $0x48] sm:$0xff]   ;;  %v13267_v22 = vld [vmem:[%s17830_s0 + $0x50] sm:$0xff]   ;;  %v13268_v23 = vld [vmem:[%s17830_s0 + $0x58] sm:$0xff]   ;;  %712 = vst [vmem:[#allocation2 + $0x12c] sm:$0xf] %v13526_v39 }
   0x9   :  { %v13269_v24 = vld [vmem:[%s17830_s0 + $0x60] sm:$0xff]   ;;  %v13270_v25 = vld [vmem:[%s17830_s0 + $0x68] sm:$0xff]   ;;  %v13271_v26 = vld [vmem:[%s17830_s0 + $0x70] sm:$0xff]   ;;  %714 = vst [vmem:[#allocation2 + $0x110] sm:$0xf] %v13526_v39 }
   0xa   :  { %v13272_v27 = vld [vmem:[%s17830_s0 + $0x78] sm:$0xff]   ;;  %v13273_v28 = vld [vmem:[%s17830_s0 + $0x80] sm:$0xff]   ;;  %v13274_v29 = vld [vmem:[%s17830_s0 + $0x88] sm:$0xff]   ;;  %715 = vst [vmem:[#allocation2 + $0x114] sm:$0xf] %v13526_v39 }
   0xb   :  { %12453 = vmatpush3.bf16.msra.mxu0 %v13251_v2  ;;  %12531 = vmatpush3.bf16.msra.mxu1 %v13290_v14  ;;  %v13275_v30 = vld [vmem:[%s17830_s0 + $0x90] sm:$0xff]   ;;  %v13293_v32 = vld [vmem:[%s17831_s2 + $0x60] sm:$0xff]   ;;  %v13276_v33 = vld [vmem:[%s17830_s0 + $0x98] sm:$0xff]   ;;  %716 = vst [vmem:[#allocation2 + $0x118] sm:$0xf] %v13526_v39 }
   0xc   :  { %12454 = vmatprep.subr.bf16.mxu0 %v13252_v3  ;;  %12532 = vmatprep.subr.bf16.mxu1 %v13291_v15  ;;  %v13294_v31 = vld [vmem:[%s17831_s2 + $0x30] sm:$0xff]   ;;  %v13296_v34 = vld [vmem:[%s17831_s2 + $0x28] sm:$0xff]   ;;  %v13277_v35 = vld [vmem:[%s17830_s0 + $0xa0] sm:$0xff]   ;;  %717 = vst [vmem:[#allocation2 + $0x11c] sm:$0xf] %v13526_v39 }
   0xd   :  { %v13295_v36 = vld [vmem:[%s17831_s2 + $0x58] sm:$0xff]   ;;  %v13671_v37 = vld [vmem:[%s17831_s2 + $0x20] sm:$0xff]   ;;  %v13676_v38 = vld [vmem:[%s17831_s2 + $0x50] sm:$0xff]   ;;  %718 = vst [vmem:[#allocation2 + $0x230] sm:$0xf] %v13526_v39 }
   0xe   :  { %719 = vst [vmem:[#allocation2 + $0x234] sm:$0xf] %v13526_v39  ;;  %720 = vst [vmem:[#allocation2 + $0x238] sm:$0xf] %v13526_v39  ;;  %v13278_v40 = vld [vmem:[%s17830_s0 + $0xa8] sm:$0xff]   ;;  %v13300_v41 = vld [vmem:[%s17831_s2 + $0x18] sm:$0xff]  }
   0xf   :  { %12455 = vmatpush3.bf16.msra.mxu0 %v13252_v3  ;;  %12533 = vmatpush3.bf16.msra.mxu1 %v13291_v15  ;;  %721 = vst [vmem:[#allocation2 + $0x23c] sm:$0xf] %v13526_v39  ;;  %723 = vst [vmem:[#allocation2 + $0x10] sm:$0xf] %v13526_v39  ;;  %v13279_v42 = vld [vmem:[%s17830_s0 + $0xb0] sm:$0xff]   ;;  %v13299_v43 = vld [vmem:[%s17831_s2 + $0x48] sm:$0xff]  }
  0x10   :  { %12456 = vmatprep.subr.bf16.mxu0 %v13253_v5  ;;  %12534 = vmatprep.subr.bf16.mxu1 %v13293_v32  ;;  %724 = vst [vmem:[#allocation2 + $0x20] sm:$0xf] %v13526_v39  ;;  %725 = vst [vmem:[#allocation2 + $0x30] sm:$0xf] %v13526_v39  ;;  %v13302_v44 = vld [vmem:[%s17831_s2 + $0x10] sm:$0xff]   ;;  %v13301_v45 = vld [vmem:[%s17831_s2 + $0x40] sm:$0xff]  }
  0x11   :  { %726 = vst [vmem:[#allocation2 + $0x40] sm:$0xf] %v13526_v39  ;;  %727 = vst [vmem:[#allocation2 + $0x50] sm:$0xf] %v13526_v39  ;;  %v1116_v46 = vld [vmem:[#allocation2 + $0x4] sm:$0xf] }
  0x12   :  { %728 = vst [vmem:[#allocation2 + $0x60] sm:$0xf] %v13526_v39  ;;  %729 = vst [vmem:[#allocation2 + $0x70] sm:$0xf] %v13526_v39  ;;  %v1117_v47 = vld [vmem:[#allocation2 + $0x8] sm:$0xf] }
  0x13   :  { %12457 = vmatpush3.bf16.msra.mxu0 %v13253_v5  ;;  %12535 = vmatpush3.bf16.msra.mxu1 %v13293_v32  ;;  %730 = vst [vmem:[#allocation2 + $0x80] sm:$0xf] %v13526_v39  ;;  %731 = vst [vmem:[#allocation2 + $0x90] sm:$0xf] %v13526_v39  ;;  %v13280_v48 = vld [vmem:[%s17830_s0 + $0xb8] sm:$0xff]   ;;  %v11447_v49 = vcombine.low %v1116_v46, %v1117_v47  ;;  %v13304_v50 = vld [vmem:[%s17831_s2 + $0x8] sm:$0xff]  }
  0x14   :  { %12458 = vmatprep.subr.bf16.mxu0 %v13254_v6  ;;  %12536 = vmatprep.subr.bf16.mxu1 %v13295_v36  ;;  %732 = vst [vmem:[#allocation2 + $0xa0] sm:$0xf] %v13526_v39  ;;  %733 = vst [vmem:[#allocation2 + $0xb0] sm:$0xf] %v13526_v39  ;;  %v13281_v51 = vld [vmem:[%s17830_s0 + $0xc0] sm:$0xff]   ;;  %v13282_v53 = vld [vmem:[%s17830_s0 + $0xc8] sm:$0xff]  }
  0x15   :  { %734 = vst [vmem:[#allocation2 + $0xc0] sm:$0xf] %v13526_v39  ;;  %735 = vst [vmem:[#allocation2 + $0xd0] sm:$0xf] %v13526_v39  ;;  %12544 = vmatprep.mubr.bf16.mxu1 %v11447_v49  ;;  %v13308_v52 = vld [vmem:[%s17831_s2] sm:$0xff]   ;;  %v13283_v54 = vld [vmem:[%s17830_s0 + $0xd0] sm:$0xff]  }
  0x16   :  { %736 = vst [vmem:[#allocation2 + $0xe0] sm:$0xf] %v13526_v39  ;;  %737 = vst [vmem:[#allocation2 + $0xf0] sm:$0xf] %v13526_v39  ;;  %v13809_v55 = vld [vmem:[%s17831_s2 + $0xb8] sm:$0xff]   ;;  %v13285_v57 = vld [vmem:[%s17830_s0 + $0xe0] sm:$0xff]  }
  0x17   :  { %12459 = vmatpush3.bf16.msra.mxu0 %v13254_v6  ;;  %12537 = vmatpush3.bf16.msra.mxu1 %v13295_v36  ;;  %738 = vst [vmem:[#allocation2 + $0x100] sm:$0xf] %v13526_v39  ;;  %741 = vst [vmem:[#allocation2 + $0x130] sm:$0xf] %v13526_v39  ;;  %v13284_v56 = vld [vmem:[%s17830_s0 + $0xd8] sm:$0xff]   ;;  %v1220_v58 = vshrl.u32 %v1116_v46, 16 }
  0x18   :  { %12460 = vmatprep.subr.bf16.mxu0 %v13255_v7  ;;  %742 = vst [vmem:[#allocation2 + $0x140] sm:$0xf] %v13526_v39  ;;  %743 = vst [vmem:[#allocation2 + $0x150] sm:$0xf] %v13526_v39  ;;  %12538 = vmatprep.subr.bf16.mxu1 %v13676_v38  ;;  %v1229_v59 = vshrl.u32 %v1117_v47, 16  ;;  %v1223_v62 = vshll.u32 %v1116_v46, 16 }
  0x19   :  { %744 = vst [vmem:[#allocation2 + $0x160] sm:$0xf] %v13526_v39  ;;  %745 = vst [vmem:[#allocation2 + $0x170] sm:$0xf] %v13526_v39  ;;  %v1222_v61 = vrot.slane %v1220_v58, 7  ;;  %v1232_v0 = vshll.u32 %v1117_v47, 16 }
  0x1a   :  { %746 = vst [vmem:[#allocation2 + $0x180] sm:$0xf] %v13526_v39  ;;  %747 = vst [vmem:[#allocation2 + $0x190] sm:$0xf] %v13526_v39  ;;  %v1231_v63 = vrot.slane %v1229_v59, 7  ;;  %v13286_v2 = vld [vmem:[%s17830_s0 + $0xe8] sm:$0xff]  }
  0x1b   :  { %12461 = vmatpush3.bf16.msra.mxu0 %v13255_v7  ;;  %748 = vst [vmem:[#allocation2 + $0x1a0] sm:$0xf] %v13526_v39  ;;  %749 = vst [vmem:[#allocation2 + $0x1b0] sm:$0xf] %v13526_v39  ;;  %12539 = vmatpush3.bf16.msra.mxu1 %v13676_v38  ;;  %v13287_v3 = vld [vmem:[%s17830_s0 + $0xf0] sm:$0xff]   ;;  %v1225_v4 = vor.u32 %v1223_v62, %v1222_v61  ;;  %v1227_v5 = vrot.slane %v1222_v61, 4 }
  0x1c   :  { %12462 = vmatprep.subr.bf16.mxu0 %v13256_v8  ;;  %750 = vst [vmem:[#allocation2 + $0x1c0] sm:$0xf] %v13526_v39  ;;  %751 = vst [vmem:[#allocation2 + $0x1d0] sm:$0xf] %v13526_v39  ;;  %12540 = vmatprep.subr.bf16.mxu1 %v13299_v43  ;;  %v1234_v6 = vor.u32 %v1232_v0, %v1231_v63  ;;  %v1121_v13 = vld [vmem:[#allocation2 + $0x20] sm:$0x8] }
  0x1d   :  { %752 = vst [vmem:[#allocation2 + $0x1e0] sm:$0xf] %v13526_v39  ;;  %753 = vst [vmem:[#allocation2 + $0x1f0] sm:$0xf] %v13526_v39  ;;  %v1118_v14 = vld [vmem:[#allocation2 + $0x10] sm:$0x8] }
  0x1e   :  { %754 = vst [vmem:[#allocation2 + $0x200] sm:$0xf] %v13526_v39  ;;  %755 = vst [vmem:[#allocation2 + $0x210] sm:$0xf] %v13526_v39  ;;  %v1127_v15 = vld [vmem:[#allocation2 + $0x40] sm:$0x8] }
  0x1f   :  { %12463 = vmatpush3.bf16.msra.mxu0 %v13256_v8  ;;  %756 = vst [vmem:[#allocation2 + $0x220] sm:$0xf] %v13526_v39  ;;  %759 = vst [vmem:[#allocation2 + $0x1c] sm:$0xf] %v13526_v39  ;;  %12541 = vmatpush3.bf16.msra.mxu1 %v13299_v43  ;;  %v17839_v8 = vmov 0 }
  0x20   :  { %12608 = vmatprep.subr.bf16.mxu0 %v13292_v16  ;;  %760 = vst [vmem:[#allocation2 + $0x2c] sm:$0xf] %v13526_v39  ;;  %761 = vst [vmem:[#allocation2 + $0x3c] sm:$0xf] %v13526_v39  ;;  %12542 = vmatprep.subr.bf16.mxu1 %v13301_v45  ;;  %v1151_v32 = vld [vmem:[#allocation2 + $0xc0] sm:$0x8] }
  0x21   :  { %762 = vst [vmem:[#allocation2 + $0x4c] sm:$0xf] %v13526_v39  ;;  %763 = vst [vmem:[#allocation2 + $0x5c] sm:$0xf] %v13526_v39  ;;  %v1154_v46 = vld [vmem:[#allocation2 + $0xd0] sm:$0x8] }
  0x22   :  { %12465 = vmatmul.mubr.bf16.vlgmr.msra.gmra.mxu0 %v13258_v9  ;;  %764 = vst [vmem:[#allocation2 + $0x6c] sm:$0xf] %v13526_v39  ;;  %765 = vst [vmem:[#allocation2 + $0x7c] sm:$0xf] %v13526_v39  ;;  %v1501_v62 = vshrl.u32 %v1154_v46, 16 }
  0x23   :  { %12468 = vmatprep.mubr.bf16.mxu0 %v13259_v10  ;;  %12609 = vmatpush3.bf16.msra.mxu0 %v13292_v16  ;;  %766 = vst [vmem:[#allocation2 + $0x8c] sm:$0xf] %v13526_v39  ;;  %767 = vst [vmem:[#allocation2 + $0x9c] sm:$0xf] %v13526_v39  ;;  %v1124_v16 = vld [vmem:[#allocation2 + $0x30] sm:$0x8] }
  0x24   :  { %12610 = vmatprep.subr.bf16.mxu0 %v13294_v31  ;;  %768 = vst [vmem:[#allocation2 + $0xac] sm:$0xf] %v13526_v39  ;;  %769 = vst [vmem:[#allocation2 + $0xbc] sm:$0xf] %v13526_v39  ;;  %12543 = vmatpush3.bf16.msra.mxu1 %v13301_v45  ;;  %v1479_v45 = vshrl.u32 %v1151_v32, 16 }
  0x25   :  { %770 = vst [vmem:[#allocation2 + $0xcc] sm:$0xf] %v13526_v39  ;;  %771 = vst [vmem:[#allocation2 + $0xdc] sm:$0xf] %v13526_v39  ;;  %12688 = vmatprep.subr.bf16.mxu1 %v13809_v55  ;;  %v1169_v63 = vld [vmem:[#allocation2 + $0x140] sm:$0x8] }
  0x26   :  { %772 = vst [vmem:[#allocation2 + $0xec] sm:$0xf] %v13526_v39  ;;  %773 = vst [vmem:[#allocation2 + $0xfc] sm:$0xf] %v13526_v39  ;;  %vm3041_vm3 = vsmask.f32 3328 }
  0x27   :  { %12611 = vmatpush3.bf16.msra.mxu0 %v13294_v31  ;;  %774 = vst [vmem:[#allocation2 + $0x10c] sm:$0xf] %v13526_v39  ;;  %777 = vst [vmem:[#allocation2 + $0x13c] sm:$0xf] %v13526_v39  ;;  %v1142_v31 = vld [vmem:[#allocation2 + $0x90] sm:$0x8] }
  0x28   :  { %12612 = vmatprep.subr.bf16.mxu0 %v13296_v34  ;;  %778 = vst [vmem:[#allocation2 + $0x14c] sm:$0xf] %v13526_v39  ;;  %779 = vst [vmem:[#allocation2 + $0x15c] sm:$0xf] %v13526_v39  ;;  %vm3042_vm4 = vsmask.f32 7440 }
  0x29   :  { %780 = vst [vmem:[#allocation2 + $0x16c] sm:$0xf] %v13526_v39  ;;  %781 = vst [vmem:[#allocation2 + $0x17c] sm:$0xf] %v13526_v39 }
  0x2a   :  { %12469 = vmatmul.mubr.bf16.gmra.mxu0 %v13260_v11  ;;  %782 = vst [vmem:[#allocation2 + $0x18c] sm:$0xf] %v13526_v39  ;;  %783 = vst [vmem:[#allocation2 + $0x19c] sm:$0xf] %v13526_v39  ;;  %v13288_v11 = vld [vmem:[%s17830_s0 + $0xf8] sm:$0xff]  }
  0x2b   :  { %12472 = vmatprep.mubr.bf16.mxu0 %v13261_v12  ;;  %12613 = vmatpush3.bf16.msra.mxu0 %v13296_v34  ;;  %784 = vst [vmem:[#allocation2 + $0x1ac] sm:$0xf] %v13526_v39  ;;  %785 = vst [vmem:[#allocation2 + $0x1bc] sm:$0xf] %v13526_v39  ;;  %v1148_v34 = vld [vmem:[#allocation2 + $0xb0] sm:$0x8] }
  0x2c   :  { %786 = vst [vmem:[#allocation2 + $0x1cc] sm:$0xf] %v13526_v39  ;;  %787 = vst [vmem:[#allocation2 + $0x1dc] sm:$0xf] %v13526_v39  ;;  %12614 = vmatprep.subr.bf16.mxu0 %v13671_v37 }
  0x2d   :  { %788 = vst [vmem:[#allocation2 + $0x1ec] sm:$0xf] %v13526_v39  ;;  %789 = vst [vmem:[#allocation2 + $0x1fc] sm:$0xf] %v13526_v39 }
  0x2e   :  { %790 = vst [vmem:[#allocation2 + $0x20c] sm:$0xf] %v13526_v39  ;;  %791 = vst [vmem:[#allocation2 + $0x21c] sm:$0xf] %v13526_v39 }
  0x2f   :  { %792 = vst [vmem:[#allocation2 + $0x22c] sm:$0xf] %v13526_v39  ;;  %722 = vst [vmem:[#allocation2] sm:$0xf] %v13526_v39  ;;  %12615 = vmatpush3.bf16.msra.mxu0 %v13671_v37 }
  0x30   :  { %739 = vst [vmem:[#allocation2 + $0x110] sm:$0xf] %v13526_v39  ;;  %740 = vst [vmem:[#allocation2 + $0x120] sm:$0xf] %v13526_v39  ;;  %12616 = vmatprep.subr.bf16.mxu0 %v13300_v41 }
  0x31   :  { %757 = vst [vmem:[#allocation2 + $0x230] sm:$0xf] %v13526_v39  ;;  %758 = vst [vmem:[#allocation2 + $0xc] sm:$0xf] %v13526_v39 }
  0x32   :  { %12473 = vmatmul.mubr.bf16.gmra.mxu0 %v13262_v17  ;;  %775 = vst [vmem:[#allocation2 + $0x11c] sm:$0xf] %v13526_v39  ;;  %776 = vst [vmem:[#allocation2 + $0x12c] sm:$0xf] %v13526_v39  ;;  %v1133_v17 = vld [vmem:[#allocation2 + $0x60] sm:$0x8] }
  0x33   :  { %12476 = vmatprep.mubr.bf16.mxu0 %v13263_v18  ;;  %793 = vst [vmem:[#allocation2 + $0x23c] sm:$0xf] %v13526_v39  ;;  %12617 = vmatpush3.bf16.msra.mxu0 %v13300_v41  ;;  %vm13824_vm2 = vmor %vm1211_vm0, %vm1212_vm1  ;;  %v1259_v18 = vshrl.u32 %v1121_v13, 16  ;;  %v1157_v41 = vld [vmem:[#allocation2 + $0xe0] sm:$0x8] }
  0x34   :  { %12618 = vmatprep.subr.bf16.mxu0 %v13302_v44  ;;  %v17840_v8 = vsel %vm13824_vm2, 4294967295, %v17839_v8  ;;  %v1235_v10 = vsel %vm13824_vm2, %v1227_v5, %v1234_v6  ;;  %vm14360_vm5 = vmor %vm3041_vm3, %vm3042_vm4 }
  0x35   :  { %17841 = vst [vmem:[#allocation3_spill] sm:$0xff] %v17840_v8  ;;  %v13848_v38 = vrot.slane %v1259_v18, 11 }
  0x36   :  { %v1115_v60 = vld [vmem:[#allocation2] sm:$0x8] }
  0x37   :  { %12619 = vmatpush3.bf16.msra.mxu0 %v13302_v44  ;;  %v1215_v1 = vshrl.u32 %v1115_v60, 16  ;;  %v1413_v44 = vshrl.u32 %v1142_v31, 16  ;;  %v1163_v58 = vld [vmem:[#allocation2 + $0x120] sm:$0x8] }
  0x38   :  { %12620 = vmatprep.subr.bf16.mxu0 %v13304_v50 }
  0x39   :  { %v11399_v7 = vrot.slane %v1215_v1, 11  ;;  %v13866_v1 = vrot.slane %v1413_v44, 11 }
  0x3a   :  { %12477 = vmatmul.mubr.bf16.gmra.mxu0 %v13264_v19  ;;  %v1130_v19 = vld [vmem:[#allocation2 + $0x50] sm:$0x8] }
  0x3b   :  { %12480 = vmatprep.mubr.bf16.mxu0 %v13265_v20  ;;  %12621 = vmatpush3.bf16.msra.mxu0 %v13304_v50  ;;  %v1226_v9 = vsel %vm13824_vm2, %v11399_v7, %v1225_v4  ;;  %v1139_v20 = vld [vmem:[#allocation2 + $0x80] sm:$0x8]  ;;  %v1457_v50 = vshrl.u32 %v1148_v34, 16 }
  0x3c   :  { %12622 = vmatprep.subr.bf16.mxu0 %v13308_v52  ;;  %v11487_v12 = vcombine.low %v1226_v9, %v1235_v10  ;;  %v1567_v9 = vshrl.u32 %v1163_v58, 16  ;;  %v1166_v10 = vld [vmem:[#allocation2 + $0x130] sm:$0x8] }
  0x3d   :  { %v13872_v7 = vrot.slane %v1457_v50, 11 }
  0x3e   :  { %v11415_v34 = vrot.slane %v1567_v9, 11 }
  0x3f   :  { %12623 = vmatpush3.bf16.msra.mxu0 %v13308_v52 }
  0x42   :  { %12481 = vmatmul.mubr.bf16.gmra.mxu0 %v13266_v21  ;;  %v1237_v21 = vshrl.u32 %v1118_v14, 16 }
  0x43   :  { %12484 = vmatprep.mubr.bf16.mxu0 %v13267_v22  ;;  %v1303_v22 = vshrl.u32 %v1127_v15, 16  ;;  %v1611_v15 = vshrl.u32 %v1169_v63, 16 }
  0x44   :  { %v13846_v37 = vrot.slane %v1237_v21, 11  ;;  %v1175_v21 = vld [vmem:[#allocation2 + $0x160] sm:$0x8] }
  0x45   :  { %v13852_v43 = vrot.slane %v1303_v22, 11 }
  0x4a   :  { %12485 = vmatmul.mubr.bf16.gmra.mxu0 %v13268_v23  ;;  %v13835_v23 = vld [vmem:[#allocation2 + $0x124] sm:$0xf] }
  0x4b   :  { %12488 = vmatprep.mubr.bf16.mxu0 %v13269_v24  ;;  %v13837_v24 = vld [vmem:[#allocation2 + $0x128] sm:$0xf] }
  0x4c   :  { %v1581_v36 = vshrl.u32 %v13837_v24, 16 }
  0x52   :  { %12489 = vmatmul.mubr.bf16.gmra.mxu0 %v13270_v25  ;;  %v1281_v25 = vshrl.u32 %v1124_v16, 16 }
  0x53   :  { %12492 = vmatprep.mubr.bf16.mxu0 %v13271_v26  ;;  %v1347_v26 = vshrl.u32 %v1133_v17, 16 }
  0x5a   :  { %12493 = vmatmul.mubr.bf16.gmra.mxu0 %v13272_v27  ;;  %v1136_v27 = vld [vmem:[#allocation2 + $0x70] sm:$0x8] }
  0x5b   :  { %12496 = vmatprep.mubr.bf16.mxu0 %v13273_v28  ;;  %v1145_v28 = vld [vmem:[#allocation2 + $0xa0] sm:$0x8]  ;;  %v1369_v39 = vshrl.u32 %v1136_v27, 16  ;;  %v1589_v27 = vshrl.u32 %v1166_v10, 16 }
  0x5d   :  { %v13862_v60 = vrot.slane %v1369_v39, 11 }
  0x62   :  { %12497 = vmatmul.mubr.bf16.gmra.mxu0 %v13274_v29  ;;  %v1325_v29 = vshrl.u32 %v1130_v19, 16  ;;  %v13877_v19 = vrot.slane %v1501_v62, 11 }
  0x63   :  { %12500 = vmatprep.mubr.bf16.mxu0 %v13275_v30  ;;  %v1391_v30 = vshrl.u32 %v1139_v20, 16  ;;  %v1172_v20 = vld [vmem:[#allocation2 + $0x150] sm:$0x8] }
  0x64   :  { %v13854_v47 = vrot.slane %v1325_v29, 11  ;;  %v1181_v29 = vld [vmem:[#allocation2 + $0x180] sm:$0x8]  ;;  %v1633_v44 = vshrl.u32 %v1172_v20, 16 }
  0x65   :  { %v13858_v49 = vrot.slane %v1391_v30, 11 }
  0x6a   :  { %12501 = vmatmul.mubr.bf16.gmra.mxu0 %v13276_v33  ;;  %v13842_v33 = vld [vmem:[%s17832_s3] ss:$0 sm:$0xff] }
  0x6b   :  { %12504 = vmatprep.mubr.bf16.mxu0 %v13277_v35  ;;  %v1572_v35 = vshrl.u32 %v13835_v23, 16 }
  0x72   :  { %12505 = vmatmul.mubr.bf16.gmra.mxu0 %v13278_v40  ;;  %v1435_v40 = vshrl.u32 %v1145_v28, 16  ;;  %v1178_v28 = vld [vmem:[#allocation2 + $0x170] sm:$0x8] }
  0x73   :  { %12508 = vmatprep.mubr.bf16.mxu0 %v13279_v42  ;;  %v13850_v42 = vrot.slane %v1281_v25, 11 }
  0x74   :  { %v13864_v61 = vrot.slane %v1435_v40, 11 }
  0x7a   :  { %12509 = vmatmul.mubr.bf16.gmra.mxu0 %v13280_v48  ;;  %v13856_v48 = vrot.slane %v1347_v26, 11 }
  0x7b   :  { %12512 = vmatprep.mubr.bf16.mxu0 %v13281_v51  ;;  %v1160_v51 = vld [vmem:[#allocation2 + $0xf0] sm:$0x8] }
  0x7c   :  { %v1545_v4 = vshrl.u32 %v1160_v51, 16 }
  0x7e   :  { %v13879_v25 = vrot.slane %v1545_v4, 11  ;;  %v1190_v4 = vld [vmem:[#allocation2 + $0x1b0] sm:$0x8] }
  0x7f   :  { %v1765_v10 = vshrl.u32 %v1190_v4, 16 }
  0x82   :  { %12513 = vmatmul.mubr.bf16.gmra.mxu0 %v13282_v53  ;;  %v1523_v53 = vshrl.u32 %v1157_v41, 16  ;;  %v13884_v41 = vrot.slane %v1611_v15, 11 }
  0x83   :  { %12516 = vmatprep.mubr.bf16.mxu0 %v13283_v54  ;;  %v1574_v54 = vrot.slane %v1572_v35, 7  ;;  %v1184_v35 = vld [vmem:[#allocation2 + $0x190] sm:$0x8] }
  0x84   :  { %v1721_v58 = vshrl.u32 %v1184_v35, 16 }
  0x85   :  { %v1579_v13 = vrot.slane %v1574_v54, 4 }
  0x8a   :  { %12517 = vmatmul.mubr.bf16.gmra.mxu0 %v13284_v56  ;;  %v1583_v56 = vrot.slane %v1581_v36, 7  ;;  %v1187_v36 = vld [vmem:[#allocation2 + $0x1a0] sm:$0x8] }
  0x8b   :  { %12520 = vmatprep.mubr.bf16.mxu0 %v13285_v57  ;;  %v1584_v57 = vshll.u32 %v13837_v24, 16 }
  0x8d   :  { %v1586_v14 = vor.u32 %v1584_v57, %v1583_v56  ;;  %v13887_v56 = vrot.slane %v1589_v27, 11  ;;  %v1677_v57 = vshrl.u32 %v1178_v28, 16 }
  0x8f   :  { %v1587_v40 = vsel %vm13824_vm2, %v1579_v13, %v1586_v14  ;;  %v13901_v20 = vrot.slane %v1677_v57, 11 }
  0x92   :  { %12521 = vmatmul.mubr.bf16.gmra.mxu0 %v13286_v2  ;;  %v13868_v2 = vrot.slane %v1479_v45, 11  ;;  %v1655_v45 = vshrl.u32 %v1175_v21, 16  ;;  %v13903_v21 = vrot.slane %v1721_v58, 11 }
  0x93   :  { %12524 = vmatprep.mubr.bf16.mxu0 %v13287_v3  ;;  %v1575_v3 = vshll.u32 %v13835_v23, 16 }
  0x94   :  { %v13894_v9 = vrot.slane %v1655_v45, 11 }
  0x95   :  { %v1577_v26 = vor.u32 %v1575_v3, %v1574_v54 }
  0x97   :  { %v1578_v3 = vsel %vm13824_vm2, %v11415_v34, %v1577_v26  ;;  %v13910_v26 = vld [vmem:[%s17831_s2 + $0xf8] sm:$0xff]   ;;  %v11463_v34 = vcombine.low %v13835_v23, %v13837_v24 }
  0x98   :  { %v13916_v35 = vcombine.low %v1578_v3, %v1587_v40  ;;  %12768 = vmatprep.subr.bf16.mxu0 %v13910_v26 }
  0x9a   :  { %12525 = vmatmul.mubr.bf16.gmra.mxu0 %v13288_v11 }
  0x9b   :  { %12624 = vmatprep.mubr.bf16.mxu0 %v11487_v12  ;;  %v13874_v12 = vrot.slane %v1523_v53, 11  ;;  %v1193_v53 = vld [vmem:[#allocation2 + $0x1c0] sm:$0x8] }
  0xe2   :  { %v12466_v52 = vpop.f32.mrf.mxu0 }
  0xe3   :  { %v391_v59 = vadd.f32 %v12466_v52, %v13842_v33  ;;  %v1699_v52 = vshrl.u32 %v1181_v29, 16 }
  0xe4   :  { %v382_v0 = vpop.f32.mrf.mxu0 }
  0xe5   :  { %v639_v5 = vmax.f32 %v391_v59, 0.0  ;;  %v383_v6 = vadd.f32 %v13842_v33, %v382_v0  ;;  %v1743_v59 = vshrl.u32 %v1187_v36, 16  ;;  %v13918_v36 = vrot.slane %v1765_v10, 11 }
  0xe6   :  { %v12467_v11 = vpop.f32.mrf.mxu0 }
  0xe7   :  { %v11986_v16 = vpack.c.bf16 %v639_v5, %v639_v5  ;;  %v637_v17 = vmax.f32 %v383_v6, 0.0  ;;  %v394_v18 = vadd.f32 %v12467_v11, %v13842_v33  ;;  %v13892_v6 = vrot.slane %v1633_v44, 11 }
  0xe8   :  { %v385_v22 = vpop.f32.mrf.mxu0  ;;  %v1787_v11 = vshrl.u32 %v1193_v53, 16 }
  0xe9   :  { %1053 = vst [vmem:[#allocation2 + $0x24] sm:$0xf] %v11986_v16  ;;  %v11984_v30 = vpack.c.bf16 %v637_v17, %v637_v17  ;;  %v640_v31 = vmax.f32 %v394_v18, 0.0  ;;  %v386_v32 = vadd.f32 %v13842_v33, %v385_v22  ;;  %v13897_v16 = vrot.slane %v1699_v52, 11 }
  0xea   :  { %v12470_v39 = vpop.f32.mrf.mxu0  ;;  %v13905_v22 = vrot.slane %v1743_v59, 11 }
  0xeb   :  { %1051 = vst [vmem:[#allocation2 + $0x14] sm:$0xf] %v11984_v30  ;;  %v11987_v46 = vpack.c.bf16 %v640_v31, %v640_v31  ;;  %v638_v50 = vmax.f32 %v386_v32, 0.0  ;;  %v407_v51 = vadd.f32 %v12470_v39, %v13842_v33  ;;  %v13921_v39 = vrot.slane %v1787_v11, 11 }
  0xec   :  { %v398_v54 = vpop.f32.mrf.mxu0 }
  0xed   :  { %1054 = vst [vmem:[#allocation2 + $0x28] sm:$0xf] %v11987_v46  ;;  %v11985_v62 = vpack.c.bf16 %v638_v50, %v638_v50  ;;  %v643_v63 = vmax.f32 %v407_v51, 0.0  ;;  %v399_v0 = vadd.f32 %v13842_v33, %v398_v54 }
  0xee   :  { %v12471_v5 = vpop.f32.mrf.mxu0 }
  0xef   :  { %1052 = vst [vmem:[#allocation2 + $0x18] sm:$0xf] %v11985_v62  ;;  %v11990_v13 = vpack.c.bf16 %v643_v63, %v643_v63  ;;  %v641_v14 = vmax.f32 %v399_v0, 0.0  ;;  %v410_v15 = vadd.f32 %v12471_v5, %v13842_v33 }
  0xf0   :  { %v401_v17 = vpop.f32.mrf.mxu0  ;;  %v13899_v18 = vld [vmem:[#allocation2 + $0x24] sm:$0xf] }
  0xf1   :  { %1057 = vst [vmem:[#allocation2 + $0x44] sm:$0xf] %v11990_v13  ;;  %v11988_v27 = vpack.c.bf16 %v641_v14, %v641_v14  ;;  %v644_v28 = vmax.f32 %v410_v15, 0.0  ;;  %v402_v29 = vadd.f32 %v13842_v33, %v401_v17  ;;  %v1264_v30 = vshrl.u32 %v13899_v18, 16 }
  0xf2   :  { %v12474_v31 = vpop.f32.mrf.mxu0  ;;  %v1119_v32 = vld [vmem:[#allocation2 + $0x14] sm:$0xf]  ;;  %v1267_v40 = vshll.u32 %v13899_v18, 16 }
  0xf3   :  { %v13923_v44 = vld [vmem:[#allocation2 + $0x14] sm:$0xf]  ;;  %1055 = vst [vmem:[#allocation2 + $0x34] sm:$0xf] %v11988_v27  ;;  %v11991_v45 = vpack.c.bf16 %v644_v28, %v644_v28  ;;  %v642_v46 = vmax.f32 %v402_v29, 0.0  ;;  %v423_v50 = vadd.f32 %v12474_v31, %v13842_v33  ;;  %v1242_v51 = vshrl.u32 %v1119_v32, 16 }
  0xf4   :  { %v414_v52 = vpop.f32.mrf.mxu0  ;;  %v1245_v53 = vshll.u32 %v1119_v32, 16  ;;  %v1123_v54 = vld [vmem:[#allocation2 + $0x28] sm:$0xf]  ;;  %v1266_v57 = vrot.slane %v1264_v30, 7  ;;  %v3069_v58 = vshrl.u32 %v13923_v44, 16 }
  0xf5   :  { %1058 = vst [vmem:[#allocation2 + $0x48] sm:$0xf] %v11991_v45  ;;  %v11989_v59 = vpack.c.bf16 %v642_v46, %v642_v46  ;;  %v647_v62 = vmax.f32 %v423_v50, 0.0  ;;  %v415_v63 = vadd.f32 %v13842_v33, %v414_v52  ;;  %v1244_v0 = vrot.slane %v1242_v51, 7  ;;  %v13311_v46 = vld [vmem:[%s17831_s2 + $0xb0] sm:$0xff]  }
  0xf6   :  { %v12475_v3 = vpop.f32.mrf.mxu0  ;;  %v1120_v4 = vld [vmem:[#allocation2 + $0x18] sm:$0xf]  ;;  %v1273_v5 = vshrl.u32 %v1123_v54, 16  ;;  %v1276_v10 = vshll.u32 %v1123_v54, 16  ;;  %v11449_v11 = vcombine.low %v13899_v18, %v1123_v54  ;;  %v1269_v13 = vor.u32 %v1267_v40, %v1266_v57 }
  0xf7   :  { %1056 = vst [vmem:[#allocation2 + $0x38] sm:$0xf] %v11989_v59  ;;  %v11994_v14 = vpack.c.bf16 %v647_v62, %v647_v62  ;;  %v645_v15 = vmax.f32 %v415_v63, 0.0  ;;  %v426_v17 = vadd.f32 %v12475_v3, %v13842_v33  ;;  %v1247_v27 = vor.u32 %v1245_v53, %v1244_v0 }
  0xf8   :  { %v417_v28 = vpop.f32.mrf.mxu0  ;;  %v1249_v29 = vrot.slane %v1244_v0, 4  ;;  %v1251_v30 = vshrl.u32 %v1120_v4, 16  ;;  %v1254_v31 = vshll.u32 %v1120_v4, 16  ;;  %v11448_v45 = vcombine.low %v1119_v32, %v1120_v4  ;;  %v13935_v54 = vld [vmem:[#allocation2 + $0x44] sm:$0xf] }
  0xf9   :  { %1061 = vst [vmem:[#allocation2 + $0x64] sm:$0xf] %v11994_v14  ;;  %v11992_v50 = vpack.c.bf16 %v645_v15, %v645_v15  ;;  %v648_v51 = vmax.f32 %v426_v17, 0.0  ;;  %v418_v18 = vadd.f32 %v13842_v33, %v417_v28  ;;  %v1275_v52 = vrot.slane %v1273_v5, 7 }
  0xfa   :  { %v1253_v40 = vrot.slane %v1251_v30, 7  ;;  %12545 = vmatmul.mubr.bf16.vlgmr.msra.gmra.mxu1 %v11448_v45  ;;  %v12478_v53 = vpop.f32.mrf.mxu0  ;;  %v1248_v59 = vsel %vm13824_vm2, %v13846_v37, %v1247_v27  ;;  %v1125_v32 = vld [vmem:[#allocation2 + $0x34] sm:$0xf]  ;;  %v1270_v62 = vsel %vm13824_vm2, %v13848_v38, %v1269_v13  ;;  %v1271_v63 = vrot.slane %v1266_v57, 4  ;;  %v13316_v38 = vld [vmem:[%s17831_s2 + $0xa8] sm:$0xff]  }
  0xfb   :  { %1059 = vst [vmem:[#allocation2 + $0x54] sm:$0xf] %v11992_v50  ;;  %v11995_v0 = vpack.c.bf16 %v648_v51, %v648_v51  ;;  %v646_v3 = vmax.f32 %v418_v18, 0.0  ;;  %12689 = vmatpush3.bf16.msra.mxu1 %v13809_v55  ;;  %v439_v4 = vadd.f32 %v12478_v53, %v13842_v33  ;;  %12548 = vmatprep.mubr.bf16.mxu1 %v11449_v11  ;;  %v1286_v5 = vshrl.u32 %v1125_v32, 16 }
  0xfc   :  { %v1256_v14 = vor.u32 %v1254_v31, %v1253_v40  ;;  %v430_v15 = vpop.f32.mrf.mxu0  ;;  %v1289_v17 = vshll.u32 %v1125_v32, 16  ;;  %v1278_v28 = vor.u32 %v1276_v10, %v1275_v52  ;;  %v1308_v37 = vshrl.u32 %v13935_v54, 16  ;;  %12690 = vmatprep.subr.bf16.mxu1 %v13311_v46  ;;  %v13954_v45 = vld [vmem:[#allocation2 + $0x48] sm:$0xf] }
  0xfd   :  { %1062 = vst [vmem:[#allocation2 + $0x68] sm:$0xf] %v11995_v0  ;;  %v11993_v57 = vpack.c.bf16 %v646_v3, %v646_v3  ;;  %v651_v13 = vmax.f32 %v439_v4, 0.0  ;;  %v431_v55 = vadd.f32 %v13842_v33, %v430_v15  ;;  %v1288_v27 = vrot.slane %v1286_v5, 7  ;;  %v13468_v8 = vld [vmem:[#allocation2 + $0x48] sm:$0xf] }
  0xfe   :  { %v12479_v30 = vpop.f32.mrf.mxu0  ;;  %v1257_v11 = vsel %vm13824_vm2, %v1249_v29, %v1256_v14  ;;  %v1126_v31 = vld [vmem:[#allocation2 + $0x38] sm:$0xf]  ;;  %v1279_v10 = vsel %vm13824_vm2, %v1271_v63, %v1278_v28  ;;  %v13956_v50 = vrot.slane %v1308_v37, 7  ;;  %v1311_v51 = vshll.u32 %v13935_v54, 16  ;;  %v13321_v63 = vld [vmem:[%s17831_s2 + $0xa0] sm:$0xff]  }
  0xff   :  { %1060 = vst [vmem:[#allocation2 + $0x58] sm:$0xf] %v11993_v57  ;;  %v11998_v18 = vpack.c.bf16 %v651_v13, %v651_v13  ;;  %v649_v52 = vmax.f32 %v431_v55, 0.0  ;;  %v442_v40 = vadd.f32 %v12479_v30, %v13842_v33  ;;  %v11488_v53 = vcombine.low %v1248_v59, %v1257_v11  ;;  %12691 = vmatpush3.bf16.msra.mxu1 %v13311_v46  ;;  %v13342_v46 = vld [vmem:[%s17831_s2 + $0xf0] sm:$0xff]  }
 0x100   :  { %v433_v0 = vpop.f32.mrf.mxu0  ;;  %v1295_v3 = vshrl.u32 %v1126_v31, 16  ;;  %v1298_v29 = vshll.u32 %v1126_v31, 16  ;;  %v11450_v4 = vcombine.low %v1125_v32, %v1126_v31  ;;  %v11489_v5 = vcombine.low %v1270_v62, %v1279_v10  ;;  %12692 = vmatprep.subr.bf16.mxu1 %v13316_v38 }
 0x101   :  { %1065 = vst [vmem:[#allocation2 + $0x84] sm:$0xf] %v11998_v18  ;;  %v11996_v14 = vpack.c.bf16 %v649_v52, %v649_v52  ;;  %v652_v15 = vmax.f32 %v442_v40, 0.0  ;;  %v434_v28 = vadd.f32 %v13842_v33, %v433_v0  ;;  %12625 = vmatmul.mubr.bf16.vlgmr.msra.gmra.mxu0 %v11488_v53  ;;  %v1317_v37 = vshrl.u32 %v13954_v45, 16 }
 0x102   :  { %v1297_v59 = vrot.slane %v1295_v3, 7  ;;  %12549 = vmatmul.mubr.bf16.gmra.mxu1 %v11450_v4  ;;  %12628 = vmatprep.mubr.bf16.mxu0 %v11489_v5  ;;  %v12482_v32 = vpop.f32.mrf.mxu0  ;;  %v1320_v62 = vshll.u32 %v13954_v45, 16  ;;  %v11451_v57 = vcombine.low %v13935_v54, %v13954_v45  ;;  %v1291_v13 = vor.u32 %v1289_v17, %v1288_v27  ;;  %v13971_v55 = vld [vmem:[#allocation2 + $0x54] sm:$0xf]  ;;  %v13326_v45 = vld [vmem:[%s17831_s2 + $0x98] sm:$0xff]  }
 0x103   :  { %1063 = vst [vmem:[#allocation2 + $0x74] sm:$0xf] %v11996_v14  ;;  %v11999_v30 = vpack.c.bf16 %v652_v15, %v652_v15  ;;  %v650_v11 = vmax.f32 %v434_v28, 0.0  ;;  %v455_v31 = vadd.f32 %v12482_v32, %v13842_v33  ;;  %v1319_v10 = vrot.slane %v1317_v37, 7  ;;  %12693 = vmatpush3.bf16.msra.mxu1 %v13316_v38  ;;  %12769 = vmatpush3.bf16.msra.mxu0 %v13910_v26  ;;  %v13344_v38 = vld [vmem:[%s17831_s2 + $0xe8] sm:$0xff]  }
 0x104   :  { %12552 = vmatprep.mubr.bf16.mxu1 %v11451_v57  ;;  %v446_v18 = vpop.f32.mrf.mxu0  ;;  %v1292_v52 = vsel %vm13824_vm2, %v13850_v42, %v1291_v13  ;;  %v1293_v40 = vrot.slane %v1288_v27, 4  ;;  %v1300_v54 = vor.u32 %v1298_v29, %v1297_v59  ;;  %v1330_v17 = vshrl.u32 %v13971_v55, 16  ;;  %12694 = vmatprep.subr.bf16.mxu1 %v13321_v63  ;;  %v13994_v32 = vld [vmem:[#allocation2 + $0x64] sm:$0xf]  ;;  %v13996_v57 = vld [vmem:[#allocation2 + $0x68] sm:$0xf] }
 0x105   :  { %1066 = vst [vmem:[#allocation2 + $0x88] sm:$0xf] %v11999_v30  ;;  %v11997_v26 = vpack.c.bf16 %v650_v11, %v650_v11  ;;  %v655_v53 = vmax.f32 %v455_v31, 0.0  ;;  %v447_v0 = vadd.f32 %v13842_v33, %v446_v18  ;;  %v1333_v42 = vshll.u32 %v13971_v55, 16  ;;  %12770 = vmatprep.subr.bf16.mxu0 %v13342_v46 }
 0x106   :  { %v12483_v27 = vpop.f32.mrf.mxu0  ;;  %v1301_v3 = vsel %vm13824_vm2, %v1293_v40, %v1300_v54  ;;  %v1132_v29 = vld [vmem:[#allocation2 + $0x58] sm:$0xf]  ;;  %v13989_v4 = vrot.slane %v1330_v17, 7  ;;  %v1313_v5 = vor.u32 %v1311_v51, %v13956_v50  ;;  %v1315_v14 = vrot.slane %v13956_v50, 4  ;;  %v13331_v51 = vld [vmem:[%s17831_s2 + $0x90] sm:$0xff]  }
 0x107   :  { %1064 = vst [vmem:[#allocation2 + $0x78] sm:$0xf] %v11997_v26  ;;  %v12002_v15 = vpack.c.bf16 %v655_v53, %v655_v53  ;;  %v653_v28 = vmax.f32 %v447_v0, 0.0  ;;  %v458_v37 = vadd.f32 %v12483_v27, %v13842_v33  ;;  %v11490_v59 = vcombine.low %v1292_v52, %v1301_v3  ;;  %12695 = vmatpush3.bf16.msra.mxu1 %v13321_v63  ;;  %v13347_v63 = vld [vmem:[%s17831_s2 + $0xe0] sm:$0xff]  }
 0x108   :  { %12771 = vmatpush3.bf16.msra.mxu0 %v13342_v46  ;;  %v449_v13 = vpop.f32.mrf.mxu0  ;;  %v1339_v30 = vshrl.u32 %v1132_v29, 16  ;;  %v1342_v11 = vshll.u32 %v1132_v29, 16  ;;  %v11452_v31 = vcombine.low %v13971_v55, %v1132_v29  ;;  %v1314_v50 = vsel %vm13824_vm2, %v13852_v43, %v1313_v5  ;;  %12696 = vmatprep.subr.bf16.mxu1 %v13326_v45 }
 0x109   :  { %12772 = vmatprep.subr.bf16.mxu0 %v13344_v38  ;;  %1069 = vst [vmem:[#allocation2 + $0xa4] sm:$0xf] %v12002_v15  ;;  %v12000_v46 = vpack.c.bf16 %v653_v28, %v653_v28  ;;  %v656_v18 = vmax.f32 %v458_v37, 0.0  ;;  %v450_v52 = vadd.f32 %v13842_v33, %v449_v13  ;;  %12629 = vmatmul.mubr.bf16.gmra.mxu0 %v11490_v59  ;;  %v1352_v54 = vshrl.u32 %v13994_v32, 16  ;;  %v13336_v37 = vld [vmem:[%s17831_s2 + $0x88] sm:$0xff]   ;;  %v13348_v13 = vld [vmem:[%s17831_s2 + $0xd8] sm:$0xff]  }
 0x10a   :  { %v1322_v55 = vor.u32 %v1320_v62, %v1319_v10  ;;  %v1341_v40 = vrot.slane %v1339_v30, 7  ;;  %12553 = vmatmul.mubr.bf16.gmra.mxu1 %v11452_v31  ;;  %v12486_v43 = vpop.f32.mrf.mxu0  ;;  %v1355_v17 = vshll.u32 %v13994_v32, 16  ;;  %v1361_v26 = vshrl.u32 %v13996_v57, 16  ;;  %v14015_v29 = vld [vmem:[#allocation2 + $0x74] sm:$0xf] }
 0x10b   :  { %1067 = vst [vmem:[#allocation2 + $0x94] sm:$0xf] %v12000_v46  ;;  %v12003_v53 = vpack.c.bf16 %v656_v18, %v656_v18  ;;  %v654_v0 = vmax.f32 %v450_v52, 0.0  ;;  %v471_v3 = vadd.f32 %v12486_v43, %v13842_v33  ;;  %12697 = vmatpush3.bf16.msra.mxu1 %v13326_v45  ;;  %v14017_v10 = vrot.slane %v1352_v54, 7 }
 0x10c   :  { %v1323_v27 = vsel %vm13824_vm2, %v1315_v14, %v1322_v55  ;;  %12773 = vmatpush3.bf16.msra.mxu0 %v13344_v38  ;;  %v1363_v5 = vrot.slane %v1361_v26, 7  ;;  %v1364_v15 = vshll.u32 %v13996_v57, 16  ;;  %v462_v28 = vpop.f32.mrf.mxu0  ;;  %12698 = vmatprep.subr.bf16.mxu1 %v13331_v51  ;;  %v11453_v45 = vcombine.low %v13994_v32, %v13996_v57  ;;  %v13343_v26 = vld [vmem:[%s17831_s2 + $0x80] sm:$0xff]  }
 0x10d   :  { %v11491_v62 = vcombine.low %v1314_v50, %v1323_v27  ;;  %12774 = vmatprep.subr.bf16.mxu0 %v13347_v63  ;;  %1070 = vst [vmem:[#allocation2 + $0xa8] sm:$0xf] %v12003_v53  ;;  %v12001_v14 = vpack.c.bf16 %v654_v0, %v654_v0  ;;  %v659_v59 = vmax.f32 %v471_v3, 0.0  ;;  %v463_v38 = vadd.f32 %v13842_v33, %v462_v28 }
 0x10e   :  { %v12487_v30 = vpop.f32.mrf.mxu0  ;;  %v1335_v31 = vor.u32 %v1333_v42, %v13989_v4  ;;  %v1337_v50 = vrot.slane %v13989_v4, 4  ;;  %v1344_v46 = vor.u32 %v1342_v11, %v1341_v40  ;;  %v14031_v18 = vld [vmem:[#allocation2 + $0x78] sm:$0xf]  ;;  %v1374_v52 = vshrl.u32 %v14015_v29, 16  ;;  %12556 = vmatprep.mubr.bf16.mxu1 %v11453_v45  ;;  %v14054_v45 = vld [vmem:[#allocation2 + $0x88] sm:$0xf] }
 0x10f   :  { %12632 = vmatprep.mubr.bf16.mxu0 %v11491_v62  ;;  %1068 = vst [vmem:[#allocation2 + $0x98] sm:$0xf] %v12001_v14  ;;  %v12006_v55 = vpack.c.bf16 %v659_v59, %v659_v59  ;;  %v657_v32 = vmax.f32 %v463_v38, 0.0  ;;  %v474_v57 = vadd.f32 %v12487_v30, %v13842_v33  ;;  %v1377_v43 = vshll.u32 %v14015_v29, 16  ;;  %12699 = vmatpush3.bf16.msra.mxu1 %v13331_v51 }
 0x110   :  { %v465_v54 = vpop.f32.mrf.mxu0  ;;  %v1336_v42 = vsel %vm13824_vm2, %v13854_v47, %v1335_v31  ;;  %v1345_v4 = vsel %vm13824_vm2, %v1337_v50, %v1344_v46  ;;  %v14041_v11 = vrot.slane %v1374_v52, 7  ;;  %v1383_v40 = vshrl.u32 %v14031_v18, 16  ;;  %12700 = vmatprep.subr.bf16.mxu1 %v13336_v37  ;;  %12775 = vmatpush3.bf16.msra.mxu0 %v13347_v63  ;;  %v14048_v47 = vld [vmem:[#allocation2 + $0x84] sm:$0xf]  ;;  %v13350_v63 = vld [vmem:[%s17831_s2 + $0xd0] sm:$0xff]  }
 0x111   :  { %1073 = vst [vmem:[#allocation2 + $0xc4] sm:$0xf] %v12006_v55  ;;  %v12004_v51 = vpack.c.bf16 %v657_v32, %v657_v32  ;;  %v660_v53 = vmax.f32 %v474_v57, 0.0  ;;  %v466_v0 = vadd.f32 %v13842_v33, %v465_v54  ;;  %v11492_v27 = vcombine.low %v1336_v42, %v1345_v4  ;;  %12776 = vmatprep.subr.bf16.mxu0 %v13348_v13 }
 0x112   :  { %v1385_v3 = vrot.slane %v1383_v40, 7  ;;  %v1386_v62 = vshll.u32 %v14031_v18, 16  ;;  %v11454_v28 = vcombine.low %v14015_v29, %v14031_v18  ;;  %v1357_v14 = vor.u32 %v1355_v17, %v14017_v10  ;;  %v12490_v59 = vpop.f32.mrf.mxu0  ;;  %v13351_v40 = vld [vmem:[%s17831_s2 + $0xc8] sm:$0xff]  }
 0x113   :  { %1071 = vst [vmem:[#allocation2 + $0xb4] sm:$0xf] %v12004_v51  ;;  %v12007_v38 = vpack.c.bf16 %v660_v53, %v660_v53  ;;  %v658_v30 = vmax.f32 %v466_v0, 0.0  ;;  %12633 = vmatmul.mubr.bf16.gmra.mxu0 %v11492_v27  ;;  %v1359_v31 = vrot.slane %v14017_v10, 4  ;;  %v1366_v50 = vor.u32 %v1364_v15, %v1363_v5  ;;  %12701 = vmatpush3.bf16.msra.mxu1 %v13336_v37  ;;  %v14070_v37 = vld [vmem:[#allocation2 + $0x94] sm:$0xf] }
 0x114   :  { %12557 = vmatmul.mubr.bf16.gmra.mxu1 %v11454_v28  ;;  %v1358_v17 = vsel %vm13824_vm2, %v13856_v48, %v1357_v14  ;;  %v487_v29 = vadd.f32 %v12490_v59, %v13842_v33  ;;  %v1396_v46 = vshrl.u32 %v14048_v47, 16  ;;  %v1399_v18 = vshll.u32 %v14048_v47, 16  ;;  %v478_v52 = vpop.f32.mrf.mxu0  ;;  %12702 = vmatprep.subr.bf16.mxu1 %v13343_v26  ;;  %v13352_v48 = vld [vmem:[%s17831_s2 + $0x138] sm:$0xff]  }
 0x115   :  { %1074 = vst [vmem:[#allocation2 + $0xc8] sm:$0xf] %v12007_v38  ;;  %v12005_v55 = vpack.c.bf16 %v658_v30, %v658_v30  ;;  %v1367_v10 = vsel %vm13824_vm2, %v1359_v31, %v1366_v50  ;;  %v1405_v5 = vshrl.u32 %v14054_v45, 16  ;;  %v1408_v15 = vshll.u32 %v14054_v45, 16  ;;  %12777 = vmatpush3.bf16.msra.mxu0 %v13348_v13 }
 0x116   :  { %v11493_v32 = vcombine.low %v1358_v17, %v1367_v10  ;;  %v663_v57 = vmax.f32 %v487_v29, 0.0  ;;  %v1398_v54 = vrot.slane %v1396_v46, 7  ;;  %v11455_v42 = vcombine.low %v14048_v47, %v14054_v45  ;;  %v12491_v4 = vpop.f32.mrf.mxu0  ;;  %12778 = vmatprep.subr.bf16.mxu0 %v13350_v63  ;;  %v14083_v27 = vld [vmem:[#allocation2 + $0x98] sm:$0xf] }
 0x117   :  { %1072 = vst [vmem:[#allocation2 + $0xb8] sm:$0xf] %v12005_v55  ;;  %v1407_v51 = vrot.slane %v1405_v5, 7  ;;  %v479_v13 = vadd.f32 %v13842_v33, %v478_v52  ;;  %v490_v53 = vadd.f32 %v12491_v4, %v13842_v33  ;;  %v1379_v0 = vor.u32 %v1377_v43, %v14041_v11  ;;  %12703 = vmatpush3.bf16.msra.mxu1 %v13343_v26  ;;  %v14097_v55 = vld [vmem:[#allocation2 + $0xa4] sm:$0xf] }
 0x118   :  { %12636 = vmatprep.mubr.bf16.mxu0 %v11493_v32  ;;  %v12010_v28 = vpack.c.bf16 %v663_v57, %v663_v57  ;;  %12560 = vmatprep.mubr.bf16.mxu1 %v11455_v42  ;;  %v481_v47 = vpop.f32.mrf.mxu0  ;;  %v1381_v14 = vrot.slane %v14041_v11, 4  ;;  %v1388_v59 = vor.u32 %v1386_v62, %v1385_v3  ;;  %v1418_v45 = vshrl.u32 %v14070_v37, 16 }
 0x119   :  { %v661_v38 = vmax.f32 %v479_v13, 0.0  ;;  %v664_v30 = vmax.f32 %v490_v53, 0.0  ;;  %v482_v31 = vadd.f32 %v13842_v33, %v481_v47  ;;  %v1380_v43 = vsel %vm13824_vm2, %v13862_v60, %v1379_v0  ;;  %12779 = vmatpush3.bf16.msra.mxu0 %v13350_v63  ;;  %12848 = vmatprep.subr.bf16.mxu1 %v13352_v48  ;;  %v14099_v60 = vld [vmem:[#allocation2 + $0xa8] sm:$0xf]  ;;  %v13353_v63 = vld [vmem:[%s17831_s2 + $0xc0] sm:$0xff]  }
 0x11a   :  { %1077 = vst [vmem:[#allocation2 + $0xe4] sm:$0xf] %v12010_v28  ;;  %v1389_v26 = vsel %vm13824_vm2, %v1381_v14, %v1388_v59  ;;  %v14093_v50 = vrot.slane %v1418_v45, 7  ;;  %v1421_v11 = vshll.u32 %v14070_v37, 16  ;;  %v1427_v3 = vshrl.u32 %v14083_v27, 16  ;;  %v12494_v62 = vpop.f32.mrf.mxu0  ;;  %12780 = vmatprep.subr.bf16.mxu0 %v13351_v40 }
 0x11b   :  { %v12008_v17 = vpack.c.bf16 %v661_v38, %v661_v38  ;;  %v12011_v29 = vpack.c.bf16 %v664_v30, %v664_v30  ;;  %v662_v46 = vmax.f32 %v482_v31, 0.0  ;;  %v11494_v52 = vcombine.low %v1380_v43, %v1389_v26  ;;  %v14119_v14 = vld [vmem:[#allocation2 + $0xb4] sm:$0xf] }
 0x11c   :  { %v1429_v10 = vrot.slane %v1427_v3, 7  ;;  %v1430_v5 = vshll.u32 %v14083_v27, 16  ;;  %v11456_v48 = vcombine.low %v14070_v37, %v14083_v27  ;;  %v1401_v32 = vor.u32 %v1399_v18, %v1398_v54  ;;  %v494_v57 = vpop.f32.mrf.mxu0 }
 0x11d   :  { %1075 = vst [vmem:[#allocation2 + $0xd4] sm:$0xf] %v12008_v17  ;;  %1078 = vst [vmem:[#allocation2 + $0xe8] sm:$0xf] %v12011_v29  ;;  %v12009_v42 = vpack.c.bf16 %v662_v46, %v662_v46  ;;  %12637 = vmatmul.mubr.bf16.gmra.mxu0 %v11494_v52  ;;  %v1403_v4 = vrot.slane %v1398_v54, 4  ;;  %v1410_v13 = vor.u32 %v1408_v15, %v1407_v51  ;;  %v1440_v28 = vshrl.u32 %v14097_v55, 16 }
 0x11e   :  { %v503_v53 = vadd.f32 %v12494_v62, %v13842_v33  ;;  %12561 = vmatmul.mubr.bf16.gmra.mxu1 %v11456_v48  ;;  %v1402_v0 = vsel %vm13824_vm2, %v13858_v49, %v1401_v32  ;;  %v1443_v47 = vshll.u32 %v14097_v55, 16  ;;  %v1449_v18 = vshrl.u32 %v14099_v60, 16  ;;  %v12495_v37 = vpop.f32.mrf.mxu0  ;;  %12781 = vmatpush3.bf16.msra.mxu0 %v13351_v40  ;;  %v14125_v3 = vld [vmem:[#allocation2 + $0xb8] sm:$0xf] }
 0x11f   :  { %1076 = vst [vmem:[#allocation2 + $0xd8] sm:$0xf] %v12009_v42  ;;  %v1411_v54 = vsel %vm13824_vm2, %v1403_v4, %v1410_v13  ;;  %v1452_v51 = vshll.u32 %v14099_v60, 16  ;;  %v11457_v27 = vcombine.low %v14097_v55, %v14099_v60  ;;  %12782 = vmatprep.subr.bf16.mxu0 %v13353_v63  ;;  %v1442_v59 = vrot.slane %v1440_v28, 7 }
 0x120   :  { %v667_v15 = vmax.f32 %v503_v53, 0.0  ;;  %v11495_v49 = vcombine.low %v1402_v0, %v1411_v54  ;;  %v1451_v45 = vrot.slane %v1449_v18, 7  ;;  %v495_v38 = vadd.f32 %v13842_v33, %v494_v57  ;;  %v497_v30 = vpop.f32.mrf.mxu0  ;;  %v14139_v0 = vld [vmem:[#allocation2 + $0xc8] sm:$0xf] }
 0x121   :  { %12564 = vmatprep.mubr.bf16.mxu1 %v11457_v27  ;;  %v506_v31 = vadd.f32 %v12495_v37, %v13842_v33  ;;  %v498_v43 = vadd.f32 %v13842_v33, %v497_v30  ;;  %v1423_v26 = vor.u32 %v1421_v11, %v14093_v50  ;;  %v1425_v17 = vrot.slane %v14093_v50, 4 }
 0x122   :  { %v12014_v40 = vpack.c.bf16 %v667_v15, %v667_v15  ;;  %12640 = vmatprep.mubr.bf16.mxu0 %v11495_v49  ;;  %v665_v62 = vmax.f32 %v495_v38, 0.0  ;;  %v1432_v29 = vor.u32 %v1430_v5, %v1429_v10  ;;  %v1462_v46 = vshrl.u32 %v14119_v14, 16  ;;  %v12498_v52 = vpop.f32.mrf.mxu0  ;;  %12783 = vmatpush3.bf16.msra.mxu0 %v13353_v63  ;;  %v14136_v10 = vld [vmem:[#allocation2 + $0xc4] sm:$0xf] }
 0x123   :  { %v668_v55 = vmax.f32 %v506_v31, 0.0  ;;  %v666_v60 = vmax.f32 %v498_v43, 0.0  ;;  %v1424_v48 = vsel %vm13824_vm2, %v13866_v1, %v1423_v26  ;;  %v1465_v11 = vshll.u32 %v14119_v14, 16 }
 0x124   :  { %1081 = vst [vmem:[#allocation2 + $0x104] sm:$0xf] %v12014_v40  ;;  %v12012_v32 = vpack.c.bf16 %v665_v62, %v665_v62  ;;  %v1433_v57 = vsel %vm13824_vm2, %v1425_v17, %v1432_v29  ;;  %v1464_v42 = vrot.slane %v1462_v46, 7  ;;  %v1471_v50 = vshrl.u32 %v14125_v3, 16  ;;  %v510_v5 = vpop.f32.mrf.mxu0  ;;  %v14156_v26 = vld [vmem:[#allocation2 + $0xd4] sm:$0xf] }
 0x125   :  { %v12015_v63 = vpack.c.bf16 %v668_v55, %v668_v55  ;;  %v12013_v4 = vpack.c.bf16 %v666_v60, %v666_v60  ;;  %v11496_v13 = vcombine.low %v1424_v48, %v1433_v57  ;;  %v1474_v53 = vshll.u32 %v14125_v3, 16 }
 0x126   :  { %1079 = vst [vmem:[#allocation2 + $0xf4] sm:$0xf] %v12012_v32  ;;  %v1473_v1 = vrot.slane %v1471_v50, 7  ;;  %v11458_v28 = vcombine.low %v14119_v14, %v14125_v3  ;;  %v1445_v18 = vor.u32 %v1443_v47, %v1442_v59  ;;  %v1447_v37 = vrot.slane %v1442_v59, 4  ;;  %v12499_v54 = vpop.f32.mrf.mxu0  ;;  %v14160_v29 = vld [vmem:[#allocation2 + $0xd8] sm:$0xf] }
 0x127   :  { %1082 = vst [vmem:[#allocation2 + $0x108] sm:$0xf] %v12015_v63  ;;  %1080 = vst [vmem:[#allocation2 + $0xf8] sm:$0xf] %v12013_v4  ;;  %12641 = vmatmul.mubr.bf16.gmra.mxu0 %v11496_v13  ;;  %v1454_v15 = vor.u32 %v1452_v51, %v1451_v45  ;;  %v519_v27 = vadd.f32 %v12498_v52, %v13842_v33  ;;  %v1484_v49 = vshrl.u32 %v14136_v10, 16  ;;  %v1487_v38 = vshll.u32 %v14136_v10, 16 }
 0x128   :  { %12565 = vmatmul.mubr.bf16.gmra.mxu1 %v11458_v28  ;;  %v1446_v30 = vsel %vm13824_vm2, %v13864_v61, %v1445_v18  ;;  %v1493_v14 = vshrl.u32 %v14139_v0, 16  ;;  %v1496_v47 = vshll.u32 %v14139_v0, 16  ;;  %v11459_v59 = vcombine.low %v14136_v10, %v14139_v0  ;;  %v513_v40 = vpop.f32.mrf.mxu0 }
 0x129   :  { %v1455_v51 = vsel %vm13824_vm2, %v1447_v37, %v1454_v15  ;;  %v671_v45 = vmax.f32 %v519_v27, 0.0  ;;  %v1486_v31 = vrot.slane %v1484_v49, 7  ;;  %v511_v43 = vadd.f32 %v13842_v33, %v510_v5 }
 0x12a   :  { %v11497_v3 = vcombine.low %v1446_v30, %v1455_v51  ;;  %v1495_v62 = vrot.slane %v1493_v14, 7  ;;  %12568 = vmatprep.mubr.bf16.mxu1 %v11459_v59  ;;  %v522_v61 = vadd.f32 %v12499_v54, %v13842_v33  ;;  %v514_v17 = vadd.f32 %v13842_v33, %v513_v40  ;;  %v12502_v46 = vpop.f32.mrf.mxu0  ;;  %v14180_v14 = vld [vmem:[%s17832_s3] ss:$0 sm:$0xff] }
 0x12b   :  { %v12018_v52 = vpack.c.bf16 %v671_v45, %v671_v45  ;;  %v669_v55 = vmax.f32 %v511_v43, 0.0  ;;  %v1467_v60 = vor.u32 %v1465_v11, %v1464_v42  ;;  %v1469_v48 = vrot.slane %v1464_v42, 4 }
 0x12c   :  { %12644 = vmatprep.mubr.bf16.mxu0 %v11497_v3  ;;  %v672_v32 = vmax.f32 %v522_v61, 0.0  ;;  %v670_v57 = vmax.f32 %v514_v17, 0.0  ;;  %v1476_v50 = vor.u32 %v1474_v53, %v1473_v1  ;;  %v1506_v10 = vshrl.u32 %v14156_v26, 16  ;;  %v526_v5 = vpop.f32.mrf.mxu0  ;;  %v14170_v53 = vld [vmem:[#allocation2 + $0xe4] sm:$0xf] }
 0x12d   :  { %1085 = vst [vmem:[#allocation2 + $0x144] sm:$0xf] %v12018_v52  ;;  %v12016_v63 = vpack.c.bf16 %v669_v55, %v669_v55  ;;  %v1468_v33 = vsel %vm13824_vm2, %v13872_v7, %v1467_v60  ;;  %v1509_v4 = vshll.u32 %v14156_v26, 16  ;;  %v1515_v13 = vshrl.u32 %v14160_v29, 16  ;;  %v14172_v1 = vld [vmem:[#allocation2 + $0xe8] sm:$0xf] }
 0x12e   :  { %v12019_v0 = vpack.c.bf16 %v672_v32, %v672_v32  ;;  %v12017_v11 = vpack.c.bf16 %v670_v57, %v670_v57  ;;  %v1477_v42 = vsel %vm13824_vm2, %v1469_v48, %v1476_v50  ;;  %v1508_v28 = vrot.slane %v1506_v10, 7  ;;  %v12503_v18 = vpop.f32.mrf.mxu0  ;;  %v1162_v32 = vld [vmem:[#allocation2 + $0xf8] sm:$0xf] }
 0x12f   :  { %1083 = vst [vmem:[#allocation2 + $0x134] sm:$0xf] %v12016_v63  ;;  %v11498_v37 = vcombine.low %v1468_v33, %v1477_v42  ;;  %v1517_v54 = vrot.slane %v1515_v13, 7  ;;  %v1518_v7 = vshll.u32 %v14160_v29, 16  ;;  %v11460_v15 = vcombine.low %v14156_v26, %v14160_v29 }
 0x130   :  { %1086 = vst [vmem:[#allocation2 + $0x148] sm:$0xf] %v12019_v0  ;;  %1084 = vst [vmem:[#allocation2 + $0x138] sm:$0xf] %v12017_v11  ;;  %v1489_v27 = vor.u32 %v1487_v38, %v1486_v31  ;;  %v1491_v49 = vrot.slane %v1486_v31, 4  ;;  %v1498_v30 = vor.u32 %v1496_v47, %v1495_v62  ;;  %v535_v59 = vadd.f32 %v14180_v14, %v12502_v46  ;;  %v529_v40 = vpop.f32.mrf.mxu0 }
 0x131   :  { %12645 = vmatmul.mubr.bf16.gmra.mxu0 %v11498_v37  ;;  %12569 = vmatmul.mubr.bf16.gmra.mxu1 %v11460_v15  ;;  %v1528_v51 = vshrl.u32 %v14170_v53, 16  ;;  %v1531_v45 = vshll.u32 %v14170_v53, 16  ;;  %v1537_v43 = vshrl.u32 %v14172_v1, 16  ;;  %v1540_v38 = vshll.u32 %v14172_v1, 16  ;;  %v1161_v62 = vld [vmem:[#allocation2 + $0xf4] sm:$0xf] }
 0x132   :  { %v1490_v47 = vsel %vm13824_vm2, %v13868_v2, %v1489_v27  ;;  %v1499_v31 = vsel %vm13824_vm2, %v1491_v49, %v1498_v30  ;;  %v675_v26 = vmax.f32 %v535_v59, 0.0  ;;  %v11461_v3 = vcombine.low %v14170_v53, %v14172_v1  ;;  %v12506_v61 = vpop.f32.mrf.mxu0 }
 0x133   :  { %v11499_v17 = vcombine.low %v1490_v47, %v1499_v31  ;;  %v1530_v29 = vrot.slane %v1528_v51, 7  ;;  %v1539_v46 = vrot.slane %v1537_v43, 7  ;;  %v527_v52 = vadd.f32 %v14180_v14, %v526_v5 }
 0x134   :  { %v12022_v55 = vpack.c.bf16 %v675_v26, %v675_v26  ;;  %12572 = vmatprep.mubr.bf16.mxu1 %v11461_v3  ;;  %v538_v60 = vadd.f32 %v14180_v14, %v12503_v18  ;;  %v530_v2 = vadd.f32 %v14180_v14, %v529_v40  ;;  %v1511_v48 = vor.u32 %v1509_v4, %v1508_v28  ;;  %v542_v57 = vpop.f32.mrf.mxu0 }
 0x135   :  { %12648 = vmatprep.mubr.bf16.mxu0 %v11499_v17  ;;  %v673_v50 = vmax.f32 %v527_v52, 0.0  ;;  %v1513_v10 = vrot.slane %v1508_v28, 4  ;;  %v1520_v63 = vor.u32 %v1518_v7, %v1517_v54  ;;  %v1550_v33 = vshrl.u32 %v1161_v62, 16 }
 0x136   :  { %1089 = vst [vmem:[#allocation2 + $0x164] sm:$0xf] %v12022_v55  ;;  %v676_v13 = vmax.f32 %v538_v60, 0.0  ;;  %v674_v0 = vmax.f32 %v530_v2, 0.0  ;;  %v1512_v5 = vsel %vm13824_vm2, %v13877_v19, %v1511_v48  ;;  %v1553_v11 = vshll.u32 %v1161_v62, 16  ;;  %v12507_v42 = vpop.f32.mrf.mxu0 }
 0x137   :  { %v12020_v53 = vpack.c.bf16 %v673_v50, %v673_v50  ;;  %v1521_v4 = vsel %vm13824_vm2, %v1513_v10, %v1520_v63  ;;  %v1552_v1 = vrot.slane %v1550_v33, 7  ;;  %v1559_v18 = vshrl.u32 %v1162_v32, 16  ;;  %v14217_v10 = vld [vmem:[#allocation2 + $0x144] sm:$0xf] }
 0x138   :  { %v12023_v37 = vpack.c.bf16 %v676_v13, %v676_v13  ;;  %v12021_v15 = vpack.c.bf16 %v674_v0, %v674_v0  ;;  %v11500_v28 = vcombine.low %v1512_v5, %v1521_v4  ;;  %v1562_v54 = vshll.u32 %v1162_v32, 16  ;;  %v545_v7 = vpop.f32.mrf.mxu0  ;;  %v1171_v13 = vld [vmem:[#allocation2 + $0x148] sm:$0xf] }
 0x139   :  { %1087 = vst [vmem:[#allocation2 + $0x154] sm:$0xf] %v12020_v53  ;;  %v1561_v27 = vrot.slane %v1559_v18, 7  ;;  %v11462_v49 = vcombine.low %v1161_v62, %v1162_v32  ;;  %v1533_v30 = vor.u32 %v1531_v45, %v1530_v29  ;;  %v1535_v59 = vrot.slane %v1530_v29, 4  ;;  %v1167_v62 = vld [vmem:[#allocation2 + $0x134] sm:$0xf] }
 0x13a   :  { %1090 = vst [vmem:[#allocation2 + $0x168] sm:$0xf] %v12023_v37  ;;  %1088 = vst [vmem:[#allocation2 + $0x158] sm:$0xf] %v12021_v15  ;;  %12649 = vmatmul.mubr.bf16.gmra.mxu0 %v11500_v28  ;;  %v1542_v19 = vor.u32 %v1540_v38, %v1539_v46  ;;  %v551_v40 = vadd.f32 %v14180_v14, %v12506_v61  ;;  %v543_v51 = vadd.f32 %v14180_v14, %v542_v57  ;;  %v12510_v47 = vpop.f32.mrf.mxu0  ;;  %v1168_v46 = vld [vmem:[#allocation2 + $0x138] sm:$0xf] }
 0x13b   :  { %v554_v43 = vadd.f32 %v14180_v14, %v12507_v42  ;;  %12573 = vmatmul.mubr.bf16.gmra.mxu1 %v11462_v49  ;;  %v1534_v31 = vsel %vm13824_vm2, %v13874_v12, %v1533_v30  ;;  %v546_v26 = vadd.f32 %v14180_v14, %v545_v7  ;;  %v1555_v45 = vor.u32 %v1553_v11, %v1552_v1 }
 0x13c   :  { %v1557_v3 = vrot.slane %v1552_v1, 4  ;;  %v1543_v38 = vsel %vm13824_vm2, %v1535_v59, %v1542_v19  ;;  %v679_v17 = vmax.f32 %v551_v40, 0.0  ;;  %v677_v61 = vmax.f32 %v543_v51, 0.0  ;;  %12576 = vmatprep.mubr.bf16.mxu1 %v11463_v34  ;;  %v558_v52 = vpop.f32.mrf.mxu0 }
 0x13d   :  { %v680_v29 = vmax.f32 %v554_v43, 0.0  ;;  %v11501_v55 = vcombine.low %v1534_v31, %v1543_v38  ;;  %v678_v60 = vmax.f32 %v546_v26, 0.0  ;;  %v1556_v12 = vsel %vm13824_vm2, %v13879_v25, %v1555_v45 }
 0x13e   :  { %v1564_v2 = vor.u32 %v1562_v54, %v1561_v27  ;;  %v12026_v48 = vpack.c.bf16 %v679_v17, %v679_v17  ;;  %v12024_v32 = vpack.c.bf16 %v677_v61, %v677_v61  ;;  %v1594_v50 = vshrl.u32 %v1167_v62, 16  ;;  %v12511_v63 = vpop.f32.mrf.mxu0 }
 0x13f   :  { %v12027_v57 = vpack.c.bf16 %v680_v29, %v680_v29  ;;  %12652 = vmatprep.mubr.bf16.mxu0 %v11501_v55  ;;  %v12025_v33 = vpack.c.bf16 %v678_v60, %v678_v60  ;;  %v1597_v24 = vshll.u32 %v1167_v62, 16  ;;  %v1603_v34 = vshrl.u32 %v1168_v46, 16 }
 0x140   :  { %v1565_v23 = vsel %vm13824_vm2, %v1557_v3, %v1564_v2  ;;  %1093 = vst [vmem:[#allocation2 + $0x184] sm:$0xf] %v12026_v48  ;;  %1091 = vst [vmem:[#allocation2 + $0x174] sm:$0xf] %v12024_v32  ;;  %v1596_v0 = vrot.slane %v1594_v50, 7  ;;  %v1606_v5 = vshll.u32 %v1168_v46, 16  ;;  %v11464_v11 = vcombine.low %v1167_v62, %v1168_v46  ;;  %v561_v42 = vpop.f32.mrf.mxu0 }
 0x141   :  { %1094 = vst [vmem:[#allocation2 + $0x188] sm:$0xf] %v12027_v57  ;;  %v11502_v25 = vcombine.low %v1556_v12, %v1565_v23  ;;  %1092 = vst [vmem:[#allocation2 + $0x178] sm:$0xf] %v12025_v33  ;;  %v1605_v53 = vrot.slane %v1603_v34, 7  ;;  %v567_v4 = vadd.f32 %v14180_v14, %v12510_v47  ;;  %v1616_v1 = vshrl.u32 %v14217_v10, 16 }
 0x142   :  { %v1619_v18 = vshll.u32 %v14217_v10, 16  ;;  %v1625_v37 = vshrl.u32 %v1171_v13, 16  ;;  %v1628_v15 = vshll.u32 %v1171_v13, 16  ;;  %v11465_v28 = vcombine.low %v14217_v10, %v1171_v13  ;;  %v12514_v7 = vpop.f32.mrf.mxu0  ;;  %v1173_v19 = vld [vmem:[#allocation2 + $0x154] sm:$0xf] }
 0x143   :  { %12653 = vmatmul.mubr.bf16.gmra.mxu0 %v11502_v25  ;;  %v559_v54 = vadd.f32 %v14180_v14, %v558_v52  ;;  %12577 = vmatmul.mubr.bf16.gmra.mxu1 %v11464_v11  ;;  %v683_v27 = vmax.f32 %v567_v4, 0.0  ;;  %v1618_v49 = vrot.slane %v1616_v1, 7  ;;  %v570_v30 = vadd.f32 %v14180_v14, %v12511_v63  ;;  %v1174_v31 = vld [vmem:[#allocation2 + $0x158] sm:$0xf]  ;;  %v14234_v2 = vld [vmem:[#allocation2 + $0x164] sm:$0xf] }
 0x144   :  { %12656 = vmatprep.mubr.bf16.mxu0 %v13916_v35  ;;  %v562_v59 = vadd.f32 %v14180_v14, %v561_v42  ;;  %v1627_v40 = vrot.slane %v1625_v37, 7  ;;  %12580 = vmatprep.mubr.bf16.mxu1 %v11465_v28  ;;  %v1599_v43 = vor.u32 %v1597_v24, %v1596_v0  ;;  %v1601_v47 = vrot.slane %v1596_v0, 4  ;;  %v574_v26 = vpop.f32.mrf.mxu0  ;;  %v14236_v48 = vld [vmem:[#allocation2 + $0x168] sm:$0xf] }
 0x145   :  { %v681_v51 = vmax.f32 %v559_v54, 0.0  ;;  %v12030_v45 = vpack.c.bf16 %v683_v27, %v683_v27  ;;  %v684_v3 = vmax.f32 %v570_v30, 0.0  ;;  %v1608_v38 = vor.u32 %v1606_v5, %v1605_v53 }
 0x146   :  { %v682_v62 = vmax.f32 %v562_v59, 0.0  ;;  %v1600_v61 = vsel %vm13824_vm2, %v13887_v56, %v1599_v43  ;;  %v1638_v35 = vshrl.u32 %v1173_v19, 16  ;;  %v1641_v29 = vshll.u32 %v1173_v19, 16  ;;  %v12515_v46 = vpop.f32.mrf.mxu0 }
 0x147   :  { %v12028_v17 = vpack.c.bf16 %v681_v51, %v681_v51  ;;  %1097 = vst [vmem:[#allocation2 + $0x1a4] sm:$0xf] %v12030_v45  ;;  %v12031_v52 = vpack.c.bf16 %v684_v3, %v684_v3  ;;  %v1609_v60 = vsel %vm13824_vm2, %v1601_v47, %v1608_v38  ;;  %v1647_v12 = vshrl.u32 %v1174_v31, 16  ;;  %v14250_v1 = vld [vmem:[#allocation2 + $0x174] sm:$0xf] }
 0x148   :  { %v12029_v55 = vpack.c.bf16 %v682_v62, %v682_v62  ;;  %v11504_v32 = vcombine.low %v1600_v61, %v1609_v60  ;;  %v1640_v57 = vrot.slane %v1638_v35, 7  ;;  %v1650_v50 = vshll.u32 %v1174_v31, 16  ;;  %v577_v56 = vpop.f32.mrf.mxu0  ;;  %v1180_v30 = vld [vmem:[#allocation2 + $0x178] sm:$0xf]  ;;  %v14262_v61 = vld [vmem:[#allocation2 + $0x184] sm:$0xf] }
 0x149   :  { %1095 = vst [vmem:[#allocation2 + $0x194] sm:$0xf] %v12028_v17  ;;  %v11466_v10 = vcombine.low %v1173_v19, %v1174_v31  ;;  %1098 = vst [vmem:[#allocation2 + $0x1a8] sm:$0xf] %v12031_v52  ;;  %v1649_v63 = vrot.slane %v1647_v12, 7  ;;  %v1621_v33 = vor.u32 %v1619_v18, %v1618_v49  ;;  %v1623_v23 = vrot.slane %v1618_v49, 4 }
 0x14a   :  { %1096 = vst [vmem:[#allocation2 + $0x198] sm:$0xf] %v12029_v55  ;;  %v1630_v24 = vor.u32 %v1628_v15, %v1627_v40  ;;  %v583_v34 = vadd.f32 %v14180_v14, %v12514_v7  ;;  %v1660_v13 = vshrl.u32 %v14234_v2, 16  ;;  %v1663_v25 = vshll.u32 %v14234_v2, 16  ;;  %v12518_v5 = vpop.f32.mrf.mxu0  ;;  %v14264_v60 = vld [vmem:[#allocation2 + $0x188] sm:$0xf] }
 0x14b   :  { %12657 = vmatmul.mubr.bf16.gmra.mxu0 %v11504_v32  ;;  %v1669_v0 = vshrl.u32 %v14236_v48, 16  ;;  %12581 = vmatmul.mubr.bf16.gmra.mxu1 %v11466_v10  ;;  %v1622_v11 = vsel %vm13824_vm2, %v13884_v41, %v1621_v33  ;;  %v1672_v53 = vshll.u32 %v14236_v48, 16  ;;  %v11467_v4 = vcombine.low %v14234_v2, %v14236_v48 }
 0x14c   :  { %v1631_v42 = vsel %vm13824_vm2, %v1623_v23, %v1630_v24  ;;  %v687_v37 = vmax.f32 %v583_v34, 0.0  ;;  %v1662_v15 = vrot.slane %v1660_v13, 7  ;;  %v590_v54 = vpop.f32.mrf.mxu0  ;;  %v575_v7 = vadd.f32 %v14180_v14, %v574_v26 }
 0x14d   :  { %v11505_v18 = vcombine.low %v1622_v11, %v1631_v42  ;;  %v1671_v28 = vrot.slane %v1669_v0, 7  ;;  %12584 = vmatprep.mubr.bf16.mxu1 %v11467_v4  ;;  %v586_v41 = vadd.f32 %v14180_v14, %v12515_v46  ;;  %v578_v27 = vadd.f32 %v14180_v14, %v577_v56 }
 0x14e   :  { %v1643_v49 = vor.u32 %v1641_v29, %v1640_v57  ;;  %v12034_v59 = vpack.c.bf16 %v687_v37, %v687_v37  ;;  %v1645_v19 = vrot.slane %v1640_v57, 4  ;;  %v1652_v40 = vor.u32 %v1650_v50, %v1649_v63  ;;  %v12519_v43 = vpop.f32.mrf.mxu0 }
 0x14f   :  { %12660 = vmatprep.mubr.bf16.mxu0 %v11505_v18  ;;  %v1682_v51 = vshrl.u32 %v14250_v1, 16  ;;  %v685_v47 = vmax.f32 %v575_v7, 0.0  ;;  %v688_v31 = vmax.f32 %v586_v41, 0.0  ;;  %v686_v45 = vmax.f32 %v578_v27, 0.0 }
 0x150   :  { %v1644_v26 = vsel %vm13824_vm2, %v13892_v6, %v1643_v49  ;;  %1101 = vst [vmem:[#allocation2 + $0x1c4] sm:$0xf] %v12034_v59  ;;  %v1653_v3 = vsel %vm13824_vm2, %v1645_v19, %v1652_v40  ;;  %v1685_v38 = vshll.u32 %v14250_v1, 16  ;;  %v1691_v17 = vshrl.u32 %v1180_v30, 16  ;;  %v593_v35 = vpop.f32.mrf.mxu0  ;;  %v1185_v11 = vld [vmem:[#allocation2 + $0x194] sm:$0xf] }
 0x151   :  { %v1684_v62 = vrot.slane %v1682_v51, 7  ;;  %v12032_v29 = vpack.c.bf16 %v685_v47, %v685_v47  ;;  %v12035_v46 = vpack.c.bf16 %v688_v31, %v688_v31  ;;  %v12033_v52 = vpack.c.bf16 %v686_v45, %v686_v45 }
 0x152   :  { %v11506_v55 = vcombine.low %v1644_v26, %v1653_v3  ;;  %v1693_v12 = vrot.slane %v1691_v17, 7  ;;  %v1694_v2 = vshll.u32 %v1180_v30, 16  ;;  %v11468_v6 = vcombine.low %v14250_v1, %v1180_v30  ;;  %v12522_v32 = vpop.f32.mrf.mxu0  ;;  %v1186_v1 = vld [vmem:[#allocation2 + $0x198] sm:$0xf]  ;;  %v14289_v26 = vld [vmem:[#allocation2 + $0x1a4] sm:$0xf] }
 0x153   :  { %v1665_v48 = vor.u32 %v1663_v25, %v1662_v15  ;;  %1099 = vst [vmem:[#allocation2 + $0x1b4] sm:$0xf] %v12032_v29  ;;  %1102 = vst [vmem:[#allocation2 + $0x1c8] sm:$0xf] %v12035_v46  ;;  %v1667_v57 = vrot.slane %v1662_v15, 4  ;;  %v1674_v50 = vor.u32 %v1672_v53, %v1671_v28  ;;  %v599_v10 = vadd.f32 %v14180_v14, %v12518_v5 }
 0x154   :  { %1100 = vst [vmem:[#allocation2 + $0x1b8] sm:$0xf] %v12033_v52  ;;  %12661 = vmatmul.mubr.bf16.gmra.mxu0 %v11506_v55  ;;  %v1704_v56 = vshrl.u32 %v14262_v61, 16  ;;  %12585 = vmatmul.mubr.bf16.gmra.mxu1 %v11468_v6  ;;  %v1707_v33 = vshll.u32 %v14262_v61, 16  ;;  %v1713_v23 = vshrl.u32 %v14264_v60, 16  ;;  %v1716_v24 = vshll.u32 %v14264_v60, 16  ;;  %v14275_v34 = vpop.f32.mrf.mxu0 }
 0x155   :  { %v1666_v63 = vsel %vm13824_vm2, %v13894_v9, %v1665_v48  ;;  %v1675_v13 = vsel %vm13824_vm2, %v1667_v57, %v1674_v50  ;;  %v691_v25 = vmax.f32 %v599_v10, 0.0  ;;  %v11469_v5 = vcombine.low %v14262_v61, %v14264_v60  ;;  %v14291_v3 = vld [vmem:[#allocation2 + $0x1a8] sm:$0xf] }
 0x156   :  { %v1706_v0 = vrot.slane %v1704_v56, 7  ;;  %v11507_v42 = vcombine.low %v1666_v63, %v1675_v13  ;;  %v1715_v53 = vrot.slane %v1713_v23, 7  ;;  %v591_v9 = vadd.f32 %v14180_v14, %v590_v54  ;;  %v12523_v18 = vpop.f32.mrf.mxu0 }
 0x157   :  { %v602_v4 = vadd.f32 %v14180_v14, %v12519_v43  ;;  %v12038_v37 = vpack.c.bf16 %v691_v25, %v691_v25  ;;  %12588 = vmatprep.mubr.bf16.mxu1 %v11469_v5  ;;  %v594_v15 = vadd.f32 %v14180_v14, %v593_v35  ;;  %v1687_v28 = vor.u32 %v1685_v38, %v1684_v62 }
 0x158   :  { %v1689_v7 = vrot.slane %v1684_v62, 4  ;;  %12664 = vmatprep.mubr.bf16.mxu0 %v11507_v42  ;;  %v689_v41 = vmax.f32 %v591_v9, 0.0  ;;  %v1696_v49 = vor.u32 %v1694_v2, %v1693_v12  ;;  %v1726_v30 = vshrl.u32 %v1185_v11, 16  ;;  %v609_v59 = vpop.f32.mrf.mxu0 }
 0x159   :  { %v692_v27 = vmax.f32 %v602_v4, 0.0  ;;  %1105 = vst [vmem:[#allocation2 + $0x1e4] sm:$0xf] %v12038_v37  ;;  %v690_v19 = vmax.f32 %v594_v15, 0.0  ;;  %v1688_v54 = vsel %vm13824_vm2, %v13901_v20, %v1687_v28  ;;  %v1729_v40 = vshll.u32 %v1185_v11, 16 }
 0x15a   :  { %v1735_v51 = vshrl.u32 %v1186_v1, 16  ;;  %v12036_v43 = vpack.c.bf16 %v689_v41, %v689_v41  ;;  %v1697_v31 = vsel %vm13824_vm2, %v1689_v7, %v1696_v49  ;;  %v1728_v45 = vrot.slane %v1726_v30, 7  ;;  %v14293_v35 = vpop.f32.mrf.mxu0 }
 0x15b   :  { %v12039_v47 = vpack.c.bf16 %v692_v27, %v692_v27  ;;  %v12037_v62 = vpack.c.bf16 %v690_v19, %v690_v19  ;;  %v11508_v38 = vcombine.low %v1688_v54, %v1697_v31  ;;  %v1738_v61 = vshll.u32 %v1186_v1, 16 }
 0x15c   :  { %v1737_v17 = vrot.slane %v1735_v51, 7  ;;  %1103 = vst [vmem:[#allocation2 + $0x1d4] sm:$0xf] %v12036_v43  ;;  %v11470_v20 = vcombine.low %v1185_v11, %v1186_v1  ;;  %v1709_v29 = vor.u32 %v1707_v33, %v1706_v0  ;;  %v1711_v46 = vrot.slane %v1706_v0, 4  ;;  %v622_v23 = vpop.f32.mrf.mxu0  ;;  %v1192_v0 = vld [vmem:[#allocation2 + $0x1b8] sm:$0xf] }
 0x15d   :  { %1106 = vst [vmem:[#allocation2 + $0x1e8] sm:$0xf] %v12039_v47  ;;  %v1718_v52 = vor.u32 %v1716_v24, %v1715_v53  ;;  %1104 = vst [vmem:[#allocation2 + $0x1d8] sm:$0xf] %v12037_v62  ;;  %12665 = vmatmul.mubr.bf16.gmra.mxu0 %v11508_v38  ;;  %v615_v55 = vadd.f32 %v14180_v14, %v12522_v32  ;;  %v1748_v60 = vshrl.u32 %v14289_v26, 16  ;;  %v1751_v12 = vshll.u32 %v14289_v26, 16 }
 0x15e   :  { %v1757_v2 = vshrl.u32 %v14291_v3, 16  ;;  %12589 = vmatmul.mubr.bf16.gmra.mxu1 %v11470_v20  ;;  %v1710_v6 = vsel %vm13824_vm2, %v13897_v16, %v1709_v29  ;;  %v1760_v57 = vshll.u32 %v14291_v3, 16  ;;  %v11471_v50 = vcombine.low %v14289_v26, %v14291_v3  ;;  %v1191_v32 = vld [vmem:[#allocation2 + $0x1b4] sm:$0xf]  ;;  %v12527_v7 = vpop.f32.mrf.mxu0  ;;  %v1195_v43 = vld [vmem:[#allocation2 + $0x1c8] sm:$0xf] }
 0x15f   :  { %v1719_v48 = vsel %vm13824_vm2, %v1711_v46, %v1718_v52  ;;  %v695_v56 = vmax.f32 %v615_v55, 0.0  ;;  %v1750_v63 = vrot.slane %v1748_v60, 7  ;;  %v607_v24 = vadd.f32 %v14180_v14, %v14275_v34 }
 0x160   :  { %v11509_v10 = vcombine.low %v1710_v6, %v1719_v48  ;;  %v1759_v33 = vrot.slane %v1757_v2, 7  ;;  %12592 = vmatprep.mubr.bf16.mxu1 %v11471_v50  ;;  %v618_v16 = vadd.f32 %v14180_v14, %v12523_v18  ;;  %v610_v13 = vadd.f32 %v14180_v14, %v609_v59  ;;  %v1194_v59 = vld [vmem:[#allocation2 + $0x1c4] sm:$0xf] }
 0x161   :  { %v1731_v25 = vor.u32 %v1729_v40, %v1728_v45  ;;  %v12042_v5 = vpack.c.bf16 %v695_v56, %v695_v56  ;;  %v1733_v11 = vrot.slane %v1728_v45, 4  ;;  %v1740_v42 = vor.u32 %v1738_v61, %v1737_v17  ;;  %v625_v17 = vpop.f32.mrf.mxu0 }
 0x162   :  { %12668 = vmatprep.mubr.bf16.mxu0 %v11509_v10  ;;  %v1770_v53 = vshrl.u32 %v1191_v32, 16  ;;  %v693_v9 = vmax.f32 %v607_v24, 0.0  ;;  %v696_v4 = vmax.f32 %v618_v16, 0.0  ;;  %v694_v1 = vmax.f32 %v610_v13, 0.0 }
 0x163   :  { %v1732_v37 = vsel %vm13824_vm2, %v13903_v21, %v1731_v25  ;;  %1109 = vst [vmem:[#allocation2 + $0x204] sm:$0xf] %v12042_v5  ;;  %v1741_v34 = vsel %vm13824_vm2, %v1733_v11, %v1740_v42  ;;  %v1773_v15 = vshll.u32 %v1191_v32, 16  ;;  %v1779_v28 = vshrl.u32 %v1192_v0, 16  ;;  %v1197_v52 = vld [vmem:[#allocation2 + $0x1d4] sm:$0xf] }
 0x164   :  { %v1772_v18 = vrot.slane %v1770_v53, 7  ;;  %v12040_v41 = vpack.c.bf16 %v693_v9, %v693_v9  ;;  %v12043_v27 = vpack.c.bf16 %v696_v4, %v696_v4  ;;  %v12041_v49 = vpack.c.bf16 %v694_v1, %v694_v1  ;;  %v1198_v50 = vld [vmem:[#allocation2 + $0x1d8] sm:$0xf] }
 0x165   :  { %v11510_v30 = vcombine.low %v1732_v37, %v1741_v34  ;;  %v1781_v40 = vrot.slane %v1779_v28, 7  ;;  %v1782_v51 = vshll.u32 %v1192_v0, 16  ;;  %v11472_v21 = vcombine.low %v1191_v32, %v1192_v0  ;;  %v1200_v0 = vld [vmem:[#allocation2 + $0x1e4] sm:$0xf]  ;;  %v1196_v34 = vld [vmem:[#allocation2 + $0x1d0] sm:$0x8] }
 0x166   :  { %v1775_v19 = vor.u32 %v1773_v15, %v1772_v18  ;;  %v1777_v54 = vrot.slane %v1772_v18, 4  ;;  %1107 = vst [vmem:[#allocation2 + $0x1f4] sm:$0xf] %v12040_v41  ;;  %1110 = vst [vmem:[#allocation2 + $0x208] sm:$0xf] %v12043_v27  ;;  %v1753_v47 = vor.u32 %v1751_v12, %v1750_v63  ;;  %v1755_v31 = vrot.slane %v1750_v63, 4 }
 0x167   :  { %1108 = vst [vmem:[#allocation2 + $0x1f8] sm:$0xf] %v12041_v49  ;;  %12669 = vmatmul.mubr.bf16.gmra.mxu0 %v11510_v30  ;;  %v1762_v45 = vor.u32 %v1760_v57, %v1759_v33  ;;  %v1784_v26 = vor.u32 %v1782_v51, %v1781_v40  ;;  %v631_v3 = vadd.f32 %v14180_v14, %v14293_v35  ;;  %v1792_v62 = vshrl.u32 %v1194_v59, 16 }
 0x168   :  { %v1795_v38 = vshll.u32 %v1194_v59, 16  ;;  %12593 = vmatmul.mubr.bf16.gmra.mxu1 %v11472_v21  ;;  %v1754_v61 = vsel %vm13824_vm2, %v13905_v22, %v1753_v47  ;;  %v1801_v29 = vshrl.u32 %v1195_v43, 16  ;;  %v1804_v46 = vshll.u32 %v1195_v43, 16  ;;  %v1199_v21 = vld [vmem:[#allocation2 + $0x1e0] sm:$0x8] }
 0x169   :  { %v1763_v20 = vsel %vm13824_vm2, %v1755_v31, %v1762_v45  ;;  %v699_v60 = vmax.f32 %v631_v3, 0.0  ;;  %v1794_v12 = vrot.slane %v1792_v62, 7  ;;  %v11473_v2 = vcombine.low %v1194_v59, %v1195_v43 }
 0x16a   :  { %v11511_v55 = vcombine.low %v1754_v61, %v1763_v20  ;;  %v1803_v6 = vrot.slane %v1801_v29, 7  ;;  %v623_v35 = vadd.f32 %v14180_v14, %v622_v23  ;;  %v634_v48 = vadd.f32 %v14180_v14, %v12527_v7 }
 0x16b   :  { %v626_v57 = vadd.f32 %v14180_v14, %v625_v17  ;;  %v12046_v22 = vpack.c.bf16 %v699_v60, %v699_v60  ;;  %12596 = vmatprep.mubr.bf16.mxu1 %v11473_v2  ;;  %v1776_v32 = vsel %vm13824_vm2, %v13918_v36, %v1775_v19  ;;  %v1785_v10 = vsel %vm13824_vm2, %v1777_v54, %v1784_v26  ;;  %v1201_v36 = vld [vmem:[#allocation2 + $0x1e8] sm:$0xf] }
 0x16c   :  { %12672 = vmatprep.mubr.bf16.mxu0 %v11511_v55  ;;  %v1814_v56 = vshrl.u32 %v1197_v52, 16  ;;  %v697_v63 = vmax.f32 %v623_v35, 0.0  ;;  %v700_v33 = vmax.f32 %v634_v48, 0.0  ;;  %v11512_v23 = vcombine.low %v1776_v32, %v1785_v10 }
 0x16d   :  { %v698_v24 = vmax.f32 %v626_v57, 0.0  ;;  %1113 = vst [vmem:[#allocation2 + $0x224] sm:$0xf] %v12046_v22  ;;  %v1817_v13 = vshll.u32 %v1197_v52, 16  ;;  %v1823_v14 = vshrl.u32 %v1198_v50, 16  ;;  %v1826_v25 = vshll.u32 %v1198_v50, 16 }
 0x16e   :  { %v1816_v16 = vrot.slane %v1814_v56, 7  ;;  %v12044_v5 = vpack.c.bf16 %v697_v63, %v697_v63  ;;  %v12047_v11 = vpack.c.bf16 %v700_v33, %v700_v33  ;;  %v11474_v53 = vcombine.low %v1197_v52, %v1198_v50  ;;  %v1203_v41 = vld [vmem:[#allocation2 + $0x1f4] sm:$0xf]  ;;  %v1204_v19 = vld [vmem:[#allocation2 + $0x1f8] sm:$0xf] }
 0x16f   :  { %v12045_v42 = vpack.c.bf16 %v698_v24, %v698_v24  ;;  %12673 = vmatmul.mubr.bf16.gmra.mxu0 %v11512_v23  ;;  %v1825_v1 = vrot.slane %v1823_v14, 7  ;;  %v1797_v37 = vor.u32 %v1795_v38, %v1794_v12  ;;  %v1799_v18 = vrot.slane %v1794_v12, 4  ;;  %v1207_v2 = vld [vmem:[#allocation2 + $0x208] sm:$0xf]  ;;  %v1202_v50 = vld [vmem:[#allocation2 + $0x1f0] sm:$0x8] }
 0x170   :  { %v1819_v9 = vor.u32 %v1817_v13, %v1816_v16  ;;  %v1821_v4 = vrot.slane %v1816_v16, 4  ;;  %1111 = vst [vmem:[#allocation2 + $0x214] sm:$0xf] %v12044_v5  ;;  %1114 = vst [vmem:[#allocation2 + $0x228] sm:$0xf] %v12047_v11  ;;  %12597 = vmatmul.mubr.bf16.gmra.mxu1 %v11474_v53  ;;  %v1806_v15 = vor.u32 %v1804_v46, %v1803_v6  ;;  %v1836_v28 = vshrl.u32 %v1200_v0, 16 }
 0x171   :  { %1112 = vst [vmem:[#allocation2 + $0x218] sm:$0xf] %v12045_v42  ;;  %v1839_v7 = vshll.u32 %v1200_v0, 16  ;;  %v1828_v27 = vor.u32 %v1826_v25, %v1825_v1  ;;  %v1798_v49 = vsel %vm13824_vm2, %v13921_v39, %v1797_v37  ;;  %v1845_v30 = vshrl.u32 %v1201_v36, 16  ;;  %v1206_v46 = vld [vmem:[#allocation2 + $0x204] sm:$0xf] }
 0x172   :  { %v1848_v59 = vshll.u32 %v1201_v36, 16  ;;  %v1807_v54 = vsel %vm13824_vm2, %v1799_v18, %v1806_v15  ;;  %v1838_v40 = vrot.slane %v1836_v28, 7  ;;  %v11475_v51 = vcombine.low %v1200_v0, %v1201_v36  ;;  %v1205_v14 = vld [vmem:[#allocation2 + $0x200] sm:$0x8] }
 0x173   :  { %v1809_v43 = vshrl.u32 %v1196_v34, 16  ;;  %v11513_v47 = vcombine.low %v1798_v49, %v1807_v54  ;;  %v1847_v31 = vrot.slane %v1845_v30, 7  ;;  %v1829_v45 = vsel %vm13824_vm2, %v1821_v4, %v1828_v27  ;;  %v1208_v4 = vld [vmem:[#allocation2 + $0x210] sm:$0x8]  ;;  %v2945_v27 = vld [vmem:[#allocation2 + $0x4] sm:$0xf] }
 0x174   :  { %v1858_v26 = vshrl.u32 %v1203_v41, 16  ;;  %12600 = vmatprep.mubr.bf16.mxu1 %v11475_v51  ;;  %v1861_v62 = vshll.u32 %v1203_v41, 16  ;;  %v1867_v39 = vshrl.u32 %v1204_v19, 16  ;;  %v1870_v38 = vshll.u32 %v1204_v19, 16  ;;  %v2946_v54 = vld [vmem:[#allocation2 + $0x8] sm:$0xf] }
 0x175   :  { %v11426_v3 = vrot.slane %v1809_v43, 11  ;;  %12676 = vmatprep.mubr.bf16.mxu0 %v11513_v47  ;;  %v11476_v61 = vcombine.low %v1203_v41, %v1204_v19  ;;  %v1831_v20 = vshrl.u32 %v1199_v21, 16  ;;  %v1841_v29 = vor.u32 %v1839_v7, %v1838_v40  ;;  %v2947_v47 = vld [vmem:[#allocation2 + $0xc] sm:$0x1] }
 0x176   :  { %v1860_v17 = vrot.slane %v1858_v26, 7  ;;  %v1869_v55 = vrot.slane %v1867_v39, 7  ;;  %v1843_v60 = vrot.slane %v1838_v40, 4  ;;  %v1850_v12 = vor.u32 %v1848_v59, %v1847_v31 }
 0x177   :  { %v1820_v52 = vsel %vm13824_vm2, %v11426_v3, %v1819_v9  ;;  %v11427_v57 = vrot.slane %v1831_v20, 11  ;;  %v1880_v10 = vshrl.u32 %v1206_v46, 16  ;;  %v1883_v56 = vshll.u32 %v1206_v46, 16  ;;  %v1209_v63 = vld [vmem:[#allocation2 + $0x214] sm:$0xf] }
 0x178   :  { %v11514_v6 = vcombine.low %v1820_v52, %v1829_v45  ;;  %v1863_v35 = vor.u32 %v1861_v62, %v1860_v17  ;;  %v1865_v48 = vrot.slane %v1860_v17, 4  ;;  %v1872_v22 = vor.u32 %v1870_v38, %v1869_v55  ;;  %12601 = vmatmul.mubr.bf16.gmra.mxu1 %v11476_v61  ;;  %v1210_v33 = vld [vmem:[#allocation2 + $0x218] sm:$0xf]  ;;  %v2950_v20 = vld [vmem:[#allocation2 + $0x1c] sm:$0x1] }
 0x179   :  { %v1851_v32 = vsel %vm13824_vm2, %v1843_v60, %v1850_v12  ;;  %v1842_v24 = vsel %vm13824_vm2, %v11427_v57, %v1841_v29  ;;  %v1889_v23 = vshrl.u32 %v1207_v2, 16  ;;  %v1892_v16 = vshll.u32 %v1207_v2, 16  ;;  %v2949_v61 = vld [vmem:[#allocation2 + $0x18] sm:$0xf]  ;;  %v4358_v60 = vld [vmem:[#allocation2 + $0x10] sm:$0x8] }
 0x17a   :  { %12677 = vmatmul.mubr.bf16.gmra.mxu0 %v11514_v6  ;;  %v11477_v13 = vcombine.low %v1206_v46, %v1207_v2  ;;  %v11515_v25 = vcombine.low %v1842_v24, %v1851_v32  ;;  %v1882_v0 = vrot.slane %v1880_v10, 7  ;;  %v1853_v5 = vshrl.u32 %v1202_v50, 16 }
 0x17b   :  { %v1873_v11 = vsel %vm13824_vm2, %v1865_v48, %v1872_v22  ;;  %v1891_v42 = vrot.slane %v1889_v23, 7  ;;  %v1902_v53 = vshrl.u32 %v1209_v63, 16  ;;  %v1905_v36 = vshll.u32 %v1209_v63, 16  ;;  %v4359_v48 = vld [vmem:[#allocation2 + $0x14] sm:$0xf] }
 0x17c   :  { %12604 = vmatprep.mubr.bf16.mxu1 %v11477_v13  ;;  %v1911_v9 = vshrl.u32 %v1210_v33, 16  ;;  %12680 = vmatprep.mubr.bf16.mxu0 %v11515_v25  ;;  %v11428_v1 = vrot.slane %v1853_v5, 11  ;;  %v1914_v37 = vshll.u32 %v1210_v33, 16  ;;  %v11478_v34 = vcombine.low %v1209_v63, %v1210_v33  ;;  %v13458_v22 = vld [vmem:[#allocation2 + $0x14] sm:$0xf] }
 0x17d   :  { %v1875_v18 = vshrl.u32 %v1205_v14, 16  ;;  %v1904_v15 = vrot.slane %v1902_v53, 7  ;;  %v1885_v7 = vor.u32 %v1883_v56, %v1882_v0  ;;  %v1887_v41 = vrot.slane %v1882_v0, 4  ;;  %v4360_v14 = vld [vmem:[#allocation2 + $0x18] sm:$0xf] }
 0x17e   :  { %v1913_v28 = vrot.slane %v1911_v9, 7  ;;  %v1864_v49 = vsel %vm13824_vm2, %v11428_v1, %v1863_v35  ;;  %v1894_v59 = vor.u32 %v1892_v16, %v1891_v42  ;;  %v1897_v19 = vshrl.u32 %v1208_v4, 16  ;;  %v2951_v4 = vld [vmem:[#allocation2 + $0x24] sm:$0xf] }
 0x17f   :  { %v11429_v30 = vrot.slane %v1875_v18, 11  ;;  %v11516_v40 = vcombine.low %v1864_v49, %v1873_v11  ;;  %v1907_v51 = vor.u32 %v1905_v36, %v1904_v15  ;;  %v1909_v43 = vrot.slane %v1904_v15, 4  ;;  %v2952_v15 = vld [vmem:[#allocation2 + $0x28] sm:$0xf] }
 0x180   :  { %v1916_v21 = vor.u32 %v1914_v37, %v1913_v28  ;;  %12605 = vmatmul.mubr.bf16.gmra.mxu1 %v11478_v34  ;;  %v1895_v45 = vsel %vm13824_vm2, %v1887_v41, %v1894_v59  ;;  %v11430_v26 = vrot.slane %v1897_v19, 11  ;;  %v3045_v3 = vshrl.u32 %v2945_v27, 16  ;;  %v2953_v19 = vld [vmem:[#allocation2 + $0x2c] sm:$0x1] }
 0x181   :  { %v1886_v31 = vsel %vm13824_vm2, %v11429_v30, %v1885_v7  ;;  %v3048_v38 = vshll.u32 %v2945_v27, 16  ;;  %v3054_v17 = vshll.u32 %v2946_v54, 16  ;;  %v3058_v52 = vshrl.u32 %v2946_v54, 16 }
 0x182   :  { %12681 = vmatmul.mubr.bf16.gmra.mxu0 %v11516_v40  ;;  %v11517_v62 = vcombine.low %v1886_v31, %v1895_v45  ;;  %v1917_v39 = vsel %vm13824_vm2, %v1909_v43, %v1916_v21  ;;  %v1908_v29 = vsel %vm13824_vm2, %v11430_v26, %v1907_v51  ;;  %v3047_v46 = vrot.slane %v3045_v3, 4  ;;  %v4362_v31 = vld [vmem:[#allocation2 + $0x24] sm:$0xf] }
 0x183   :  { %v3064_v55 = vshll.u32 %v2947_v47, 16  ;;  %v11518_v12 = vcombine.low %v1908_v29, %v1917_v39  ;;  %v3050_v2 = vrot.slane %v3048_v38, 5  ;;  %v3056_v6 = vrot.slane %v3054_v17, 5  ;;  %v4361_v47 = vld [vmem:[#allocation2 + $0x20] sm:$0x8]  ;;  %v13354_v29 = vld [vmem:[%s17831_s2 + $0x130] sm:$0xff]  }
 0x184   :  { %12684 = vmatprep.mubr.bf16.mxu0 %v11517_v62  ;;  %v3071_v35 = vrot.slane %v3069_v58, 4  ;;  %v3060_v57 = vrot.slane %v3058_v52, 4  ;;  %v3072_v32 = vshll.u32 %v13458_v22, 16  ;;  %v3078_v10 = vshll.u32 %v2949_v61, 16 }
 0x185   :  { %v3066_v50 = vrot.slane %v3064_v55, 5  ;;  %v3051_v56 = vor.u32 %v3050_v2, %v3047_v46  ;;  %v3082_v63 = vshrl.u32 %v2949_v61, 16  ;;  %v3088_v33 = vshll.u32 %v2950_v20, 16  ;;  %v4363_v20 = vld [vmem:[#allocation2 + $0x28] sm:$0xf] }
 0x186   :  { %v4455_v24 = vshrl.u32 %v4358_v60, 16  ;;  %v3061_v23 = vor.u32 %v3060_v57, %v3056_v6  ;;  %v3074_v16 = vrot.slane %v3072_v32, 5  ;;  %v3080_v13 = vrot.slane %v3078_v10, 5  ;;  %v13459_v57 = vld [vmem:[%s17831_s2 + $0x138] sm:$0xff]  }
 0x187   :  { %v4460_v25 = vshrl.u32 %v4359_v48, 16  ;;  %v3052_v0 = vrot.slane %v3051_v56, 4  ;;  %v3084_v5 = vrot.slane %v3082_v63, 4  ;;  %v3090_v11 = vrot.slane %v3088_v33, 5  ;;  %v2955_v56 = vld [vmem:[#allocation2 + $0x38] sm:$0xf] }
 0x188   :  { %v11583_v44 = vrot.slane %v4455_v24, 11  ;;  %v17842_v58 = vmov 0  ;;  %v3062_v42 = vrot.slane %v3061_v23, 4  ;;  %v3075_v53 = vor.u32 %v3074_v16, %v3071_v35  ;;  %v4365_v16 = vld [vmem:[#allocation2 + $0x34] sm:$0xf] }
 0x189   :  { %v17843_v58 = vsel %vm14360_vm5, 4294967295, %v17842_v58  ;;  %v4462_v36 = vrot.slane %v4460_v25, 7  ;;  %v4463_v9 = vshll.u32 %v4359_v48, 16  ;;  %v3057_v1 = vsel %vm14360_vm5, %v3052_v0, %v3056_v6 }
 0x18a   :  { %17844 = vst [vmem:[#allocation4_spill] sm:$0xff] %v17843_v58  ;;  %12685 = vmatmul.mubr.bf16.gmra.mxu0 %v11518_v12  ;;  %v3085_v37 = vor.u32 %v3084_v5, %v3080_v13  ;;  %v4469_v34 = vshrl.u32 %v4360_v14, 16  ;;  %v4472_v18 = vshll.u32 %v4360_v14, 16  ;;  %v3067_v28 = vsel %vm14360_vm5, %v3062_v42, %v3066_v50  ;;  %v2954_v12 = vld [vmem:[#allocation2 + $0x34] sm:$0xf] }
 0x18b   :  { %v3076_v7 = vrot.slane %v3075_v53, 4  ;;  %v4465_v41 = vor.u32 %v4463_v9, %v4462_v36  ;;  %v4467_v27 = vrot.slane %v4462_v36, 4  ;;  %v11543_v49 = vcombine.low %v3057_v1, %v3067_v28  ;;  %v4364_v9 = vld [vmem:[#allocation2 + $0x30] sm:$0x8] }
 0x18c   :  { %v3086_v30 = vrot.slane %v3085_v37, 4  ;;  %v4471_v59 = vrot.slane %v4469_v34, 7  ;;  %v3093_v54 = vshrl.u32 %v2951_v4, 16  ;;  %v3096_v43 = vshll.u32 %v2951_v4, 16 }
 0x18d   :  { %v3081_v40 = vsel %vm14360_vm5, %v3076_v7, %v3080_v13  ;;  %v4466_v51 = vsel %vm13824_vm2, %v11583_v44, %v4465_v41  ;;  %v3102_v21 = vshll.u32 %v2952_v15, 16  ;;  %12704 = vmatprep.mubr.bf16.mxu1 %v11543_v49  ;;  %v3106_v62 = vshrl.u32 %v2952_v15, 16  ;;  %v13355_v13 = vld [vmem:[%s17831_s2 + $0x128] sm:$0xff]   ;;  %v4366_v41 = vld [vmem:[#allocation2 + $0x38] sm:$0xf] }
 0x18e   :  { %v3091_v45 = vsel %vm14360_vm5, %v3086_v30, %v3090_v11  ;;  %v4474_v26 = vor.u32 %v4472_v18, %v4471_v59  ;;  %v3095_v3 = vrot.slane %v3093_v54, 4  ;;  %v3098_v38 = vrot.slane %v3096_v43, 5  ;;  %v2956_v11 = vld [vmem:[#allocation2 + $0x3c] sm:$0x1]  ;;  %v2957_v54 = vld [vmem:[#allocation2 + $0x44] sm:$0xf] }
 0x18f   :  { %v11544_v39 = vcombine.low %v3081_v40, %v3091_v45  ;;  %v3104_v17 = vrot.slane %v3102_v21, 5  ;;  %v3112_v61 = vshll.u32 %v2953_v19, 16  ;;  %v3108_v52 = vrot.slane %v3106_v62, 4 }
 0x190   :  { %v4475_v46 = vsel %vm13824_vm2, %v4467_v27, %v4474_v26  ;;  %v4477_v55 = vshrl.u32 %v4361_v47, 16  ;;  %v4482_v60 = vshrl.u32 %v4362_v31, 16  ;;  %v3099_v6 = vor.u32 %v3098_v38, %v3095_v3  ;;  %v13356_v27 = vld [vmem:[%s17831_s2 + $0x120] sm:$0xff]   ;;  %v2958_v3 = vld [vmem:[#allocation2 + $0x48] sm:$0xf] }
 0x191   :  { %12705 = vmatmul.mubr.bf16.vlgmr.msra.gmra.mxu1 %v11544_v39  ;;  %v11631_v2 = vcombine.low %v4466_v51, %v4475_v46  ;;  %v3114_v35 = vrot.slane %v3112_v61, 5  ;;  %v4485_v48 = vshll.u32 %v4362_v31, 16  ;;  %v3109_v50 = vor.u32 %v3108_v52, %v3104_v17  ;;  %v2959_v38 = vld [vmem:[#allocation2 + $0x4c] sm:$0x1] }
 0x192   :  { %12849 = vmatpush3.bf16.msra.mxu1 %v13459_v57  ;;  %v11584_v22 = vrot.slane %v4477_v55, 11  ;;  %v4484_v32 = vrot.slane %v4482_v60, 7  ;;  %v4491_v10 = vshrl.u32 %v4363_v20, 16  ;;  %v3100_v63 = vrot.slane %v3099_v6, 4  ;;  %v4367_v60 = vld [vmem:[#allocation2 + $0x40] sm:$0x8] }
 0x193   :  { %12784 = vmatprep.mubr.bf16.mxu0 %v11631_v2  ;;  %v4494_v33 = vshll.u32 %v4363_v20, 16  ;;  %v3117_v24 = vshrl.u32 %v2954_v12, 16  ;;  %v3120_v23 = vshll.u32 %v2954_v12, 16  ;;  %12850 = vmatprep.subr.bf16.mxu1 %v13354_v29  ;;  %v3110_v14 = vrot.slane %v3109_v50, 4  ;;  %v13357_v20 = vld [vmem:[%s17831_s2 + $0x118] sm:$0xff]  }
 0x194   :  { %v4487_v25 = vor.u32 %v4485_v48, %v4484_v32  ;;  %v4489_v0 = vrot.slane %v4484_v32, 4  ;;  %v4493_v5 = vrot.slane %v4491_v10, 7  ;;  %v3105_v44 = vsel %vm14360_vm5, %v3100_v63, %v3104_v17  ;;  %v4368_v48 = vld [vmem:[#allocation2 + $0x44] sm:$0xf] }
 0x195   :  { %v3119_v42 = vrot.slane %v3117_v24, 4  ;;  %v3122_v53 = vrot.slane %v3120_v23, 5  ;;  %v3126_v36 = vshll.u32 %v2955_v56, 16  ;;  %v3115_v4 = vsel %vm14360_vm5, %v3110_v14, %v3114_v35  ;;  %v4369_v24 = vld [vmem:[#allocation2 + $0x48] sm:$0xf] }
 0x196   :  { %v4488_v1 = vsel %vm13824_vm2, %v11584_v22, %v4487_v25  ;;  %v4496_v37 = vor.u32 %v4494_v33, %v4493_v5  ;;  %v3130_v34 = vshrl.u32 %v2955_v56, 16  ;;  %12851 = vmatpush3.bf16.msra.mxu1 %v13354_v29  ;;  %v11545_v18 = vcombine.low %v3105_v44, %v3115_v4  ;;  %v2960_v25 = vld [vmem:[#allocation2 + $0x54] sm:$0xf] }
 0x197   :  { %v3123_v15 = vor.u32 %v3122_v53, %v3119_v42  ;;  %v3128_v28 = vrot.slane %v3126_v36, 5  ;;  %v3136_v7 = vshll.u32 %v2956_v11, 16  ;;  %12852 = vmatprep.subr.bf16.mxu1 %v13355_v13  ;;  %v4499_v59 = vshrl.u32 %v4364_v9, 16  ;;  %v2961_v42 = vld [vmem:[#allocation2 + $0x58] sm:$0xf] }
 0x198   :  { %v4497_v49 = vsel %vm13824_vm2, %v4489_v0, %v4496_v37  ;;  %v3132_v30 = vrot.slane %v3130_v34, 4  ;;  %v4504_v19 = vshrl.u32 %v4365_v16, 16  ;;  %12708 = vmatprep.mubr.bf16.mxu1 %v11545_v18  ;;  %v4507_v21 = vshll.u32 %v4365_v16, 16  ;;  %v2962_v34 = vld [vmem:[#allocation2 + $0x5c] sm:$0x1] }
 0x199   :  { %v11632_v40 = vcombine.low %v4488_v1, %v4497_v49  ;;  %v3124_v51 = vrot.slane %v3123_v15, 4  ;;  %v3138_v43 = vrot.slane %v3136_v7, 5  ;;  %v11585_v31 = vrot.slane %v4499_v59, 11 }
 0x19a   :  { %v3133_v47 = vor.u32 %v3132_v30, %v3128_v28  ;;  %v4506_v45 = vrot.slane %v4504_v19, 7  ;;  %v4513_v26 = vshrl.u32 %v4366_v41, 16  ;;  %12853 = vmatpush3.bf16.msra.mxu1 %v13355_v13  ;;  %v4516_v39 = vshll.u32 %v4366_v41, 16  ;;  %v4370_v30 = vld [vmem:[#allocation2 + $0x50] sm:$0x8] }
 0x19b   :  { %12785 = vmatmul.mubr.bf16.vlgmr.msra.gmra.mxu0 %v11632_v40  ;;  %v3129_v62 = vsel %vm14360_vm5, %v3124_v51, %v3128_v28  ;;  %v3141_v17 = vshrl.u32 %v2957_v54, 16  ;;  %v3144_v61 = vshll.u32 %v2957_v54, 16  ;;  %12854 = vmatprep.subr.bf16.mxu1 %v13356_v27  ;;  %v3150_v6 = vshll.u32 %v2958_v3, 16  ;;  %v4371_v28 = vld [vmem:[#allocation2 + $0x54] sm:$0xf] }
 0x19c   :  { %v3134_v29 = vrot.slane %v3133_v47, 4  ;;  %v4509_v46 = vor.u32 %v4507_v21, %v4506_v45  ;;  %v4511_v52 = vrot.slane %v4506_v45, 4  ;;  %v4515_v55 = vrot.slane %v4513_v26, 7  ;;  %v4372_v51 = vld [vmem:[#allocation2 + $0x58] sm:$0xf] }
 0x19d   :  { %v3143_v12 = vrot.slane %v3141_v17, 4  ;;  %v3146_v2 = vrot.slane %v3144_v61, 5  ;;  %v3154_v35 = vshrl.u32 %v2958_v3, 16  ;;  %v3160_v32 = vshll.u32 %v2959_v38, 16 }
 0x19e   :  { %v3139_v57 = vsel %vm14360_vm5, %v3134_v29, %v3138_v43  ;;  %v4510_v50 = vsel %vm13824_vm2, %v11585_v31, %v4509_v46  ;;  %v4518_v22 = vor.u32 %v4516_v39, %v4515_v55  ;;  %12855 = vmatpush3.bf16.msra.mxu1 %v13356_v27  ;;  %v3152_v63 = vrot.slane %v3150_v6, 5  ;;  %v13358_v29 = vld [vmem:[%s17831_s2 + $0x110] sm:$0xff]  }
 0x19f   :  { %v11546_v10 = vcombine.low %v3129_v62, %v3139_v57  ;;  %v3147_v56 = vor.u32 %v3146_v2, %v3143_v12  ;;  %v3156_v33 = vrot.slane %v3154_v35, 4  ;;  %12856 = vmatprep.subr.bf16.mxu1 %v13357_v20  ;;  %v3162_v16 = vrot.slane %v3160_v32, 5  ;;  %v2964_v12 = vld [vmem:[#allocation2 + $0x68] sm:$0xf] }
 0x1a0   :  { %v4519_v23 = vsel %vm13824_vm2, %v4511_v52, %v4518_v22  ;;  %v4521_v13 = vshrl.u32 %v4367_v60, 16  ;;  %v4526_v14 = vshrl.u32 %v4368_v48, 16  ;;  %v4529_v44 = vshll.u32 %v4368_v48, 16 }
 0x1a1   :  { %12709 = vmatmul.mubr.bf16.gmra.mxu1 %v11546_v10  ;;  %v11633_v0 = vcombine.low %v4510_v50, %v4519_v23  ;;  %v3148_v5 = vrot.slane %v3147_v56, 4  ;;  %v3157_v11 = vor.u32 %v3156_v33, %v3152_v63  ;;  %v4535_v9 = vshrl.u32 %v4369_v24, 16  ;;  %v4373_v10 = vld [vmem:[#allocation2 + $0x60] sm:$0x8] }
 0x1a2   :  { %v11586_v53 = vrot.slane %v4521_v13, 11  ;;  %v4528_v36 = vrot.slane %v4526_v14, 7  ;;  %v4538_v4 = vshll.u32 %v4369_v24, 16  ;;  %12857 = vmatpush3.bf16.msra.mxu1 %v13357_v20  ;;  %v3165_v18 = vshrl.u32 %v2960_v25, 16  ;;  %v2963_v20 = vld [vmem:[#allocation2 + $0x64] sm:$0xf] }
 0x1a3   :  { %12788 = vmatprep.mubr.bf16.mxu0 %v11633_v0  ;;  %v3153_v1 = vsel %vm14360_vm5, %v3148_v5, %v3152_v63  ;;  %v3158_v37 = vrot.slane %v3157_v11, 4  ;;  %v3168_v15 = vshll.u32 %v2960_v25, 16  ;;  %v4537_v27 = vrot.slane %v4535_v9, 7  ;;  %12858 = vmatprep.subr.bf16.mxu1 %v13358_v29  ;;  %v2965_v24 = vld [vmem:[#allocation2 + $0x6c] sm:$0x1] }
 0x1a4   :  { %v4531_v7 = vor.u32 %v4529_v44, %v4528_v36  ;;  %v4533_v41 = vrot.slane %v4528_v36, 4  ;;  %v3174_v49 = vshll.u32 %v2961_v42, 16  ;;  %v3167_v19 = vrot.slane %v3165_v18, 4  ;;  %v4375_v5 = vld [vmem:[#allocation2 + $0x68] sm:$0xf] }
 0x1a5   :  { %v3163_v59 = vsel %vm14360_vm5, %v3158_v37, %v3162_v16  ;;  %v3170_v54 = vrot.slane %v3168_v15, 5  ;;  %v3178_v40 = vshrl.u32 %v2961_v42, 16  ;;  %v4540_v47 = vor.u32 %v4538_v4, %v4537_v27  ;;  %v4374_v16 = vld [vmem:[#allocation2 + $0x64] sm:$0xf]  ;;  %v2966_v37 = vld [vmem:[#allocation2 + $0x74] sm:$0xf] }
 0x1a6   :  { %v11547_v43 = vcombine.low %v3153_v1, %v3163_v59  ;;  %v4532_v21 = vsel %vm13824_vm2, %v11586_v53, %v4531_v7  ;;  %v3176_v31 = vrot.slane %v3174_v49, 5  ;;  %v3184_v3 = vshll.u32 %v2962_v34, 16  ;;  %12859 = vmatpush3.bf16.msra.mxu1 %v13358_v29  ;;  %v2967_v7 = vld [vmem:[#allocation2 + $0x78] sm:$0xf] }
 0x1a7   :  { %v3171_v45 = vor.u32 %v3170_v54, %v3167_v19  ;;  %v3180_v26 = vrot.slane %v3178_v40, 4  ;;  %v4543_v62 = vshrl.u32 %v4370_v30, 16  ;;  %v4541_v39 = vsel %vm13824_vm2, %v4533_v41, %v4540_v47 }
 0x1a8   :  { %12712 = vmatprep.mubr.bf16.mxu1 %v11547_v43  ;;  %v4548_v38 = vshrl.u32 %v4371_v28, 16  ;;  %v4551_v17 = vshll.u32 %v4371_v28, 16  ;;  %v4557_v61 = vshrl.u32 %v4372_v51, 16  ;;  %v11634_v46 = vcombine.low %v4532_v21, %v4541_v39  ;;  %v2968_v21 = vld [vmem:[#allocation2 + $0x7c] sm:$0x1] }
 0x1a9   :  { %v3172_v52 = vrot.slane %v3171_v45, 4  ;;  %v3181_v55 = vor.u32 %v3180_v26, %v3176_v31  ;;  %v3186_v60 = vrot.slane %v3184_v3, 5  ;;  %v11587_v2 = vrot.slane %v4543_v62, 11  ;;  %v4376_v39 = vld [vmem:[#allocation2 + $0x70] sm:$0x8] }
 0x1aa   :  { %v4550_v6 = vrot.slane %v4548_v38, 7  ;;  %v4559_v35 = vrot.slane %v4557_v61, 7  ;;  %v4560_v48 = vshll.u32 %v4372_v51, 16  ;;  %12789 = vmatmul.mubr.bf16.gmra.mxu0 %v11634_v46  ;;  %v3189_v22 = vshrl.u32 %v2963_v20, 16  ;;  %v4377_v38 = vld [vmem:[#allocation2 + $0x74] sm:$0xf] }
 0x1ab   :  { %v3177_v57 = vsel %vm14360_vm5, %v3172_v52, %v3176_v31  ;;  %v3182_v50 = vrot.slane %v3181_v55, 4  ;;  %v3192_v32 = vshll.u32 %v2963_v20, 16  ;;  %v3198_v23 = vshll.u32 %v2964_v12, 16  ;;  %v4378_v46 = vld [vmem:[#allocation2 + $0x78] sm:$0xf] }
 0x1ac   :  { %v4553_v56 = vor.u32 %v4551_v17, %v4550_v6  ;;  %v4555_v63 = vrot.slane %v4550_v6, 4  ;;  %v4562_v33 = vor.u32 %v4560_v48, %v4559_v35  ;;  %v3191_v14 = vrot.slane %v3189_v22, 4 }
 0x1ad   :  { %v3187_v13 = vsel %vm14360_vm5, %v3182_v50, %v3186_v60  ;;  %v3194_v25 = vrot.slane %v3192_v32, 5  ;;  %v3202_v0 = vshrl.u32 %v2964_v12, 16  ;;  %v3200_v53 = vrot.slane %v3198_v23, 5 }
 0x1ae   :  { %v11548_v11 = vcombine.low %v3177_v57, %v3187_v13  ;;  %v4554_v44 = vsel %vm13824_vm2, %v11587_v2, %v4553_v56  ;;  %v4563_v42 = vsel %vm13824_vm2, %v4555_v63, %v4562_v33  ;;  %v3208_v1 = vshll.u32 %v2965_v24, 16  ;;  %v2969_v57 = vld [vmem:[#allocation2 + $0x84] sm:$0xf]  ;;  %v2970_v56 = vld [vmem:[#allocation2 + $0x88] sm:$0xf] }
 0x1af   :  { %v11635_v36 = vcombine.low %v4554_v44, %v4563_v42  ;;  %v3195_v9 = vor.u32 %v3194_v25, %v3191_v14  ;;  %v3204_v4 = vrot.slane %v3202_v0, 4  ;;  %v4565_v34 = vshrl.u32 %v4373_v10, 16 }
 0x1b0   :  { %12713 = vmatmul.mubr.bf16.gmra.mxu1 %v11548_v11  ;;  %v4570_v18 = vshrl.u32 %v4374_v16, 16  ;;  %v4573_v15 = vshll.u32 %v4374_v16, 16  ;;  %v4579_v28 = vshrl.u32 %v4375_v5, 16  ;;  %v3210_v49 = vrot.slane %v3208_v1, 5  ;;  %v2971_v11 = vld [vmem:[#allocation2 + $0x8c] sm:$0x1] }
 0x1b1   :  { %12792 = vmatprep.mubr.bf16.mxu0 %v11635_v36  ;;  %v3196_v41 = vrot.slane %v3195_v9, 4  ;;  %v3205_v27 = vor.u32 %v3204_v4, %v3200_v53  ;;  %v4582_v30 = vshll.u32 %v4375_v5, 16  ;;  %v11588_v59 = vrot.slane %v4565_v34, 11  ;;  %v4380_v34 = vld [vmem:[#allocation2 + $0x84] sm:$0xf] }
 0x1b2   :  { %v4572_v19 = vrot.slane %v4570_v18, 7  ;;  %v4581_v54 = vrot.slane %v4579_v28, 7  ;;  %v3213_v40 = vshrl.u32 %v2966_v37, 16  ;;  %v3216_v47 = vshll.u32 %v2966_v37, 16  ;;  %v4379_v37 = vld [vmem:[#allocation2 + $0x80] sm:$0x8] }
 0x1b3   :  { %v3201_v51 = vsel %vm14360_vm5, %v3196_v41, %v3200_v53  ;;  %v3206_v43 = vrot.slane %v3205_v27, 4  ;;  %v3222_v31 = vshll.u32 %v2967_v7, 16  ;;  %v3226_v29 = vshrl.u32 %v2967_v7, 16  ;;  %v4381_v41 = vld [vmem:[#allocation2 + $0x88] sm:$0xf] }
 0x1b4   :  { %v4575_v45 = vor.u32 %v4573_v15, %v4572_v19  ;;  %v4577_v26 = vrot.slane %v4572_v19, 4  ;;  %v4584_v3 = vor.u32 %v4582_v30, %v4581_v54  ;;  %v3215_v62 = vrot.slane %v3213_v40, 4 }
 0x1b5   :  { %v3211_v17 = vsel %vm14360_vm5, %v3206_v43, %v3210_v49  ;;  %v3218_v61 = vrot.slane %v3216_v47, 5  ;;  %v3224_v20 = vrot.slane %v3222_v31, 5  ;;  %v3232_v12 = vshll.u32 %v2968_v21, 16  ;;  %v2972_v21 = vld [vmem:[#allocation2 + $0x94] sm:$0xf] }
 0x1b6   :  { %v11549_v52 = vcombine.low %v3201_v51, %v3211_v17  ;;  %v4576_v55 = vsel %vm13824_vm2, %v11588_v59, %v4575_v45  ;;  %v4585_v60 = vsel %vm13824_vm2, %v4577_v26, %v4584_v3  ;;  %v3228_v35 = vrot.slane %v3226_v29, 4 }
 0x1b7   :  { %v11636_v2 = vcombine.low %v4576_v55, %v4585_v60  ;;  %v3219_v6 = vor.u32 %v3218_v61, %v3215_v62  ;;  %v4587_v48 = vshrl.u32 %v4376_v39, 16  ;;  %v3234_v50 = vrot.slane %v3232_v12, 5  ;;  %v2973_v62 = vld [vmem:[#allocation2 + $0x98] sm:$0xf] }
 0x1b8   :  { %12716 = vmatprep.mubr.bf16.mxu1 %v11549_v52  ;;  %v4592_v22 = vshrl.u32 %v4377_v38, 16  ;;  %v4595_v32 = vshll.u32 %v4377_v38, 16  ;;  %v4601_v10 = vshrl.u32 %v4378_v46, 16  ;;  %v3229_v33 = vor.u32 %v3228_v35, %v3224_v20 }
 0x1b9   :  { %12793 = vmatmul.mubr.bf16.gmra.mxu0 %v11636_v2  ;;  %v3220_v63 = vrot.slane %v3219_v6, 4  ;;  %v11589_v24 = vrot.slane %v4587_v48, 11  ;;  %v4604_v23 = vshll.u32 %v4378_v46, 16  ;;  %v3237_v14 = vshrl.u32 %v2969_v57, 16  ;;  %v2974_v6 = vld [vmem:[#allocation2 + $0x9c] sm:$0x1] }
 0x1ba   :  { %v4594_v16 = vrot.slane %v4592_v22, 7  ;;  %v4603_v13 = vrot.slane %v4601_v10, 7  ;;  %v3240_v25 = vshll.u32 %v2969_v57, 16  ;;  %v3230_v5 = vrot.slane %v3229_v33, 4  ;;  %v14436_v53 = vpop.f32.mrf.mxu1  ;;  %v4382_v57 = vld [vmem:[#allocation2 + $0x90] sm:$0x8] }
 0x1bb   :  { %v3225_v0 = vsel %vm14360_vm5, %v3220_v63, %v3224_v20  ;;  %v3246_v44 = vshll.u32 %v2970_v56, 16  ;;  %v3250_v42 = vshrl.u32 %v2970_v56, 16  ;;  %v3239_v1 = vrot.slane %v3237_v14, 4  ;;  %v4383_v63 = vld [vmem:[#allocation2 + $0x94] sm:$0xf] }
 0x1bc   :  { %v4597_v36 = vor.u32 %v4595_v32, %v4594_v16  ;;  %v4599_v9 = vrot.slane %v4594_v16, 4  ;;  %v4606_v4 = vor.u32 %v4604_v23, %v4603_v13  ;;  %v3235_v18 = vsel %vm14360_vm5, %v3230_v5, %v3234_v50  ;;  %v14440_v27 = vpop.f32.mrf.mxu1  ;;  %v4384_v14 = vld [vmem:[#allocation2 + $0x98] sm:$0xf] }
 0x1bd   :  { %v3242_v15 = vrot.slane %v3240_v25, 5  ;;  %v3248_v28 = vrot.slane %v3246_v44, 5  ;;  %v3252_v7 = vrot.slane %v3250_v42, 4  ;;  %v11550_v49 = vcombine.low %v3225_v0, %v3235_v18 }
 0x1be   :  { %v4598_v30 = vsel %vm13824_vm2, %v11589_v24, %v4597_v36  ;;  %v4607_v59 = vsel %vm13824_vm2, %v4599_v9, %v4606_v4  ;;  %v3256_v19 = vshll.u32 %v2971_v11, 16  ;;  %v4609_v43 = vshrl.u32 %v4379_v37, 16  ;;  %v14446_v47 = vpop.f32.mrf.mxu1  ;;  %v2975_v37 = vld [vmem:[#allocation2 + $0xa4] sm:$0xf] }
 0x1bf   :  { %v11637_v54 = vcombine.low %v4598_v30, %v4607_v59  ;;  %v3243_v40 = vor.u32 %v3242_v15, %v3239_v1  ;;  %v3253_v51 = vor.u32 %v3252_v7, %v3248_v28  ;;  %12717 = vmatmul.mubr.bf16.gmra.mxu1 %v11550_v49  ;;  %v4614_v45 = vshrl.u32 %v4380_v34, 16 }
 0x1c0   :  { %v3258_v31 = vrot.slane %v3256_v19, 5  ;;  %v4617_v26 = vshll.u32 %v4380_v34, 16  ;;  %v4623_v3 = vshrl.u32 %v4381_v41, 16  ;;  %v11590_v17 = vrot.slane %v4609_v43, 11  ;;  %v14448_v20 = vpop.f32.mrf.mxu1  ;;  %v2976_v34 = vld [vmem:[#allocation2 + $0xa8] sm:$0xf] }
 0x1c1   :  { %12796 = vmatprep.mubr.bf16.mxu0 %v11637_v54  ;;  %v3244_v39 = vrot.slane %v3243_v40, 4  ;;  %v3254_v38 = vrot.slane %v3253_v51, 4  ;;  %v4626_v61 = vshll.u32 %v4381_v41, 16  ;;  %17845 = vst [vmem:[#allocation5_spill] sm:$0xff] %v14448_v20  ;;  %v4616_v29 = vrot.slane %v4614_v45, 7  ;;  %v14450_v60 = vpop.f32.mrf.mxu0  ;;  %v13359_v51 = vld [vmem:[%s17831_s2 + $0x108] sm:$0xff]  }
 0x1c2   :  { %v4625_v46 = vrot.slane %v4623_v3, 7  ;;  %v3261_v52 = vshrl.u32 %v2972_v21, 16  ;;  %v3264_v55 = vshll.u32 %v2972_v21, 16  ;;  %v3270_v35 = vshll.u32 %v2973_v62, 16  ;;  %v14456_v50 = vpop.f32.mrf.mxu1  ;;  %v2977_v21 = vld [vmem:[#allocation2 + $0xac] sm:$0x1]  ;;  %12860 = vmatprep.subr.bf16.mxu1 %v13359_v51 }
 0x1c3   :  { %v3249_v12 = vsel %vm14360_vm5, %v3244_v39, %v3248_v28  ;;  %v3259_v2 = vsel %vm14360_vm5, %v3254_v38, %v3258_v31  ;;  %v3274_v48 = vshrl.u32 %v2973_v62, 16  ;;  %v4619_v32 = vor.u32 %v4617_v26, %v4616_v29  ;;  %v14458_v33 = vpop.f32.mrf.mxu0  ;;  %12861 = vmatpush3.bf16.msra.mxu1 %v13359_v51 }
 0x1c4   :  { %v11551_v22 = vcombine.low %v3249_v12, %v3259_v2  ;;  %v4621_v10 = vrot.slane %v4616_v29, 4  ;;  %v4628_v56 = vor.u32 %v4626_v61, %v4625_v46  ;;  %v3263_v24 = vrot.slane %v3261_v52, 4  ;;  %v14460_v25 = vpop.f32.mrf.mxu1  ;;  %v4385_v61 = vld [vmem:[#allocation2 + $0xa0] sm:$0x8]  ;;  %v4386_v29 = vld [vmem:[#allocation2 + $0xa4] sm:$0xf] }
 0x1c5   :  { %v3266_v23 = vrot.slane %v3264_v55, 5  ;;  %v3272_v16 = vrot.slane %v3270_v35, 5  ;;  %v3276_v13 = vrot.slane %v3274_v48, 4  ;;  %v4620_v0 = vsel %vm13824_vm2, %v11590_v17, %v4619_v32  ;;  %v14466_v42 = vpop.f32.mrf.mxu0  ;;  %v4387_v32 = vld [vmem:[#allocation2 + $0xa8] sm:$0xf] }
 0x1c6   :  { %12720 = vmatprep.mubr.bf16.mxu1 %v11551_v22  ;;  %v4629_v5 = vsel %vm13824_vm2, %v4621_v10, %v4628_v56  ;;  %v3280_v11 = vshll.u32 %v2974_v6, 16  ;;  %v4631_v44 = vshrl.u32 %v4382_v57, 16  ;;  %v4636_v1 = vshrl.u32 %v4383_v63, 16  ;;  %v14468_v18 = vpop.f32.mrf.mxu1 }
 0x1c7   :  { %v11638_v36 = vcombine.low %v4620_v0, %v4629_v5  ;;  %v3267_v9 = vor.u32 %v3266_v23, %v3263_v24  ;;  %v3277_v4 = vor.u32 %v3276_v13, %v3272_v16  ;;  %v4639_v7 = vshll.u32 %v4383_v63, 16  ;;  %v14470_v49 = vpop.f32.mrf.mxu0 }
 0x1c8   :  { %v3282_v15 = vrot.slane %v3280_v11, 5  ;;  %v11591_v28 = vrot.slane %v4631_v44, 11  ;;  %v4645_v41 = vshrl.u32 %v4384_v14, 16  ;;  %17846 = vst [vmem:[#allocation6_spill] sm:$0xff] %v14470_v49  ;;  %v4638_v19 = vrot.slane %v4636_v1, 7  ;;  %v14472_v40 = vpop.f32.mrf.mxu1 }
 0x1c9   :  { %12797 = vmatmul.mubr.bf16.gmra.mxu0 %v11638_v36  ;;  %v3268_v30 = vrot.slane %v3267_v9, 4  ;;  %v3278_v59 = vrot.slane %v3277_v4, 4  ;;  %v4648_v54 = vshll.u32 %v4384_v14, 16  ;;  %17847 = vst [vmem:[#allocation7_spill] sm:$0xff] %v14472_v40  ;;  %v3285_v31 = vshrl.u32 %v2975_v37, 16  ;;  %v14477_v3 = vpop.f32.mrf.mxu0 }
 0x1ca   :  { %v4647_v43 = vrot.slane %v4645_v41, 7  ;;  %v3288_v45 = vshll.u32 %v2975_v37, 16  ;;  %v3294_v26 = vshll.u32 %v2976_v34, 16  ;;  %v4641_v38 = vor.u32 %v4639_v7, %v4638_v19  ;;  %v14483_v46 = vpop.f32.mrf.mxu1  ;;  %v2979_v37 = vld [vmem:[#allocation2 + $0xb8] sm:$0xf] }
 0x1cb   :  { %v3273_v62 = vsel %vm14360_vm5, %v3268_v30, %v3272_v16  ;;  %v3283_v39 = vsel %vm14360_vm5, %v3278_v59, %v3282_v15  ;;  %v4643_v17 = vrot.slane %v4638_v19, 4  ;;  %v3287_v12 = vrot.slane %v3285_v31, 4  ;;  %v14485_v6 = vpop.f32.mrf.mxu0  ;;  %v2978_v16 = vld [vmem:[#allocation2 + $0xb4] sm:$0xf]  ;;  %v2980_v7 = vld [vmem:[#allocation2 + $0xbc] sm:$0x1] }
 0x1cc   :  { %v11552_v52 = vcombine.low %v3273_v62, %v3283_v39  ;;  %v4650_v55 = vor.u32 %v4648_v54, %v4647_v43  ;;  %v3290_v2 = vrot.slane %v3288_v45, 5  ;;  %v4642_v35 = vsel %vm13824_vm2, %v11591_v28, %v4641_v38  ;;  %v14489_v10 = vpop.f32.mrf.mxu1 }
 0x1cd   :  { %v3296_v48 = vrot.slane %v3294_v26, 5  ;;  %v3298_v57 = vshrl.u32 %v2976_v34, 16  ;;  %v3304_v22 = vshll.u32 %v2977_v21, 16  ;;  %v4653_v24 = vshrl.u32 %v4385_v61, 16  ;;  %v14493_v13 = vpop.f32.mrf.mxu0  ;;  %v4388_v21 = vld [vmem:[#allocation2 + $0xb0] sm:$0x8] }
 0x1ce   :  { %12721 = vmatmul.mubr.bf16.gmra.mxu1 %v11552_v52  ;;  %v4651_v56 = vsel %vm13824_vm2, %v4643_v17, %v4650_v55  ;;  %v3291_v63 = vor.u32 %v3290_v2, %v3287_v12  ;;  %v4658_v23 = vshrl.u32 %v4386_v29, 16  ;;  %v4661_v11 = vshll.u32 %v4386_v29, 16  ;;  %v14495_v44 = vpop.f32.mrf.mxu1  ;;  %v4389_v29 = vld [vmem:[#allocation2 + $0xb4] sm:$0xf] }
 0x1cf   :  { %v11639_v14 = vcombine.low %v4642_v35, %v4651_v56  ;;  %v3300_v0 = vrot.slane %v3298_v57, 4  ;;  %v3306_v5 = vrot.slane %v3304_v22, 5  ;;  %v11592_v9 = vrot.slane %v4653_v24, 11  ;;  %v14497_v34 = vpop.f32.mrf.mxu0  ;;  %v4390_v35 = vld [vmem:[#allocation2 + $0xb8] sm:$0xf] }
 0x1d0   :  { %v3292_v36 = vrot.slane %v3291_v63, 4  ;;  %v4660_v4 = vrot.slane %v4658_v23, 7  ;;  %v4667_v1 = vshrl.u32 %v4387_v32, 16  ;;  %17848 = vst [vmem:[#allocation8_spill] sm:$0xff] %v14497_v34  ;;  %v4670_v28 = vshll.u32 %v4387_v32, 16  ;;  %v14499_v59 = vpop.f32.mrf.mxu1 }
 0x1d1   :  { %12800 = vmatprep.mubr.bf16.mxu0 %v11639_v14  ;;  %v3301_v15 = vor.u32 %v3300_v0, %v3296_v48  ;;  %v3309_v41 = vshrl.u32 %v2978_v16, 16  ;;  %v3312_v30 = vshll.u32 %v2978_v16, 16  ;;  %17849 = vst [vmem:[#allocation9_spill] sm:$0xff] %v14499_v59  ;;  %v3318_v62 = vshll.u32 %v2979_v37, 16  ;;  %v2981_v24 = vld [vmem:[#allocation2 + $0xc4] sm:$0xf] }
 0x1d2   :  { %v3297_v19 = vsel %vm14360_vm5, %v3292_v36, %v3296_v48  ;;  %v4663_v54 = vor.u32 %v4661_v11, %v4660_v4  ;;  %v4665_v51 = vrot.slane %v4660_v4, 4  ;;  %v4669_v43 = vrot.slane %v4667_v1, 7  ;;  %v4399_v59 = vld [vmem:[#allocation2 + $0xe8] sm:$0xf] }
 0x1d3   :  { %v3302_v31 = vrot.slane %v3301_v15, 4  ;;  %v3311_v45 = vrot.slane %v3309_v41, 4  ;;  %v3314_v26 = vrot.slane %v3312_v30, 5  ;;  %v3322_v17 = vshrl.u32 %v2979_v37, 16  ;;  %v14505_v52 = vpop.f32.mrf.mxu0  ;;  %v2983_v41 = vld [vmem:[#allocation2 + $0xcc] sm:$0x1] }
 0x1d4   :  { %v4664_v39 = vsel %vm13824_vm2, %v11592_v9, %v4663_v54  ;;  %v4672_v38 = vor.u32 %v4670_v28, %v4669_v43  ;;  %v3328_v61 = vshll.u32 %v2980_v7, 16  ;;  %v3320_v2 = vrot.slane %v3318_v62, 5  ;;  %v14509_v57 = vpop.f32.mrf.mxu1 }
 0x1d5   :  { %v3307_v55 = vsel %vm14360_vm5, %v3302_v31, %v3306_v5  ;;  %v3315_v12 = vor.u32 %v3314_v26, %v3311_v45  ;;  %v4675_v48 = vshrl.u32 %v4388_v21, 16  ;;  %v3324_v56 = vrot.slane %v3322_v17, 4  ;;  %v14513_v23 = vpop.f32.mrf.mxu0  ;;  %v2982_v5 = vld [vmem:[#allocation2 + $0xc8] sm:$0xf]  ;;  %v4391_v26 = vld [vmem:[#allocation2 + $0xc0] sm:$0x8] }
 0x1d6   :  { %v11553_v22 = vcombine.low %v3297_v19, %v3307_v55  ;;  %v4673_v32 = vsel %vm13824_vm2, %v4665_v51, %v4672_v38  ;;  %v3330_v63 = vrot.slane %v3328_v61, 5  ;;  %v4680_v11 = vshrl.u32 %v4389_v29, 16  ;;  %v14515_v36 = vpop.f32.mrf.mxu1  ;;  %v13360_v51 = vld [vmem:[%s17831_s2 + $0x178] sm:$0xff]  }
 0x1d7   :  { %v11640_v16 = vcombine.low %v4664_v39, %v4673_v32  ;;  %v3316_v14 = vrot.slane %v3315_v12, 4  ;;  %v11593_v0 = vrot.slane %v4675_v48, 11  ;;  %v3325_v9 = vor.u32 %v3324_v56, %v3320_v2  ;;  %v14517_v15 = vpop.f32.mrf.mxu0  ;;  %12928 = vmatprep.subr.bf16.mxu0 %v13360_v51 }
 0x1d8   :  { %12724 = vmatprep.mubr.bf16.mxu1 %v11553_v22  ;;  %v4683_v4 = vshll.u32 %v4389_v29, 16  ;;  %v4689_v1 = vshrl.u32 %v4390_v35, 16  ;;  %v4692_v37 = vshll.u32 %v4390_v35, 16  ;;  %v4682_v7 = vrot.slane %v4680_v11, 7  ;;  %v14521_v54 = vpop.f32.mrf.mxu1  ;;  %v4392_v29 = vld [vmem:[#allocation2 + $0xc4] sm:$0xf]  ;;  %12929 = vmatpush3.bf16.msra.mxu0 %v13360_v51 }
 0x1d9   :  { %12801 = vmatmul.mubr.bf16.gmra.mxu0 %v11640_v16  ;;  %v3321_v28 = vsel %vm14360_vm5, %v3316_v14, %v3320_v2  ;;  %v3333_v30 = vshrl.u32 %v2981_v24, 16  ;;  %v3336_v19 = vshll.u32 %v2981_v24, 16  ;;  %v3326_v43 = vrot.slane %v3325_v9, 4  ;;  %v14526_v62 = vpop.f32.mrf.mxu0  ;;  %v4393_v16 = vld [vmem:[#allocation2 + $0xc8] sm:$0xf] }
 0x1da   :  { %v4691_v21 = vrot.slane %v4689_v1, 7  ;;  %v3342_v31 = vshll.u32 %v2982_v5, 16  ;;  %v3346_v45 = vshrl.u32 %v2982_v5, 16  ;;  %17850 = vst [vmem:[#allocation10_spill] sm:$0xff] %v14526_v62  ;;  %v4685_v39 = vor.u32 %v4683_v4, %v4682_v7  ;;  %v14528_v55 = vpop.f32.mrf.mxu1  ;;  %v2984_v4 = vld [vmem:[#allocation2 + $0xd4] sm:$0xf] }
 0x1db   :  { %v4687_v38 = vrot.slane %v4682_v7, 4  ;;  %v3335_v17 = vrot.slane %v3333_v30, 4  ;;  %v3338_v61 = vrot.slane %v3336_v19, 5  ;;  %17851 = vst [vmem:[#allocation11_spill] sm:$0xff] %v14528_v55  ;;  %v3331_v12 = vsel %vm14360_vm5, %v3326_v43, %v3330_v63  ;;  %v2985_v43 = vld [vmem:[#allocation2 + $0xd8] sm:$0xf] }
 0x1dc   :  { %v4694_v2 = vor.u32 %v4692_v37, %v4691_v21  ;;  %v3344_v35 = vrot.slane %v3342_v31, 5  ;;  %v3348_v48 = vrot.slane %v3346_v45, 4  ;;  %v11554_v22 = vcombine.low %v3321_v28, %v3331_v12  ;;  %v13361_v55 = vld [vmem:[%s17831_s2 + $0x170] sm:$0xff]  }
 0x1dd   :  { %v4686_v32 = vsel %vm13824_vm2, %v11593_v0, %v4685_v39  ;;  %v3339_v56 = vor.u32 %v3338_v61, %v3335_v17  ;;  %v3352_v24 = vshll.u32 %v2983_v41, 16  ;;  %v4697_v5 = vshrl.u32 %v4391_v26, 16  ;;  %v14536_v1 = vpop.f32.mrf.mxu0  ;;  %v2986_v26 = vld [vmem:[#allocation2 + $0xdc] sm:$0x1]  ;;  %12930 = vmatprep.subr.bf16.mxu0 %v13361_v55 }
 0x1de   :  { %v4695_v14 = vsel %vm13824_vm2, %v4687_v38, %v4694_v2  ;;  %v3349_v11 = vor.u32 %v3348_v48, %v3344_v35  ;;  %v4702_v9 = vshrl.u32 %v4392_v29, 16  ;;  %12725 = vmatmul.mubr.bf16.gmra.mxu1 %v11554_v22  ;;  %v4705_v28 = vshll.u32 %v4392_v29, 16  ;;  %v14538_v30 = vpop.f32.mrf.mxu1  ;;  %v4394_v48 = vld [vmem:[#allocation2 + $0xd0] sm:$0x8]  ;;  %v4395_v22 = vld [vmem:[#allocation2 + $0xd4] sm:$0xf]  ;;  %12931 = vmatpush3.bf16.msra.mxu0 %v13361_v55 }
 0x1df   :  { %v11641_v63 = vcombine.low %v4686_v32, %v4695_v14  ;;  %v3340_v37 = vrot.slane %v3339_v56, 4  ;;  %v3354_v7 = vrot.slane %v3352_v24, 5  ;;  %v11594_v19 = vrot.slane %v4697_v5, 11  ;;  %v14540_v21 = vpop.f32.mrf.mxu0 }
 0x1e0   :  { %v3350_v0 = vrot.slane %v3349_v11, 4  ;;  %v4704_v41 = vrot.slane %v4702_v9, 7  ;;  %v4711_v51 = vshrl.u32 %v4393_v16, 16  ;;  %v4714_v45 = vshll.u32 %v4393_v16, 16  ;;  %v14544_v17 = vpop.f32.mrf.mxu1 }
 0x1e1   :  { %12804 = vmatprep.mubr.bf16.mxu0 %v11641_v63  ;;  %v3345_v31 = vsel %vm14360_vm5, %v3340_v37, %v3344_v35  ;;  %v3357_v39 = vshrl.u32 %v2984_v4, 16  ;;  %v3360_v38 = vshll.u32 %v2984_v4, 16  ;;  %v14548_v32 = vpop.f32.mrf.mxu0  ;;  %v3366_v35 = vshll.u32 %v2985_v43, 16  ;;  %v2987_v63 = vld [vmem:[#allocation2 + $0xe4] sm:$0xf] }
 0x1e2   :  { %v3355_v61 = vsel %vm14360_vm5, %v3350_v0, %v3354_v7  ;;  %v4707_v29 = vor.u32 %v4705_v28, %v4704_v41  ;;  %v4709_v12 = vrot.slane %v4704_v41, 4  ;;  %v4713_v2 = vrot.slane %v4711_v51, 7  ;;  %v14550_v16 = vpop.f32.mrf.mxu1  ;;  %v4396_v0 = vld [vmem:[#allocation2 + $0xd8] sm:$0xf] }
 0x1e3   :  { %v11555_v56 = vcombine.low %v3345_v31, %v3355_v61  ;;  %v3359_v24 = vrot.slane %v3357_v39, 4  ;;  %v3362_v14 = vrot.slane %v3360_v38, 5  ;;  %v3370_v9 = vshrl.u32 %v2985_v43, 16  ;;  %v14554_v37 = vpop.f32.mrf.mxu0 }
 0x1e4   :  { %v4708_v11 = vsel %vm13824_vm2, %v11594_v19, %v4707_v29  ;;  %v4716_v5 = vor.u32 %v4714_v45, %v4713_v2  ;;  %v3376_v4 = vshll.u32 %v2986_v26, 16  ;;  %17852 = vst [vmem:[#allocation12_spill] sm:$0xff] %v14554_v37  ;;  %v3368_v28 = vrot.slane %v3366_v35, 5  ;;  %v14556_v31 = vpop.f32.mrf.mxu1  ;;  %v2988_v2 = vld [vmem:[#allocation2 + $0xe8] sm:$0xf] }
 0x1e5   :  { %12728 = vmatprep.mubr.bf16.mxu1 %v11555_v56  ;;  %v3363_v7 = vor.u32 %v3362_v14, %v3359_v24  ;;  %v4719_v41 = vshrl.u32 %v4394_v48, 16  ;;  %v4724_v51 = vshrl.u32 %v4395_v22, 16  ;;  %17853 = vst [vmem:[#allocation13_spill] sm:$0xff] %v14556_v31  ;;  %v3372_v38 = vrot.slane %v3370_v9, 4  ;;  %v2989_v14 = vld [vmem:[#allocation2 + $0xec] sm:$0x1] }
 0x1e6   :  { %v4717_v39 = vsel %vm13824_vm2, %v4709_v12, %v4716_v5  ;;  %v3378_v61 = vrot.slane %v3376_v4, 5  ;;  %v4727_v19 = vshll.u32 %v4395_v22, 16  ;;  %v4733_v56 = vshrl.u32 %v4396_v0, 16  ;;  %v4397_v9 = vld [vmem:[#allocation2 + $0xe0] sm:$0x8] }
 0x1e7   :  { %v11642_v45 = vcombine.low %v4708_v11, %v4717_v39  ;;  %v3364_v43 = vrot.slane %v3363_v7, 4  ;;  %v11595_v26 = vrot.slane %v4719_v41, 11  ;;  %v4726_v29 = vrot.slane %v4724_v51, 7  ;;  %v14560_v48 = vpop.f32.mrf.mxu0  ;;  %v13362_v7 = vld [vmem:[%s17831_s2 + $0x100] sm:$0xff]   ;;  %v4401_v31 = vld [vmem:[#allocation2 + $0xf4] sm:$0xf] }
 0x1e8   :  { %v3373_v37 = vor.u32 %v3372_v38, %v3368_v28  ;;  %v4736_v24 = vshll.u32 %v4396_v0, 16  ;;  %v3381_v35 = vshrl.u32 %v2987_v63, 16  ;;  %v3384_v5 = vshll.u32 %v2987_v63, 16  ;;  %v14567_v4 = vpop.f32.mrf.mxu1  ;;  %v13363_v0 = vld [vmem:[%s17831_s2 + $0x168] sm:$0xff]   ;;  %12862 = vmatprep.subr.bf16.mxu1 %v13362_v7 }
 0x1e9   :  { %12805 = vmatmul.mubr.bf16.gmra.mxu0 %v11642_v45  ;;  %v3369_v12 = vsel %vm14360_vm5, %v3364_v43, %v3368_v28  ;;  %v4729_v22 = vor.u32 %v4727_v19, %v4726_v29  ;;  %v4731_v11 = vrot.slane %v4726_v29, 4  ;;  %v4735_v51 = vrot.slane %v4733_v56, 7  ;;  %v14575_v45 = vpop.f32.mrf.mxu0  ;;  %v4398_v29 = vld [vmem:[#allocation2 + $0xe4] sm:$0xf]  ;;  %12932 = vmatprep.subr.bf16.mxu0 %v13363_v0 }
 0x1ea   :  { %v3374_v41 = vrot.slane %v3373_v37, 4  ;;  %v3383_v39 = vrot.slane %v3381_v35, 4  ;;  %v3390_v38 = vshll.u32 %v2988_v2, 16  ;;  %v3386_v28 = vrot.slane %v3384_v5, 5  ;;  %v14579_v62 = vpop.f32.mrf.mxu1  ;;  %12863 = vmatpush3.bf16.msra.mxu1 %v13362_v7  ;;  %v2990_v5 = vld [vmem:[#allocation2 + $0xf4] sm:$0xf]  ;;  %12933 = vmatpush3.bf16.msra.mxu0 %v13363_v0 }
 0x1eb   :  { %v4730_v63 = vsel %vm13824_vm2, %v11595_v26, %v4729_v22  ;;  %v3394_v19 = vshrl.u32 %v2988_v2, 16  ;;  %v3400_v43 = vshll.u32 %v2989_v14, 16  ;;  %17854 = vst [vmem:[#allocation14_spill] sm:$0xff] %v14579_v62  ;;  %v4738_v56 = vor.u32 %v4736_v24, %v4735_v51  ;;  %v14583_v40 = vpop.f32.mrf.mxu0  ;;  %v2993_v62 = vld [vmem:[#allocation2 + $0x124] sm:$0xf] }
 0x1ec   :  { %v3379_v37 = vsel %vm14360_vm5, %v3374_v41, %v3378_v61  ;;  %v3392_v35 = vrot.slane %v3390_v38, 5  ;;  %v4741_v34 = vshrl.u32 %v4397_v9, 16  ;;  %v3387_v22 = vor.u32 %v3386_v28, %v3383_v39  ;;  %v14585_v49 = vpop.f32.mrf.mxu1  ;;  %v2991_v41 = vld [vmem:[#allocation2 + $0xf8] sm:$0xf] }
 0x1ed   :  { %v11556_v26 = vcombine.low %v3369_v12, %v3379_v37  ;;  %v3396_v2 = vrot.slane %v3394_v19, 4  ;;  %v3402_v14 = vrot.slane %v3400_v43, 5  ;;  %17855 = vst [vmem:[#allocation15_spill] sm:$0xff] %v14585_v49  ;;  %v4739_v55 = vsel %vm13824_vm2, %v4731_v11, %v4738_v56  ;;  %v14589_v51 = vpop.f32.mrf.mxu0  ;;  %v2992_v56 = vld [vmem:[#allocation2 + $0xfc] sm:$0x1] }
 0x1ee   :  { %v11596_v20 = vrot.slane %v4741_v34, 11  ;;  %v4746_v61 = vshrl.u32 %v4398_v29, 16  ;;  %v4749_v24 = vshll.u32 %v4398_v29, 16  ;;  %17856 = vst [vmem:[#allocation16_spill] sm:$0xff] %v14589_v51  ;;  %v11643_v9 = vcombine.low %v4730_v63, %v4739_v55  ;;  %v14591_v39 = vpop.f32.mrf.mxu1  ;;  %v4400_v51 = vld [vmem:[#allocation2 + $0xf0] sm:$0x8] }
 0x1ef   :  { %12729 = vmatmul.mubr.bf16.gmra.mxu1 %v11556_v26  ;;  %v3388_v38 = vrot.slane %v3387_v22, 4  ;;  %v3397_v7 = vor.u32 %v3396_v2, %v3392_v35  ;;  %v4755_v12 = vshrl.u32 %v4399_v59, 16  ;;  %17857 = vst [vmem:[#allocation17_spill] sm:$0xff] %v14591_v39  ;;  %v4758_v19 = vshll.u32 %v4399_v59, 16 }
 0x1f0   :  { %v4748_v28 = vrot.slane %v4746_v61, 7  ;;  %v3405_v43 = vshrl.u32 %v2990_v5, 16  ;;  %v3408_v37 = vshll.u32 %v2990_v5, 16  ;;  %12808 = vmatprep.mubr.bf16.mxu0 %v11643_v9  ;;  %v3414_v26 = vshll.u32 %v2991_v41, 16 }
 0x1f1   :  { %v3393_v34 = vsel %vm14360_vm5, %v3388_v38, %v3392_v35  ;;  %v3398_v11 = vrot.slane %v3397_v7, 4  ;;  %v4757_v29 = vrot.slane %v4755_v12, 7  ;;  %v14595_v39 = vpop.f32.mrf.mxu0  ;;  %v14597_v0 = vpop.f32.mrf.mxu1  ;;  %v3418_v9 = vshrl.u32 %v2991_v41, 16  ;;  %v4402_v12 = vld [vmem:[#allocation2 + $0xf8] sm:$0xf] }
 0x1f2   :  { %v4751_v63 = vor.u32 %v4749_v24, %v4748_v28  ;;  %v4753_v22 = vrot.slane %v4748_v28, 4  ;;  %v3407_v2 = vrot.slane %v3405_v43, 4  ;;  %v3410_v55 = vrot.slane %v3408_v37, 5  ;;  %17858 = vst [vmem:[#allocation18_spill] sm:$0xff] %v14595_v39  ;;  %17859 = vst [vmem:[#allocation19_spill] sm:$0xff] %v14597_v0 }
 0x1f3   :  { %v3403_v59 = vsel %vm14360_vm5, %v3398_v11, %v3402_v14  ;;  %v4760_v5 = vor.u32 %v4758_v19, %v4757_v29  ;;  %v3416_v61 = vrot.slane %v3414_v26, 5  ;;  %v3424_v24 = vshll.u32 %v2992_v56, 16  ;;  %v14603_v28 = vpop.f32.mrf.mxu0  ;;  %v14607_v11 = vpop.f32.mrf.mxu1 }
 0x1f4   :  { %v11557_v35 = vcombine.low %v3393_v34, %v3403_v59  ;;  %v4752_v38 = vsel %vm13824_vm2, %v11596_v20, %v4751_v63  ;;  %v3411_v7 = vor.u32 %v3410_v55, %v3407_v2  ;;  %17860 = vst [vmem:[#allocation20_spill] sm:$0xff] %v14603_v28  ;;  %v3420_v37 = vrot.slane %v3418_v9, 4  ;;  %17861 = vst [vmem:[#allocation21_spill] sm:$0xff] %v14607_v11  ;;  %v13364_v20 = vld [vmem:[%s17831_s2 + $0x160] sm:$0xff]   ;;  %v2995_v59 = vld [vmem:[#allocation2 + $0x12c] sm:$0x1] }
 0x1f5   :  { %v4761_v43 = vsel %vm13824_vm2, %v4753_v22, %v4760_v5  ;;  %v4763_v0 = vshrl.u32 %v4400_v51, 16  ;;  %v4768_v49 = vshrl.u32 %v4401_v31, 16  ;;  %v3426_v41 = vrot.slane %v3424_v24, 5  ;;  %v2994_v22 = vld [vmem:[#allocation2 + $0x128] sm:$0xf]  ;;  %v14612_v2 = vpop.f32.mrf.mxu0  ;;  %12934 = vmatprep.subr.bf16.mxu0 %v13364_v20  ;;  %v14616_v9 = vpop.f32.mrf.mxu1 }
 0x1f6   :  { %12732 = vmatprep.mubr.bf16.mxu1 %v11557_v35  ;;  %v11644_v14 = vcombine.low %v4752_v38, %v4761_v43  ;;  %v3412_v19 = vrot.slane %v3411_v7, 4  ;;  %v4771_v34 = vshll.u32 %v4401_v31, 16  ;;  %v3421_v29 = vor.u32 %v3420_v37, %v3416_v61  ;;  %17862 = vst [vmem:[#allocation22_spill] sm:$0xff] %v14612_v2  ;;  %17863 = vst [vmem:[#allocation23_spill] sm:$0xff] %v14616_v9  ;;  %v4403_v11 = vld [vmem:[#allocation2 + $0x100] sm:$0x8] }
 0x1f7   :  { %v11597_v56 = vrot.slane %v4763_v0, 11  ;;  %v4770_v26 = vrot.slane %v4768_v49, 7  ;;  %v4777_v63 = vshrl.u32 %v4402_v12, 16  ;;  %v4780_v55 = vshll.u32 %v4402_v12, 16  ;;  %v4404_v49 = vld [vmem:[#allocation2 + $0x104] sm:$0xf]  ;;  %12935 = vmatpush3.bf16.msra.mxu0 %v13364_v20  ;;  %v14622_v9 = vpop.f32.mrf.mxu0 }
 0x1f8   :  { %12809 = vmatmul.mubr.bf16.gmra.mxu0 %v11644_v14  ;;  %v3417_v51 = vsel %vm14360_vm5, %v3412_v19, %v3416_v61  ;;  %v3429_v31 = vshrl.u32 %v2993_v62, 16  ;;  %v3432_v5 = vshll.u32 %v2993_v62, 16  ;;  %v3422_v35 = vrot.slane %v3421_v29, 4  ;;  %17864 = vst [vmem:[#allocation24_spill] sm:$0xff] %v14622_v9  ;;  %v13365_v20 = vld [vmem:[%s17831_s2 + $0x158] sm:$0xff]  }
 0x1f9   :  { %v4773_v38 = vor.u32 %v4771_v34, %v4770_v26  ;;  %v4775_v7 = vrot.slane %v4770_v26, 4  ;;  %v4779_v0 = vrot.slane %v4777_v63, 7  ;;  %v3438_v37 = vshll.u32 %v2994_v22, 16  ;;  %v14624_v34 = vpop.f32.mrf.mxu1  ;;  %12936 = vmatprep.subr.bf16.mxu0 %v13365_v20  ;;  %v2997_v9 = vld [vmem:[#allocation2 + $0x138] sm:$0xf] }
 0x1fa   :  { %v3431_v24 = vrot.slane %v3429_v31, 4  ;;  %v3434_v43 = vrot.slane %v3432_v5, 5  ;;  %v3442_v14 = vshrl.u32 %v2994_v22, 16  ;;  %v3427_v61 = vsel %vm14360_vm5, %v3422_v35, %v3426_v41  ;;  %17865 = vst [vmem:[#allocation25_spill] sm:$0xff] %v14624_v34  ;;  %v4405_v31 = vld [vmem:[#allocation2 + $0x108] sm:$0xf] }
 0x1fb   :  { %v4774_v62 = vsel %vm13824_vm2, %v11597_v56, %v4773_v38  ;;  %v4782_v12 = vor.u32 %v4780_v55, %v4779_v0  ;;  %v3448_v19 = vshll.u32 %v2995_v59, 16  ;;  %v11558_v29 = vcombine.low %v3417_v51, %v3427_v61  ;;  %v2996_v59 = vld [vmem:[#allocation2 + $0x134] sm:$0xf]  ;;  %12937 = vmatpush3.bf16.msra.mxu0 %v13365_v20  ;;  %v14631_v61 = vpop.f32.mrf.mxu0 }
 0x1fc   :  { %v3435_v26 = vor.u32 %v3434_v43, %v3431_v24  ;;  %v3440_v63 = vrot.slane %v3438_v37, 5  ;;  %v3444_v22 = vrot.slane %v3442_v14, 4  ;;  %v4785_v56 = vshrl.u32 %v4403_v11, 16  ;;  %v2998_v14 = vld [vmem:[#allocation2 + $0x13c] sm:$0x1]  ;;  %17866 = vst [vmem:[#allocation26_spill] sm:$0xff] %v14631_v61 }
 0x1fd   :  { %v4783_v41 = vsel %vm13824_vm2, %v4775_v7, %v4782_v12  ;;  %v3450_v5 = vrot.slane %v3448_v19, 5  ;;  %v4790_v55 = vshrl.u32 %v4404_v49, 16  ;;  %12733 = vmatmul.mubr.bf16.gmra.mxu1 %v11558_v29  ;;  %v4793_v34 = vshll.u32 %v4404_v49, 16  ;;  %v14633_v7 = vpop.f32.mrf.mxu1  ;;  %v4406_v29 = vld [vmem:[#allocation2 + $0x130] sm:$0x8] }
 0x1fe   :  { %v11645_v35 = vcombine.low %v4774_v62, %v4783_v41  ;;  %v3436_v38 = vrot.slane %v3435_v26, 4  ;;  %v3445_v0 = vor.u32 %v3444_v22, %v3440_v63  ;;  %v11598_v51 = vrot.slane %v4785_v56, 11  ;;  %17867 = vst [vmem:[#allocation27_spill] sm:$0xff] %v14633_v7  ;;  %v4407_v41 = vld [vmem:[#allocation2 + $0x134] sm:$0xf] }
 0x1ff   :  { %v4792_v24 = vrot.slane %v4790_v55, 7  ;;  %v4799_v43 = vshrl.u32 %v4405_v31, 16  ;;  %v4802_v37 = vshll.u32 %v4405_v31, 16  ;;  %v3453_v62 = vshrl.u32 %v2996_v59, 16  ;;  %v4408_v7 = vld [vmem:[#allocation2 + $0x138] sm:$0xf] }
 0x200   :  { %12812 = vmatprep.mubr.bf16.mxu0 %v11645_v35  ;;  %v3441_v11 = vsel %vm14360_vm5, %v3436_v38, %v3440_v63  ;;  %v3446_v12 = vrot.slane %v3445_v0, 4  ;;  %v3456_v19 = vshll.u32 %v2996_v59, 16  ;;  %v3462_v22 = vshll.u32 %v2997_v9, 16  ;;  %v14641_v59 = vpop.f32.mrf.mxu0  ;;  %v3002_v2 = vld [vmem:[#allocation2 + $0x154] sm:$0xf] }
 0x201   :  { %v4795_v49 = vor.u32 %v4793_v34, %v4792_v24  ;;  %v4797_v26 = vrot.slane %v4792_v24, 4  ;;  %v4801_v20 = vrot.slane %v4799_v43, 7  ;;  %v3455_v56 = vrot.slane %v3453_v62, 4  ;;  %17868 = vst [vmem:[#allocation28_spill] sm:$0xff] %v14641_v59  ;;  %v14643_v34 = vpop.f32.mrf.mxu1  ;;  %v13367_v24 = vld [vmem:[%s17831_s2 + $0x150] sm:$0xff]  }
 0x202   :  { %v3451_v31 = vsel %vm14360_vm5, %v3446_v12, %v3450_v5  ;;  %v3458_v55 = vrot.slane %v3456_v19, 5  ;;  %v3466_v61 = vshrl.u32 %v2997_v9, 16  ;;  %v3464_v0 = vrot.slane %v3462_v22, 5  ;;  %17869 = vst [vmem:[#allocation29_spill] sm:$0xff] %v14643_v34  ;;  %v2999_v19 = vld [vmem:[#allocation2 + $0x144] sm:$0xf]  ;;  %12938 = vmatprep.subr.bf16.mxu0 %v13367_v24 }
 0x203   :  { %v11559_v35 = vcombine.low %v3441_v11, %v3451_v31  ;;  %v4796_v63 = vsel %vm13824_vm2, %v11598_v51, %v4795_v49  ;;  %v4804_v38 = vor.u32 %v4802_v37, %v4801_v20  ;;  %v3472_v12 = vshll.u32 %v2998_v14, 16  ;;  %v14650_v49 = vpop.f32.mrf.mxu0  ;;  %v14652_v20 = vpop.f32.mrf.mxu1  ;;  %12939 = vmatpush3.bf16.msra.mxu0 %v13367_v24 }
 0x204   :  { %v3459_v43 = vor.u32 %v3458_v55, %v3455_v56  ;;  %v3468_v5 = vrot.slane %v3466_v61, 4  ;;  %v4807_v62 = vshrl.u32 %v4406_v29, 16  ;;  %v4812_v11 = vshrl.u32 %v4407_v41, 16  ;;  %17870 = vst [vmem:[#allocation30_spill] sm:$0xff] %v14650_v49  ;;  %17871 = vst [vmem:[#allocation31_spill] sm:$0xff] %v14652_v20 }
 0x205   :  { %12736 = vmatprep.mubr.bf16.mxu1 %v11559_v35  ;;  %v4805_v9 = vsel %vm13824_vm2, %v4797_v26, %v4804_v38  ;;  %v4815_v51 = vshll.u32 %v4407_v41, 16  ;;  %v4821_v37 = vshrl.u32 %v4408_v7, 16  ;;  %v3474_v56 = vrot.slane %v3472_v12, 5  ;;  %v3000_v61 = vld [vmem:[#allocation2 + $0x148] sm:$0xf]  ;;  %v14654_v26 = vpop.f32.mrf.mxu0  ;;  %v14656_v41 = vpop.f32.mrf.mxu1 }
 0x206   :  { %v11646_v22 = vcombine.low %v4796_v63, %v4805_v9  ;;  %v3460_v31 = vrot.slane %v3459_v43, 4  ;;  %v3469_v34 = vor.u32 %v3468_v5, %v3464_v0  ;;  %v11599_v14 = vrot.slane %v4807_v62, 11  ;;  %17872 = vst [vmem:[#allocation32_spill] sm:$0xff] %v14654_v26  ;;  %17873 = vst [vmem:[#allocation33_spill] sm:$0xff] %v14656_v41  ;;  %v13368_v38 = vld [vmem:[%s17831_s2 + $0x148] sm:$0xff]   ;;  %v13369_v63 = vld [vmem:[%s17831_s2 + $0x1b8] sm:$0xff]  }
 0x207   :  { %v4814_v29 = vrot.slane %v4812_v11, 7  ;;  %v4823_v55 = vrot.slane %v4821_v37, 7  ;;  %v4824_v35 = vshll.u32 %v4408_v7, 16  ;;  %v3477_v5 = vshrl.u32 %v2999_v19, 16  ;;  %v3001_v11 = vld [vmem:[#allocation2 + $0x14c] sm:$0x1]  ;;  %v14666_v26 = vpop.f32.mrf.mxu0  ;;  %12940 = vmatprep.subr.bf16.mxu0 %v13368_v38  ;;  %13008 = vmatprep.subr.bf16.mxu1 %v13369_v63  ;;  %v14668_v20 = vpop.f32.mrf.mxu1 }
 0x208   :  { %12813 = vmatmul.mubr.bf16.gmra.mxu0 %v11646_v22  ;;  %v3465_v24 = vsel %vm14360_vm5, %v3460_v31, %v3464_v0  ;;  %v3470_v43 = vrot.slane %v3469_v34, 4  ;;  %v3480_v12 = vshll.u32 %v2999_v19, 16  ;;  %v3486_v37 = vshll.u32 %v3000_v61, 16  ;;  %v4409_v41 = vld [vmem:[#allocation2 + $0x140] sm:$0x8]  ;;  %17874 = vst [vmem:[#allocation34_spill] sm:$0xff] %v14666_v26 }
 0x209   :  { %v4817_v7 = vor.u32 %v4815_v51, %v4814_v29  ;;  %v4819_v62 = vrot.slane %v4814_v29, 4  ;;  %v4826_v9 = vor.u32 %v4824_v35, %v4823_v55  ;;  %17875 = vst [vmem:[#allocation35_spill] sm:$0xff] %v14668_v20  ;;  %v3479_v49 = vrot.slane %v3477_v5, 4  ;;  %v4410_v31 = vld [vmem:[#allocation2 + $0x144] sm:$0xf]  ;;  %12941 = vmatpush3.bf16.msra.mxu0 %v13368_v38  ;;  %v14676_v5 = vpop.f32.mrf.mxu0  ;;  %v14678_v38 = vpop.f32.mrf.mxu1 }
 0x20a   :  { %v3475_v22 = vsel %vm14360_vm5, %v3470_v43, %v3474_v56  ;;  %v3482_v0 = vrot.slane %v3480_v12, 5  ;;  %v3490_v34 = vshrl.u32 %v3000_v61, 16  ;;  %v3488_v55 = vrot.slane %v3486_v37, 5  ;;  %v4411_v35 = vld [vmem:[#allocation2 + $0x148] sm:$0xf]  ;;  %17876 = vst [vmem:[#allocation36_spill] sm:$0xff] %v14676_v5 }
 0x20b   :  { %v11560_v51 = vcombine.low %v3465_v24, %v3475_v22  ;;  %v4818_v19 = vsel %vm13824_vm2, %v11599_v14, %v4817_v7  ;;  %v4827_v29 = vsel %vm13824_vm2, %v4819_v62, %v4826_v9  ;;  %v3496_v59 = vshll.u32 %v3001_v11, 16  ;;  %17877 = vst [vmem:[#allocation37_spill] sm:$0xff] %v14678_v38  ;;  %v13372_v14 = vld [vmem:[%s17831_s2 + $0x140] sm:$0xff]   ;;  %v3003_v62 = vld [vmem:[#allocation2 + $0x158] sm:$0xf]  ;;  %v14683_v22 = vpop.f32.mrf.mxu0 }
 0x20c   :  { %v11647_v63 = vcombine.low %v4818_v19, %v4827_v29  ;;  %v3483_v26 = vor.u32 %v3482_v0, %v3479_v49  ;;  %v3492_v20 = vrot.slane %v3490_v34, 4  ;;  %v4829_v56 = vshrl.u32 %v4409_v41, 16  ;;  %17878 = vst [vmem:[#allocation38_spill] sm:$0xff] %v14683_v22  ;;  %12942 = vmatprep.subr.bf16.mxu0 %v13372_v14  ;;  %v14685_v0 = vpop.f32.mrf.mxu1  ;;  %v3004_v19 = vld [vmem:[#allocation2 + $0x15c] sm:$0x1] }
 0x20d   :  { %12737 = vmatmul.mubr.bf16.gmra.mxu1 %v11560_v51  ;;  %v4834_v43 = vshrl.u32 %v4410_v31, 16  ;;  %v4837_v61 = vshll.u32 %v4410_v31, 16  ;;  %v3498_v7 = vrot.slane %v3496_v59, 5  ;;  %v4843_v49 = vshrl.u32 %v4411_v35, 16  ;;  %17879 = vst [vmem:[#allocation39_spill] sm:$0xff] %v14685_v0  ;;  %12943 = vmatpush3.bf16.msra.mxu0 %v13372_v14 }
 0x20e   :  { %12816 = vmatprep.mubr.bf16.mxu0 %v11647_v63  ;;  %v3484_v24 = vrot.slane %v3483_v26, 4  ;;  %v3493_v12 = vor.u32 %v3492_v20, %v3488_v55  ;;  %v11600_v9 = vrot.slane %v4829_v56, 11  ;;  %v4846_v37 = vshll.u32 %v4411_v35, 16  ;;  %v4412_v56 = vld [vmem:[#allocation2 + $0x150] sm:$0x8]  ;;  %v14689_v35 = vpop.f32.mrf.mxu0 }
 0x20f   :  { %v4836_v11 = vrot.slane %v4834_v43, 7  ;;  %v3501_v41 = vshrl.u32 %v3002_v2, 16  ;;  %v4845_v51 = vrot.slane %v4843_v49, 7  ;;  %v3504_v26 = vshll.u32 %v3002_v2, 16  ;;  %17880 = vst [vmem:[#allocation40_spill] sm:$0xff] %v14689_v35  ;;  %v14691_v43 = vpop.f32.mrf.mxu1 }
 0x210   :  { %v3489_v34 = vsel %vm14360_vm5, %v3484_v24, %v3488_v55  ;;  %v3494_v31 = vrot.slane %v3493_v12, 4  ;;  %v3510_v63 = vshll.u32 %v3003_v62, 16  ;;  %17881 = vst [vmem:[#allocation41_spill] sm:$0xff] %v14691_v43  ;;  %v3514_v55 = vshrl.u32 %v3003_v62, 16  ;;  %v4413_v24 = vld [vmem:[#allocation2 + $0x154] sm:$0xf] }
 0x211   :  { %v4839_v59 = vor.u32 %v4837_v61, %v4836_v11  ;;  %v4841_v20 = vrot.slane %v4836_v11, 4  ;;  %v3503_v29 = vrot.slane %v3501_v41, 4  ;;  %v4848_v38 = vor.u32 %v4846_v37, %v4845_v51  ;;  %v4414_v49 = vld [vmem:[#allocation2 + $0x158] sm:$0xf]  ;;  %v14697_v11 = vpop.f32.mrf.mxu0  ;;  %v14699_v41 = vpop.f32.mrf.mxu1 }
 0x212   :  { %v3499_v0 = vsel %vm14360_vm5, %v3494_v31, %v3498_v7  ;;  %v3506_v22 = vrot.slane %v3504_v26, 5  ;;  %v3512_v61 = vrot.slane %v3510_v63, 5  ;;  %v3520_v14 = vshll.u32 %v3004_v19, 16  ;;  %17882 = vst [vmem:[#allocation42_spill] sm:$0xff] %v14697_v11  ;;  %17883 = vst [vmem:[#allocation43_spill] sm:$0xff] %v14699_v41 }
 0x213   :  { %v11561_v12 = vcombine.low %v3489_v34, %v3499_v0  ;;  %v4840_v2 = vsel %vm13824_vm2, %v11600_v9, %v4839_v59  ;;  %v4849_v43 = vsel %vm13824_vm2, %v4841_v20, %v4848_v38  ;;  %v3516_v7 = vrot.slane %v3514_v55, 4  ;;  %v3005_v31 = vld [vmem:[#allocation2 + $0x164] sm:$0xf]  ;;  %v3006_v59 = vld [vmem:[#allocation2 + $0x168] sm:$0xf]  ;;  %v14703_v63 = vpop.f32.mrf.mxu0  ;;  %v14705_v11 = vpop.f32.mrf.mxu1 }
 0x214   :  { %v3507_v35 = vor.u32 %v3506_v22, %v3503_v29  ;;  %v4851_v37 = vshrl.u32 %v4412_v56, 16  ;;  %v11648_v62 = vcombine.low %v4840_v2, %v4849_v43  ;;  %v3522_v0 = vrot.slane %v3520_v14, 5  ;;  %17884 = vst [vmem:[#allocation44_spill] sm:$0xff] %v14703_v63  ;;  %17885 = vst [vmem:[#allocation45_spill] sm:$0xff] %v14705_v11  ;;  %v3007_v55 = vld [vmem:[#allocation2 + $0x16c] sm:$0x1] }
 0x215   :  { %12740 = vmatprep.mubr.bf16.mxu1 %v11561_v12  ;;  %v4856_v34 = vshrl.u32 %v4413_v24, 16  ;;  %v3517_v9 = vor.u32 %v3516_v7, %v3512_v61  ;;  %v4859_v26 = vshll.u32 %v4413_v24, 16  ;;  %v4865_v19 = vshrl.u32 %v4414_v49, 16  ;;  %v14709_v12 = vpop.f32.mrf.mxu0  ;;  %v14711_v24 = vpop.f32.mrf.mxu1 }
 0x216   :  { %v3508_v51 = vrot.slane %v3507_v35, 4  ;;  %12817 = vmatmul.mubr.bf16.gmra.mxu0 %v11648_v62  ;;  %v11601_v41 = vrot.slane %v4851_v37, 11  ;;  %v4868_v22 = vshll.u32 %v4414_v49, 16  ;;  %v3525_v20 = vshrl.u32 %v3005_v31, 16  ;;  %17886 = vst [vmem:[#allocation46_spill] sm:$0xff] %v14709_v12  ;;  %17887 = vst [vmem:[#allocation47_spill] sm:$0xff] %v14711_v24 }
 0x217   :  { %v4858_v38 = vrot.slane %v4856_v34, 7  ;;  %v3518_v56 = vrot.slane %v3517_v9, 4  ;;  %v4867_v43 = vrot.slane %v4865_v19, 7  ;;  %v3528_v35 = vshll.u32 %v3005_v31, 16  ;;  %v14715_v63 = vpop.f32.mrf.mxu0  ;;  %v4415_v19 = vld [vmem:[#allocation2 + $0x160] sm:$0x8] }
 0x218   :  { %v3513_v29 = vsel %vm14360_vm5, %v3508_v51, %v3512_v61  ;;  %v3527_v7 = vrot.slane %v3525_v20, 4  ;;  %v3534_v11 = vshll.u32 %v3006_v59, 16  ;;  %v3538_v34 = vshrl.u32 %v3006_v59, 16  ;;  %17888 = vst [vmem:[#allocation48_spill] sm:$0xff] %v14715_v63  ;;  %v14717_v61 = vpop.f32.mrf.mxu1  ;;  %v4416_v12 = vld [vmem:[#allocation2 + $0x164] sm:$0xf] }
 0x219   :  { %v4861_v2 = vor.u32 %v4859_v26, %v4858_v38  ;;  %v4863_v14 = vrot.slane %v4858_v38, 4  ;;  %v3523_v37 = vsel %vm14360_vm5, %v3518_v56, %v3522_v0  ;;  %v4870_v49 = vor.u32 %v4868_v22, %v4867_v43  ;;  %17889 = vst [vmem:[#allocation49_spill] sm:$0xff] %v14717_v61  ;;  %v4417_v22 = vld [vmem:[#allocation2 + $0x168] sm:$0xf]  ;;  %v3008_v56 = vld [vmem:[#allocation2 + $0x174] sm:$0xf]  ;;  %v14723_v59 = vpop.f32.mrf.mxu0 }
 0x21a   :  { %v3530_v62 = vrot.slane %v3528_v35, 5  ;;  %v11562_v51 = vcombine.low %v3513_v29, %v3523_v37  ;;  %v3536_v31 = vrot.slane %v3534_v11, 5  ;;  %v3544_v9 = vshll.u32 %v3007_v55, 16  ;;  %17890 = vst [vmem:[#allocation50_spill] sm:$0xff] %v14723_v59  ;;  %v14725_v43 = vpop.f32.mrf.mxu1  ;;  %v3009_v63 = vld [vmem:[#allocation2 + $0x178] sm:$0xf] }
 0x21b   :  { %v4862_v26 = vsel %vm13824_vm2, %v11601_v41, %v4861_v2  ;;  %v4871_v38 = vsel %vm13824_vm2, %v4863_v14, %v4870_v49  ;;  %v3540_v0 = vrot.slane %v3538_v34, 4  ;;  %17891 = vst [vmem:[#allocation51_spill] sm:$0xff] %v14725_v43  ;;  %v4873_v37 = vshrl.u32 %v4415_v19, 16  ;;  %v3010_v43 = vld [vmem:[#allocation2 + $0x17c] sm:$0x1] }
 0x21c   :  { %v3531_v20 = vor.u32 %v3530_v62, %v3527_v7  ;;  %12741 = vmatmul.mubr.bf16.gmra.mxu1 %v11562_v51  ;;  %v11649_v29 = vcombine.low %v4862_v26, %v4871_v38  ;;  %v3546_v11 = vrot.slane %v3544_v9, 5  ;;  %v4878_v61 = vshrl.u32 %v4416_v12, 16  ;;  %v14729_v51 = vpop.f32.mrf.mxu0  ;;  %v14731_v9 = vpop.f32.mrf.mxu1 }
 0x21d   :  { %v3541_v35 = vor.u32 %v3540_v0, %v3536_v31  ;;  %v4881_v41 = vshll.u32 %v4416_v12, 16  ;;  %v4887_v2 = vshrl.u32 %v4417_v22, 16  ;;  %v4890_v14 = vshll.u32 %v4417_v22, 16  ;;  %17892 = vst [vmem:[#allocation52_spill] sm:$0xff] %v14729_v51  ;;  %17893 = vst [vmem:[#allocation53_spill] sm:$0xff] %v14731_v9 }
 0x21e   :  { %v3532_v55 = vrot.slane %v3531_v20, 4  ;;  %12820 = vmatprep.mubr.bf16.mxu0 %v11649_v29  ;;  %v3549_v7 = vshrl.u32 %v3008_v56, 16  ;;  %v11602_v34 = vrot.slane %v4873_v37, 11  ;;  %v4880_v24 = vrot.slane %v4878_v61, 7  ;;  %v4418_v0 = vld [vmem:[#allocation2 + $0x170] sm:$0x8]  ;;  %v14737_v61 = vpop.f32.mrf.mxu1 }
 0x21f   :  { %v3542_v62 = vrot.slane %v3541_v35, 4  ;;  %v4889_v26 = vrot.slane %v4887_v2, 7  ;;  %v3552_v38 = vshll.u32 %v3008_v56, 16  ;;  %v3558_v20 = vshll.u32 %v3009_v63, 16  ;;  %17894 = vst [vmem:[#allocation54_spill] sm:$0xff] %v14737_v61 }
 0x220   :  { %v3537_v49 = vsel %vm14360_vm5, %v3532_v55, %v3536_v31  ;;  %v3551_v19 = vrot.slane %v3549_v7, 4  ;;  %v4883_v22 = vor.u32 %v4881_v41, %v4880_v24  ;;  %v4885_v29 = vrot.slane %v4880_v24, 4  ;;  %v4419_v31 = vld [vmem:[#allocation2 + $0x174] sm:$0xf]  ;;  %v14735_v55 = vpop.f32.mrf.mxu0  ;;  %v4420_v56 = vld [vmem:[#allocation2 + $0x178] sm:$0xf]  ;;  %v14741_v39 = vpop.f32.mrf.mxu1 }
 0x221   :  { %v3547_v12 = vsel %vm14360_vm5, %v3542_v62, %v3546_v11  ;;  %v3562_v59 = vshrl.u32 %v3009_v63, 16  ;;  %v4892_v37 = vor.u32 %v4890_v14, %v4889_v26  ;;  %v3554_v51 = vrot.slane %v3552_v38, 5  ;;  %17896 = vst [vmem:[#allocation56_spill] sm:$0xff] %v14741_v39  ;;  %v3011_v14 = vld [vmem:[#allocation2 + $0x184] sm:$0xf] }
 0x222   :  { %v11563_v35 = vcombine.low %v3537_v49, %v3547_v12  ;;  %v3560_v9 = vrot.slane %v3558_v20, 5  ;;  %v3568_v7 = vshll.u32 %v3010_v43, 16  ;;  %v4895_v5 = vshrl.u32 %v4418_v0, 16  ;;  %v14739_v28 = vpop.f32.mrf.mxu0  ;;  %v14749_v26 = vpop.f32.mrf.mxu1 }
 0x223   :  { %v3564_v2 = vrot.slane %v3562_v59, 4  ;;  %17895 = vst [vmem:[#allocation55_spill] sm:$0xff] %v14739_v28  ;;  %v4884_v63 = vsel %vm13824_vm2, %v11602_v34, %v4883_v22  ;;  %v4893_v24 = vsel %vm13824_vm2, %v4885_v29, %v4892_v37  ;;  %v3555_v11 = vor.u32 %v3554_v51, %v3551_v19  ;;  %17898 = vst [vmem:[#allocation58_spill] sm:$0xff] %v14749_v26  ;;  %v4421_v26 = vld [vmem:[#allocation2 + $0x180] sm:$0x8] }
 0x224   :  { %12744 = vmatprep.mubr.bf16.mxu1 %v11563_v35  ;;  %v4900_v41 = vshrl.u32 %v4419_v31, 16  ;;  %v11650_v49 = vcombine.low %v4884_v63, %v4893_v24  ;;  %v3570_v59 = vrot.slane %v3568_v7, 5  ;;  %v14747_v43 = vpop.f32.mrf.mxu0  ;;  %v4903_v0 = vshll.u32 %v4419_v31, 16  ;;  %v3012_v35 = vld [vmem:[#allocation2 + $0x188] sm:$0xf] }
 0x225   :  { %v3565_v62 = vor.u32 %v3564_v2, %v3560_v9  ;;  %17897 = vst [vmem:[#allocation57_spill] sm:$0xff] %v14747_v43  ;;  %v3556_v38 = vrot.slane %v3555_v11, 4  ;;  %v4909_v12 = vshrl.u32 %v4420_v56, 16  ;;  %v11603_v22 = vrot.slane %v4895_v5, 11  ;;  %v3013_v7 = vld [vmem:[#allocation2 + $0x18c] sm:$0x1] }
 0x226   :  { %v4902_v20 = vrot.slane %v4900_v41, 7  ;;  %12821 = vmatmul.mubr.bf16.gmra.mxu0 %v11650_v49  ;;  %v3573_v39 = vshrl.u32 %v3011_v14, 16  ;;  %v3576_v29 = vshll.u32 %v3011_v14, 16  ;;  %v4912_v2 = vshll.u32 %v4420_v56, 16  ;;  %v14755_v41 = vpop.f32.mrf.mxu0  ;;  %v14757_v49 = vpop.f32.mrf.mxu1  ;;  %v4422_v56 = vld [vmem:[#allocation2 + $0x184] sm:$0xf] }
 0x227   :  { %v3566_v34 = vrot.slane %v3565_v62, 4  ;;  %v3561_v51 = vsel %vm14360_vm5, %v3556_v38, %v3560_v9  ;;  %v4911_v37 = vrot.slane %v4909_v12, 7  ;;  %v3582_v31 = vshll.u32 %v3012_v35, 16  ;;  %17899 = vst [vmem:[#allocation59_spill] sm:$0xff] %v14755_v41  ;;  %17900 = vst [vmem:[#allocation60_spill] sm:$0xff] %v14757_v49 }
 0x228   :  { %v4905_v19 = vor.u32 %v4903_v0, %v4902_v20  ;;  %v3575_v24 = vrot.slane %v3573_v39, 4  ;;  %v3578_v11 = vrot.slane %v3576_v29, 5  ;;  %v4907_v62 = vrot.slane %v4902_v20, 4  ;;  %v4423_v12 = vld [vmem:[#allocation2 + $0x188] sm:$0xf]  ;;  %v14759_v61 = vpop.f32.mrf.mxu0 }
 0x229   :  { %v3571_v63 = vsel %vm14360_vm5, %v3566_v34, %v3570_v59  ;;  %v4914_v14 = vor.u32 %v4912_v2, %v4911_v37  ;;  %v3586_v28 = vshrl.u32 %v3012_v35, 16  ;;  %v3584_v38 = vrot.slane %v3582_v31, 5  ;;  %17901 = vst [vmem:[#allocation61_spill] sm:$0xff] %v14759_v61  ;;  %v14761_v59 = vpop.f32.mrf.mxu1  ;;  %v3014_v29 = vld [vmem:[#allocation2 + $0x194] sm:$0xf] }
 0x22a   :  { %v11564_v5 = vcombine.low %v3561_v51, %v3571_v63  ;;  %v3579_v9 = vor.u32 %v3578_v11, %v3575_v24  ;;  %v3592_v0 = vshll.u32 %v3013_v7, 16  ;;  %17902 = vst [vmem:[#allocation62_spill] sm:$0xff] %v14761_v59  ;;  %v4906_v39 = vsel %vm13824_vm2, %v11603_v22, %v4905_v19  ;;  %v3015_v7 = vld [vmem:[#allocation2 + $0x198] sm:$0xf]  ;;  %v14767_v63 = vpop.f32.mrf.mxu0  ;;  %v3016_v49 = vld [vmem:[#allocation2 + $0x19c] sm:$0x1] }
 0x22b   :  { %v4915_v34 = vsel %vm13824_vm2, %v4907_v62, %v4914_v14  ;;  %v3588_v20 = vrot.slane %v3586_v28, 4  ;;  %v4917_v2 = vshrl.u32 %v4421_v26, 16  ;;  %17903 = vst [vmem:[#allocation63_spill] sm:$0xff] %v14767_v63  ;;  %v14769_v24 = vpop.f32.mrf.mxu1  ;;  %v4922_v31 = vshrl.u32 %v4422_v56, 16  ;;  %v4424_v61 = vld [vmem:[#allocation2 + $0x190] sm:$0x8] }
 0x22c   :  { %12745 = vmatmul.mubr.bf16.gmra.mxu1 %v11564_v5  ;;  %v11651_v35 = vcombine.low %v4906_v39, %v4915_v34  ;;  %v3580_v51 = vrot.slane %v3579_v9, 4  ;;  %v3594_v37 = vrot.slane %v3592_v0, 5  ;;  %17904 = vst [vmem:[#allocation64_spill] sm:$0xff] %v14769_v24  ;;  %v4925_v5 = vshll.u32 %v4422_v56, 16  ;;  %v14773_v14 = vpop.f32.mrf.mxu0 }
 0x22d   :  { %v3589_v11 = vor.u32 %v3588_v20, %v3584_v38  ;;  %v4931_v59 = vshrl.u32 %v4423_v12, 16  ;;  %v11604_v28 = vrot.slane %v4917_v2, 11  ;;  %v4934_v19 = vshll.u32 %v4423_v12, 16  ;;  %17905 = vst [vmem:[#allocation65_spill] sm:$0xff] %v14773_v14  ;;  %v14775_v26 = vpop.f32.mrf.mxu1  ;;  %v4425_v2 = vld [vmem:[#allocation2 + $0x194] sm:$0xf] }
 0x22e   :  { %12824 = vmatprep.mubr.bf16.mxu0 %v11651_v35  ;;  %v3585_v22 = vsel %vm14360_vm5, %v3580_v51, %v3584_v38  ;;  %v3597_v62 = vshrl.u32 %v3014_v29, 16  ;;  %17906 = vst [vmem:[#allocation66_spill] sm:$0xff] %v14775_v26  ;;  %v4924_v0 = vrot.slane %v4922_v31, 7  ;;  %v3600_v34 = vshll.u32 %v3014_v29, 16  ;;  %v14779_v31 = vpop.f32.mrf.mxu0 }
 0x22f   :  { %v3590_v9 = vrot.slane %v3589_v11, 4  ;;  %v4933_v39 = vrot.slane %v4931_v59, 7  ;;  %v3606_v24 = vshll.u32 %v3015_v7, 16  ;;  %v3610_v56 = vshrl.u32 %v3015_v7, 16  ;;  %v4426_v11 = vld [vmem:[#allocation2 + $0x198] sm:$0xf]  ;;  %v14781_v59 = vpop.f32.mrf.mxu1 }
 0x230   :  { %v3599_v20 = vrot.slane %v3597_v62, 4  ;;  %v3616_v63 = vshll.u32 %v3016_v49, 16  ;;  %v4927_v38 = vor.u32 %v4925_v5, %v4924_v0  ;;  %v4929_v51 = vrot.slane %v4924_v0, 4  ;;  %17907 = vst [vmem:[#allocation67_spill] sm:$0xff] %v14779_v31  ;;  %17908 = vst [vmem:[#allocation68_spill] sm:$0xff] %v14781_v59  ;;  %v14787_v0 = vpop.f32.mrf.mxu0 }
 0x231   :  { %v3595_v35 = vsel %vm14360_vm5, %v3590_v9, %v3594_v37  ;;  %v4936_v12 = vor.u32 %v4934_v19, %v4933_v39  ;;  %v3602_v14 = vrot.slane %v3600_v34, 5  ;;  %v3608_v43 = vrot.slane %v3606_v24, 5  ;;  %v3017_v24 = vld [vmem:[#allocation2 + $0x1a4] sm:$0xf]  ;;  %v3018_v9 = vld [vmem:[#allocation2 + $0x1a8] sm:$0xf]  ;;  %v14789_v39 = vpop.f32.mrf.mxu1 }
 0x232   :  { %v11565_v41 = vcombine.low %v3585_v22, %v3595_v35  ;;  %v3612_v26 = vrot.slane %v3610_v56, 4  ;;  %v4928_v49 = vsel %vm13824_vm2, %v11604_v28, %v4927_v38  ;;  %v3618_v37 = vrot.slane %v3616_v63, 5  ;;  %17909 = vst [vmem:[#allocation69_spill] sm:$0xff] %v14787_v0  ;;  %17910 = vst [vmem:[#allocation70_spill] sm:$0xff] %v14789_v39  ;;  %v4428_v0 = vld [vmem:[#allocation2 + $0x1a4] sm:$0xf] }
 0x233   :  { %v4937_v29 = vsel %vm13824_vm2, %v4929_v51, %v4936_v12  ;;  %v4939_v7 = vshrl.u32 %v4424_v61, 16  ;;  %v3603_v19 = vor.u32 %v3602_v14, %v3599_v20  ;;  %v4944_v62 = vshrl.u32 %v4425_v2, 16  ;;  %v14791_v61 = vpop.f32.mrf.mxu0  ;;  %v4432_v31 = vld [vmem:[#allocation2 + $0x1b8] sm:$0xf] }
 0x234   :  { %12748 = vmatprep.mubr.bf16.mxu1 %v11565_v41  ;;  %v11652_v5 = vcombine.low %v4928_v49, %v4937_v29  ;;  %v3613_v22 = vor.u32 %v3612_v26, %v3608_v43  ;;  %v4947_v56 = vshll.u32 %v4425_v2, 16  ;;  %v4953_v35 = vshrl.u32 %v4426_v11, 16  ;;  %17911 = vst [vmem:[#allocation71_spill] sm:$0xff] %v14791_v61  ;;  %v14793_v41 = vpop.f32.mrf.mxu1  ;;  %v3019_v26 = vld [vmem:[#allocation2 + $0x1ac] sm:$0x1] }
 0x235   :  { %v11605_v34 = vrot.slane %v4939_v7, 11  ;;  %v3604_v28 = vrot.slane %v3603_v19, 4  ;;  %v4946_v51 = vrot.slane %v4944_v62, 7  ;;  %v4956_v63 = vshll.u32 %v4426_v11, 16  ;;  %17912 = vst [vmem:[#allocation72_spill] sm:$0xff] %v14793_v41  ;;  %v14799_v19 = vpop.f32.mrf.mxu0 }
 0x236   :  { %12825 = vmatmul.mubr.bf16.gmra.mxu0 %v11652_v5  ;;  %v3614_v38 = vrot.slane %v3613_v22, 4  ;;  %v4955_v14 = vrot.slane %v4953_v35, 7  ;;  %v3621_v20 = vshrl.u32 %v3017_v24, 16  ;;  %v3624_v12 = vshll.u32 %v3017_v24, 16  ;;  %17913 = vst [vmem:[#allocation73_spill] sm:$0xff] %v14799_v19  ;;  %v14801_v11 = vpop.f32.mrf.mxu1 }
 0x237   :  { %v3630_v49 = vshll.u32 %v3018_v9, 16  ;;  %v3609_v29 = vsel %vm14360_vm5, %v3604_v28, %v3608_v43  ;;  %v4949_v7 = vor.u32 %v4947_v56, %v4946_v51  ;;  %v4951_v5 = vrot.slane %v4946_v51, 4  ;;  %17914 = vst [vmem:[#allocation74_spill] sm:$0xff] %v14801_v11  ;;  %v4427_v61 = vld [vmem:[#allocation2 + $0x1a0] sm:$0x8] }
 0x238   :  { %v3619_v2 = vsel %vm14360_vm5, %v3614_v38, %v3618_v37  ;;  %v4958_v62 = vor.u32 %v4956_v63, %v4955_v14  ;;  %v3623_v41 = vrot.slane %v3621_v20, 4  ;;  %v3626_v35 = vrot.slane %v3624_v12, 5  ;;  %v4429_v28 = vld [vmem:[#allocation2 + $0x1a8] sm:$0xf]  ;;  %v3020_v38 = vld [vmem:[#allocation2 + $0x1b4] sm:$0xf]  ;;  %v14807_v14 = vpop.f32.mrf.mxu0  ;;  %v14809_v20 = vpop.f32.mrf.mxu1 }
 0x239   :  { %v11566_v22 = vcombine.low %v3609_v29, %v3619_v2  ;;  %v3632_v39 = vrot.slane %v3630_v49, 5  ;;  %v3634_v24 = vshrl.u32 %v3018_v9, 16  ;;  %v3640_v59 = vshll.u32 %v3019_v26, 16  ;;  %17915 = vst [vmem:[#allocation75_spill] sm:$0xff] %v14807_v14  ;;  %17916 = vst [vmem:[#allocation76_spill] sm:$0xff] %v14809_v20 }
 0x23a   :  { %v4950_v43 = vsel %vm13824_vm2, %v11605_v34, %v4949_v7  ;;  %v4959_v37 = vsel %vm13824_vm2, %v4951_v5, %v4958_v62  ;;  %v3627_v56 = vor.u32 %v3626_v35, %v3623_v41  ;;  %v4961_v26 = vshrl.u32 %v4427_v61, 16  ;;  %v3021_v2 = vld [vmem:[#allocation2 + $0x1b8] sm:$0xf]  ;;  %v14811_v41 = vpop.f32.mrf.mxu0  ;;  %v14813_v62 = vpop.f32.mrf.mxu1  ;;  %v4431_v19 = vld [vmem:[#allocation2 + $0x1b4] sm:$0xf] }
 0x23b   :  { %12749 = vmatmul.mubr.bf16.gmra.mxu1 %v11566_v22  ;;  %v11653_v51 = vcombine.low %v4950_v43, %v4959_v37  ;;  %v3636_v29 = vrot.slane %v3634_v24, 4  ;;  %v3642_v63 = vrot.slane %v3640_v59, 5  ;;  %v4966_v12 = vshrl.u32 %v4428_v0, 16  ;;  %17917 = vst [vmem:[#allocation77_spill] sm:$0xff] %v14811_v41  ;;  %17918 = vst [vmem:[#allocation78_spill] sm:$0xff] %v14813_v62 }
 0x23c   :  { %v3628_v9 = vrot.slane %v3627_v56, 4  ;;  %v4969_v49 = vshll.u32 %v4428_v0, 16  ;;  %v4975_v7 = vshrl.u32 %v4429_v28, 16  ;;  %v4978_v22 = vshll.u32 %v4429_v28, 16  ;;  %v3022_v43 = vld [vmem:[#allocation2 + $0x1bc] sm:$0x1]  ;;  %v14819_v28 = vpop.f32.mrf.mxu1 }
 0x23d   :  { %12828 = vmatprep.mubr.bf16.mxu0 %v11653_v51  ;;  %v3637_v34 = vor.u32 %v3636_v29, %v3632_v39  ;;  %v3645_v5 = vshrl.u32 %v3020_v38, 16  ;;  %v11606_v35 = vrot.slane %v4961_v26, 11  ;;  %v4968_v24 = vrot.slane %v4966_v12, 7  ;;  %v4430_v51 = vld [vmem:[#allocation2 + $0x1b0] sm:$0x8]  ;;  %v14817_v29 = vpop.f32.mrf.mxu0  ;;  %17920 = vst [vmem:[#allocation80_spill] sm:$0xff] %v14819_v28 }
 0x23e   :  { %v3633_v59 = vsel %vm14360_vm5, %v3628_v9, %v3632_v39  ;;  %v3648_v37 = vshll.u32 %v3020_v38, 16  ;;  %v4977_v56 = vrot.slane %v4975_v7, 7  ;;  %v3654_v20 = vshll.u32 %v3021_v2, 16  ;;  %17919 = vst [vmem:[#allocation79_spill] sm:$0xff] %v14817_v29 }
 0x23f   :  { %v3638_v61 = vrot.slane %v3637_v34, 4  ;;  %v3647_v0 = vrot.slane %v3645_v5, 4  ;;  %v4971_v11 = vor.u32 %v4969_v49, %v4968_v24  ;;  %v4973_v41 = vrot.slane %v4968_v24, 4  ;;  %v14823_v12 = vpop.f32.mrf.mxu0  ;;  %v14825_v34 = vpop.f32.mrf.mxu1 }
 0x240   :  { %v3650_v14 = vrot.slane %v3648_v37, 5  ;;  %v3658_v62 = vshrl.u32 %v3021_v2, 16  ;;  %v4980_v9 = vor.u32 %v4978_v22, %v4977_v56  ;;  %v3656_v26 = vrot.slane %v3654_v20, 5  ;;  %17921 = vst [vmem:[#allocation81_spill] sm:$0xff] %v14823_v12  ;;  %17922 = vst [vmem:[#allocation82_spill] sm:$0xff] %v14825_v34 }
 0x241   :  { %v3643_v39 = vsel %vm14360_vm5, %v3638_v61, %v3642_v63  ;;  %v3664_v38 = vshll.u32 %v3022_v43, 16  ;;  %v4972_v49 = vsel %vm13824_vm2, %v11606_v35, %v4971_v11  ;;  %v4983_v24 = vshrl.u32 %v4430_v51, 16  ;;  %v3023_v63 = vld [vmem:[#allocation2 + $0x1c4] sm:$0xf]  ;;  %v4433_v34 = vld [vmem:[#allocation2 + $0x1c0] sm:$0x8] }
 0x242   :  { %v11567_v7 = vcombine.low %v3633_v59, %v3643_v39  ;;  %v3651_v5 = vor.u32 %v3650_v14, %v3647_v0  ;;  %v3660_v29 = vrot.slane %v3658_v62, 4  ;;  %v4981_v2 = vsel %vm13824_vm2, %v4973_v41, %v4980_v9  ;;  %v3024_v14 = vld [vmem:[#allocation2 + $0x1c8] sm:$0xf]  ;;  %v14831_v62 = vpop.f32.mrf.mxu0  ;;  %v14833_v0 = vpop.f32.mrf.mxu1 }
 0x243   :  { %v4988_v37 = vshrl.u32 %v4431_v19, 16  ;;  %v11654_v20 = vcombine.low %v4972_v49, %v4981_v2  ;;  %v3666_v61 = vrot.slane %v3664_v38, 5  ;;  %v4991_v28 = vshll.u32 %v4431_v19, 16  ;;  %17923 = vst [vmem:[#allocation83_spill] sm:$0xff] %v14831_v62  ;;  %17924 = vst [vmem:[#allocation84_spill] sm:$0xff] %v14833_v0 }
 0x244   :  { %12752 = vmatprep.mubr.bf16.mxu1 %v11567_v7  ;;  %v3652_v22 = vrot.slane %v3651_v5, 4  ;;  %v3661_v43 = vor.u32 %v3660_v29, %v3656_v26  ;;  %v4997_v59 = vshrl.u32 %v4432_v31, 16  ;;  %v11607_v35 = vrot.slane %v4983_v24, 11  ;;  %v3025_v29 = vld [vmem:[#allocation2 + $0x1cc] sm:$0x1]  ;;  %v14837_v5 = vpop.f32.mrf.mxu0  ;;  %v14839_v19 = vpop.f32.mrf.mxu1 }
 0x245   :  { %v4990_v56 = vrot.slane %v4988_v37, 7  ;;  %12829 = vmatmul.mubr.bf16.gmra.mxu0 %v11654_v20  ;;  %v5000_v41 = vshll.u32 %v4432_v31, 16  ;;  %v3669_v51 = vshrl.u32 %v3023_v63, 16  ;;  %v3672_v38 = vshll.u32 %v3023_v63, 16  ;;  %17925 = vst [vmem:[#allocation85_spill] sm:$0xff] %v14837_v5  ;;  %17926 = vst [vmem:[#allocation86_spill] sm:$0xff] %v14839_v19 }
 0x246   :  { %v3662_v11 = vrot.slane %v3661_v43, 4  ;;  %v3657_v39 = vsel %vm14360_vm5, %v3652_v22, %v3656_v26  ;;  %v4999_v7 = vrot.slane %v4997_v59, 7  ;;  %v3678_v37 = vshll.u32 %v3024_v14, 16  ;;  %v4434_v26 = vld [vmem:[#allocation2 + $0x1c4] sm:$0xf]  ;;  %v14845_v22 = vpop.f32.mrf.mxu1 }
 0x247   :  { %v4993_v9 = vor.u32 %v4991_v28, %v4990_v56  ;;  %v3671_v2 = vrot.slane %v3669_v51, 4  ;;  %v3682_v20 = vshrl.u32 %v3024_v14, 16  ;;  %v4995_v31 = vrot.slane %v4990_v56, 4  ;;  %v14843_v28 = vpop.f32.mrf.mxu0  ;;  %17928 = vst [vmem:[#allocation88_spill] sm:$0xff] %v14845_v22  ;;  %v4435_v19 = vld [vmem:[#allocation2 + $0x1c8] sm:$0xf] }
 0x248   :  { %v3667_v49 = vsel %vm14360_vm5, %v3662_v11, %v3666_v61  ;;  %v5002_v43 = vor.u32 %v5000_v41, %v4999_v7  ;;  %v3674_v0 = vrot.slane %v3672_v38, 5  ;;  %17927 = vst [vmem:[#allocation87_spill] sm:$0xff] %v14843_v28  ;;  %v3680_v63 = vrot.slane %v3678_v37, 5  ;;  %v3026_v11 = vld [vmem:[#allocation2 + $0x1d4] sm:$0xf]  ;;  %v14853_v51 = vpop.f32.mrf.mxu1 }
 0x249   :  { %v11568_v24 = vcombine.low %v3657_v39, %v3667_v49  ;;  %v3684_v59 = vrot.slane %v3682_v20, 4  ;;  %v3688_v5 = vshll.u32 %v3025_v29, 16  ;;  %v4994_v61 = vsel %vm13824_vm2, %v11607_v35, %v4993_v9  ;;  %v14851_v41 = vpop.f32.mrf.mxu0  ;;  %17930 = vst [vmem:[#allocation90_spill] sm:$0xff] %v14853_v51  ;;  %v3027_v22 = vld [vmem:[#allocation2 + $0x1d8] sm:$0xf] }
 0x24a   :  { %v5003_v14 = vsel %vm13824_vm2, %v4995_v31, %v5002_v43  ;;  %v3675_v56 = vor.u32 %v3674_v0, %v3671_v2  ;;  %17929 = vst [vmem:[#allocation89_spill] sm:$0xff] %v14851_v41  ;;  %v5005_v49 = vshrl.u32 %v4433_v34, 16  ;;  %v5010_v29 = vshrl.u32 %v4434_v26, 16  ;;  %v3028_v31 = vld [vmem:[#allocation2 + $0x1dc] sm:$0x1]  ;;  %v14859_v34 = vpop.f32.mrf.mxu1 }
 0x24b   :  { %12753 = vmatmul.mubr.bf16.gmra.mxu1 %v11568_v24  ;;  %v11655_v39 = vcombine.low %v4994_v61, %v5003_v14  ;;  %v3685_v7 = vor.u32 %v3684_v59, %v3680_v63  ;;  %v3690_v38 = vrot.slane %v3688_v5, 5  ;;  %v5013_v20 = vshll.u32 %v4434_v26, 16  ;;  %v4436_v59 = vld [vmem:[#allocation2 + $0x1d0] sm:$0x8]  ;;  %v14857_v5 = vpop.f32.mrf.mxu0  ;;  %17932 = vst [vmem:[#allocation92_spill] sm:$0xff] %v14859_v34 }
 0x24c   :  { %v3676_v37 = vrot.slane %v3675_v56, 4  ;;  %v5019_v24 = vshrl.u32 %v4435_v19, 16  ;;  %v11608_v9 = vrot.slane %v5005_v49, 11  ;;  %v5022_v28 = vshll.u32 %v4435_v19, 16  ;;  %17931 = vst [vmem:[#allocation91_spill] sm:$0xff] %v14857_v5 }
 0x24d   :  { %12832 = vmatprep.mubr.bf16.mxu0 %v11655_v39  ;;  %v3686_v35 = vrot.slane %v3685_v7, 4  ;;  %v3693_v0 = vshrl.u32 %v3026_v11, 16  ;;  %v5012_v43 = vrot.slane %v5010_v29, 7  ;;  %v3696_v61 = vshll.u32 %v3026_v11, 16  ;;  %v4437_v19 = vld [vmem:[#allocation2 + $0x1d4] sm:$0xf] }
 0x24e   :  { %v3681_v2 = vsel %vm14360_vm5, %v3676_v37, %v3680_v63  ;;  %v5021_v51 = vrot.slane %v5019_v24, 7  ;;  %v3702_v56 = vshll.u32 %v3027_v22, 16  ;;  %v3706_v39 = vshrl.u32 %v3027_v22, 16  ;;  %v14863_v63 = vpop.f32.mrf.mxu0  ;;  %v14865_v37 = vpop.f32.mrf.mxu1  ;;  %v4438_v34 = vld [vmem:[#allocation2 + $0x1d8] sm:$0xf] }
 0x24f   :  { %v3691_v26 = vsel %vm14360_vm5, %v3686_v35, %v3690_v38  ;;  %v3695_v14 = vrot.slane %v3693_v0, 4  ;;  %v5015_v49 = vor.u32 %v5013_v20, %v5012_v43  ;;  %v5017_v41 = vrot.slane %v5012_v43, 4  ;;  %17933 = vst [vmem:[#allocation93_spill] sm:$0xff] %v14863_v63  ;;  %17934 = vst [vmem:[#allocation94_spill] sm:$0xff] %v14865_v37 }
 0x250   :  { %v11569_v7 = vcombine.low %v3681_v2, %v3691_v26  ;;  %v5024_v62 = vor.u32 %v5022_v28, %v5021_v51  ;;  %v3698_v11 = vrot.slane %v3696_v61, 5  ;;  %v3704_v29 = vrot.slane %v3702_v56, 5  ;;  %v14871_v0 = vpop.f32.mrf.mxu0  ;;  %v14873_v28 = vpop.f32.mrf.mxu1  ;;  %v3029_v26 = vld [vmem:[#allocation2 + $0x1e4] sm:$0xf] }
 0x251   :  { %v3708_v24 = vrot.slane %v3706_v39, 4  ;;  %v3712_v5 = vshll.u32 %v3028_v31, 16  ;;  %v5016_v38 = vsel %vm13824_vm2, %v11608_v9, %v5015_v49  ;;  %v5027_v35 = vshrl.u32 %v4436_v59, 16  ;;  %17935 = vst [vmem:[#allocation95_spill] sm:$0xff] %v14871_v0  ;;  %17936 = vst [vmem:[#allocation96_spill] sm:$0xff] %v14873_v28 }
 0x252   :  { %12756 = vmatprep.mubr.bf16.mxu1 %v11569_v7  ;;  %v5025_v22 = vsel %vm13824_vm2, %v5017_v41, %v5024_v62  ;;  %v5032_v20 = vshrl.u32 %v4437_v19, 16  ;;  %v3699_v2 = vor.u32 %v3698_v11, %v3695_v14  ;;  %v5035_v56 = vshll.u32 %v4437_v19, 16  ;;  %v3030_v7 = vld [vmem:[#allocation2 + $0x1e8] sm:$0xf]  ;;  %v14875_v62 = vpop.f32.mrf.mxu0  ;;  %v14877_v41 = vpop.f32.mrf.mxu1 }
 0x253   :  { %v11656_v51 = vcombine.low %v5016_v38, %v5025_v22  ;;  %v3709_v43 = vor.u32 %v3708_v24, %v3704_v29  ;;  %v3714_v61 = vrot.slane %v3712_v5, 5  ;;  %v5041_v39 = vshrl.u32 %v4438_v34, 16  ;;  %17937 = vst [vmem:[#allocation97_spill] sm:$0xff] %v14875_v62  ;;  %17938 = vst [vmem:[#allocation98_spill] sm:$0xff] %v14877_v41  ;;  %v3031_v38 = vld [vmem:[#allocation2 + $0x1ec] sm:$0x1] }
 0x254   :  { %v5034_v31 = vrot.slane %v5032_v20, 7  ;;  %v3700_v9 = vrot.slane %v3699_v2, 4  ;;  %v11609_v37 = vrot.slane %v5027_v35, 11  ;;  %v5044_v28 = vshll.u32 %v4438_v34, 16  ;;  %v4439_v2 = vld [vmem:[#allocation2 + $0x1e0] sm:$0x8]  ;;  %v14883_v63 = vpop.f32.mrf.mxu0  ;;  %v14885_v12 = vpop.f32.mrf.mxu1 }
 0x255   :  { %12833 = vmatmul.mubr.bf16.gmra.mxu0 %v11656_v51  ;;  %v3710_v49 = vrot.slane %v3709_v43, 4  ;;  %v5043_v0 = vrot.slane %v5041_v39, 7  ;;  %v3717_v14 = vshrl.u32 %v3029_v26, 16  ;;  %v3720_v11 = vshll.u32 %v3029_v26, 16  ;;  %v4440_v43 = vld [vmem:[#allocation2 + $0x1e4] sm:$0xf] }
 0x256   :  { %v5037_v59 = vor.u32 %v5035_v56, %v5034_v31  ;;  %v3705_v5 = vsel %vm14360_vm5, %v3700_v9, %v3704_v29  ;;  %v3726_v24 = vshll.u32 %v3030_v7, 16  ;;  %v5039_v20 = vrot.slane %v5034_v31, 4  ;;  %v4441_v62 = vld [vmem:[#allocation2 + $0x1e8] sm:$0xf]  ;;  %17939 = vst [vmem:[#allocation99_spill] sm:$0xff] %v14885_v12 }
 0x257   :  { %v3715_v19 = vsel %vm14360_vm5, %v3710_v49, %v3714_v61  ;;  %v5046_v35 = vor.u32 %v5044_v28, %v5043_v0  ;;  %v3719_v51 = vrot.slane %v3717_v14, 4  ;;  %v3722_v41 = vrot.slane %v3720_v11, 5  ;;  %v3032_v0 = vld [vmem:[#allocation2 + $0x1f4] sm:$0xf]  ;;  %v14891_v49 = vpop.f32.mrf.mxu0  ;;  %v3033_v11 = vld [vmem:[#allocation2 + $0x1f8] sm:$0xf] }
 0x258   :  { %v11570_v22 = vcombine.low %v3705_v5, %v3715_v19  ;;  %v3728_v56 = vrot.slane %v3726_v24, 5  ;;  %v3730_v39 = vshrl.u32 %v3030_v7, 16  ;;  %v3736_v34 = vshll.u32 %v3031_v38, 16  ;;  %17940 = vst [vmem:[#allocation100_spill] sm:$0xff] %v14891_v49  ;;  %v14893_v7 = vpop.f32.mrf.mxu1  ;;  %v4442_v49 = vld [vmem:[#allocation2 + $0x1f0] sm:$0x8] }
 0x259   :  { %v5038_v29 = vsel %vm13824_vm2, %v11609_v37, %v5037_v59  ;;  %v5047_v61 = vsel %vm13824_vm2, %v5039_v20, %v5046_v35  ;;  %v3723_v26 = vor.u32 %v3722_v41, %v3719_v51  ;;  %17941 = vst [vmem:[#allocation101_spill] sm:$0xff] %v14893_v7  ;;  %v5049_v38 = vshrl.u32 %v4439_v2, 16  ;;  %v14895_v20 = vpop.f32.mrf.mxu0  ;;  %v4443_v12 = vld [vmem:[#allocation2 + $0x1f4] sm:$0xf] }
 0x25a   :  { %12757 = vmatmul.mubr.bf16.gmra.mxu1 %v11570_v22  ;;  %v11657_v28 = vcombine.low %v5038_v29, %v5047_v61  ;;  %v3732_v31 = vrot.slane %v3730_v39, 4  ;;  %v3738_v9 = vrot.slane %v3736_v34, 5  ;;  %v5054_v14 = vshrl.u32 %v4440_v43, 16  ;;  %17942 = vst [vmem:[#allocation102_spill] sm:$0xff] %v14895_v20  ;;  %v14897_v35 = vpop.f32.mrf.mxu1  ;;  %v3034_v34 = vld [vmem:[#allocation2 + $0x1fc] sm:$0x1] }
 0x25b   :  { %v5057_v5 = vshll.u32 %v4440_v43, 16  ;;  %v5063_v19 = vshrl.u32 %v4441_v62, 16  ;;  %v3724_v24 = vrot.slane %v3723_v26, 4  ;;  %v5066_v59 = vshll.u32 %v4441_v62, 16  ;;  %17943 = vst [vmem:[#allocation103_spill] sm:$0xff] %v14897_v35  ;;  %v14901_v20 = vpop.f32.mrf.mxu0 }
 0x25c   :  { %12836 = vmatprep.mubr.bf16.mxu0 %v11657_v28  ;;  %v3733_v37 = vor.u32 %v3732_v31, %v3728_v56  ;;  %v3741_v22 = vshrl.u32 %v3032_v0, 16  ;;  %v11610_v41 = vrot.slane %v5049_v38, 11  ;;  %v5056_v51 = vrot.slane %v5054_v14, 7  ;;  %17944 = vst [vmem:[#allocation104_spill] sm:$0xff] %v14901_v20 }
 0x25d   :  { %v5065_v39 = vrot.slane %v5063_v19, 7  ;;  %v3744_v29 = vshll.u32 %v3032_v0, 16  ;;  %v3729_v2 = vsel %vm14360_vm5, %v3724_v24, %v3728_v56  ;;  %v3750_v7 = vshll.u32 %v3033_v11, 16  ;;  %v4444_v56 = vld [vmem:[#allocation2 + $0x1f8] sm:$0xf] }
 0x25e   :  { %v3734_v43 = vrot.slane %v3733_v37, 4  ;;  %v3743_v61 = vrot.slane %v3741_v22, 4  ;;  %v5059_v28 = vor.u32 %v5057_v5, %v5056_v51  ;;  %v5061_v26 = vrot.slane %v5056_v51, 4 }
 0x25f   :  { %v5068_v31 = vor.u32 %v5066_v59, %v5065_v39  ;;  %v3746_v62 = vrot.slane %v3744_v29, 5  ;;  %v3752_v0 = vrot.slane %v3750_v7, 5  ;;  %v3754_v14 = vshrl.u32 %v3033_v11, 16  ;;  %v3035_v29 = vld [vmem:[#allocation2 + $0x204] sm:$0xf] }
 0x260   :  { %v3739_v38 = vsel %vm14360_vm5, %v3734_v43, %v3738_v9  ;;  %v3760_v19 = vshll.u32 %v3034_v34, 16  ;;  %v5060_v5 = vsel %vm13824_vm2, %v11610_v41, %v5059_v28  ;;  %v5071_v39 = vshrl.u32 %v4442_v49, 16  ;;  %v3036_v11 = vld [vmem:[#allocation2 + $0x208] sm:$0xf]  ;;  %v14911_v34 = vpop.f32.mrf.mxu0 }
 0x261   :  { %v14903_v35 = vpop.f32.mrf.mxu1  ;;  %v11571_v24 = vcombine.low %v3729_v2, %v3739_v38  ;;  %v5069_v37 = vsel %vm13824_vm2, %v5061_v26, %v5068_v31  ;;  %v3747_v59 = vor.u32 %v3746_v62, %v3743_v61  ;;  %v3756_v51 = vrot.slane %v3754_v14, 4  ;;  %17946 = vst [vmem:[#allocation106_spill] sm:$0xff] %v14911_v34 }
 0x262   :  { %17945 = vst [vmem:[#allocation105_spill] sm:$0xff] %v14903_v35  ;;  %v11658_v22 = vcombine.low %v5060_v5, %v5069_v37  ;;  %v3762_v20 = vrot.slane %v3760_v19, 5  ;;  %v5076_v9 = vshrl.u32 %v4443_v12, 16  ;;  %v5085_v7 = vshrl.u32 %v4444_v56, 16  ;;  %v14917_v38 = vpop.f32.mrf.mxu0 }
 0x263   :  { %12760 = vmatprep.mubr.bf16.mxu1 %v11571_v24  ;;  %v3748_v35 = vrot.slane %v3747_v59, 4  ;;  %v14913_v2 = vpop.f32.mrf.mxu1  ;;  %v3757_v41 = vor.u32 %v3756_v51, %v3752_v0  ;;  %v11611_v43 = vrot.slane %v5071_v39, 11  ;;  %v5079_v28 = vshll.u32 %v4443_v12, 16  ;;  %17948 = vst [vmem:[#allocation108_spill] sm:$0xff] %v14917_v38  ;;  %v3037_v24 = vld [vmem:[#allocation2 + $0x20c] sm:$0x1] }
 0x264   :  { %17947 = vst [vmem:[#allocation107_spill] sm:$0xff] %v14913_v2  ;;  %12837 = vmatmul.mubr.bf16.gmra.mxu0 %v11658_v22  ;;  %v5088_v26 = vshll.u32 %v4444_v56, 16  ;;  %v5078_v49 = vrot.slane %v5076_v9, 7  ;;  %v5087_v31 = vrot.slane %v5085_v7, 7  ;;  %v3765_v62 = vshrl.u32 %v3035_v29, 16  ;;  %v14921_v56 = vpop.f32.mrf.mxu0 }
 0x265   :  { %v3753_v61 = vsel %vm14360_vm5, %v3748_v35, %v3752_v0  ;;  %v14919_v14 = vpop.f32.mrf.mxu1  ;;  %v3758_v19 = vrot.slane %v3757_v41, 4  ;;  %v3768_v5 = vshll.u32 %v3035_v29, 16  ;;  %v3774_v37 = vshll.u32 %v3036_v11, 16  ;;  %17950 = vst [vmem:[#allocation110_spill] sm:$0xff] %v14921_v56  ;;  %v3038_v56 = vld [vmem:[#allocation2 + $0x214] sm:$0xf] }
 0x266   :  { %17949 = vst [vmem:[#allocation109_spill] sm:$0xff] %v14919_v14  ;;  %v3778_v59 = vshrl.u32 %v3036_v11, 16  ;;  %v5081_v22 = vor.u32 %v5079_v28, %v5078_v49  ;;  %v5083_v51 = vrot.slane %v5078_v49, 4  ;;  %v5090_v39 = vor.u32 %v5088_v26, %v5087_v31  ;;  %v4445_v14 = vld [vmem:[#allocation2 + $0x200] sm:$0x8] }
 0x267   :  { %v3767_v12 = vrot.slane %v3765_v62, 4  ;;  %v14923_v2 = vpop.f32.mrf.mxu1  ;;  %v3763_v35 = vsel %vm14360_vm5, %v3758_v19, %v3762_v20  ;;  %v3770_v0 = vrot.slane %v3768_v5, 5  ;;  %v3776_v9 = vrot.slane %v3774_v37, 5  ;;  %v4446_v26 = vld [vmem:[#allocation2 + $0x204] sm:$0xf] }
 0x268   :  { %17951 = vst [vmem:[#allocation111_spill] sm:$0xff] %v14923_v2  ;;  %v3780_v7 = vrot.slane %v3778_v59, 4  ;;  %v11572_v41 = vcombine.low %v3753_v61, %v3763_v35  ;;  %v5082_v29 = vsel %vm13824_vm2, %v11611_v43, %v5081_v22  ;;  %v5091_v11 = vsel %vm13824_vm2, %v5083_v51, %v5090_v39  ;;  %v4447_v2 = vld [vmem:[#allocation2 + $0x208] sm:$0xf]  ;;  %v3039_v22 = vld [vmem:[#allocation2 + $0x218] sm:$0xf] }
 0x269   :  { %v3784_v28 = vshll.u32 %v3037_v24, 16  ;;  %v11659_v49 = vcombine.low %v5082_v29, %v5091_v11  ;;  %v3771_v31 = vor.u32 %v3770_v0, %v3767_v12  ;;  %v5093_v19 = vshrl.u32 %v4445_v14, 16  ;;  %v3040_v14 = vld [vmem:[#allocation2 + $0x21c] sm:$0x1]  ;;  %v4448_v29 = vld [vmem:[#allocation2 + $0x210] sm:$0x8] }
 0x26a   :  { %v3781_v62 = vor.u32 %v3780_v7, %v3776_v9  ;;  %v14931_v38 = vpop.f32.mrf.mxu0  ;;  %12761 = vmatmul.mubr.bf16.gmra.mxu1 %v11572_v41  ;;  %v5098_v37 = vshrl.u32 %v4446_v26, 16  ;;  %v5101_v59 = vshll.u32 %v4446_v26, 16  ;;  %v5107_v51 = vshrl.u32 %v4447_v2, 16 }
 0x26b   :  { %17952 = vst [vmem:[#allocation112_spill] sm:$0xff] %v14931_v38  ;;  %v3786_v20 = vrot.slane %v3784_v28, 5  ;;  %12840 = vmatprep.mubr.bf16.mxu0 %v11659_v49  ;;  %v3772_v61 = vrot.slane %v3771_v31, 4  ;;  %v11612_v24 = vrot.slane %v5093_v19, 11  ;;  %v5110_v39 = vshll.u32 %v4447_v2, 16 }
 0x26c   :  { %v3782_v43 = vrot.slane %v3781_v62, 4  ;;  %v3789_v12 = vshrl.u32 %v3038_v56, 16  ;;  %v5100_v7 = vrot.slane %v5098_v37, 7  ;;  %v3792_v41 = vshll.u32 %v3038_v56, 16  ;;  %v14939_v11 = vpop.f32.mrf.mxu0  ;;  %v4449_v62 = vld [vmem:[#allocation2 + $0x214] sm:$0xf] }
 0x26d   :  { %v3777_v35 = vsel %vm14360_vm5, %v3772_v61, %v3776_v9  ;;  %17954 = vst [vmem:[#allocation114_spill] sm:$0xff] %v14939_v11  ;;  %v5109_v49 = vrot.slane %v5107_v51, 7  ;;  %v3798_v31 = vshll.u32 %v3039_v22, 16  ;;  %v3802_v9 = vshrl.u32 %v3039_v22, 16 }
 0x26e   :  { %v3787_v0 = vsel %vm14360_vm5, %v3782_v43, %v3786_v20  ;;  %v3791_v26 = vrot.slane %v3789_v12, 4  ;;  %v5103_v2 = vor.u32 %v5101_v59, %v5100_v7  ;;  %v3794_v38 = vrot.slane %v3792_v41, 5  ;;  %v14943_v61 = vpop.f32.mrf.mxu0 }
 0x26f   :  { %v11573_v28 = vcombine.low %v3777_v35, %v3787_v0  ;;  %17956 = vst [vmem:[#allocation116_spill] sm:$0xff] %v14943_v61  ;;  %v5112_v20 = vor.u32 %v5110_v39, %v5109_v49  ;;  %v3800_v43 = vrot.slane %v3798_v31, 5  ;;  %v3808_v56 = vshll.u32 %v3040_v14, 16  ;;  %v4450_v35 = vld [vmem:[#allocation2 + $0x218] sm:$0xf] }
 0x270   :  { %v14933_v5 = vpop.f32.mrf.mxu1  ;;  %v5115_v37 = vshrl.u32 %v4448_v29, 16  ;;  %v3795_v34 = vor.u32 %v3794_v38, %v3791_v26  ;;  %v3804_v11 = vrot.slane %v3802_v9, 4  ;;  %v5120_v51 = vshrl.u32 %v4449_v62, 16  ;;  %v14945_v12 = vpop.f32.mrf.mxu0  ;;  %v4451_v26 = vld [vmem:[#allocation2 + $0x220] sm:$0x8] }
 0x271   :  { %17953 = vst [vmem:[#allocation113_spill] sm:$0xff] %v14933_v5  ;;  %v5105_v5 = vrot.slane %v5100_v7, 4  ;;  %12764 = vmatprep.mubr.bf16.mxu1 %v11573_v28  ;;  %17957 = vst [vmem:[#allocation117_spill] sm:$0xff] %v14945_v12  ;;  %v5104_v0 = vsel %vm13824_vm2, %v11612_v24, %v5103_v2  ;;  %v3810_v22 = vrot.slane %v3808_v56, 5  ;;  %v5123_v7 = vshll.u32 %v4449_v62, 16 }
 0x272   :  { %v14941_v19 = vpop.f32.mrf.mxu1  ;;  %v3796_v28 = vrot.slane %v3795_v34, 4  ;;  %v3805_v14 = vor.u32 %v3804_v11, %v3800_v43  ;;  %v5122_v29 = vrot.slane %v5120_v51, 7  ;;  %v11613_v38 = vrot.slane %v5115_v37, 11  ;;  %v4452_v31 = vld [vmem:[#allocation2 + $0x224] sm:$0xf] }
 0x273   :  { %17955 = vst [vmem:[#allocation115_spill] sm:$0xff] %v14941_v19  ;;  %v5113_v59 = vsel %vm13824_vm2, %v5105_v5, %v5112_v20  ;;  %v5129_v49 = vshrl.u32 %v4450_v35, 16  ;;  %v4453_v61 = vld [vmem:[#allocation2 + $0x228] sm:$0xf]  ;;  %v5132_v2 = vshll.u32 %v4450_v35, 16 }
 0x274   :  { %v14951_v41 = vpop.f32.mrf.mxu1  ;;  %v11660_v39 = vcombine.low %v5104_v0, %v5113_v59  ;;  %v3806_v9 = vrot.slane %v3805_v14, 4  ;;  %v5125_v12 = vor.u32 %v5123_v7, %v5122_v29  ;;  %v3801_v5 = vsel %vm14360_vm5, %v3796_v28, %v3800_v43  ;;  %v13460_v20 = vld [vmem:[#allocation2 + $0x14] sm:$0xf]  ;;  %v13461_v56 = vld [vmem:[#allocation2 + $0x18] sm:$0xf] }
 0x275   :  { %17958 = vst [vmem:[#allocation118_spill] sm:$0xff] %v14951_v41  ;;  %v5131_v62 = vrot.slane %v5129_v49, 7  ;;  %v11687_v34 = vcombine.low %v13460_v20, %v13461_v56  ;;  %v5127_v51 = vrot.slane %v5122_v29, 4  ;;  %v5137_v0 = vshrl.u32 %v4451_v26, 16  ;;  %v6314_v7 = vld [vmem:[#allocation2 + $0x14] sm:$0xf] }
 0x276   :  { %12841 = vmatmul.mubr.bf16.gmra.mxu0 %v11660_v39  ;;  %v14957_v11 = vpop.f32.mrf.mxu1  ;;  %v3811_v37 = vsel %vm14360_vm5, %v3806_v9, %v3810_v22  ;;  %v5142_v59 = vshrl.u32 %v4452_v31, 16  ;;  %v5126_v14 = vsel %vm13824_vm2, %v11613_v38, %v5125_v12  ;;  %v5151_v43 = vshrl.u32 %v4453_v61, 16  ;;  %v6315_v28 = vld [vmem:[#allocation2 + $0x18] sm:$0xf]  ;;  %v6316_v26 = vld [vmem:[#allocation2 + $0x1c] sm:$0x1] }
 0x277   :  { %17960 = vst [vmem:[#allocation120_spill] sm:$0xff] %v14957_v11  ;;  %v11574_v39 = vcombine.low %v3801_v5, %v3811_v37  ;;  %v11614_v35 = vrot.slane %v5137_v0, 11  ;;  %v5145_v41 = vshll.u32 %v4452_v31, 16  ;;  %v5154_v20 = vshll.u32 %v4453_v61, 16  ;;  %v13467_v19 = vld [vmem:[#allocation2 + $0x44] sm:$0xf] }
 0x278   :  { %v5144_v49 = vrot.slane %v5142_v59, 7  ;;  %v5153_v29 = vrot.slane %v5151_v43, 7  ;;  %v6411_v9 = vshrl.u32 %v6314_v7, 16  ;;  %v6414_v5 = vshll.u32 %v6314_v7, 16  ;;  %v6319_v43 = vld [vmem:[#allocation2 + $0x2c] sm:$0x1] }
 0x279   :  { %v14953_v24 = vpop.f32.mrf.mxu0  ;;  %12765 = vmatmul.mubr.bf16.gmra.mxu1 %v11574_v39  ;;  %v6424_v59 = vshrl.u32 %v6315_v28, 16  ;;  %v6430_v11 = vshll.u32 %v6316_v26, 16  ;;  %v13464_v26 = vld [vmem:[#allocation2 + $0x34] sm:$0xf] }
 0x27a   :  { %17959 = vst [vmem:[#allocation119_spill] sm:$0xff] %v14953_v24  ;;  %v5134_v24 = vor.u32 %v5132_v2, %v5131_v62  ;;  %12864 = vmatprep.mubr.bf16.mxu1 %v11687_v34  ;;  %v5147_v38 = vor.u32 %v5145_v41, %v5144_v49  ;;  %v5149_v62 = vrot.slane %v5144_v49, 4  ;;  %v6420_v2 = vshll.u32 %v6315_v28, 16  ;;  %v13462_v28 = vld [vmem:[#allocation2 + $0x24] sm:$0xf] }
 0x27b   :  { %v14963_v56 = vpop.f32.mrf.mxu0  ;;  %v5156_v0 = vor.u32 %v5154_v20, %v5153_v29  ;;  %v6413_v31 = vrot.slane %v6411_v9, 4  ;;  %v6416_v61 = vrot.slane %v6414_v5, 5  ;;  %v6426_v41 = vrot.slane %v6424_v59, 4  ;;  %v13465_v9 = vld [vmem:[#allocation2 + $0x38] sm:$0xf] }
 0x27c   :  { %17961 = vst [vmem:[#allocation121_spill] sm:$0xff] %v14963_v56  ;;  %v5135_v22 = vsel %vm13824_vm2, %v5127_v51, %v5134_v24  ;;  %v6422_v39 = vrot.slane %v6420_v2, 5  ;;  %v6317_v56 = vld [vmem:[#allocation2 + $0x24] sm:$0xf]  ;;  %v5148_v51 = vsel %vm13824_vm2, %v11614_v35, %v5147_v38  ;;  %v11689_v5 = vcombine.low %v13464_v26, %v13465_v9  ;;  %v6320_v38 = vld [vmem:[#allocation2 + $0x34] sm:$0xf] }
 0x27d   :  { %v11661_v12 = vcombine.low %v5126_v14, %v5135_v22  ;;  %v14969_v24 = vpop.f32.mrf.mxu0  ;;  %v5157_v7 = vsel %vm13824_vm2, %v5149_v62, %v5156_v0  ;;  %v6417_v34 = vor.u32 %v6416_v61, %v6413_v31  ;;  %v6318_v14 = vld [vmem:[#allocation2 + $0x28] sm:$0xf]  ;;  %v6435_v35 = vshrl.u32 %v6317_v56, 16  ;;  %v13375_v62 = vld [vmem:[%s17831_s2 + $0x1b0] sm:$0xff]   ;;  %v6322_v26 = vld [vmem:[#allocation2 + $0x3c] sm:$0x1] }
 0x27e   :  { %17963 = vst [vmem:[#allocation123_spill] sm:$0xff] %v14969_v24  ;;  %v11662_v20 = vcombine.low %v5148_v51, %v5157_v7  ;;  %v13463_v22 = vld [vmem:[#allocation2 + $0x28] sm:$0xf]  ;;  %v6427_v2 = vor.u32 %v6426_v41, %v6422_v39  ;;  %v6432_v24 = vrot.slane %v6430_v11, 5  ;;  %v6438_v0 = vshll.u32 %v6317_v56, 16 }
 0x27f   :  { %v14967_v37 = vpop.f32.mrf.mxu1  ;;  %12844 = vmatprep.mubr.bf16.mxu0 %v11661_v12  ;;  %v11688_v29 = vcombine.low %v13462_v28, %v13463_v22  ;;  %v6418_v12 = vrot.slane %v6417_v34, 4  ;;  %v6444_v31 = vshll.u32 %v6318_v14, 16  ;;  %v6448_v61 = vshrl.u32 %v6318_v14, 16  ;;  %v6321_v51 = vld [vmem:[#allocation2 + $0x38] sm:$0xf]  ;;  %v14980_v7 = vpop.f32.mrf.mxu0 }
 0x280   :  { %17962 = vst [vmem:[#allocation122_spill] sm:$0xff] %v14967_v37  ;;  %12845 = vmatmul.mubr.bf16.gmra.mxu0 %v11662_v20  ;;  %v6454_v59 = vshll.u32 %v6319_v43, 16  ;;  %17965 = vst [vmem:[#allocation125_spill] sm:$0xff] %v14980_v7  ;;  %v6428_v41 = vrot.slane %v6427_v2, 4  ;;  %v6437_v11 = vrot.slane %v6435_v35, 4  ;;  %v13466_v22 = vld [vmem:[%s17831_s2 + $0x1b8] sm:$0xff]  }
 0x281   :  { %v14975_v49 = vpop.f32.mrf.mxu1  ;;  %12865 = vmatmul.mubr.bf16.vlgmr.msra.gmra.mxu1 %v11688_v29  ;;  %v6423_v34 = vsel %vm14360_vm5, %v6418_v12, %v6422_v39  ;;  %v6440_v56 = vrot.slane %v6438_v0, 5  ;;  %v6446_v14 = vrot.slane %v6444_v31, 5  ;;  %v6450_v43 = vrot.slane %v6448_v61, 4  ;;  %v13380_v2 = vld [vmem:[%s17831_s2 + $0x1a8] sm:$0xff]   ;;  %v6323_v37 = vld [vmem:[#allocation2 + $0x44] sm:$0xf] }
 0x282   :  { %17964 = vst [vmem:[#allocation124_spill] sm:$0xff] %v14975_v49  ;;  %13009 = vmatpush3.bf16.msra.mxu1 %v13466_v22  ;;  %12868 = vmatprep.mubr.bf16.mxu1 %v11689_v5  ;;  %v6456_v20 = vrot.slane %v6454_v59, 5  ;;  %v6433_v29 = vsel %vm14360_vm5, %v6428_v41, %v6432_v24  ;;  %v6459_v9 = vshrl.u32 %v6320_v38, 16  ;;  %v6462_v39 = vshll.u32 %v6320_v38, 16 }
 0x283   :  { %v14984_v28 = vpop.f32.mrf.mxu1  ;;  %v6468_v12 = vshll.u32 %v6321_v51, 16  ;;  %13010 = vmatprep.subr.bf16.mxu1 %v13375_v62  ;;  %v11743_v35 = vcombine.low %v6423_v34, %v6433_v29  ;;  %v6441_v7 = vor.u32 %v6440_v56, %v6437_v11  ;;  %v6451_v22 = vor.u32 %v6450_v43, %v6446_v14  ;;  %v13385_v43 = vld [vmem:[%s17831_s2 + $0x1a0] sm:$0xff]  }
 0x284   :  { %17966 = vst [vmem:[#allocation126_spill] sm:$0xff] %v14984_v28  ;;  %v6472_v5 = vshrl.u32 %v6321_v51, 16  ;;  %v6461_v31 = vrot.slane %v6459_v9, 4  ;;  %v6464_v61 = vrot.slane %v6462_v39, 5  ;;  %v6478_v28 = vshll.u32 %v6322_v26, 16 }
 0x285   :  { %v6470_v59 = vrot.slane %v6468_v12, 5  ;;  %v14996_v49 = vpop.f32.mrf.mxu1  ;;  %12944 = vmatprep.mubr.bf16.mxu0 %v11743_v35  ;;  %v6442_v24 = vrot.slane %v6441_v7, 4  ;;  %v6452_v38 = vrot.slane %v6451_v22, 4  ;;  %v11690_v34 = vcombine.low %v13467_v19, %v13468_v8  ;;  %v6324_v51 = vld [vmem:[#allocation2 + $0x48] sm:$0xf]  ;;  %v13403_v19 = vld [vmem:[%s17831_s2 + $0x1f8] sm:$0xff]  }
 0x286   :  { %17967 = vst [vmem:[#allocation127_spill] sm:$0xff] %v14996_v49  ;;  %v6474_v41 = vrot.slane %v6472_v5, 4  ;;  %13011 = vmatpush3.bf16.msra.mxu1 %v13375_v62  ;;  %v6465_v11 = vor.u32 %v6464_v61, %v6461_v31  ;;  %v6480_v56 = vrot.slane %v6478_v28, 5  ;;  %v13469_v9 = vld [vmem:[#allocation2 + $0x54] sm:$0xf]  ;;  %v6483_v22 = vshrl.u32 %v6323_v37, 16  ;;  %13088 = vmatprep.subr.bf16.mxu0 %v13403_v19 }
 0x287   :  { %13012 = vmatprep.subr.bf16.mxu1 %v13380_v2  ;;  %v6447_v26 = vsel %vm14360_vm5, %v6442_v24, %v6446_v14  ;;  %v6457_v7 = vsel %vm14360_vm5, %v6452_v38, %v6456_v20  ;;  %v13470_v62 = vld [vmem:[#allocation2 + $0x58] sm:$0xf]  ;;  %v6325_v12 = vld [vmem:[#allocation2 + $0x4c] sm:$0x1]  ;;  %v6486_v20 = vshll.u32 %v6323_v37, 16  ;;  %v6492_v31 = vshll.u32 %v6324_v51, 16 }
 0x288   :  { %v6475_v29 = vor.u32 %v6474_v41, %v6470_v59  ;;  %v11691_v39 = vcombine.low %v13469_v9, %v13470_v62  ;;  %v11744_v28 = vcombine.low %v6447_v26, %v6457_v7  ;;  %v6466_v35 = vrot.slane %v6465_v11, 4  ;;  %v6326_v24 = vld [vmem:[#allocation2 + $0x54] sm:$0xf]  ;;  %v6327_v62 = vld [vmem:[#allocation2 + $0x58] sm:$0xf] }
 0x289   :  { %v14994_v0 = vpop.f32.mrf.mxu0  ;;  %12869 = vmatmul.mubr.bf16.gmra.mxu1 %v11690_v34  ;;  %v6496_v61 = vshrl.u32 %v6324_v51, 16  ;;  %v6485_v41 = vrot.slane %v6483_v22, 4  ;;  %v6502_v9 = vshll.u32 %v6325_v12, 16  ;;  %v13390_v34 = vld [vmem:[%s17831_s2 + $0x198] sm:$0xff]   ;;  %v6488_v37 = vrot.slane %v6486_v20, 5 }
 0x28a   :  { %v6476_v14 = vrot.slane %v6475_v29, 4  ;;  %12872 = vmatprep.mubr.bf16.mxu1 %v11691_v39  ;;  %13013 = vmatpush3.bf16.msra.mxu1 %v13380_v2  ;;  %v6471_v38 = vsel %vm14360_vm5, %v6466_v35, %v6470_v59  ;;  %v6494_v26 = vrot.slane %v6492_v31, 5  ;;  %v6328_v7 = vld [vmem:[#allocation2 + $0x5c] sm:$0x1]  ;;  %v6507_v39 = vshrl.u32 %v6326_v24, 16  ;;  %v13406_v35 = vld [vmem:[%s17831_s2 + $0x1f0] sm:$0xff]  }
 0x28b   :  { %v15005_v8 = vpop.f32.mrf.mxu0  ;;  %12945 = vmatmul.mubr.bf16.vlgmr.msra.gmra.mxu0 %v11744_v28  ;;  %13014 = vmatprep.subr.bf16.mxu1 %v13385_v43  ;;  %v6498_v51 = vrot.slane %v6496_v61, 4  ;;  %v6504_v59 = vrot.slane %v6502_v9, 5  ;;  %v6510_v12 = vshll.u32 %v6326_v24, 16  ;;  %v6489_v22 = vor.u32 %v6488_v37, %v6485_v41  ;;  %v13471_v31 = vld [vmem:[#allocation2 + $0x64] sm:$0xf] }
 0x28c   :  { %17968 = vst [vmem:[#allocation128_spill] sm:$0xff] %v15005_v8  ;;  %v6481_v11 = vsel %vm14360_vm5, %v6476_v14, %v6480_v56  ;;  %13089 = vmatpush3.bf16.msra.mxu0 %v13403_v19  ;;  %v6516_v14 = vshll.u32 %v6327_v62, 16  ;;  %v6520_v20 = vshrl.u32 %v6327_v62, 16  ;;  %v13472_v61 = vld [vmem:[#allocation2 + $0x68] sm:$0xf]  ;;  %v13395_v19 = vld [vmem:[%s17831_s2 + $0x190] sm:$0xff]  }
 0x28d   :  { %v15019_v2 = vpop.f32.mrf.mxu0  ;;  %v11745_v29 = vcombine.low %v6471_v38, %v6481_v11  ;;  %v6499_v56 = vor.u32 %v6498_v51, %v6494_v26  ;;  %v11692_v49 = vcombine.low %v13471_v31, %v13472_v61  ;;  %v6509_v38 = vrot.slane %v6507_v39, 4  ;;  %v6329_v37 = vld [vmem:[#allocation2 + $0x64] sm:$0xf]  ;;  %13090 = vmatprep.subr.bf16.mxu0 %v13406_v35  ;;  %v13473_v62 = vld [vmem:[#allocation2 + $0x74] sm:$0xf] }
 0x28e   :  { %v15010_v5 = vpop.f32.mrf.mxu1  ;;  %17969 = vst [vmem:[#allocation129_spill] sm:$0xff] %v15019_v2  ;;  %13015 = vmatpush3.bf16.msra.mxu1 %v13385_v43  ;;  %v6512_v9 = vrot.slane %v6510_v12, 5  ;;  %v6526_v11 = vshll.u32 %v6328_v7, 16  ;;  %v6490_v24 = vrot.slane %v6489_v22, 4  ;;  %v6522_v41 = vrot.slane %v6520_v20, 4 }
 0x28f   :  { %12948 = vmatprep.mubr.bf16.mxu0 %v11745_v29  ;;  %13016 = vmatprep.subr.bf16.mxu1 %v13390_v34  ;;  %v6500_v2 = vrot.slane %v6499_v56, 4  ;;  %v15029_v51 = vpop.f32.mrf.mxu0  ;;  %v13474_v29 = vld [vmem:[#allocation2 + $0x78] sm:$0xf]  ;;  %v6330_v12 = vld [vmem:[#allocation2 + $0x68] sm:$0xf] }
 0x290   :  { %v15021_v28 = vpop.f32.mrf.mxu1  ;;  %17971 = vst [vmem:[#allocation131_spill] sm:$0xff] %v15029_v51  ;;  %v6513_v43 = vor.u32 %v6512_v9, %v6509_v38  ;;  %v11693_v39 = vcombine.low %v13473_v62, %v13474_v29  ;;  %13091 = vmatpush3.bf16.msra.mxu0 %v13406_v35  ;;  %v6495_v31 = vsel %vm14360_vm5, %v6490_v24, %v6494_v26  ;;  %v6331_v20 = vld [vmem:[#allocation2 + $0x6c] sm:$0x1]  ;;  %v6531_v38 = vshrl.u32 %v6329_v37, 16  ;;  %v13475_v29 = vld [vmem:[#allocation2 + $0x84] sm:$0xf] }
 0x291   :  { %17970 = vst [vmem:[#allocation130_spill] sm:$0xff] %v15021_v28  ;;  %v6518_v28 = vrot.slane %v6516_v14, 5  ;;  %12873 = vmatmul.mubr.bf16.gmra.mxu1 %v11692_v49  ;;  %v6505_v22 = vsel %vm14360_vm5, %v6500_v2, %v6504_v59  ;;  %v6528_v14 = vrot.slane %v6526_v11, 5  ;;  %v13400_v9 = vld [vmem:[%s17831_s2 + $0x188] sm:$0xff]   ;;  %v6534_v24 = vshll.u32 %v6329_v37, 16 }
 0x292   :  { %v15031_v7 = vpop.f32.mrf.mxu1  ;;  %13017 = vmatpush3.bf16.msra.mxu1 %v13390_v34  ;;  %v11746_v61 = vcombine.low %v6495_v31, %v6505_v22  ;;  %v6514_v49 = vrot.slane %v6513_v43, 4  ;;  %12876 = vmatprep.mubr.bf16.mxu1 %v11693_v39  ;;  %v13408_v26 = vld [vmem:[%s17831_s2 + $0x1e8] sm:$0xff]   ;;  %v6540_v2 = vshll.u32 %v6330_v12, 16  ;;  %v6544_v59 = vshrl.u32 %v6330_v12, 16  ;;  %v6332_v11 = vld [vmem:[#allocation2 + $0x74] sm:$0xf] }
 0x293   :  { %17972 = vst [vmem:[#allocation132_spill] sm:$0xff] %v15031_v7  ;;  %v6523_v56 = vor.u32 %v6522_v41, %v6518_v28  ;;  %13018 = vmatprep.subr.bf16.mxu1 %v13395_v19  ;;  %v6533_v43 = vrot.slane %v6531_v38, 4  ;;  %v6550_v62 = vshll.u32 %v6331_v20, 16  ;;  %v13476_v39 = vld [vmem:[#allocation2 + $0x88] sm:$0xf]  ;;  %13092 = vmatprep.subr.bf16.mxu0 %v13408_v26  ;;  %v6536_v12 = vrot.slane %v6534_v24, 5 }
 0x294   :  { %12949 = vmatmul.mubr.bf16.gmra.mxu0 %v11746_v61  ;;  %v6519_v34 = vsel %vm14360_vm5, %v6514_v49, %v6518_v28  ;;  %v11694_v31 = vcombine.low %v13475_v29, %v13476_v39  ;;  %v6333_v22 = vld [vmem:[#allocation2 + $0x78] sm:$0xf]  ;;  %v15047_v51 = vpop.f32.mrf.mxu1  ;;  %v6546_v7 = vrot.slane %v6544_v59, 4  ;;  %v6555_v49 = vshrl.u32 %v6332_v11, 16  ;;  %v13407_v38 = vld [vmem:[%s17831_s2 + $0x180] sm:$0xff]  }
 0x295   :  { %v6524_v35 = vrot.slane %v6523_v56, 4  ;;  %17974 = vst [vmem:[#allocation134_spill] sm:$0xff] %v15047_v51  ;;  %v6542_v56 = vrot.slane %v6540_v2, 5  ;;  %13093 = vmatpush3.bf16.msra.mxu0 %v13408_v26  ;;  %v6552_v28 = vrot.slane %v6550_v62, 5  ;;  %v6558_v20 = vshll.u32 %v6332_v11, 16 }
 0x296   :  { %13019 = vmatpush3.bf16.msra.mxu1 %v13395_v19  ;;  %v6537_v29 = vor.u32 %v6536_v12, %v6533_v43  ;;  %v6564_v51 = vshll.u32 %v6333_v22, 16  ;;  %v6568_v8 = vshrl.u32 %v6333_v22, 16  ;;  %v13411_v19 = vld [vmem:[%s17831_s2 + $0x1e0] sm:$0xff]   ;;  %v6557_v26 = vrot.slane %v6555_v49, 4  ;;  %v13477_v22 = vld [vmem:[#allocation2 + $0x94] sm:$0xf] }
 0x297   :  { %v6529_v37 = vsel %vm14360_vm5, %v6524_v35, %v6528_v14  ;;  %13020 = vmatprep.subr.bf16.mxu1 %v13400_v9  ;;  %v6547_v39 = vor.u32 %v6546_v7, %v6542_v56  ;;  %v6560_v35 = vrot.slane %v6558_v20, 5  ;;  %v6335_v7 = vld [vmem:[#allocation2 + $0x84] sm:$0xf]  ;;  %13094 = vmatprep.subr.bf16.mxu0 %v13411_v19 }
 0x298   :  { %v11747_v61 = vcombine.low %v6519_v34, %v6529_v37  ;;  %v6538_v59 = vrot.slane %v6537_v29, 4  ;;  %v6566_v34 = vrot.slane %v6564_v51, 5  ;;  %v6570_v43 = vrot.slane %v6568_v8, 4  ;;  %v13478_v37 = vld [vmem:[#allocation2 + $0x98] sm:$0xf] }
 0x299   :  { %v15043_v41 = vpop.f32.mrf.mxu0  ;;  %12877 = vmatmul.mubr.bf16.gmra.mxu1 %v11694_v31  ;;  %v6548_v11 = vrot.slane %v6547_v39, 4  ;;  %v6561_v62 = vor.u32 %v6560_v35, %v6557_v26  ;;  %v11695_v12 = vcombine.low %v13477_v22, %v13478_v37  ;;  %13095 = vmatpush3.bf16.msra.mxu0 %v13411_v19  ;;  %v6337_v51 = vld [vmem:[#allocation2 + $0x8c] sm:$0x1]  ;;  %v6579_v29 = vshrl.u32 %v6335_v7, 16  ;;  %v6338_v39 = vld [vmem:[#allocation2 + $0x94] sm:$0xf] }
 0x29a   :  { %17973 = vst [vmem:[#allocation133_spill] sm:$0xff] %v15043_v41  ;;  %v6334_v41 = vld [vmem:[#allocation2 + $0x7c] sm:$0x1]  ;;  %12952 = vmatprep.mubr.bf16.mxu0 %v11747_v61  ;;  %13021 = vmatpush3.bf16.msra.mxu1 %v13400_v9  ;;  %v6543_v31 = vsel %vm14360_vm5, %v6538_v59, %v6542_v56  ;;  %v6571_v61 = vor.u32 %v6570_v43, %v6566_v34  ;;  %v6582_v19 = vshll.u32 %v6335_v7, 16  ;;  %v6598_v59 = vshll.u32 %v6337_v51, 16 }
 0x29b   :  { %v15054_v14 = vpop.f32.mrf.mxu0  ;;  %v6574_v24 = vshll.u32 %v6334_v41, 16  ;;  %13022 = vmatprep.subr.bf16.mxu1 %v13407_v38  ;;  %v6553_v41 = vsel %vm14360_vm5, %v6548_v11, %v6552_v28  ;;  %v6562_v20 = vrot.slane %v6561_v62, 4  ;;  %12880 = vmatprep.mubr.bf16.mxu1 %v11695_v12  ;;  %v13412_v56 = vld [vmem:[%s17831_s2 + $0x1d8] sm:$0xff]   ;;  %v13479_v11 = vld [vmem:[#allocation2 + $0xa4] sm:$0xf] }
 0x29c   :  { %17975 = vst [vmem:[#allocation135_spill] sm:$0xff] %v15054_v14  ;;  %v6336_v14 = vld [vmem:[#allocation2 + $0x88] sm:$0xf]  ;;  %v11748_v9 = vcombine.low %v6543_v31, %v6553_v41  ;;  %v6572_v35 = vrot.slane %v6571_v61, 4  ;;  %v6339_v12 = vld [vmem:[#allocation2 + $0x98] sm:$0xf]  ;;  %13096 = vmatprep.subr.bf16.mxu0 %v13412_v56 }
 0x29d   :  { %v6576_v49 = vrot.slane %v6574_v24, 5  ;;  %v15065_v8 = vpop.f32.mrf.mxu0  ;;  %v6588_v22 = vshll.u32 %v6336_v14, 16  ;;  %v6592_v37 = vshrl.u32 %v6336_v14, 16  ;;  %v6567_v28 = vsel %vm14360_vm5, %v6562_v20, %v6566_v34  ;;  %v13480_v43 = vld [vmem:[#allocation2 + $0xa8] sm:$0xf]  ;;  %13097 = vmatpush3.bf16.msra.mxu0 %v13412_v56 }
 0x29e   :  { %v15059_v2 = vpop.f32.mrf.mxu1  ;;  %17977 = vst [vmem:[#allocation137_spill] sm:$0xff] %v15065_v8  ;;  %13023 = vmatpush3.bf16.msra.mxu1 %v13407_v38  ;;  %12953 = vmatmul.mubr.bf16.gmra.mxu0 %v11748_v9  ;;  %v6581_v24 = vrot.slane %v6579_v29, 4  ;;  %v11696_v62 = vcombine.low %v13479_v11, %v13480_v43  ;;  %v6584_v31 = vrot.slane %v6582_v19, 5  ;;  %v6340_v41 = vld [vmem:[#allocation2 + $0x9c] sm:$0x1]  ;;  %v6600_v8 = vrot.slane %v6598_v59, 5 }
 0x29f   :  { %17976 = vst [vmem:[#allocation136_spill] sm:$0xff] %v15059_v2  ;;  %v6577_v7 = vsel %vm14360_vm5, %v6572_v35, %v6576_v49  ;;  %v6590_v14 = vrot.slane %v6588_v22, 5  ;;  %v6594_v38 = vrot.slane %v6592_v37, 4  ;;  %v15076_v61 = vpop.f32.mrf.mxu0  ;;  %v6603_v34 = vshrl.u32 %v6338_v39, 16  ;;  %v6342_v56 = vld [vmem:[#allocation2 + $0xa8] sm:$0xf] }
 0x2a0   :  { %v15067_v26 = vpop.f32.mrf.mxu1  ;;  %17979 = vst [vmem:[#allocation139_spill] sm:$0xff] %v15076_v61  ;;  %v11749_v9 = vcombine.low %v6567_v28, %v6577_v7  ;;  %v6606_v20 = vshll.u32 %v6338_v39, 16  ;;  %v6585_v29 = vor.u32 %v6584_v31, %v6581_v24  ;;  %v6612_v43 = vshll.u32 %v6339_v12, 16  ;;  %v6341_v28 = vld [vmem:[#allocation2 + $0xa4] sm:$0xf] }
 0x2a1   :  { %17978 = vst [vmem:[#allocation138_spill] sm:$0xff] %v15067_v26  ;;  %12881 = vmatmul.mubr.bf16.gmra.mxu1 %v11696_v62  ;;  %v6595_v11 = vor.u32 %v6594_v38, %v6590_v14  ;;  %v6616_v26 = vshrl.u32 %v6339_v12, 16  ;;  %v6605_v49 = vrot.slane %v6603_v34, 4  ;;  %v6622_v19 = vshll.u32 %v6340_v41, 16  ;;  %v13481_v39 = vld [vmem:[#allocation2 + $0xb4] sm:$0xf] }
 0x2a2   :  { %v15078_v51 = vpop.f32.mrf.mxu1  ;;  %12956 = vmatprep.mubr.bf16.mxu0 %v11749_v9  ;;  %v6608_v35 = vrot.slane %v6606_v20, 5  ;;  %v6586_v22 = vrot.slane %v6585_v29, 4  ;;  %v6614_v61 = vrot.slane %v6612_v43, 5  ;;  %v13482_v7 = vld [vmem:[#allocation2 + $0xb8] sm:$0xf]  ;;  %v6627_v29 = vshrl.u32 %v6341_v28, 16 }
 0x2a3   :  { %17980 = vst [vmem:[#allocation140_spill] sm:$0xff] %v15078_v51  ;;  %v6596_v37 = vrot.slane %v6595_v11, 4  ;;  %v6618_v2 = vrot.slane %v6616_v26, 4  ;;  %v11697_v51 = vcombine.low %v13481_v39, %v13482_v7  ;;  %v6624_v41 = vrot.slane %v6622_v19, 5  ;;  %v6343_v9 = vld [vmem:[#allocation2 + $0xac] sm:$0x1] }
 0x2a4   :  { %v6609_v62 = vor.u32 %v6608_v35, %v6605_v49  ;;  %v15082_v24 = vpop.f32.mrf.mxu1  ;;  %v6591_v12 = vsel %vm14360_vm5, %v6586_v22, %v6590_v14  ;;  %v13414_v26 = vld [vmem:[%s17831_s2 + $0x1d0] sm:$0xff]   ;;  %v6630_v43 = vshll.u32 %v6341_v28, 16  ;;  %v6636_v49 = vshll.u32 %v6342_v56, 16  ;;  %v13483_v22 = vld [vmem:[#allocation2 + $0xc4] sm:$0xf] }
 0x2a5   :  { %17982 = vst [vmem:[#allocation142_spill] sm:$0xff] %v15082_v24  ;;  %v6601_v31 = vsel %vm14360_vm5, %v6596_v37, %v6600_v8  ;;  %v6619_v38 = vor.u32 %v6618_v2, %v6614_v61  ;;  %12884 = vmatprep.mubr.bf16.mxu1 %v11697_v51  ;;  %v6640_v35 = vshrl.u32 %v6342_v56, 16  ;;  %v6344_v39 = vld [vmem:[#allocation2 + $0xb4] sm:$0xf]  ;;  %13098 = vmatprep.subr.bf16.mxu0 %v13414_v26  ;;  %v6629_v8 = vrot.slane %v6627_v29, 4 }
 0x2a6   :  { %v11750_v34 = vcombine.low %v6591_v12, %v6601_v31  ;;  %v6610_v20 = vrot.slane %v6609_v62, 4  ;;  %v6646_v19 = vshll.u32 %v6343_v9, 16  ;;  %v13484_v37 = vld [vmem:[#allocation2 + $0xc8] sm:$0xf]  ;;  %v6345_v62 = vld [vmem:[#allocation2 + $0xb8] sm:$0xf]  ;;  %13099 = vmatpush3.bf16.msra.mxu0 %v13414_v26 }
 0x2a7   :  { %v6620_v11 = vrot.slane %v6619_v38, 4  ;;  %v11698_v7 = vcombine.low %v13483_v22, %v13484_v37  ;;  %v6632_v56 = vrot.slane %v6630_v43, 5  ;;  %v6638_v12 = vrot.slane %v6636_v49, 5  ;;  %v6346_v38 = vld [vmem:[#allocation2 + $0xbc] sm:$0x1]  ;;  %v13415_v26 = vld [vmem:[%s17831_s2 + $0x1c8] sm:$0xff]  }
 0x2a8   :  { %12957 = vmatmul.mubr.bf16.gmra.mxu0 %v11750_v34  ;;  %v6615_v2 = vsel %vm14360_vm5, %v6610_v20, %v6614_v61  ;;  %v6642_v31 = vrot.slane %v6640_v35, 4  ;;  %v6648_v24 = vrot.slane %v6646_v19, 5  ;;  %v6651_v61 = vshrl.u32 %v6344_v39, 16  ;;  %v13416_v43 = vld [vmem:[%s17831_s2 + $0x238] sm:$0xff]   ;;  %13100 = vmatprep.subr.bf16.mxu0 %v13415_v26 }
 0x2a9   :  { %v15080_v59 = vpop.f32.mrf.mxu0  ;;  %v6625_v28 = vsel %vm14360_vm5, %v6620_v11, %v6624_v41  ;;  %12885 = vmatmul.mubr.bf16.gmra.mxu1 %v11698_v7  ;;  %v6654_v20 = vshll.u32 %v6344_v39, 16  ;;  %v6633_v9 = vor.u32 %v6632_v56, %v6629_v8  ;;  %v6664_v22 = vshrl.u32 %v6345_v62, 16  ;;  %v6347_v8 = vld [vmem:[#allocation2 + $0xc4] sm:$0xf]  ;;  %v13485_v7 = vld [vmem:[#allocation2 + $0xd4] sm:$0xf]  ;;  %13168 = vmatprep.subr.bf16.mxu1 %v13416_v43 }
 0x2aa   :  { %17981 = vst [vmem:[#allocation141_spill] sm:$0xff] %v15080_v59  ;;  %v11751_v34 = vcombine.low %v6615_v2, %v6625_v28  ;;  %v6643_v29 = vor.u32 %v6642_v31, %v6638_v12  ;;  %v6670_v41 = vshll.u32 %v6346_v38, 16  ;;  %v6348_v56 = vld [vmem:[#allocation2 + $0xc8] sm:$0xf]  ;;  %13101 = vmatpush3.bf16.msra.mxu0 %v13415_v26  ;;  %v6678_v43 = vshll.u32 %v6347_v8, 16 }
 0x2ab   :  { %v15091_v14 = vpop.f32.mrf.mxu0  ;;  %v6656_v59 = vrot.slane %v6654_v20, 5  ;;  %v6634_v49 = vrot.slane %v6633_v9, 4  ;;  %v6666_v2 = vrot.slane %v6664_v22, 4  ;;  %v6349_v20 = vld [vmem:[#allocation2 + $0xcc] sm:$0x1] }
 0x2ac   :  { %17983 = vst [vmem:[#allocation143_spill] sm:$0xff] %v15091_v14  ;;  %v6660_v14 = vshll.u32 %v6345_v62, 16  ;;  %12960 = vmatprep.mubr.bf16.mxu0 %v11751_v34  ;;  %v6644_v35 = vrot.slane %v6643_v29, 4  ;;  %v13486_v62 = vld [vmem:[#allocation2 + $0xd8] sm:$0xf] }
 0x2ad   :  { %v15099_v37 = vpop.f32.mrf.mxu0  ;;  %v11699_v28 = vcombine.low %v13485_v7, %v13486_v62  ;;  %v6639_v31 = vsel %vm14360_vm5, %v6634_v49, %v6638_v12  ;;  %v6684_v7 = vshll.u32 %v6348_v56, 16  ;;  %v6688_v62 = vshrl.u32 %v6348_v56, 16  ;;  %v6350_v12 = vld [vmem:[#allocation2 + $0xd4] sm:$0xf] }
 0x2ae   :  { %17985 = vst [vmem:[#allocation145_spill] sm:$0xff] %v15099_v37  ;;  %v6662_v39 = vrot.slane %v6660_v14, 5  ;;  %v6649_v38 = vsel %vm14360_vm5, %v6644_v35, %v6648_v24  ;;  %v6694_v49 = vshll.u32 %v6349_v20, 16  ;;  %v13487_v35 = vld [vmem:[#allocation2 + $0xe4] sm:$0xf]  ;;  %v6699_v20 = vshrl.u32 %v6350_v12, 16 }
 0x2af   :  { %v15095_v51 = vpop.f32.mrf.mxu1  ;;  %v15113_v9 = vpop.f32.mrf.mxu0  ;;  %v11752_v14 = vcombine.low %v6639_v31, %v6649_v38  ;;  %12888 = vmatprep.mubr.bf16.mxu1 %v11699_v28  ;;  %v6351_v31 = vld [vmem:[#allocation2 + $0xd8] sm:$0xf]  ;;  %v6680_v28 = vrot.slane %v6678_v43, 5  ;;  %v6686_v56 = vrot.slane %v6684_v7, 5  ;;  %v6690_v38 = vrot.slane %v6688_v62, 4 }
 0x2b0   :  { %17984 = vst [vmem:[#allocation144_spill] sm:$0xff] %v15095_v51  ;;  %v6653_v51 = vrot.slane %v6651_v61, 4  ;;  %v6667_v34 = vor.u32 %v6666_v2, %v6662_v39  ;;  %v6672_v61 = vrot.slane %v6670_v41, 5  ;;  %17987 = vst [vmem:[#allocation147_spill] sm:$0xff] %v15113_v9  ;;  %v13488_v2 = vld [vmem:[#allocation2 + $0xe8] sm:$0xf] }
 0x2b1   :  { %v15101_v11 = vpop.f32.mrf.mxu1  ;;  %12961 = vmatmul.mubr.bf16.gmra.mxu0 %v11752_v14  ;;  %v11700_v26 = vcombine.low %v13487_v35, %v13488_v2  ;;  %v6691_v9 = vor.u32 %v6690_v38, %v6686_v56  ;;  %v6712_v37 = vshrl.u32 %v6351_v31, 16 }
 0x2b2   :  { %17986 = vst [vmem:[#allocation146_spill] sm:$0xff] %v15101_v11  ;;  %v6657_v19 = vor.u32 %v6656_v59, %v6653_v51  ;;  %v6675_v51 = vshrl.u32 %v6347_v8, 16  ;;  %v6668_v22 = vrot.slane %v6667_v34, 4  ;;  %v6352_v34 = vld [vmem:[#allocation2 + $0xdc] sm:$0x1] }
 0x2b3   :  { %v15115_v29 = vpop.f32.mrf.mxu1  ;;  %12889 = vmatmul.mubr.bf16.gmra.mxu1 %v11700_v26  ;;  %v6718_v43 = vshll.u32 %v6352_v34, 16  ;;  %v6692_v62 = vrot.slane %v6691_v9, 4 }
 0x2b4   :  { %v6658_v59 = vrot.slane %v6657_v19, 4  ;;  %17988 = vst [vmem:[#allocation148_spill] sm:$0xff] %v15115_v29  ;;  %v6677_v41 = vrot.slane %v6675_v51, 4  ;;  %v13418_v19 = vld [vmem:[%s17831_s2 + $0x1c0] sm:$0xff]   ;;  %v6673_v8 = vsel %vm14360_vm5, %v6668_v22, %v6672_v61  ;;  %v6702_v51 = vshll.u32 %v6350_v12, 16 }
 0x2b5   :  { %v15126_v35 = vpop.f32.mrf.mxu1  ;;  %13102 = vmatprep.subr.bf16.mxu0 %v13418_v19  ;;  %v6708_v29 = vshll.u32 %v6351_v31, 16  ;;  %v6701_v61 = vrot.slane %v6699_v20, 4  ;;  %v6720_v9 = vrot.slane %v6718_v43, 5  ;;  %v13492_v43 = vld [vmem:[#allocation2 + $0x108] sm:$0xf] }
 0x2b6   :  { %v6663_v24 = vsel %vm14360_vm5, %v6658_v59, %v6662_v39  ;;  %v6696_v59 = vrot.slane %v6694_v49, 5  ;;  %17990 = vst [vmem:[#allocation150_spill] sm:$0xff] %v15126_v35  ;;  %v6681_v2 = vor.u32 %v6680_v28, %v6677_v41  ;;  %13103 = vmatpush3.bf16.msra.mxu0 %v13418_v19  ;;  %v6704_v22 = vrot.slane %v6702_v51, 5  ;;  %v6353_v49 = vld [vmem:[#allocation2 + $0xe4] sm:$0xf] }
 0x2b7   :  { %v11753_v39 = vcombine.low %v6663_v24, %v6673_v8  ;;  %v6714_v24 = vrot.slane %v6712_v37, 4  ;;  %v13489_v8 = vld [vmem:[#allocation2 + $0xf4] sm:$0xf]  ;;  %v13490_v35 = vld [vmem:[#allocation2 + $0xf8] sm:$0xf]  ;;  %v6726_v51 = vshll.u32 %v6353_v49, 16 }
 0x2b8   :  { %v15124_v14 = vpop.f32.mrf.mxu0  ;;  %v6682_v7 = vrot.slane %v6681_v2, 4  ;;  %v6705_v12 = vor.u32 %v6704_v22, %v6701_v61  ;;  %v11701_v11 = vcombine.low %v13489_v8, %v13490_v35  ;;  %v6354_v41 = vld [vmem:[#allocation2 + $0xe8] sm:$0xf]  ;;  %v6697_v19 = vsel %vm14360_vm5, %v6692_v62, %v6696_v59  ;;  %v6356_v61 = vld [vmem:[#allocation2 + $0xf4] sm:$0xf] }
 0x2b9   :  { %17989 = vst [vmem:[#allocation149_spill] sm:$0xff] %v15124_v14  ;;  %12964 = vmatprep.mubr.bf16.mxu0 %v11753_v39  ;;  %v6710_v14 = vrot.slane %v6708_v29, 5  ;;  %v6355_v29 = vld [vmem:[#allocation2 + $0xec] sm:$0x1]  ;;  %v6723_v39 = vshrl.u32 %v6353_v49, 16  ;;  %v6732_v2 = vshll.u32 %v6354_v41, 16 }
 0x2ba   :  { %v15128_v26 = vpop.f32.mrf.mxu0  ;;  %v6687_v31 = vsel %vm14360_vm5, %v6682_v7, %v6686_v56  ;;  %v6706_v34 = vrot.slane %v6705_v12, 4  ;;  %12892 = vmatprep.mubr.bf16.mxu1 %v11701_v11  ;;  %v6736_v35 = vshrl.u32 %v6354_v41, 16  ;;  %v6742_v59 = vshll.u32 %v6355_v29, 16  ;;  %v13491_v62 = vld [vmem:[#allocation2 + $0x104] sm:$0xf] }
 0x2bb   :  { %17991 = vst [vmem:[#allocation151_spill] sm:$0xff] %v15128_v26  ;;  %v6715_v38 = vor.u32 %v6714_v24, %v6710_v14  ;;  %v11754_v37 = vcombine.low %v6687_v31, %v6697_v19  ;;  %v6725_v7 = vrot.slane %v6723_v39, 4  ;;  %v11702_v24 = vcombine.low %v13491_v62, %v13492_v43  ;;  %v6357_v8 = vld [vmem:[#allocation2 + $0xf8] sm:$0xf]  ;;  %v6358_v19 = vld [vmem:[#allocation2 + $0xfc] sm:$0x1] }
 0x2bc   :  { %v15136_v22 = vpop.f32.mrf.mxu0  ;;  %v6711_v56 = vsel %vm14360_vm5, %v6706_v34, %v6710_v14  ;;  %v6728_v49 = vrot.slane %v6726_v51, 5  ;;  %v6734_v41 = vrot.slane %v6732_v2, 5  ;;  %v6738_v31 = vrot.slane %v6736_v35, 4 }
 0x2bd   :  { %v15130_v28 = vpop.f32.mrf.mxu1  ;;  %v6716_v20 = vrot.slane %v6715_v38, 4  ;;  %17993 = vst [vmem:[#allocation153_spill] sm:$0xff] %v15136_v22  ;;  %12965 = vmatmul.mubr.bf16.gmra.mxu0 %v11754_v37  ;;  %v6744_v37 = vrot.slane %v6742_v59, 5  ;;  %12893 = vmatmul.mubr.bf16.gmra.mxu1 %v11702_v24  ;;  %v6747_v22 = vshrl.u32 %v6356_v61, 16  ;;  %v6750_v14 = vshll.u32 %v6356_v61, 16 }
 0x2be   :  { %17992 = vst [vmem:[#allocation152_spill] sm:$0xff] %v15130_v28  ;;  %v6729_v34 = vor.u32 %v6728_v49, %v6725_v7  ;;  %v6739_v29 = vor.u32 %v6738_v31, %v6734_v41  ;;  %v6756_v39 = vshll.u32 %v6357_v8, 16  ;;  %v6760_v26 = vshrl.u32 %v6357_v8, 16  ;;  %v15144_v62 = vpop.f32.mrf.mxu0  ;;  %v13493_v24 = vld [vmem:[#allocation2 + $0x134] sm:$0xf] }
 0x2bf   :  { %v15140_v12 = vpop.f32.mrf.mxu1  ;;  %v6721_v11 = vsel %vm14360_vm5, %v6716_v20, %v6720_v9  ;;  %17995 = vst [vmem:[#allocation155_spill] sm:$0xff] %v15144_v62  ;;  %v6749_v43 = vrot.slane %v6747_v22, 4  ;;  %v6766_v28 = vshll.u32 %v6358_v19, 16  ;;  %v13494_v61 = vld [vmem:[#allocation2 + $0x138] sm:$0xf] }
 0x2c0   :  { %17994 = vst [vmem:[#allocation154_spill] sm:$0xff] %v15140_v12  ;;  %v11755_v38 = vcombine.low %v6711_v56, %v6721_v11  ;;  %v6752_v12 = vrot.slane %v6750_v14, 5  ;;  %v6730_v20 = vrot.slane %v6729_v34, 4  ;;  %v6740_v51 = vrot.slane %v6739_v29, 4  ;;  %v6359_v56 = vld [vmem:[#allocation2 + $0x104] sm:$0xf] }
 0x2c1   :  { %v15146_v9 = vpop.f32.mrf.mxu1  ;;  %v6758_v2 = vrot.slane %v6756_v39, 5  ;;  %v6762_v35 = vrot.slane %v6760_v26, 4  ;;  %v11703_v7 = vcombine.low %v13493_v24, %v13494_v61  ;;  %v6360_v11 = vld [vmem:[#allocation2 + $0x108] sm:$0xf]  ;;  %v6768_v31 = vrot.slane %v6766_v28, 5 }
 0x2c2   :  { %12968 = vmatprep.mubr.bf16.mxu0 %v11755_v38  ;;  %17996 = vst [vmem:[#allocation156_spill] sm:$0xff] %v15146_v9  ;;  %v6753_v59 = vor.u32 %v6752_v12, %v6749_v43  ;;  %v6735_v8 = vsel %vm14360_vm5, %v6730_v20, %v6734_v41  ;;  %v6745_v22 = vsel %vm14360_vm5, %v6740_v51, %v6744_v37  ;;  %v6361_v19 = vld [vmem:[#allocation2 + $0x10c] sm:$0x1]  ;;  %v6771_v26 = vshrl.u32 %v6359_v56, 16  ;;  %v6362_v61 = vld [vmem:[#allocation2 + $0x134] sm:$0xf] }
 0x2c3   :  { %v6763_v49 = vor.u32 %v6762_v35, %v6758_v2  ;;  %v11756_v14 = vcombine.low %v6735_v8, %v6745_v22  ;;  %12896 = vmatprep.mubr.bf16.mxu1 %v11703_v7  ;;  %v15154_v12 = vpop.f32.mrf.mxu1  ;;  %v6774_v39 = vshll.u32 %v6359_v56, 16  ;;  %v6780_v43 = vshll.u32 %v6360_v11, 16  ;;  %v6363_v20 = vld [vmem:[#allocation2 + $0x138] sm:$0xf]  ;;  %v6364_v8 = vld [vmem:[#allocation2 + $0x13c] sm:$0x1] }
 0x2c4   :  { %v6754_v34 = vrot.slane %v6753_v59, 4  ;;  %17998 = vst [vmem:[#allocation158_spill] sm:$0xff] %v15154_v12  ;;  %v6784_v24 = vshrl.u32 %v6360_v11, 16  ;;  %v6773_v37 = vrot.slane %v6771_v26, 4  ;;  %v6790_v28 = vshll.u32 %v6361_v19, 16 }
 0x2c5   :  { %v6764_v29 = vrot.slane %v6763_v49, 4  ;;  %12969 = vmatmul.mubr.bf16.gmra.mxu0 %v11756_v14  ;;  %v6776_v35 = vrot.slane %v6774_v39, 5  ;;  %v6782_v59 = vrot.slane %v6780_v43, 5  ;;  %v13495_v11 = vld [vmem:[#allocation2 + $0x144] sm:$0xf]  ;;  %v6795_v62 = vshrl.u32 %v6362_v61, 16 }
 0x2c6   :  { %v6759_v41 = vsel %vm14360_vm5, %v6754_v34, %v6758_v2  ;;  %v6786_v7 = vrot.slane %v6784_v24, 4  ;;  %v6792_v49 = vrot.slane %v6790_v28, 5  ;;  %v13496_v12 = vld [vmem:[#allocation2 + $0x148] sm:$0xf]  ;;  %v6798_v34 = vshll.u32 %v6362_v61, 16 }
 0x2c7   :  { %v6769_v51 = vsel %vm14360_vm5, %v6764_v29, %v6768_v31  ;;  %v11704_v14 = vcombine.low %v13495_v11, %v13496_v12  ;;  %v6777_v2 = vor.u32 %v6776_v35, %v6773_v37  ;;  %v6804_v26 = vshll.u32 %v6363_v20, 16  ;;  %v13497_v12 = vld [vmem:[#allocation2 + $0x154] sm:$0xf]  ;;  %v13498_v11 = vld [vmem:[#allocation2 + $0x158] sm:$0xf] }
 0x2c8   :  { %v15152_v38 = vpop.f32.mrf.mxu0  ;;  %v11757_v56 = vcombine.low %v6759_v41, %v6769_v51  ;;  %v6787_v19 = vor.u32 %v6786_v7, %v6782_v59  ;;  %v6797_v31 = vrot.slane %v6795_v62, 4  ;;  %v6808_v29 = vshrl.u32 %v6363_v20, 16  ;;  %v6366_v35 = vld [vmem:[#allocation2 + $0x148] sm:$0xf] }
 0x2c9   :  { %17997 = vst [vmem:[#allocation157_spill] sm:$0xff] %v15152_v38  ;;  %12897 = vmatmul.mubr.bf16.gmra.mxu1 %v11704_v14  ;;  %v6814_v39 = vshll.u32 %v6364_v8, 16  ;;  %v6778_v43 = vrot.slane %v6777_v2, 4  ;;  %v6806_v41 = vrot.slane %v6804_v26, 5  ;;  %v11705_v9 = vcombine.low %v13497_v12, %v13498_v11  ;;  %v6367_v14 = vld [vmem:[#allocation2 + $0x14c] sm:$0x1] }
 0x2ca   :  { %v15160_v22 = vpop.f32.mrf.mxu0  ;;  %12972 = vmatprep.mubr.bf16.mxu0 %v11757_v56  ;;  %v6788_v24 = vrot.slane %v6787_v19, 4  ;;  %v6810_v51 = vrot.slane %v6808_v29, 4  ;;  %v6828_v12 = vshll.u32 %v6366_v35, 16  ;;  %v6832_v11 = vshrl.u32 %v6366_v35, 16  ;;  %v13500_v35 = vld [vmem:[#allocation2 + $0x168] sm:$0xf] }
 0x2cb   :  { %17999 = vst [vmem:[#allocation159_spill] sm:$0xff] %v15160_v22  ;;  %v6800_v22 = vrot.slane %v6798_v34, 5  ;;  %v6783_v61 = vsel %vm14360_vm5, %v6778_v43, %v6782_v59  ;;  %v6816_v56 = vrot.slane %v6814_v39, 5  ;;  %12900 = vmatprep.mubr.bf16.mxu1 %v11705_v9  ;;  %v6368_v59 = vld [vmem:[#allocation2 + $0x154] sm:$0xf] }
 0x2cc   :  { %v15164_v28 = vpop.f32.mrf.mxu0  ;;  %v6793_v62 = vsel %vm14360_vm5, %v6788_v24, %v6792_v49  ;;  %v6811_v8 = vor.u32 %v6810_v51, %v6806_v41  ;;  %v6369_v39 = vld [vmem:[#allocation2 + $0x158] sm:$0xf]  ;;  %v6830_v51 = vrot.slane %v6828_v12, 5 }
 0x2cd   :  { %v15162_v38 = vpop.f32.mrf.mxu1  ;;  %18001 = vst [vmem:[#allocation161_spill] sm:$0xff] %v15164_v28  ;;  %v6801_v20 = vor.u32 %v6800_v22, %v6797_v31  ;;  %v11758_v7 = vcombine.low %v6783_v61, %v6793_v62  ;;  %v6838_v31 = vshll.u32 %v6367_v14, 16  ;;  %v6834_v61 = vrot.slane %v6832_v11, 4  ;;  %v6370_v62 = vld [vmem:[#allocation2 + $0x15c] sm:$0x1] }
 0x2ce   :  { %18000 = vst [vmem:[#allocation160_spill] sm:$0xff] %v15162_v38  ;;  %v6365_v38 = vld [vmem:[#allocation2 + $0x144] sm:$0xf]  ;;  %v15172_v34 = vpop.f32.mrf.mxu0  ;;  %v6812_v26 = vrot.slane %v6811_v8, 4  ;;  %v6852_v14 = vshll.u32 %v6369_v39, 16 }
 0x2cf   :  { %v15166_v37 = vpop.f32.mrf.mxu1  ;;  %v6802_v2 = vrot.slane %v6801_v20, 4  ;;  %v6819_v19 = vshrl.u32 %v6365_v38, 16  ;;  %18003 = vst [vmem:[#allocation163_spill] sm:$0xff] %v15172_v34  ;;  %12973 = vmatmul.mubr.bf16.gmra.mxu0 %v11758_v7  ;;  %v6822_v29 = vshll.u32 %v6365_v38, 16  ;;  %v6840_v38 = vrot.slane %v6838_v31, 5 }
 0x2d0   :  { %18002 = vst [vmem:[#allocation162_spill] sm:$0xff] %v15166_v37  ;;  %v6817_v9 = vsel %vm14360_vm5, %v6812_v26, %v6816_v56  ;;  %v13499_v7 = vld [vmem:[#allocation2 + $0x164] sm:$0xf]  ;;  %v6843_v34 = vshrl.u32 %v6368_v59, 16  ;;  %v6856_v26 = vshrl.u32 %v6369_v39, 16  ;;  %v6854_v31 = vrot.slane %v6852_v14, 5 }
 0x2d1   :  { %v15174_v43 = vpop.f32.mrf.mxu1  ;;  %v6807_v22 = vsel %vm14360_vm5, %v6802_v2, %v6806_v41  ;;  %v6821_v49 = vrot.slane %v6819_v19, 4  ;;  %v6824_v24 = vrot.slane %v6822_v29, 5  ;;  %v11706_v8 = vcombine.low %v13499_v7, %v13500_v35  ;;  %v13501_v7 = vld [vmem:[#allocation2 + $0x174] sm:$0xf]  ;;  %v13502_v35 = vld [vmem:[#allocation2 + $0x178] sm:$0xf] }
 0x2d2   :  { %18004 = vst [vmem:[#allocation164_spill] sm:$0xff] %v15174_v43  ;;  %v11759_v20 = vcombine.low %v6807_v22, %v6817_v9  ;;  %v6835_v41 = vor.u32 %v6834_v61, %v6830_v51  ;;  %v6846_v2 = vshll.u32 %v6368_v59, 16  ;;  %v6845_v56 = vrot.slane %v6843_v34, 4 }
 0x2d3   :  { %v6825_v28 = vor.u32 %v6824_v24, %v6821_v49  ;;  %v15182_v19 = vpop.f32.mrf.mxu1  ;;  %12901 = vmatmul.mubr.bf16.gmra.mxu1 %v11706_v8  ;;  %v6862_v29 = vshll.u32 %v6370_v62, 16  ;;  %v6858_v9 = vrot.slane %v6856_v26, 4  ;;  %v11707_v37 = vcombine.low %v13501_v7, %v13502_v35  ;;  %v6372_v24 = vld [vmem:[#allocation2 + $0x168] sm:$0xf]  ;;  %v6374_v26 = vld [vmem:[#allocation2 + $0x174] sm:$0xf] }
 0x2d4   :  { %18006 = vst [vmem:[#allocation166_spill] sm:$0xff] %v15182_v19  ;;  %12976 = vmatprep.mubr.bf16.mxu0 %v11759_v20  ;;  %v6836_v11 = vrot.slane %v6835_v41, 4  ;;  %v6848_v22 = vrot.slane %v6846_v2, 5  ;;  %v15188_v59 = vadd.f32 %v14450_v60, %v14436_v53  ;;  %v15198_v62 = vadd.f32 %v14458_v33, %v14440_v27  ;;  %v6373_v53 = vld [vmem:[#allocation2 + $0x16c] sm:$0x1] }
 0x2d5   :  { %v6826_v12 = vrot.slane %v6825_v28, 4  ;;  %v6859_v8 = vor.u32 %v6858_v9, %v6854_v31  ;;  %v6864_v41 = vrot.slane %v6862_v29, 5  ;;  %12904 = vmatprep.mubr.bf16.mxu1 %v11707_v37  ;;  %v15202_v60 = vadd.f32 %v14466_v42, %v14446_v47  ;;  %v6376_v7 = vld [vmem:[#allocation2 + $0x17c] sm:$0x1] }
 0x2d6   :  { %v15180_v43 = vpop.f32.mrf.mxu0  ;;  %v6841_v28 = vsel %vm14360_vm5, %v6836_v11, %v6840_v38  ;;  %v6849_v39 = vor.u32 %v6848_v22, %v6845_v56  ;;  %v6876_v27 = vshll.u32 %v6372_v24, 16  ;;  %v6880_v33 = vshrl.u32 %v6372_v24, 16 }
 0x2d7   :  { %18005 = vst [vmem:[#allocation165_spill] sm:$0xff] %v15180_v43  ;;  %v6371_v43 = vld [vmem:[#allocation2 + $0x164] sm:$0xf]  ;;  %v6831_v34 = vsel %vm14360_vm5, %v6826_v12, %v6830_v51  ;;  %v15206_v51 = vadd.f32 %v14477_v3, %v14456_v50  ;;  %v6860_v14 = vrot.slane %v6859_v8, 4  ;;  %v15212_v37 = vadd.f32 %v14485_v6, %v14460_v25  ;;  %v6375_v3 = vld [vmem:[#allocation2 + $0x178] sm:$0xf] }
 0x2d8   :  { %v15184_v49 = vpop.f32.mrf.mxu0  ;;  %v11760_v20 = vcombine.low %v6831_v34, %v6841_v28  ;;  %v6850_v38 = vrot.slane %v6849_v39, 4  ;;  %v6867_v2 = vshrl.u32 %v6371_v43, 16  ;;  %v6870_v56 = vshll.u32 %v6371_v43, 16  ;;  %v13503_v28 = vld [vmem:[#allocation2 + $0x184] sm:$0xf] }
 0x2d9   :  { %18007 = vst [vmem:[#allocation167_spill] sm:$0xff] %v15184_v49  ;;  %v6886_v50 = vshll.u32 %v6373_v53, 16  ;;  %v6865_v43 = vsel %vm14360_vm5, %v6860_v14, %v6864_v41  ;;  %v6878_v22 = vrot.slane %v6876_v27, 5  ;;  %v6882_v9 = vrot.slane %v6880_v33, 4  ;;  %v13504_v25 = vld [vmem:[#allocation2 + $0x188] sm:$0xf] }
 0x2da   :  { %12977 = vmatmul.mubr.bf16.gmra.mxu0 %v11760_v20  ;;  %v15208_v12 = vpop.f32.mrf.mxu0  ;;  %v6855_v47 = vsel %vm14360_vm5, %v6850_v38, %v6854_v31  ;;  %v6869_v42 = vrot.slane %v6867_v2, 4  ;;  %v6872_v11 = vrot.slane %v6870_v56, 5  ;;  %v11708_v6 = vcombine.low %v13503_v28, %v13504_v25  ;;  %v13524_v49 = vld [vmem:[#allocation2 + $0x228] sm:$0xf] }
 0x2db   :  { %18009 = vst [vmem:[#allocation169_spill] sm:$0xff] %v15208_v12  ;;  %v11761_v35 = vcombine.low %v6855_v47, %v6865_v43  ;;  %v6888_v34 = vrot.slane %v6886_v50, 5  ;;  %v6891_v39 = vshrl.u32 %v6374_v26, 16  ;;  %v6883_v31 = vor.u32 %v6882_v9, %v6878_v22  ;;  %v13506_v43 = vld [vmem:[#allocation2 + $0x198] sm:$0xf] }
 0x2dc   :  { %v15194_v61 = vpop.f32.mrf.mxu1  ;;  %v6873_v24 = vor.u32 %v6872_v11, %v6869_v42  ;;  %v6894_v20 = vshll.u32 %v6374_v26, 16  ;;  %v6900_v8 = vshll.u32 %v6375_v3, 16  ;;  %v15220_v53 = vpop.f32.mrf.mxu0  ;;  %v15224_v38 = vadd.f32 %v14493_v13, %v14468_v18  ;;  %12905 = vmatmul.mubr.bf16.gmra.mxu1 %v11708_v6  ;;  %v13505_v13 = vld [vmem:[#allocation2 + $0x194] sm:$0xf] }
 0x2dd   :  { %18008 = vst [vmem:[#allocation168_spill] sm:$0xff] %v15194_v61  ;;  %18011 = vst [vmem:[#allocation171_spill] sm:$0xff] %v15220_v53  ;;  %12980 = vmatprep.mubr.bf16.mxu0 %v11761_v35  ;;  %v6893_v41 = vrot.slane %v6891_v39, 4  ;;  %v6904_v2 = vshrl.u32 %v6375_v3, 16  ;;  %v6910_v14 = vshll.u32 %v6376_v7, 16  ;;  %v6884_v33 = vrot.slane %v6883_v31, 4 }
 0x2de   :  { %v15216_v29 = vpop.f32.mrf.mxu1  ;;  %v6874_v27 = vrot.slane %v6873_v24, 4  ;;  %v6896_v47 = vrot.slane %v6894_v20, 5  ;;  %v6902_v42 = vrot.slane %v6900_v8, 5  ;;  %v15230_v26 = vadd.f32 %v14505_v52, %v14483_v46  ;;  %v6377_v3 = vld [vmem:[#allocation2 + $0x184] sm:$0xf] }
 0x2df   :  { %18010 = vst [vmem:[#allocation170_spill] sm:$0xff] %v15216_v29  ;;  %v15234_v50 = vadd.f32 %v14513_v23, %v14489_v10  ;;  %v6906_v18 = vrot.slane %v6904_v2, 4  ;;  %v11709_v11 = vcombine.low %v13505_v13, %v13506_v43  ;;  %v15238_v9 = vadd.f32 %v14517_v15, %v14495_v44  ;;  %v6378_v35 = vld [vmem:[#allocation2 + $0x188] sm:$0xf]  ;;  %v6379_v44 = vld [vmem:[#allocation2 + $0x18c] sm:$0x1] }
 0x2e0   :  { %v15226_v56 = vpop.f32.mrf.mxu1  ;;  %v6879_v7 = vsel %vm14360_vm5, %v6874_v27, %v6878_v22  ;;  %v6889_v46 = vsel %vm14360_vm5, %v6884_v33, %v6888_v34  ;;  %v6897_v52 = vor.u32 %v6896_v47, %v6893_v41  ;;  %v15248_v10 = vadd.f32 %v14536_v1, %v14509_v57  ;;  %v6380_v8 = vld [vmem:[#allocation2 + $0x194] sm:$0xf]  ;;  %v18058_v29 = vld [vmem:[#allocation47_spill] sm:$0xff] }
 0x2e1   :  { %18012 = vst [vmem:[#allocation172_spill] sm:$0xff] %v15226_v56  ;;  %v11762_v23 = vcombine.low %v6879_v7, %v6889_v46  ;;  %v6907_v25 = vor.u32 %v6906_v18, %v6902_v42  ;;  %v6912_v6 = vrot.slane %v6910_v14, 5  ;;  %12908 = vmatprep.mubr.bf16.mxu1 %v11709_v11  ;;  %v15254_v22 = vadd.f32 %v14540_v21, %v14515_v36  ;;  %v6381_v14 = vld [vmem:[#allocation2 + $0x198] sm:$0xf]  ;;  %v6382_v18 = vld [vmem:[#allocation2 + $0x19c] sm:$0x1] }
 0x2e2   :  { %v15250_v15 = vpop.f32.mrf.mxu1  ;;  %v15258_v34 = vadd.f32 %v14548_v32, %v14521_v54  ;;  %v6898_v39 = vrot.slane %v6897_v52, 4  ;;  %v6915_v24 = vshrl.u32 %v6377_v3, 16  ;;  %v6918_v1 = vshll.u32 %v6377_v3, 16  ;;  %v13508_v11 = vld [vmem:[#allocation2 + $0x1a8] sm:$0xf] }
 0x2e3   :  { %18014 = vst [vmem:[#allocation174_spill] sm:$0xff] %v15250_v15  ;;  %12981 = vmatmul.mubr.bf16.gmra.mxu0 %v11762_v23  ;;  %v6908_v57 = vrot.slane %v6907_v25, 4  ;;  %v6924_v31 = vshll.u32 %v6378_v35, 16  ;;  %v6928_v20 = vshrl.u32 %v6378_v35, 16  ;;  %v15262_v41 = vadd.f32 %v14560_v48, %v14538_v30  ;;  %v13507_v48 = vld [vmem:[#allocation2 + $0x1a4] sm:$0xf] }
 0x2e4   :  { %v6903_v36 = vsel %vm14360_vm5, %v6898_v39, %v6902_v42  ;;  %v6917_v21 = vrot.slane %v6915_v24, 4  ;;  %v6934_v2 = vshll.u32 %v6379_v44, 16  ;;  %v6920_v27 = vrot.slane %v6918_v1, 5  ;;  %v13511_v15 = vld [vmem:[#allocation2 + $0x1c4] sm:$0xf] }
 0x2e5   :  { %v6913_v32 = vsel %vm14360_vm5, %v6908_v57, %v6912_v6  ;;  %v6926_v33 = vrot.slane %v6924_v31, 5  ;;  %v6930_v47 = vrot.slane %v6928_v20, 4  ;;  %v11710_v3 = vcombine.low %v13507_v48, %v13508_v11  ;;  %v6384_v48 = vld [vmem:[#allocation2 + $0x1a8] sm:$0xf]  ;;  %v18022_v11 = vld [vmem:[#allocation15_spill] sm:$0xff] }
 0x2e6   :  { %v15244_v28 = vpop.f32.mrf.mxu0  ;;  %v11763_v43 = vcombine.low %v6903_v36, %v6913_v32  ;;  %v6936_v30 = vrot.slane %v6934_v2, 5  ;;  %v6939_v42 = vshrl.u32 %v6380_v8, 16  ;;  %v6921_v7 = vor.u32 %v6920_v27, %v6917_v21  ;;  %v13509_v21 = vld [vmem:[#allocation2 + $0x1b4] sm:$0xf]  ;;  %v13510_v2 = vld [vmem:[#allocation2 + $0x1b8] sm:$0xf] }
 0x2e7   :  { %18013 = vst [vmem:[#allocation173_spill] sm:$0xff] %v15244_v28  ;;  %v6931_v46 = vor.u32 %v6930_v47, %v6926_v33  ;;  %v6942_v52 = vshll.u32 %v6380_v8, 16  ;;  %v6948_v35 = vshll.u32 %v6381_v14, 16  ;;  %v15274_v23 = vadd.f32 %v14575_v45, %v14544_v17  ;;  %12909 = vmatmul.mubr.bf16.gmra.mxu1 %v11710_v3  ;;  %v18019_v17 = vld [vmem:[#allocation18_spill] sm:$0xff]  ;;  %v6383_v32 = vld [vmem:[#allocation2 + $0x1a4] sm:$0xf] }
 0x2e8   :  { %v15266_v54 = vpop.f32.mrf.mxu0  ;;  %12984 = vmatprep.mubr.bf16.mxu0 %v11763_v43  ;;  %v6941_v25 = vrot.slane %v6939_v42, 4  ;;  %v6952_v6 = vshrl.u32 %v6381_v14, 16  ;;  %v6958_v44 = vshll.u32 %v6382_v18, 16  ;;  %v6922_v24 = vrot.slane %v6921_v7, 4  ;;  %v18020_v27 = vld [vmem:[#allocation14_spill] sm:$0xff]  ;;  %v18021_v47 = vld [vmem:[#allocation20_spill] sm:$0xff] }
 0x2e9   :  { %18015 = vst [vmem:[#allocation175_spill] sm:$0xff] %v15266_v54  ;;  %v6932_v57 = vrot.slane %v6931_v46, 4  ;;  %v6944_v1 = vrot.slane %v6942_v52, 5  ;;  %v6950_v31 = vrot.slane %v6948_v35, 5  ;;  %v15282_v8 = vadd.f32 %v14583_v40, %v14550_v16  ;;  %v6385_v52 = vld [vmem:[#allocation2 + $0x1ac] sm:$0x1] }
 0x2ea   :  { %v15276_v39 = vpop.f32.mrf.mxu0  ;;  %v15286_v45 = vadd.f32 %v18019_v17, %v14567_v4  ;;  %v6954_v36 = vrot.slane %v6952_v6, 4  ;;  %v11711_v14 = vcombine.low %v13509_v21, %v13510_v2  ;;  %v15290_v18 = vadd.f32 %v18021_v47, %v18020_v27  ;;  %v18023_v4 = vld [vmem:[#allocation22_spill] sm:$0xff]  ;;  %v18025_v6 = vld [vmem:[#allocation19_spill] sm:$0xff]  ;;  %v6386_v27 = vld [vmem:[#allocation2 + $0x1b4] sm:$0xf] }
 0x2eb   :  { %18017 = vst [vmem:[#allocation177_spill] sm:$0xff] %v15276_v39  ;;  %v6927_v43 = vsel %vm14360_vm5, %v6922_v24, %v6926_v33  ;;  %v6937_v40 = vsel %vm14360_vm5, %v6932_v57, %v6936_v30  ;;  %v6945_v16 = vor.u32 %v6944_v1, %v6941_v25  ;;  %v15298_v3 = vadd.f32 %v18023_v4, %v18022_v11  ;;  %v18026_v17 = vld [vmem:[#allocation26_spill] sm:$0xff]  ;;  %v18027_v33 = vld [vmem:[#allocation21_spill] sm:$0xff]  ;;  %v18028_v24 = vld [vmem:[#allocation28_spill] sm:$0xff] }
 0x2ec   :  { %v15270_v13 = vpop.f32.mrf.mxu1  ;;  %v11764_v42 = vcombine.low %v6927_v43, %v6937_v40  ;;  %v6955_v7 = vor.u32 %v6954_v36, %v6950_v31  ;;  %v6960_v46 = vrot.slane %v6958_v44, 5  ;;  %12912 = vmatprep.mubr.bf16.mxu1 %v11711_v14  ;;  %v15300_v35 = vpop.f32.mrf.mxu0  ;;  %v15304_v21 = vadd.f32 %v18026_v17, %v18025_v6  ;;  %v18030_v47 = vld [vmem:[#allocation23_spill] sm:$0xff]  ;;  %v18031_v43 = vld [vmem:[#allocation30_spill] sm:$0xff]  ;;  %v13516_v28 = vld [vmem:[#allocation2 + $0x1e8] sm:$0xf] }
 0x2ed   :  { %18016 = vst [vmem:[#allocation176_spill] sm:$0xff] %v15270_v13  ;;  %18024 = vst [vmem:[#allocation18_spill] sm:$0xff] %v15300_v35  ;;  %v15308_v30 = vadd.f32 %v18028_v24, %v18027_v33  ;;  %v6946_v25 = vrot.slane %v6945_v16, 4  ;;  %v6963_v57 = vshrl.u32 %v6383_v32, 16  ;;  %v6966_v36 = vshll.u32 %v6383_v32, 16  ;;  %v18046_v39 = vld [vmem:[#allocation39_spill] sm:$0xff] }
 0x2ee   :  { %v15278_v20 = vpop.f32.mrf.mxu1  ;;  %12985 = vmatmul.mubr.bf16.gmra.mxu0 %v11764_v42  ;;  %v6956_v2 = vrot.slane %v6955_v7, 4  ;;  %v6972_v44 = vshll.u32 %v6384_v48, 16  ;;  %v6976_v14 = vshrl.u32 %v6384_v48, 16  ;;  %v15314_v40 = vadd.f32 %v18031_v43, %v18030_v47  ;;  %v6387_v17 = vld [vmem:[#allocation2 + $0x1b8] sm:$0xf] }
 0x2ef   :  { %18018 = vst [vmem:[#allocation178_spill] sm:$0xff] %v15278_v20  ;;  %v6951_v11 = vsel %vm14360_vm5, %v6946_v25, %v6950_v31  ;;  %v6965_v4 = vrot.slane %v6963_v57, 4  ;;  %v6982_v6 = vshll.u32 %v6385_v52, 16  ;;  %v6968_v33 = vrot.slane %v6966_v36, 5  ;;  %v6388_v32 = vld [vmem:[#allocation2 + $0x1bc] sm:$0x1] }
 0x2f0   :  { %v15310_v1 = vpop.f32.mrf.mxu1  ;;  %v6961_v16 = vsel %vm14360_vm5, %v6956_v2, %v6960_v46  ;;  %v6974_v42 = vrot.slane %v6972_v44, 5  ;;  %v6978_v7 = vrot.slane %v6976_v14, 4  ;;  %v13512_v47 = vld [vmem:[#allocation2 + $0x1c8] sm:$0xf]  ;;  %v6987_v53 = vshrl.u32 %v6386_v27, 16  ;;  %v18035_v46 = vld [vmem:[#allocation34_spill] sm:$0xff] }
 0x2f1   :  { %18029 = vst [vmem:[#allocation14_spill] sm:$0xff] %v15310_v1  ;;  %v11765_v48 = vcombine.low %v6951_v11, %v6961_v16  ;;  %v6984_v35 = vrot.slane %v6982_v6, 5  ;;  %v11712_v43 = vcombine.low %v13511_v15, %v13512_v47  ;;  %v6969_v31 = vor.u32 %v6968_v33, %v6965_v4  ;;  %v18034_v1 = vld [vmem:[#allocation27_spill] sm:$0xff]  ;;  %v18038_v4 = vld [vmem:[#allocation36_spill] sm:$0xff] }
 0x2f2   :  { %v15322_v19 = vpop.f32.mrf.mxu1  ;;  %v6979_v52 = vor.u32 %v6978_v7, %v6974_v42  ;;  %v6990_v25 = vshll.u32 %v6386_v27, 16  ;;  %v6996_v57 = vshll.u32 %v6387_v17, 16  ;;  %v15326_v2 = vadd.f32 %v18035_v46, %v18034_v1  ;;  %v18039_v27 = vld [vmem:[#allocation31_spill] sm:$0xff]  ;;  %v18040_v7 = vld [vmem:[#allocation38_spill] sm:$0xff] }
 0x2f3   :  { %18033 = vst [vmem:[#allocation15_spill] sm:$0xff] %v15322_v19  ;;  %12988 = vmatprep.mubr.bf16.mxu0 %v11765_v48  ;;  %12913 = vmatmul.mubr.bf16.gmra.mxu1 %v11712_v43  ;;  %v6989_v36 = vrot.slane %v6987_v53, 4  ;;  %v7000_v44 = vshrl.u32 %v6387_v17, 16  ;;  %v7006_v14 = vshll.u32 %v6388_v32, 16  ;;  %v6970_v11 = vrot.slane %v6969_v31, 4  ;;  %v18037_v19 = vld [vmem:[#allocation29_spill] sm:$0xff] }
 0x2f4   :  { %v6980_v6 = vrot.slane %v6979_v52, 4  ;;  %v6992_v16 = vrot.slane %v6990_v25, 5  ;;  %v6998_v15 = vrot.slane %v6996_v57, 5  ;;  %v15332_v33 = vadd.f32 %v18038_v4, %v18037_v19  ;;  %v13513_v48 = vld [vmem:[#allocation2 + $0x1d4] sm:$0xf]  ;;  %v18042_v31 = vld [vmem:[#allocation35_spill] sm:$0xff] }
 0x2f5   :  { %v7002_v1 = vrot.slane %v7000_v44, 4  ;;  %v13514_v43 = vld [vmem:[#allocation2 + $0x1d8] sm:$0xf]  ;;  %v6389_v17 = vld [vmem:[#allocation2 + $0x1c4] sm:$0xf]  ;;  %v6975_v57 = vsel %vm14360_vm5, %v6970_v11, %v6974_v42  ;;  %v18045_v44 = vld [vmem:[#allocation44_spill] sm:$0xff] }
 0x2f6   :  { %v15320_v24 = vpop.f32.mrf.mxu0  ;;  %v11713_v53 = vcombine.low %v13513_v48, %v13514_v43  ;;  %v18043_v52 = vld [vmem:[#allocation42_spill] sm:$0xff]  ;;  %v6985_v19 = vsel %vm14360_vm5, %v6980_v6, %v6984_v35  ;;  %v6993_v46 = vor.u32 %v6992_v16, %v6989_v36  ;;  %v6390_v4 = vld [vmem:[#allocation2 + $0x1c8] sm:$0xf]  ;;  %v18048_v20 = vld [vmem:[#allocation43_spill] sm:$0xff]  ;;  %v7011_v36 = vshrl.u32 %v6389_v17, 16 }
 0x2f7   :  { %18032 = vst [vmem:[#allocation20_spill] sm:$0xff] %v15320_v24  ;;  %v15336_v24 = vadd.f32 %v18040_v7, %v18039_v27  ;;  %v15342_v25 = vadd.f32 %v18043_v52, %v18042_v31  ;;  %v18044_v27 = vld [vmem:[#allocation37_spill] sm:$0xff]  ;;  %v11766_v48 = vcombine.low %v6975_v57, %v6985_v19  ;;  %v7003_v43 = vor.u32 %v7002_v1, %v6998_v15  ;;  %v18047_v31 = vld [vmem:[#allocation46_spill] sm:$0xff] }
 0x2f8   :  { %v15328_v47 = vpop.f32.mrf.mxu0  ;;  %v15350_v7 = vadd.f32 %v18045_v44, %v18044_v27  ;;  %12916 = vmatprep.mubr.bf16.mxu1 %v11713_v53  ;;  %v15354_v52 = vadd.f32 %v18047_v31, %v18046_v39  ;;  %v18049_v42 = vld [vmem:[#allocation50_spill] sm:$0xff]  ;;  %v6994_v35 = vrot.slane %v6993_v46, 4  ;;  %v7014_v27 = vshll.u32 %v6389_v17, 16  ;;  %v18053_v19 = vld [vmem:[#allocation45_spill] sm:$0xff]  ;;  %v18054_v44 = vld [vmem:[#allocation52_spill] sm:$0xff] }
 0x2f9   :  { %18036 = vst [vmem:[#allocation22_spill] sm:$0xff] %v15328_v47  ;;  %v7008_v47 = vrot.slane %v7006_v14, 5  ;;  %v15358_v11 = vadd.f32 %v18049_v42, %v18048_v20  ;;  %12989 = vmatmul.mubr.bf16.gmra.mxu0 %v11766_v48  ;;  %v7004_v16 = vrot.slane %v7003_v43, 4  ;;  %v7020_v57 = vshll.u32 %v6390_v4, 16  ;;  %v6392_v14 = vld [vmem:[#allocation2 + $0x1d4] sm:$0xf] }
 0x2fa   :  { %v15360_v6 = vpop.f32.mrf.mxu0  ;;  %v7024_v1 = vshrl.u32 %v6390_v4, 16  ;;  %v15366_v39 = vadd.f32 %v18054_v44, %v18053_v19  ;;  %v6999_v20 = vsel %vm14360_vm5, %v6994_v35, %v6998_v15  ;;  %v7013_v31 = vrot.slane %v7011_v36, 4  ;;  %v6393_v42 = vld [vmem:[#allocation2 + $0x1d8] sm:$0xf]  ;;  %v6394_v4 = vld [vmem:[#allocation2 + $0x1dc] sm:$0x1] }
 0x2fb   :  { %v15338_v32 = vpop.f32.mrf.mxu1  ;;  %18050 = vst [vmem:[#allocation26_spill] sm:$0xff] %v15358_v11  ;;  %18051 = vst [vmem:[#allocation21_spill] sm:$0xff] %v15360_v6  ;;  %v7009_v48 = vsel %vm14360_vm5, %v7004_v16, %v7008_v47  ;;  %v7016_v43 = vrot.slane %v7014_v27, 5  ;;  %v7022_v17 = vrot.slane %v7020_v57, 5  ;;  %v7035_v19 = vshrl.u32 %v6392_v14, 16 }
 0x2fc   :  { %18041 = vst [vmem:[#allocation19_spill] sm:$0xff] %v15338_v32  ;;  %v6391_v32 = vld [vmem:[#allocation2 + $0x1cc] sm:$0x1]  ;;  %18055 = vst [vmem:[#allocation23_spill] sm:$0xff] %v15366_v39  ;;  %v7026_v6 = vrot.slane %v7024_v1, 4  ;;  %v11767_v54 = vcombine.low %v6999_v20, %v7009_v48  ;;  %v15372_v44 = vpop.f32.mrf.mxu0  ;;  %v7038_v35 = vshll.u32 %v6392_v14, 16  ;;  %v15378_v47 = vadd.f32 %v14735_v55, %v18058_v29 }
 0x2fd   :  { %v15362_v53 = vpop.f32.mrf.mxu1  ;;  %v7030_v46 = vshll.u32 %v6391_v32, 16  ;;  %18056 = vst [vmem:[#allocation30_spill] sm:$0xff] %v15372_v44  ;;  %v7017_v12 = vor.u32 %v7016_v43, %v7013_v31  ;;  %v7044_v32 = vshll.u32 %v6393_v42, 16  ;;  %v7037_v16 = vrot.slane %v7035_v19, 4  ;;  %v18061_v31 = vld [vmem:[#allocation57_spill] sm:$0xff]  ;;  %v18064_v48 = vld [vmem:[#allocation59_spill] sm:$0xff] }
 0x2fe   :  { %18052 = vst [vmem:[#allocation28_spill] sm:$0xff] %v15362_v53  ;;  %v13515_v53 = vld [vmem:[#allocation2 + $0x1e4] sm:$0xf]  ;;  %v7027_v15 = vor.u32 %v7026_v6, %v7022_v17  ;;  %18059 = vst [vmem:[#allocation34_spill] sm:$0xff] %v15378_v47  ;;  %12992 = vmatprep.mubr.bf16.mxu0 %v11767_v54  ;;  %v7048_v27 = vshrl.u32 %v6393_v42, 16  ;;  %v7054_v57 = vshll.u32 %v6394_v4, 16 }
 0x2ff   :  { %v7032_v13 = vrot.slane %v7030_v46, 5  ;;  %v11714_v56 = vcombine.low %v13515_v53, %v13516_v28  ;;  %v15374_v36 = vpop.f32.mrf.mxu1  ;;  %v7018_v1 = vrot.slane %v7017_v12, 4  ;;  %v7040_v53 = vrot.slane %v7038_v35, 5  ;;  %v18060_v46 = vld [vmem:[#allocation51_spill] sm:$0xff]  ;;  %v18063_v14 = vld [vmem:[#allocation53_spill] sm:$0xff]  ;;  %v18067_v42 = vld [vmem:[#allocation54_spill] sm:$0xff] }
 0x300   :  { %18057 = vst [vmem:[#allocation27_spill] sm:$0xff] %v15374_v36  ;;  %v7028_v28 = vrot.slane %v7027_v15, 4  ;;  %v7046_v20 = vrot.slane %v7044_v32, 5  ;;  %v15382_v6 = vadd.f32 %v18061_v31, %v18060_v46  ;;  %v15386_v43 = vadd.f32 %v18064_v48, %v18063_v14  ;;  %v13517_v55 = vld [vmem:[#allocation2 + $0x1f4] sm:$0xf]  ;;  %v18075_v36 = vld [vmem:[#allocation67_spill] sm:$0xff] }
 0x301   :  { %12917 = vmatmul.mubr.bf16.gmra.mxu1 %v11714_v56  ;;  %v7050_v44 = vrot.slane %v7048_v27, 4  ;;  %v13518_v29 = vld [vmem:[#allocation2 + $0x1f8] sm:$0xf]  ;;  %v6395_v56 = vld [vmem:[#allocation2 + $0x1e4] sm:$0xf]  ;;  %v18068_v12 = vld [vmem:[#allocation61_spill] sm:$0xff]  ;;  %v7023_v15 = vsel %vm14360_vm5, %v7018_v1, %v7022_v17  ;;  %v7041_v32 = vor.u32 %v7040_v53, %v7037_v16  ;;  %v15398_v31 = vpop.f32.mrf.mxu1 }
 0x302   :  { %18062 = vst [vmem:[#allocation29_spill] sm:$0xff] %v15382_v6  ;;  %18065 = vst [vmem:[#allocation36_spill] sm:$0xff] %v15386_v43  ;;  %v11715_v54 = vcombine.low %v13517_v55, %v13518_v29  ;;  %v15392_v4 = vadd.f32 %v18068_v12, %v18067_v42  ;;  %v7033_v35 = vsel %vm14360_vm5, %v7028_v28, %v7032_v13  ;;  %v6396_v46 = vld [vmem:[#allocation2 + $0x1e8] sm:$0xf]  ;;  %v18071_v27 = vld [vmem:[#allocation58_spill] sm:$0xff]  ;;  %v7059_v28 = vshrl.u32 %v6395_v56, 16 }
 0x303   :  { %18070 = vst [vmem:[#allocation35_spill] sm:$0xff] %v15398_v31  ;;  %v18072_v14 = vld [vmem:[#allocation65_spill] sm:$0xff]  ;;  %v11768_v55 = vcombine.low %v7023_v15, %v7033_v35  ;;  %v7051_v29 = vor.u32 %v7050_v44, %v7046_v20  ;;  %v6397_v42 = vld [vmem:[#allocation2 + $0x1ec] sm:$0x1]  ;;  %v18077_v17 = vld [vmem:[#allocation62_spill] sm:$0xff]  ;;  %v7042_v16 = vrot.slane %v7041_v32, 4 }
 0x304   :  { %18069 = vst [vmem:[#allocation38_spill] sm:$0xff] %v15392_v4  ;;  %v15402_v48 = vadd.f32 %v18072_v14, %v18071_v27  ;;  %12920 = vmatprep.mubr.bf16.mxu1 %v11715_v54  ;;  %v18074_v12 = vld [vmem:[#allocation60_spill] sm:$0xff]  ;;  %v18078_v1 = vld [vmem:[#allocation69_spill] sm:$0xff]  ;;  %v7062_v31 = vshll.u32 %v6395_v56, 16  ;;  %v7068_v27 = vshll.u32 %v6396_v46, 16  ;;  %v7072_v14 = vshrl.u32 %v6396_v46, 16 }
 0x305   :  { %v15388_v19 = vpop.f32.mrf.mxu0  ;;  %v15406_v4 = vadd.f32 %v18075_v36, %v18074_v12  ;;  %v15410_v13 = vadd.f32 %v18078_v1, %v18077_v17  ;;  %12993 = vmatmul.mubr.bf16.gmra.mxu0 %v11768_v55  ;;  %v7052_v53 = vrot.slane %v7051_v29, 4  ;;  %v6398_v15 = vld [vmem:[#allocation2 + $0x1f4] sm:$0xf]  ;;  %v7047_v36 = vsel %vm14360_vm5, %v7042_v16, %v7046_v20  ;;  %v6399_v1 = vld [vmem:[#allocation2 + $0x1f8] sm:$0xf]  ;;  %v18087_v6 = vld [vmem:[#allocation75_spill] sm:$0xff] }
 0x306   :  { %18066 = vst [vmem:[#allocation31_spill] sm:$0xff] %v15388_v19  ;;  %18073 = vst [vmem:[#allocation42_spill] sm:$0xff] %v15402_v48  ;;  %v7056_v19 = vrot.slane %v7054_v57, 5  ;;  %v18081_v57 = vld [vmem:[#allocation66_spill] sm:$0xff]  ;;  %v18082_v54 = vld [vmem:[#allocation73_spill] sm:$0xff]  ;;  %v7061_v12 = vrot.slane %v7059_v28, 4 }
 0x307   :  { %18076 = vst [vmem:[#allocation37_spill] sm:$0xff] %v15406_v4  ;;  %18079 = vst [vmem:[#allocation44_spill] sm:$0xff] %v15410_v13  ;;  %v15412_v44 = vpop.f32.mrf.mxu0  ;;  %v15416_v35 = vadd.f32 %v18082_v54, %v18081_v57  ;;  %v7078_v17 = vshll.u32 %v6397_v42, 16  ;;  %v7064_v55 = vrot.slane %v7062_v31, 5  ;;  %v7070_v46 = vrot.slane %v7068_v27, 5 }
 0x308   :  { %18080 = vst [vmem:[#allocation39_spill] sm:$0xff] %v15412_v44  ;;  %v7057_v56 = vsel %vm14360_vm5, %v7052_v53, %v7056_v19  ;;  %v7074_v29 = vrot.slane %v7072_v14, 4  ;;  %v6400_v13 = vld [vmem:[#allocation2 + $0x1fc] sm:$0x1]  ;;  %v13519_v48 = vld [vmem:[#allocation2 + $0x204] sm:$0xf] }
 0x309   :  { %18083 = vst [vmem:[#allocation46_spill] sm:$0xff] %v15416_v35  ;;  %v11769_v44 = vcombine.low %v7047_v36, %v7057_v56  ;;  %v7080_v4 = vrot.slane %v7078_v17, 5  ;;  %v13520_v57 = vld [vmem:[#allocation2 + $0x208] sm:$0xf]  ;;  %v7083_v35 = vshrl.u32 %v6398_v15, 16  ;;  %v7065_v43 = vor.u32 %v7064_v55, %v7061_v12  ;;  %v15424_v28 = vpop.f32.mrf.mxu0  ;;  %v18090_v17 = vld [vmem:[#allocation70_spill] sm:$0xff] }
 0x30a   :  { %v11716_v54 = vcombine.low %v13519_v48, %v13520_v57  ;;  %v7075_v20 = vor.u32 %v7074_v29, %v7070_v46  ;;  %v7086_v16 = vshll.u32 %v6398_v15, 16  ;;  %v7092_v42 = vshll.u32 %v6399_v1, 16  ;;  %18085 = vst [vmem:[#allocation50_spill] sm:$0xff] %v15424_v28  ;;  %v18091_v15 = vld [vmem:[#allocation77_spill] sm:$0xff]  ;;  %v18093_v55 = vld [vmem:[#allocation74_spill] sm:$0xff] }
 0x30b   :  { %v15420_v32 = vpop.f32.mrf.mxu1  ;;  %12996 = vmatprep.mubr.bf16.mxu0 %v11769_v44  ;;  %v7085_v19 = vrot.slane %v7083_v35, 4  ;;  %v7096_v31 = vshrl.u32 %v6399_v1, 16  ;;  %v7102_v53 = vshll.u32 %v6400_v13, 16  ;;  %v7066_v14 = vrot.slane %v7065_v43, 4  ;;  %v18094_v29 = vld [vmem:[#allocation81_spill] sm:$0xff]  ;;  %v18095_v13 = vld [vmem:[#allocation76_spill] sm:$0xff] }
 0x30c   :  { %18084 = vst [vmem:[#allocation43_spill] sm:$0xff] %v15420_v32  ;;  %v18086_v32 = vld [vmem:[#allocation68_spill] sm:$0xff]  ;;  %12921 = vmatmul.mubr.bf16.gmra.mxu1 %v11716_v54  ;;  %v7076_v48 = vrot.slane %v7075_v20, 4  ;;  %v7088_v36 = vrot.slane %v7086_v16, 5  ;;  %v7094_v12 = vrot.slane %v7092_v42, 5  ;;  %v15434_v56 = vadd.f32 %v18091_v15, %v18090_v17  ;;  %v18096_v54 = vld [vmem:[#allocation83_spill] sm:$0xff]  ;;  %v15448_v17 = vpop.f32.mrf.mxu0 }
 0x30d   :  { %v15428_v47 = vadd.f32 %v18087_v6, %v18086_v32  ;;  %v15430_v27 = vpop.f32.mrf.mxu1  ;;  %v15438_v57 = vadd.f32 %v18094_v29, %v18093_v55  ;;  %v7098_v6 = vrot.slane %v7096_v31, 4  ;;  %v13521_v44 = vld [vmem:[#allocation2 + $0x214] sm:$0xf]  ;;  %v13522_v32 = vld [vmem:[#allocation2 + $0x218] sm:$0xf]  ;;  %v15442_v28 = vadd.f32 %v18096_v54, %v18095_v13  ;;  %18097 = vst [vmem:[#allocation51_spill] sm:$0xff] %v15448_v17 }
 0x30e   :  { %18089 = vst [vmem:[#allocation52_spill] sm:$0xff] %v15430_v27  ;;  %18092 = vst [vmem:[#allocation47_spill] sm:$0xff] %v15434_v56  ;;  %v11717_v35 = vcombine.low %v13521_v44, %v13522_v32  ;;  %v6401_v1 = vld [vmem:[#allocation2 + $0x204] sm:$0xf]  ;;  %v7071_v43 = vsel %vm14360_vm5, %v7066_v14, %v7070_v46  ;;  %v7081_v20 = vsel %vm14360_vm5, %v7076_v48, %v7080_v4  ;;  %v6402_v42 = vld [vmem:[#allocation2 + $0x208] sm:$0xf] }
 0x30f   :  { %18088 = vst [vmem:[#allocation45_spill] sm:$0xff] %v15428_v47  ;;  %v7089_v16 = vor.u32 %v7088_v36, %v7085_v19  ;;  %v18098_v15 = vld [vmem:[#allocation78_spill] sm:$0xff]  ;;  %v18099_v31 = vld [vmem:[#allocation85_spill] sm:$0xff]  ;;  %v11770_v29 = vcombine.low %v7071_v43, %v7081_v20  ;;  %v7099_v44 = vor.u32 %v7098_v6, %v7094_v12  ;;  %v7104_v32 = vrot.slane %v7102_v53, 5  ;;  %v6403_v13 = vld [vmem:[#allocation2 + $0x20c] sm:$0x1]  ;;  %v15454_v54 = vpop.f32.mrf.mxu1 }
 0x310   :  { %v15452_v55 = vadd.f32 %v18099_v31, %v18098_v15  ;;  %12924 = vmatprep.mubr.bf16.mxu1 %v11717_v35  ;;  %18100 = vst [vmem:[#allocation57_spill] sm:$0xff] %v15454_v54  ;;  %v18101_v56 = vld [vmem:[#allocation82_spill] sm:$0xff]  ;;  %v18102_v46 = vld [vmem:[#allocation89_spill] sm:$0xff]  ;;  %v18104_v4 = vld [vmem:[#allocation84_spill] sm:$0xff]  ;;  %v7107_v17 = vshrl.u32 %v6401_v1, 16  ;;  %v7110_v31 = vshll.u32 %v6401_v1, 16 }
 0x311   :  { %v15458_v14 = vadd.f32 %v18102_v46, %v18101_v56  ;;  %v18105_v19 = vld [vmem:[#allocation91_spill] sm:$0xff]  ;;  %v7090_v36 = vrot.slane %v7089_v16, 4  ;;  %12997 = vmatmul.mubr.bf16.gmra.mxu0 %v11770_v29  ;;  %v7100_v15 = vrot.slane %v7099_v44, 4  ;;  %v7116_v43 = vshll.u32 %v6402_v42, 16  ;;  %v6404_v53 = vld [vmem:[#allocation2 + $0x214] sm:$0xf] }
 0x312   :  { %v15462_v48 = vadd.f32 %v18105_v19, %v18104_v4  ;;  %v7120_v6 = vshrl.u32 %v6402_v42, 16  ;;  %v18107_v35 = vld [vmem:[#allocation86_spill] sm:$0xff]  ;;  %v18108_v20 = vld [vmem:[#allocation93_spill] sm:$0xff]  ;;  %v7109_v46 = vrot.slane %v7107_v17, 4  ;;  %v7126_v54 = vshll.u32 %v6403_v13, 16  ;;  %v15474_v19 = vpop.f32.mrf.mxu1 }
 0x313   :  { %18103 = vst [vmem:[#allocation53_spill] sm:$0xff] %v15458_v14  ;;  %v15466_v27 = vadd.f32 %v18108_v20, %v18107_v35  ;;  %v7095_v56 = vsel %vm14360_vm5, %v7090_v36, %v7094_v12  ;;  %v6405_v47 = vld [vmem:[#allocation2 + $0x218] sm:$0xf]  ;;  %v7105_v16 = vsel %vm14360_vm5, %v7100_v15, %v7104_v32  ;;  %v7112_v29 = vrot.slane %v7110_v31, 5  ;;  %v6406_v42 = vld [vmem:[#allocation2 + $0x21c] sm:$0x1] }
 0x314   :  { %18106 = vst [vmem:[#allocation59_spill] sm:$0xff] %v15462_v48  ;;  %v7118_v1 = vrot.slane %v7116_v43, 5  ;;  %v7122_v44 = vrot.slane %v7120_v6, 4  ;;  %18111 = vst [vmem:[#allocation58_spill] sm:$0xff] %v15474_v19  ;;  %v11771_v39 = vcombine.low %v7095_v56, %v7105_v16  ;;  %v7128_v35 = vrot.slane %v7126_v54, 5  ;;  %v18112_v32 = vld [vmem:[#allocation90_spill] sm:$0xff] }
 0x315   :  { %18109 = vst [vmem:[#allocation54_spill] sm:$0xff] %v15466_v27  ;;  %v15470_v4 = vpop.f32.mrf.mxu0  ;;  %v13523_v20 = vld [vmem:[#allocation2 + $0x224] sm:$0xf]  ;;  %v7131_v12 = vshrl.u32 %v6404_v53, 16  ;;  %v7113_v17 = vor.u32 %v7112_v29, %v7109_v46  ;;  %v7134_v36 = vshll.u32 %v6404_v53, 16  ;;  %v7140_v61 = vshll.u32 %v6405_v47, 16 }
 0x316   :  { %18110 = vst [vmem:[#allocation61_spill] sm:$0xff] %v15470_v4  ;;  %v11718_v27 = vcombine.low %v13523_v20, %v13524_v49  ;;  %v7123_v13 = vor.u32 %v7122_v44, %v7118_v1  ;;  %v7725_v4 = vld [vmem:[#allocation2 + $0x20] sm:$0x8]  ;;  %v15476_v11 = vld [vmem:[#allocation2 + $0x24] sm:$0xf]  ;;  %v18113_v15 = vld [vmem:[#allocation97_spill] sm:$0xff]  ;;  %13000 = vmatprep.mubr.bf16.mxu0 %v11771_v39 }
 0x317   :  { %v15480_v31 = vadd.f32 %v18113_v15, %v18112_v32  ;;  %v7133_v43 = vrot.slane %v7131_v12, 4  ;;  %v7144_v6 = vshrl.u32 %v6405_v47, 16  ;;  %v7150_v54 = vshll.u32 %v6406_v42, 16  ;;  %v15482_v56 = vpop.f32.mrf.mxu0  ;;  %v18116_v44 = vld [vmem:[#allocation98_spill] sm:$0xff]  ;;  %v15488_v48 = vld [vmem:[#allocation2 + $0x28] sm:$0xf] }
 0x318   :  { %12925 = vmatmul.mubr.bf16.gmra.mxu1 %v11718_v27  ;;  %18115 = vst [vmem:[#allocation60_spill] sm:$0xff] %v15482_v56  ;;  %v7114_v49 = vrot.slane %v7113_v17, 4  ;;  %v7124_v16 = vrot.slane %v7123_v13, 4  ;;  %v7136_v46 = vrot.slane %v7134_v36, 5  ;;  %v7142_v29 = vrot.slane %v7140_v61, 5  ;;  %v18118_v15 = vld [vmem:[#allocation92_spill] sm:$0xff] }
 0x319   :  { %18114 = vst [vmem:[#allocation65_spill] sm:$0xff] %v15480_v31  ;;  %v4296_v20 = vadd.f32 %v18116_v44, %v15188_v59  ;;  %v7146_v19 = vrot.slane %v7144_v6, 4  ;;  %v7822_v32 = vshrl.u32 %v7725_v4, 16  ;;  %v7827_v39 = vshrl.u32 %v15476_v11, 16  ;;  %v15496_v59 = vpop.f32.mrf.mxu0  ;;  %v18120_v6 = vld [vmem:[#allocation99_spill] sm:$0xff] }
 0x31a   :  { %v15484_v53 = vpop.f32.mrf.mxu1  ;;  %v7119_v47 = vsel %vm14360_vm5, %v7114_v49, %v7118_v1  ;;  %v7129_v27 = vsel %vm14360_vm5, %v7124_v16, %v7128_v35  ;;  %v7137_v42 = vor.u32 %v7136_v46, %v7133_v43  ;;  %v7152_v12 = vrot.slane %v7150_v54, 5  ;;  %18117 = vst [vmem:[#allocation67_spill] sm:$0xff] %v15496_v59  ;;  %v18121_v43 = vld [vmem:[#allocation94_spill] sm:$0xff]  ;;  %v18122_v54 = vld [vmem:[#allocation100_spill] sm:$0xff] }
 0x31b   :  { %v11772_v61 = vcombine.low %v7119_v47, %v7129_v27  ;;  %v7147_v17 = vor.u32 %v7146_v19, %v7142_v29  ;;  %v7829_v13 = vrot.slane %v7827_v39, 7  ;;  %v7830_v36 = vshll.u32 %v15476_v11, 16  ;;  %v6407_v47 = vld [vmem:[#allocation2 + $0x224] sm:$0xf]  ;;  %v6409_v56 = vld [vmem:[#allocation2 + $0x22c] sm:$0x1] }
 0x31c   :  { %v15500_v4 = vadd.f32 %v14883_v63, %v18118_v15  ;;  %v4294_v44 = vadd.f32 %v18120_v6, %v15198_v62  ;;  %v7138_v1 = vrot.slane %v7137_v42, 4  ;;  %v7836_v49 = vshrl.u32 %v15488_v48, 16  ;;  %v15505_v35 = vpop.f32.mrf.mxu1  ;;  %v18124_v63 = vld [vmem:[#allocation101_spill] sm:$0xff]  ;;  %v18125_v15 = vld [vmem:[#allocation104_spill] sm:$0xff] }
 0x31d   :  { %v15509_v19 = vadd.f32 %v18122_v54, %v18121_v43  ;;  %13001 = vmatmul.mubr.bf16.gmra.mxu0 %v11772_v61  ;;  %v7148_v16 = vrot.slane %v7147_v17, 4  ;;  %v11783_v46 = vrot.slane %v7822_v32, 11  ;;  %v7832_v39 = vor.u32 %v7830_v36, %v7829_v13  ;;  %v6408_v6 = vld [vmem:[#allocation2 + $0x228] sm:$0xf]  ;;  %v15525_v36 = vpop.f32.mrf.mxu0 }
 0x31e   :  { %18119 = vst [vmem:[#allocation62_spill] sm:$0xff] %v15500_v4  ;;  %v4297_v27 = vadd.f32 %v18124_v63, %v15202_v60  ;;  %v15514_v59 = vadd.f32 %v18125_v15, %v4296_v20  ;;  %v7838_v62 = vrot.slane %v7836_v49, 7  ;;  %v7839_v42 = vshll.u32 %v15488_v48, 16  ;;  %v18127_v4 = vld [vmem:[#allocation105_spill] sm:$0xff]  ;;  %18128 = vst [vmem:[#allocation73_spill] sm:$0xff] %v15525_v36  ;;  %v15527_v15 = vpop.f32.mrf.mxu1  ;;  %v18133_v36 = vld [vmem:[#allocation108_spill] sm:$0xff] }
 0x31f   :  { %18123 = vst [vmem:[#allocation69_spill] sm:$0xff] %v15509_v19  ;;  %v15519_v43 = vadd.f32 %v18127_v4, %v15206_v51  ;;  %v7143_v32 = vsel %vm14360_vm5, %v7138_v1, %v7142_v29  ;;  %v7153_v61 = vsel %vm14360_vm5, %v7148_v16, %v7152_v12  ;;  %v7834_v17 = vrot.slane %v7829_v13, 4  ;;  %v7728_v60 = vld [vmem:[#allocation2 + $0x30] sm:$0x8]  ;;  %v15531_v29 = vld [vmem:[#allocation2 + $0x34] sm:$0xf] }
 0x320   :  { %18126 = vst [vmem:[#allocation66_spill] sm:$0xff] %v15514_v59  ;;  %v11773_v20 = vcombine.low %v7143_v32, %v7153_v61  ;;  %v7841_v49 = vor.u32 %v7839_v42, %v7838_v62  ;;  %v7155_v54 = vshrl.u32 %v6407_v47, 16  ;;  %v7158_v63 = vshll.u32 %v6407_v47, 16  ;;  %v15535_v16 = vld [vmem:[#allocation2 + $0x38] sm:$0xf] }
 0x321   :  { %v7833_v51 = vsel %vm13824_vm2, %v11783_v46, %v7832_v39  ;;  %v7164_v4 = vshll.u32 %v6408_v6, 16  ;;  %v7168_v19 = vshrl.u32 %v6408_v6, 16  ;;  %v7174_v31 = vshll.u32 %v6409_v56, 16  ;;  %v18130_v47 = vld [vmem:[#allocation106_spill] sm:$0xff]  ;;  %v7731_v39 = vld [vmem:[#allocation2 + $0x40] sm:$0x8] }
 0x322   :  { %13004 = vmatprep.mubr.bf16.mxu0 %v11773_v20  ;;  %v7842_v12 = vsel %vm13824_vm2, %v7834_v17, %v7841_v49  ;;  %v7157_v13 = vrot.slane %v7155_v54, 4  ;;  %v7160_v1 = vrot.slane %v7158_v63, 5  ;;  %v7844_v62 = vshrl.u32 %v7728_v60, 16  ;;  %v18132_v56 = vld [vmem:[#allocation107_spill] sm:$0xff]  ;;  %v15550_v60 = vpop.f32.mrf.mxu1 }
 0x323   :  { %v15538_v42 = vadd.f32 %v18130_v47, %v4294_v44  ;;  %v11831_v32 = vcombine.low %v7833_v51, %v7842_v12  ;;  %v7166_v61 = vrot.slane %v7164_v4, 5  ;;  %v7170_v46 = vrot.slane %v7168_v19, 4  ;;  %v15548_v54 = vld [vmem:[#allocation2 + $0x44] sm:$0xf]  ;;  %18135 = vst [vmem:[#allocation70_spill] sm:$0xff] %v15550_v60 }
 0x324   :  { %v15540_v6 = vpop.f32.mrf.mxu0  ;;  %v4298_v20 = vadd.f32 %v18132_v56, %v15212_v37  ;;  %v15545_v14 = vadd.f32 %v18133_v36, %v4297_v27  ;;  %v7161_v17 = vor.u32 %v7160_v1, %v7157_v13  ;;  %v7849_v49 = vshrl.u32 %v15531_v29, 16  ;;  %v15554_v47 = vld [vmem:[#allocation2 + $0x48] sm:$0xf] }
 0x325   :  { %18131 = vst [vmem:[#allocation68_spill] sm:$0xff] %v15538_v42  ;;  %13024 = vmatprep.mubr.bf16.mxu1 %v11831_v32  ;;  %v7171_v44 = vor.u32 %v7170_v46, %v7166_v61  ;;  %v7176_v63 = vrot.slane %v7174_v31, 5  ;;  %v11784_v19 = vrot.slane %v7844_v62, 11  ;;  %v7858_v51 = vshrl.u32 %v15535_v16, 16 }
 0x326   :  { %18134 = vst [vmem:[#allocation75_spill] sm:$0xff] %v15545_v14  ;;  %v7162_v4 = vrot.slane %v7161_v17, 4  ;;  %v7851_v12 = vrot.slane %v7849_v49, 7  ;;  %v7852_v37 = vshll.u32 %v15531_v29, 16  ;;  %v7866_v27 = vshrl.u32 %v7731_v39, 16  ;;  %v15558_v60 = vpop.f32.mrf.mxu0 }
 0x327   :  { %v7172_v36 = vrot.slane %v7171_v44, 4  ;;  %v7860_v13 = vrot.slane %v7858_v51, 7  ;;  %v7861_v1 = vshll.u32 %v15535_v16, 16  ;;  %v7871_v56 = vshrl.u32 %v15548_v54, 16 }
 0x328   :  { %v7167_v31 = vsel %vm14360_vm5, %v7162_v4, %v7166_v61  ;;  %v7854_v62 = vor.u32 %v7852_v37, %v7851_v12  ;;  %v7856_v32 = vrot.slane %v7851_v12, 4  ;;  %v7874_v46 = vshll.u32 %v15548_v54, 16 }
 0x329   :  { %v7177_v39 = vsel %vm14360_vm5, %v7172_v36, %v7176_v63  ;;  %v7863_v49 = vor.u32 %v7861_v1, %v7860_v13  ;;  %v7873_v44 = vrot.slane %v7871_v56, 7  ;;  %v7880_v51 = vshrl.u32 %v15554_v47, 16  ;;  %v7734_v63 = vld [vmem:[#allocation2 + $0x50] sm:$0x8]  ;;  %v15575_v36 = vld [vmem:[#allocation2 + $0x54] sm:$0xf]  ;;  %v15577_v13 = vpop.f32.mrf.mxu0 }
 0x32a   :  { %v15563_v17 = vpop.f32.mrf.mxu1  ;;  %v11774_v14 = vcombine.low %v7167_v31, %v7177_v39  ;;  %v7855_v42 = vsel %vm13824_vm2, %v11784_v19, %v7854_v62  ;;  %v11887_v61 = vcombine.low %v15476_v11, %v15488_v48  ;;  %v11785_v4 = vrot.slane %v7866_v27, 11  ;;  %v18137_v1 = vld [vmem:[#allocation109_spill] sm:$0xff]  ;;  %v18138_v19 = vld [vmem:[#allocation112_spill] sm:$0xff]  ;;  %v15587_v62 = vld [vmem:[#allocation2 + $0x58] sm:$0xf] }
 0x32b   :  { %18136 = vst [vmem:[#allocation77_spill] sm:$0xff] %v15563_v17  ;;  %v7864_v12 = vsel %vm13824_vm2, %v7856_v32, %v7863_v49  ;;  %v7876_v37 = vor.u32 %v7874_v46, %v7873_v44  ;;  %v7882_v17 = vrot.slane %v7880_v51, 7  ;;  %v7883_v58 = vshll.u32 %v15554_v47, 16  ;;  %v18140_v11 = vld [vmem:[#allocation113_spill] sm:$0xff]  ;;  %v18142_v39 = vld [vmem:[#allocation114_spill] sm:$0xff] }
 0x32c   :  { %v4301_v56 = vadd.f32 %v18137_v1, %v15224_v38  ;;  %v15583_v31 = vadd.f32 %v18138_v19, %v15519_v43  ;;  %v4304_v48 = vadd.f32 %v18140_v11, %v15230_v26  ;;  %13005 = vmatmul.mubr.bf16.gmra.mxu0 %v11774_v14  ;;  %v11832_v27 = vcombine.low %v7855_v42, %v7864_v12  ;;  %v13422_v32 = vld [vmem:[%s17831_s2 + $0x230] sm:$0xff]   ;;  %v15592_v46 = vpop.f32.mrf.mxu1  ;;  %v18143_v38 = vld [vmem:[#allocation115_spill] sm:$0xff]  ;;  %v18144_v26 = vld [vmem:[#allocation116_spill] sm:$0xff] }
 0x32d   :  { %18141 = vst [vmem:[#allocation81_spill] sm:$0xff] %v15592_v46  ;;  %v15595_v49 = vadd.f32 %v18142_v39, %v4298_v20  ;;  %v4302_v43 = vadd.f32 %v18143_v38, %v15234_v50  ;;  %13104 = vmatprep.mubr.bf16.mxu0 %v11887_v61  ;;  %v7878_v51 = vrot.slane %v7873_v44, 4  ;;  %v7885_v1 = vor.u32 %v7883_v58, %v7882_v17  ;;  %v18146_v42 = vld [vmem:[#allocation118_spill] sm:$0xff]  ;;  %v15605_v46 = vld [vmem:[#allocation2 + $0x64] sm:$0xf]  ;;  %v15620_v61 = vpop.f32.mrf.mxu0 }
 0x32e   :  { %18139 = vst [vmem:[#allocation74_spill] sm:$0xff] %v15583_v31  ;;  %v15600_v14 = vadd.f32 %v18144_v26, %v4301_v56  ;;  %v4305_v12 = vadd.f32 %v18146_v42, %v15238_v9  ;;  %13025 = vmatmul.mubr.bf16.vlgmr.msra.gmra.mxu1 %v11832_v27  ;;  %v7888_v19 = vshrl.u32 %v7734_v63, 16  ;;  %v7893_v11 = vshrl.u32 %v15575_v36, 16  ;;  %v7737_v31 = vld [vmem:[#allocation2 + $0x60] sm:$0x8]  ;;  %v13525_v58 = vld [vmem:[%s17831_s2 + $0x238] sm:$0xff]  }
 0x32f   :  { %v18147_v20 = vld [vmem:[#allocation119_spill] sm:$0xff]  ;;  %13169 = vmatpush3.bf16.msra.mxu1 %v13525_v58  ;;  %v7877_v50 = vsel %vm13824_vm2, %v11785_v4, %v7876_v37  ;;  %v7886_v9 = vsel %vm13824_vm2, %v7878_v51, %v7885_v1  ;;  %v7902_v17 = vshrl.u32 %v15587_v62, 16  ;;  %v15618_v44 = vld [vmem:[#allocation2 + $0x68] sm:$0xf]  ;;  %18149 = vst [vmem:[#allocation78_spill] sm:$0xff] %v15620_v61  ;;  %v7905_v27 = vshll.u32 %v15587_v62, 16  ;;  %v15627_v37 = vpop.f32.mrf.mxu1 }
 0x330   :  { %18145 = vst [vmem:[#allocation76_spill] sm:$0xff] %v15600_v14  ;;  %v15608_v39 = vadd.f32 %v18147_v20, %v4304_v48  ;;  %v11833_v63 = vcombine.low %v7877_v50, %v7886_v9  ;;  %v7895_v56 = vrot.slane %v7893_v11, 7  ;;  %v7896_v48 = vshll.u32 %v15575_v36, 16  ;;  %13170 = vmatprep.subr.bf16.mxu1 %v13422_v32  ;;  %v13427_v4 = vld [vmem:[%s17831_s2 + $0x228] sm:$0xff]   ;;  %v15671_v14 = vld [vmem:[#allocation2 + $0x84] sm:$0xf] }
 0x331   :  { %v11786_v38 = vrot.slane %v7888_v19, 11  ;;  %v7904_v51 = vrot.slane %v7902_v17, 7  ;;  %v7910_v1 = vshrl.u32 %v7737_v31, 16  ;;  %v7915_v26 = vshrl.u32 %v15605_v46, 16  ;;  %v18150_v31 = vld [vmem:[#allocation122_spill] sm:$0xff] }
 0x332   :  { %18148 = vst [vmem:[#allocation83_spill] sm:$0xff] %v15608_v39  ;;  %13028 = vmatprep.mubr.bf16.mxu1 %v11833_v63  ;;  %v11888_v42 = vcombine.low %v15531_v29, %v15535_v16  ;;  %v7898_v11 = vor.u32 %v7896_v48, %v7895_v56  ;;  %v11889_v20 = vcombine.low %v15548_v54, %v15554_v47  ;;  %v7924_v58 = vshrl.u32 %v15618_v44, 16  ;;  %v13432_v54 = vld [vmem:[%s17831_s2 + $0x220] sm:$0xff]   ;;  %v15644_v47 = vpop.f32.mrf.mxu1 }
 0x333   :  { %v7900_v50 = vrot.slane %v7895_v56, 4  ;;  %v7907_v9 = vor.u32 %v7905_v27, %v7904_v51  ;;  %v7917_v61 = vrot.slane %v7915_v26, 7  ;;  %v7918_v39 = vshll.u32 %v15605_v46, 16  ;;  %13171 = vmatpush3.bf16.msra.mxu1 %v13422_v32  ;;  %18151 = vst [vmem:[#allocation85_spill] sm:$0xff] %v15644_v47  ;;  %v18152_v56 = vld [vmem:[#allocation121_spill] sm:$0xff] }
 0x334   :  { %v4308_v17 = vadd.f32 %v18150_v31, %v15248_v10  ;;  %13105 = vmatmul.mubr.bf16.vlgmr.msra.gmra.mxu0 %v11888_v42  ;;  %v11787_v63 = vrot.slane %v7910_v1, 11  ;;  %v7926_v29 = vrot.slane %v7924_v58, 7  ;;  %v7927_v16 = vshll.u32 %v15618_v44, 16  ;;  %13172 = vmatprep.subr.bf16.mxu1 %v13427_v4  ;;  %v7740_v51 = vld [vmem:[#allocation2 + $0x70] sm:$0x8]  ;;  %v18154_v42 = vld [vmem:[#allocation124_spill] sm:$0xff] }
 0x335   :  { %v15647_v48 = vadd.f32 %v18152_v56, %v4302_v43  ;;  %v7899_v32 = vsel %vm13824_vm2, %v11786_v38, %v7898_v11  ;;  %v7908_v10 = vsel %vm13824_vm2, %v7900_v50, %v7907_v9  ;;  %13108 = vmatprep.mubr.bf16.mxu0 %v11889_v20  ;;  %v7920_v27 = vor.u32 %v7918_v39, %v7917_v61  ;;  %v15653_v1 = vld [vmem:[#allocation2 + $0x74] sm:$0xf]  ;;  %v15659_v56 = vld [vmem:[#allocation2 + $0x78] sm:$0xf]  ;;  %v7743_v9 = vld [vmem:[#allocation2 + $0x80] sm:$0x8] }
 0x336   :  { %v15636_v19 = vpop.f32.mrf.mxu0  ;;  %v4306_v58 = vadd.f32 %v18154_v42, %v15254_v22  ;;  %v11834_v31 = vcombine.low %v7899_v32, %v7908_v10  ;;  %v7922_v47 = vrot.slane %v7917_v61, 4  ;;  %v7929_v43 = vor.u32 %v7927_v16, %v7926_v29  ;;  %v18157_v11 = vld [vmem:[#allocation126_spill] sm:$0xff] }
 0x337   :  { %18153 = vst [vmem:[#allocation82_spill] sm:$0xff] %v15647_v48  ;;  %v18155_v48 = vld [vmem:[#allocation123_spill] sm:$0xff]  ;;  %v4309_v20 = vadd.f32 %v18157_v11, %v15258_v34  ;;  %v15667_v39 = vadd.f32 %v14994_v0, %v4308_v17  ;;  %v4312_v50 = vadd.f32 %v15010_v5, %v15262_v41  ;;  %13173 = vmatpush3.bf16.msra.mxu1 %v13427_v4  ;;  %v7932_v34 = vshrl.u32 %v7740_v51, 16  ;;  %v15680_v17 = vld [vmem:[#allocation2 + $0x88] sm:$0xf]  ;;  %v13437_v41 = vld [vmem:[%s17831_s2 + $0x218] sm:$0xff]  }
 0x338   :  { %v15655_v26 = vpop.f32.mrf.mxu0  ;;  %v15662_v38 = vadd.f32 %v18155_v48, %v4305_v12  ;;  %13029 = vmatmul.mubr.bf16.gmra.mxu1 %v11834_v31  ;;  %v7921_v12 = vsel %vm13824_vm2, %v11787_v63, %v7920_v27  ;;  %v7930_v61 = vsel %vm13824_vm2, %v7922_v47, %v7929_v43  ;;  %v7937_v0 = vshrl.u32 %v15653_v1, 16  ;;  %13174 = vmatprep.subr.bf16.mxu1 %v13432_v54 }
 0x339   :  { %18158 = vst [vmem:[#allocation84_spill] sm:$0xff] %v15667_v39  ;;  %v15682_v5 = vpop.f32.mrf.mxu1  ;;  %v11835_v4 = vcombine.low %v7921_v12, %v7930_v61  ;;  %v11890_v29 = vcombine.low %v15575_v36, %v15587_v62  ;;  %v7940_v63 = vshll.u32 %v15653_v1, 16  ;;  %v7946_v16 = vshrl.u32 %v15659_v56, 16  ;;  %v7746_v39 = vld [vmem:[#allocation2 + $0x90] sm:$0x8] }
 0x33a   :  { %18156 = vst [vmem:[#allocation89_spill] sm:$0xff] %v15662_v38  ;;  %v15673_v22 = vpop.f32.mrf.mxu0  ;;  %v11788_v47 = vrot.slane %v7932_v34, 11  ;;  %v7939_v48 = vrot.slane %v7937_v0, 7  ;;  %v7949_v32 = vshll.u32 %v15659_v56, 16  ;;  %v7954_v10 = vshrl.u32 %v7743_v9, 16 }
 0x33b   :  { %v15692_v27 = vpop.f32.mrf.mxu1  ;;  %13032 = vmatprep.mubr.bf16.mxu1 %v11835_v4  ;;  %v7948_v51 = vrot.slane %v7946_v16, 7  ;;  %v11891_v42 = vcombine.low %v15605_v46, %v15618_v44  ;;  %v7959_v31 = vshrl.u32 %v15671_v14, 16  ;;  %v7968_v36 = vshrl.u32 %v15680_v17, 16  ;;  %13175 = vmatpush3.bf16.msra.mxu1 %v13432_v54  ;;  %v13442_v46 = vld [vmem:[%s17831_s2 + $0x210] sm:$0xff]   ;;  %v18160_v4 = vld [vmem:[#allocation128_spill] sm:$0xff] }
 0x33c   :  { %v15698_v62 = vpop.f32.mrf.mxu0  ;;  %13109 = vmatmul.mubr.bf16.gmra.mxu0 %v11890_v29  ;;  %v7942_v43 = vor.u32 %v7940_v63, %v7939_v48  ;;  %v7944_v11 = vrot.slane %v7939_v48, 4  ;;  %v11789_v12 = vrot.slane %v7954_v10, 11  ;;  %v7962_v9 = vshll.u32 %v15671_v14, 16  ;;  %13176 = vmatprep.subr.bf16.mxu1 %v13437_v41  ;;  %v18162_v63 = vld [vmem:[#allocation130_spill] sm:$0xff]  ;;  %v18163_v48 = vld [vmem:[#allocation129_spill] sm:$0xff] }
 0x33d   :  { %18159 = vst [vmem:[#allocation91_spill] sm:$0xff] %v15698_v62  ;;  %v15701_v61 = vpop.f32.mrf.mxu1  ;;  %v7951_v44 = vor.u32 %v7949_v32, %v7948_v51  ;;  %13112 = vmatprep.mubr.bf16.mxu0 %v11891_v42  ;;  %v7961_v34 = vrot.slane %v7959_v31, 7  ;;  %v7970_v0 = vrot.slane %v7968_v36, 7  ;;  %v7971_v54 = vshll.u32 %v15680_v17, 16  ;;  %v15723_v36 = vld [vmem:[#allocation2 + $0x98] sm:$0xf] }
 0x33e   :  { %v15708_v29 = vadd.f32 %v18160_v4, %v4306_v58  ;;  %v4310_v16 = vadd.f32 %v18162_v63, %v15274_v23  ;;  %v15713_v10 = vadd.f32 %v18163_v48, %v4309_v20  ;;  %v7943_v62 = vsel %vm13824_vm2, %v11788_v47, %v7942_v43  ;;  %v15721_v58 = vld [vmem:[#allocation2 + $0x94] sm:$0xf]  ;;  %v18166_v20 = vld [vmem:[#allocation132_spill] sm:$0xff] }
 0x33f   :  { %v15717_v38 = vpop.f32.mrf.mxu1  ;;  %v7952_v32 = vsel %vm13824_vm2, %v7944_v11, %v7951_v44  ;;  %v7964_v51 = vor.u32 %v7962_v9, %v7961_v34  ;;  %v7966_v42 = vrot.slane %v7961_v34, 4  ;;  %v7973_v31 = vor.u32 %v7971_v54, %v7970_v0  ;;  %13177 = vmatpush3.bf16.msra.mxu1 %v13437_v41  ;;  %v18167_v47 = vld [vmem:[#allocation133_spill] sm:$0xff]  ;;  %v18169_v63 = vld [vmem:[#allocation136_spill] sm:$0xff]  ;;  %v18170_v44 = vld [vmem:[#allocation135_spill] sm:$0xff] }
 0x340   :  { %18161 = vst [vmem:[#allocation86_spill] sm:$0xff] %v15708_v29  ;;  %18164 = vst [vmem:[#allocation93_spill] sm:$0xff] %v15713_v10  ;;  %v15725_v23 = vpop.f32.mrf.mxu0  ;;  %v4313_v4 = vadd.f32 %v18166_v20, %v15282_v8  ;;  %v15730_v43 = vadd.f32 %v18167_v47, %v4312_v50  ;;  %v4316_v48 = vadd.f32 %v18169_v63, %v15286_v45  ;;  %13178 = vmatprep.subr.bf16.mxu1 %v13442_v46  ;;  %v7749_v54 = vld [vmem:[#allocation2 + $0xa0] sm:$0x8]  ;;  %v15743_v50 = vld [vmem:[#allocation2 + $0xa4] sm:$0xf] }
 0x341   :  { %18165 = vst [vmem:[#allocation90_spill] sm:$0xff] %v15717_v38  ;;  %v11836_v11 = vcombine.low %v7943_v62, %v7952_v32  ;;  %v15734_v9 = vpop.f32.mrf.mxu1  ;;  %v15737_v34 = vadd.f32 %v18170_v44, %v4310_v16  ;;  %v7965_v0 = vsel %vm13824_vm2, %v11789_v12, %v7964_v51  ;;  %v7974_v41 = vsel %vm13824_vm2, %v7966_v42, %v7973_v31  ;;  %v13447_v45 = vld [vmem:[%s17831_s2 + $0x208] sm:$0xff]   ;;  %v18172_v38 = vld [vmem:[#allocation138_spill] sm:$0xff] }
 0x342   :  { %18168 = vst [vmem:[#allocation97_spill] sm:$0xff] %v15730_v43  ;;  %v7976_v8 = vshrl.u32 %v7746_v39, 16  ;;  %v15745_v20 = vpop.f32.mrf.mxu0  ;;  %v11837_v62 = vcombine.low %v7965_v0, %v7974_v41  ;;  %v11892_v16 = vcombine.low %v15653_v1, %v15659_v56  ;;  %v7981_v12 = vshrl.u32 %v15721_v58, 16  ;;  %v15754_v51 = vld [vmem:[#allocation2 + $0xa8] sm:$0xf] }
 0x343   :  { %18171 = vst [vmem:[#allocation98_spill] sm:$0xff] %v15737_v34  ;;  %13033 = vmatmul.mubr.bf16.gmra.mxu1 %v11836_v11  ;;  %v7990_v32 = vshrl.u32 %v15723_v36, 16  ;;  %v15756_v39 = vpop.f32.mrf.mxu1  ;;  %v7984_v31 = vshll.u32 %v15721_v58, 16  ;;  %v7993_v47 = vshll.u32 %v15723_v36, 16  ;;  %v11893_v63 = vcombine.low %v15671_v14, %v15680_v17  ;;  %v18173_v14 = vld [vmem:[#allocation137_spill] sm:$0xff] }
 0x344   :  { %v11790_v42 = vrot.slane %v7976_v8, 11  ;;  %v15762_v11 = vpop.f32.mrf.mxu0  ;;  %13179 = vmatpush3.bf16.msra.mxu1 %v13442_v46  ;;  %13036 = vmatprep.mubr.bf16.mxu1 %v11837_v62  ;;  %v7983_v1 = vrot.slane %v7981_v12, 7  ;;  %v7998_v44 = vshrl.u32 %v7749_v54, 16  ;;  %v8003_v0 = vshrl.u32 %v15743_v50, 16  ;;  %v13452_v8 = vld [vmem:[%s17831_s2 + $0x200] sm:$0xff]   ;;  %v18175_v46 = vld [vmem:[#allocation140_spill] sm:$0xff] }
 0x345   :  { %13113 = vmatmul.mubr.bf16.gmra.mxu0 %v11892_v16  ;;  %v7992_v56 = vrot.slane %v7990_v32, 7  ;;  %v15765_v41 = vpop.f32.mrf.mxu1  ;;  %v4314_v34 = vadd.f32 %v18172_v38, %v15290_v18  ;;  %v15773_v17 = vadd.f32 %v18173_v14, %v4313_v4  ;;  %v4317_v62 = vadd.f32 %v18175_v46, %v15298_v3  ;;  %13180 = vmatprep.subr.bf16.mxu1 %v13447_v45  ;;  %v18178_v3 = vld [vmem:[#allocation141_spill] sm:$0xff] }
 0x346   :  { %13116 = vmatprep.mubr.bf16.mxu0 %v11893_v63  ;;  %v8012_v54 = vshrl.u32 %v15754_v51, 16  ;;  %v7986_v16 = vor.u32 %v7984_v31, %v7983_v1  ;;  %v7988_v12 = vrot.slane %v7983_v1, 4  ;;  %v8006_v43 = vshll.u32 %v15743_v50, 16  ;;  %v15779_v10 = vpop.f32.mrf.mxu0  ;;  %v18180_v31 = vld [vmem:[#allocation144_spill] sm:$0xff]  ;;  %v15793_v46 = vld [vmem:[#allocation2 + $0xb4] sm:$0xf] }
 0x347   :  { %18174 = vst [vmem:[#allocation92_spill] sm:$0xff] %v15773_v17  ;;  %v7995_v32 = vor.u32 %v7993_v47, %v7992_v56  ;;  %18176 = vst [vmem:[#allocation99_spill] sm:$0xff] %v15779_v10  ;;  %v15781_v29 = vpop.f32.mrf.mxu1  ;;  %v11791_v18 = vrot.slane %v7998_v44, 11  ;;  %v8005_v38 = vrot.slane %v8003_v0, 7  ;;  %v8015_v14 = vshll.u32 %v15754_v51, 16 }
 0x348   :  { %18177 = vst [vmem:[#allocation94_spill] sm:$0xff] %v15781_v29  ;;  %v8014_v4 = vrot.slane %v8012_v54, 7  ;;  %v7752_v17 = vld [vmem:[#allocation2 + $0xb0] sm:$0x8]  ;;  %13181 = vmatpush3.bf16.msra.mxu1 %v13447_v45  ;;  %v15785_v63 = vadd.f32 %v18178_v3, %v4316_v48  ;;  %v4320_v1 = vadd.f32 %v18180_v31, %v15304_v21  ;;  %v7987_v47 = vsel %vm13824_vm2, %v11790_v42, %v7986_v16  ;;  %v15797_v48 = vld [vmem:[#allocation2 + $0xb8] sm:$0xf] }
 0x349   :  { %v7996_v56 = vsel %vm13824_vm2, %v7988_v12, %v7995_v32  ;;  %v15795_v44 = vpop.f32.mrf.mxu1  ;;  %13182 = vmatprep.subr.bf16.mxu1 %v13452_v8  ;;  %v8008_v54 = vor.u32 %v8006_v43, %v8005_v38  ;;  %v8010_v45 = vrot.slane %v8005_v38, 4  ;;  %v18181_v3 = vld [vmem:[#allocation143_spill] sm:$0xff]  ;;  %v18183_v21 = vld [vmem:[#allocation146_spill] sm:$0xff]  ;;  %v11894_v16 = vcombine.low %v15721_v58, %v15723_v36  ;;  %v18184_v43 = vld [vmem:[#allocation145_spill] sm:$0xff] }
 0x34a   :  { %18179 = vst [vmem:[#allocation100_spill] sm:$0xff] %v15785_v63  ;;  %v11838_v0 = vcombine.low %v7987_v47, %v7996_v56  ;;  %v8017_v29 = vor.u32 %v8015_v14, %v8014_v4  ;;  %v15800_v10 = vadd.f32 %v18181_v3, %v4314_v34  ;;  %v4318_v42 = vadd.f32 %v18183_v21, %v15308_v30  ;;  %v7755_v32 = vld [vmem:[#allocation2 + $0xc0] sm:$0x8]  ;;  %v15818_v14 = vld [vmem:[#allocation2 + $0xc4] sm:$0xf]  ;;  %v18186_v36 = vld [vmem:[#allocation148_spill] sm:$0xff] }
 0x34b   :  { %v8020_v12 = vshrl.u32 %v7752_v17, 16  ;;  %v15806_v31 = vpop.f32.mrf.mxu0  ;;  %v15808_v63 = vpop.f32.mrf.mxu1  ;;  %v15811_v38 = vadd.f32 %v18184_v43, %v4317_v62  ;;  %v8009_v34 = vsel %vm13824_vm2, %v11791_v18, %v8008_v54  ;;  %v8025_v30 = vshrl.u32 %v15793_v46, 16  ;;  %v15820_v58 = vld [vmem:[#allocation2 + $0xc8] sm:$0xf] }
 0x34c   :  { %18182 = vst [vmem:[#allocation101_spill] sm:$0xff] %v15800_v10  ;;  %13037 = vmatmul.mubr.bf16.gmra.mxu1 %v11838_v0  ;;  %v8018_v4 = vsel %vm13824_vm2, %v8010_v45, %v8017_v29  ;;  %v4321_v17 = vadd.f32 %v18186_v36, %v15314_v40  ;;  %v8028_v62 = vshll.u32 %v15793_v46, 16  ;;  %v8034_v56 = vshrl.u32 %v15797_v48, 16  ;;  %v18191_v10 = vld [vmem:[#allocation149_spill] sm:$0xff] }
 0x34d   :  { %18185 = vst [vmem:[#allocation104_spill] sm:$0xff] %v15811_v38  ;;  %v11839_v47 = vcombine.low %v8009_v34, %v8018_v4  ;;  %13117 = vmatmul.mubr.bf16.gmra.mxu0 %v11894_v16  ;;  %v15826_v0 = vpop.f32.mrf.mxu0  ;;  %v15828_v18 = vpop.f32.mrf.mxu1  ;;  %13183 = vmatpush3.bf16.msra.mxu1 %v13452_v8  ;;  %v11792_v29 = vrot.slane %v8020_v12, 11  ;;  %v8027_v54 = vrot.slane %v8025_v30, 7  ;;  %v11895_v45 = vcombine.low %v15743_v50, %v15754_v51 }
 0x34e   :  { %18187 = vst [vmem:[#allocation105_spill] sm:$0xff] %v15828_v18  ;;  %v8042_v3 = vshrl.u32 %v7755_v32, 16  ;;  %v8036_v21 = vrot.slane %v8034_v56, 7  ;;  %v8037_v40 = vshll.u32 %v15797_v48, 16  ;;  %v8047_v16 = vshrl.u32 %v15818_v14, 16 }
 0x34f   :  { %13040 = vmatprep.mubr.bf16.mxu1 %v11839_v47  ;;  %v8056_v43 = vshrl.u32 %v15820_v58, 16  ;;  %v15835_v34 = vpop.f32.mrf.mxu0  ;;  %v15837_v4 = vpop.f32.mrf.mxu1  ;;  %v8030_v36 = vor.u32 %v8028_v62, %v8027_v54  ;;  %v8032_v8 = vrot.slane %v8027_v54, 4  ;;  %13120 = vmatprep.mubr.bf16.mxu0 %v11895_v45  ;;  %v8050_v30 = vshll.u32 %v15818_v14, 16  ;;  %v18194_v54 = vld [vmem:[#allocation151_spill] sm:$0xff] }
 0x350   :  { %18188 = vst [vmem:[#allocation3_spill] sm:$0xff] %v15837_v4  ;;  %v11793_v12 = vrot.slane %v8042_v3, 11  ;;  %v8039_v50 = vor.u32 %v8037_v40, %v8036_v21  ;;  %v8049_v51 = vrot.slane %v8047_v16, 7  ;;  %v8059_v47 = vshll.u32 %v15820_v58, 16  ;;  %v18193_v4 = vld [vmem:[#allocation152_spill] sm:$0xff] }
 0x351   :  { %v8058_v32 = vrot.slane %v8056_v43, 7  ;;  %v15841_v56 = vpop.f32.mrf.mxu0  ;;  %v15843_v38 = vpop.f32.mrf.mxu1  ;;  %v15846_v18 = vadd.f32 %v18191_v10, %v4320_v1  ;;  %v4324_v62 = vadd.f32 %v18193_v4, %v15326_v2  ;;  %v15851_v45 = vadd.f32 %v18194_v54, %v4318_v42  ;;  %v7758_v21 = vld [vmem:[#allocation2 + $0xd0] sm:$0x8]  ;;  %v15859_v10 = vld [vmem:[#allocation2 + $0xd8] sm:$0xf] }
 0x352   :  { %18189 = vst [vmem:[#allocation106_spill] sm:$0xff] %v15841_v56  ;;  %18190 = vst [vmem:[#allocation107_spill] sm:$0xff] %v15843_v38  ;;  %v8031_v3 = vsel %vm13824_vm2, %v11792_v29, %v8030_v36  ;;  %v8040_v40 = vsel %vm13824_vm2, %v8032_v8, %v8039_v50  ;;  %v8052_v16 = vor.u32 %v8050_v30, %v8049_v51  ;;  %v8054_v43 = vrot.slane %v8049_v51, 4  ;;  %v15857_v38 = vld [vmem:[#allocation2 + $0xd4] sm:$0xf]  ;;  %v18196_v2 = vld [vmem:[#allocation154_spill] sm:$0xff] }
 0x353   :  { %18192 = vst [vmem:[#allocation108_spill] sm:$0xff] %v15846_v18  ;;  %18195 = vst [vmem:[#allocation109_spill] sm:$0xff] %v15851_v45  ;;  %v8061_v56 = vor.u32 %v8059_v47, %v8058_v32  ;;  %v15861_v1 = vpop.f32.mrf.mxu1  ;;  %v4322_v42 = vadd.f32 %v18196_v2, %v15332_v33  ;;  %v18197_v4 = vld [vmem:[#allocation153_spill] sm:$0xff]  ;;  %v11840_v29 = vcombine.low %v8031_v3, %v8040_v40  ;;  %v18199_v8 = vld [vmem:[#allocation156_spill] sm:$0xff]  ;;  %v8064_v32 = vshrl.u32 %v7758_v21, 16 }
 0x354   :  { %v15866_v54 = vadd.f32 %v18197_v4, %v4321_v17  ;;  %v11896_v36 = vcombine.low %v15793_v46, %v15797_v48  ;;  %v4325_v30 = vadd.f32 %v18199_v8, %v15336_v24  ;;  %v8053_v50 = vsel %vm13824_vm2, %v11793_v12, %v8052_v16  ;;  %v7761_v47 = vld [vmem:[#allocation2 + $0xe0] sm:$0x8]  ;;  %v15876_v45 = vld [vmem:[#allocation2 + $0xe4] sm:$0xf]  ;;  %v15878_v33 = vpop.f32.mrf.mxu0  ;;  %v18200_v3 = vld [vmem:[#allocation157_spill] sm:$0xff] }
 0x355   :  { %v8062_v51 = vsel %vm13824_vm2, %v8054_v43, %v8061_v56  ;;  %v15880_v17 = vpop.f32.mrf.mxu1  ;;  %v15883_v40 = vadd.f32 %v18200_v3, %v4324_v62  ;;  %13041 = vmatmul.mubr.bf16.gmra.mxu1 %v11840_v29  ;;  %v8069_v24 = vshrl.u32 %v15857_v38, 16  ;;  %v8078_v48 = vshrl.u32 %v15859_v10, 16  ;;  %v15887_v12 = vld [vmem:[#allocation2 + $0xe8] sm:$0xf] }
 0x356   :  { %18198 = vst [vmem:[#allocation112_spill] sm:$0xff] %v15866_v54  ;;  %v11841_v46 = vcombine.low %v8053_v50, %v8062_v51  ;;  %13121 = vmatmul.mubr.bf16.gmra.mxu0 %v11896_v36  ;;  %v11794_v56 = vrot.slane %v8064_v32, 11  ;;  %v8072_v21 = vshll.u32 %v15857_v38, 16  ;;  %v8081_v16 = vshll.u32 %v15859_v10, 16  ;;  %v15893_v2 = vpop.f32.mrf.mxu0  ;;  %v18203_v50 = vld [vmem:[#allocation160_spill] sm:$0xff]  ;;  %v18204_v32 = vld [vmem:[#allocation159_spill] sm:$0xff] }
 0x357   :  { %18201 = vst [vmem:[#allocation113_spill] sm:$0xff] %v15883_v40  ;;  %v11897_v43 = vcombine.low %v15818_v14, %v15820_v58  ;;  %v15895_v62 = vpop.f32.mrf.mxu1  ;;  %v8071_v4 = vrot.slane %v8069_v24, 7  ;;  %v8080_v29 = vrot.slane %v8078_v48, 7  ;;  %v8086_v36 = vshrl.u32 %v7761_v47, 16  ;;  %v18206_v40 = vld [vmem:[#allocation162_spill] sm:$0xff] }
 0x358   :  { %18202 = vst [vmem:[#allocation114_spill] sm:$0xff] %v15895_v62  ;;  %13044 = vmatprep.mubr.bf16.mxu1 %v11841_v46  ;;  %v8091_v8 = vshrl.u32 %v15876_v45, 16  ;;  %v15900_v51 = vadd.f32 %v18203_v50, %v15342_v25  ;;  %v15903_v3 = vadd.f32 %v18204_v32, %v4322_v42  ;;  %v15907_v14 = vadd.f32 %v18206_v40, %v15350_v7  ;;  %v15910_v46 = vpop.f32.mrf.mxu0 }
 0x359   :  { %13124 = vmatprep.mubr.bf16.mxu0 %v11897_v43  ;;  %v8100_v58 = vshrl.u32 %v15887_v12, 16  ;;  %v15912_v24 = vpop.f32.mrf.mxu1  ;;  %v8074_v47 = vor.u32 %v8072_v21, %v8071_v4  ;;  %v8076_v48 = vrot.slane %v8071_v4, 4  ;;  %v8083_v62 = vor.u32 %v8081_v16, %v8080_v29  ;;  %v18210_v43 = vld [vmem:[#allocation161_spill] sm:$0xff] }
 0x35a   :  { %18205 = vst [vmem:[#allocation115_spill] sm:$0xff] %v15903_v3  ;;  %18207 = vst [vmem:[#allocation116_spill] sm:$0xff] %v15912_v24  ;;  %v8094_v25 = vshll.u32 %v15876_v45, 16  ;;  %v11795_v50 = vrot.slane %v8086_v36, 11  ;;  %v8093_v54 = vrot.slane %v8091_v8, 7  ;;  %v8103_v32 = vshll.u32 %v15887_v12, 16  ;;  %v15916_v7 = vpop.f32.mrf.mxu0 }
 0x35b   :  { %v8102_v42 = vrot.slane %v8100_v58, 7  ;;  %v7764_v3 = vld [vmem:[#allocation2 + $0xf0] sm:$0x8]  ;;  %18208 = vst [vmem:[#allocation118_spill] sm:$0xff] %v15916_v7  ;;  %v15918_v40 = vpop.f32.mrf.mxu1  ;;  %v15921_v18 = vadd.f32 %v18210_v43, %v4325_v30  ;;  %v4348_v21 = vadd.f32 %v15484_v53, %v15438_v57  ;;  %v8075_v16 = vsel %vm13824_vm2, %v11794_v56, %v8074_v47  ;;  %v15929_v29 = vld [vmem:[#allocation2 + $0xf4] sm:$0xf] }
 0x35c   :  { %18209 = vst [vmem:[#allocation119_spill] sm:$0xff] %v15918_v40  ;;  %v8084_v4 = vsel %vm13824_vm2, %v8076_v48, %v8083_v62  ;;  %v8096_v8 = vor.u32 %v8094_v25, %v8093_v54  ;;  %v8098_v58 = vrot.slane %v8093_v54, 4  ;;  %v15931_v24 = vld [vmem:[#allocation2 + $0xf8] sm:$0xf]  ;;  %v4346_v30 = vadd.f32 %v15505_v35, %v15442_v28  ;;  %v7767_v62 = vld [vmem:[#allocation2 + $0x100] sm:$0x8] }
 0x35d   :  { %v11842_v36 = vcombine.low %v8075_v16, %v8084_v4  ;;  %v8105_v7 = vor.u32 %v8103_v32, %v8102_v42  ;;  %v15933_v40 = vpop.f32.mrf.mxu1  ;;  %v15938_v57 = vadd.f32 %v15540_v6, %v4348_v21  ;;  %v11898_v53 = vcombine.low %v15857_v38, %v15859_v10  ;;  %v15949_v35 = vld [vmem:[#allocation2 + $0x104] sm:$0xf]  ;;  %v15951_v6 = vld [vmem:[#allocation2 + $0x108] sm:$0xf] }
 0x35e   :  { %v8108_v56 = vshrl.u32 %v7764_v3, 16  ;;  %v8097_v54 = vsel %vm13824_vm2, %v11795_v50, %v8096_v8  ;;  %v4349_v48 = vadd.f32 %v15527_v15, %v15452_v55  ;;  %v8113_v28 = vshrl.u32 %v15929_v29, 16  ;;  %v15953_v25 = vpop.f32.mrf.mxu0 }
 0x35f   :  { %18211 = vst [vmem:[#allocation122_spill] sm:$0xff] %v15938_v57  ;;  %13045 = vmatmul.mubr.bf16.gmra.mxu1 %v11842_v36  ;;  %v8106_v47 = vsel %vm13824_vm2, %v8098_v58, %v8105_v7  ;;  %v15955_v38 = vpop.f32.mrf.mxu1  ;;  %13125 = vmatmul.mubr.bf16.gmra.mxu0 %v11898_v53  ;;  %v8116_v50 = vshll.u32 %v15929_v29, 16  ;;  %v8122_v42 = vshrl.u32 %v15931_v24, 16  ;;  %v11899_v55 = vcombine.low %v15876_v45, %v15887_v12 }
 0x360   :  { %18212 = vst [vmem:[#allocation121_spill] sm:$0xff] %v15955_v38  ;;  %v11843_v10 = vcombine.low %v8097_v54, %v8106_v47  ;;  %v11796_v3 = vrot.slane %v8108_v56, 11  ;;  %v8115_v32 = vrot.slane %v8113_v28, 7  ;;  %v15962_v15 = vadd.f32 %v15558_v60, %v4346_v30  ;;  %v15964_v43 = vpop.f32.mrf.mxu0  ;;  %v18214_v28 = vld [vmem:[#allocation164_spill] sm:$0xff]  ;;  %v7770_v38 = vld [vmem:[#allocation2 + $0x110] sm:$0x8] }
 0x361   :  { %v8130_v7 = vshrl.u32 %v7767_v62, 16  ;;  %v15966_v21 = vpop.f32.mrf.mxu1  ;;  %v8124_v16 = vrot.slane %v8122_v42, 7  ;;  %v8125_v4 = vshll.u32 %v15931_v24, 16  ;;  %v8135_v36 = vshrl.u32 %v15949_v35, 16  ;;  %13128 = vmatprep.mubr.bf16.mxu0 %v11899_v55  ;;  %v18215_v42 = vld [vmem:[#allocation53_spill] sm:$0xff] }
 0x362   :  { %18213 = vst [vmem:[#allocation124_spill] sm:$0xff] %v15962_v15  ;;  %13048 = vmatprep.mubr.bf16.mxu1 %v11843_v10  ;;  %v8144_v8 = vshrl.u32 %v15951_v6, 16  ;;  %v8118_v58 = vor.u32 %v8116_v50, %v8115_v32  ;;  %v8120_v53 = vrot.slane %v8115_v32, 4  ;;  %v8138_v60 = vshll.u32 %v15949_v35, 16  ;;  %v15972_v12 = vpop.f32.mrf.mxu0  ;;  %v18216_v50 = vld [vmem:[#allocation77_spill] sm:$0xff] }
 0x363   :  { %v11797_v45 = vrot.slane %v8130_v7, 11  ;;  %v15974_v30 = vpop.f32.mrf.mxu1  ;;  %v8127_v56 = vor.u32 %v8125_v4, %v8124_v16  ;;  %v8137_v62 = vrot.slane %v8135_v36, 7  ;;  %v8147_v47 = vshll.u32 %v15951_v6, 16 }
 0x364   :  { %v8146_v54 = vrot.slane %v8144_v8, 7  ;;  %v15979_v10 = vadd.f32 %v18214_v28, %v15354_v52  ;;  %v4352_v32 = vadd.f32 %v18216_v50, %v18215_v42  ;;  %v8119_v55 = vsel %vm13824_vm2, %v11796_v3, %v8118_v58  ;;  %v15988_v15 = vpop.f32.mrf.mxu0  ;;  %v15994_v28 = vld [vmem:[#allocation2 + $0x114] sm:$0xf]  ;;  %v15996_v42 = vld [vmem:[#allocation2 + $0x118] sm:$0xf] }
 0x365   :  { %v15986_v7 = vadd.f32 %v15577_v13, %v4349_v48  ;;  %18218 = vst [vmem:[#allocation126_spill] sm:$0xff] %v15988_v15  ;;  %v15990_v16 = vpop.f32.mrf.mxu1  ;;  %v8128_v4 = vsel %vm13824_vm2, %v8120_v53, %v8127_v56  ;;  %v8140_v36 = vor.u32 %v8138_v60, %v8137_v62  ;;  %v8142_v52 = vrot.slane %v8137_v62, 4  ;;  %v18219_v3 = vld [vmem:[#allocation165_spill] sm:$0xff]  ;;  %v18223_v56 = vld [vmem:[#allocation59_spill] sm:$0xff] }
 0x366   :  { %v8149_v8 = vor.u32 %v8147_v47, %v8146_v54  ;;  %v16000_v58 = vadd.f32 %v18219_v3, %v15900_v51  ;;  %v11844_v13 = vcombine.low %v8119_v55, %v8128_v4  ;;  %v16003_v48 = vadd.f32 %v15636_v19, %v4352_v32  ;;  %v18224_v62 = vld [vmem:[#allocation81_spill] sm:$0xff]  ;;  %v7773_v47 = vld [vmem:[#allocation2 + $0x140] sm:$0x8]  ;;  %v16015_v55 = vld [vmem:[#allocation2 + $0x144] sm:$0xf] }
 0x367   :  { %18217 = vst [vmem:[#allocation123_spill] sm:$0xff] %v15986_v7  ;;  %v11900_v50 = vcombine.low %v15929_v29, %v15931_v24  ;;  %v16007_v15 = vpop.f32.mrf.mxu1  ;;  %v8141_v53 = vsel %vm13824_vm2, %v11797_v45, %v8140_v36  ;;  %v4350_v54 = vadd.f32 %v18224_v62, %v18223_v56  ;;  %v8152_v51 = vshrl.u32 %v7770_v38, 16  ;;  %v16020_v45 = vld [vmem:[#allocation2 + $0x148] sm:$0xf]  ;;  %v18226_v62 = vld [vmem:[#allocation26_spill] sm:$0xff] }
 0x368   :  { %18220 = vst [vmem:[#allocation128_spill] sm:$0xff] %v16000_v58  ;;  %18221 = vst [vmem:[#allocation130_spill] sm:$0xff] %v16003_v48  ;;  %v8150_v60 = vsel %vm13824_vm2, %v8142_v52, %v8149_v8  ;;  %13049 = vmatmul.mubr.bf16.gmra.mxu1 %v11844_v13  ;;  %v8157_v24 = vshrl.u32 %v15994_v28, 16  ;;  %v8160_v29 = vshll.u32 %v15994_v28, 16  ;;  %v8166_v32 = vshrl.u32 %v15996_v42, 16  ;;  %v16022_v4 = vpop.f32.mrf.mxu0  ;;  %v18228_v48 = vld [vmem:[#allocation54_spill] sm:$0xff] }
 0x369   :  { %18222 = vst [vmem:[#allocation129_spill] sm:$0xff] %v16007_v15  ;;  %v11845_v19 = vcombine.low %v8141_v53, %v8150_v60  ;;  %13129 = vmatmul.mubr.bf16.gmra.mxu0 %v11900_v50  ;;  %v11798_v36 = vrot.slane %v8152_v51, 11  ;;  %v8169_v52 = vshll.u32 %v15996_v42, 16  ;;  %v11901_v38 = vcombine.low %v15949_v35, %v15951_v6  ;;  %v16033_v56 = vpop.f32.mrf.mxu1  ;;  %v18227_v51 = vld [vmem:[#allocation168_spill] sm:$0xff]  ;;  %v16124_v58 = vld [vmem:[#allocation2 + $0x174] sm:$0xf] }
 0x36a   :  { %v16028_v8 = vadd.f32 %v15655_v26, %v4350_v54  ;;  %v8159_v3 = vrot.slane %v8157_v24, 7  ;;  %v8168_v13 = vrot.slane %v8166_v32, 7  ;;  %v8174_v50 = vshrl.u32 %v7773_v47, 16  ;;  %v16031_v60 = vpop.f32.mrf.mxu0 }
 0x36b   :  { %13052 = vmatprep.mubr.bf16.mxu1 %v11845_v19  ;;  %v8179_v53 = vshrl.u32 %v16015_v55, 16  ;;  %v16037_v15 = vadd.f32 %v18227_v51, %v18226_v62  ;;  %v4353_v35 = vadd.f32 %v15627_v37, %v18228_v48  ;;  %13132 = vmatprep.mubr.bf16.mxu0 %v11901_v38  ;;  %v8182_v26 = vshll.u32 %v16015_v55, 16  ;;  %v7776_v37 = vld [vmem:[#allocation2 + $0x150] sm:$0x8]  ;;  %v18230_v48 = vld [vmem:[#allocation167_spill] sm:$0xff] }
 0x36c   :  { %18225 = vst [vmem:[#allocation132_spill] sm:$0xff] %v16028_v8  ;;  %v8188_v6 = vshrl.u32 %v16020_v45, 16  ;;  %v8162_v54 = vor.u32 %v8160_v29, %v8159_v3  ;;  %v8164_v47 = vrot.slane %v8159_v3, 4  ;;  %v8171_v19 = vor.u32 %v8169_v52, %v8168_v13  ;;  %v16044_v32 = vpop.f32.mrf.mxu0  ;;  %v16046_v8 = vpop.f32.mrf.mxu1  ;;  %v18232_v29 = vld [vmem:[#allocation65_spill] sm:$0xff] }
 0x36d   :  { %v8191_v24 = vshll.u32 %v16020_v45, 16  ;;  %v11799_v7 = vrot.slane %v8174_v50, 11  ;;  %v8181_v62 = vrot.slane %v8179_v53, 7  ;;  %v16049_v57 = vadd.f32 %v15673_v22, %v4353_v35  ;;  %v16061_v50 = vld [vmem:[#allocation2 + $0x154] sm:$0xf] }
 0x36e   :  { %v8190_v51 = vrot.slane %v8188_v6, 7  ;;  %v16053_v38 = vadd.f32 %v18230_v48, %v15907_v14  ;;  %v4356_v52 = vadd.f32 %v15682_v5, %v18232_v29  ;;  %v8163_v3 = vsel %vm13824_vm2, %v11798_v36, %v8162_v54  ;;  %v16063_v53 = vpop.f32.mrf.mxu0  ;;  %v16065_v22 = vpop.f32.mrf.mxu1  ;;  %v16067_v48 = vld [vmem:[#allocation2 + $0x158] sm:$0xf] }
 0x36f   :  { %18229 = vst [vmem:[#allocation133_spill] sm:$0xff] %v16049_v57  ;;  %v8172_v13 = vsel %vm13824_vm2, %v8164_v47, %v8171_v19  ;;  %18233 = vst [vmem:[#allocation135_spill] sm:$0xff] %v16063_v53  ;;  %v8184_v6 = vor.u32 %v8182_v26, %v8181_v62  ;;  %v8186_v57 = vrot.slane %v8181_v62, 4  ;;  %v11902_v54 = vcombine.low %v15994_v28, %v15996_v42  ;;  %v7779_v19 = vld [vmem:[#allocation2 + $0x160] sm:$0x8]  ;;  %v18237_v62 = vld [vmem:[#allocation69_spill] sm:$0xff] }
 0x370   :  { %18231 = vst [vmem:[#allocation136_spill] sm:$0xff] %v16053_v38  ;;  %v11846_v35 = vcombine.low %v8163_v3, %v8172_v13  ;;  %v8193_v14 = vor.u32 %v8191_v24, %v8190_v51  ;;  %v18234_v38 = vld [vmem:[#allocation62_spill] sm:$0xff]  ;;  %v16072_v36 = vadd.f32 %v15725_v23, %v4356_v52  ;;  %v8196_v47 = vshrl.u32 %v7776_v37, 16  ;;  %v16076_v29 = vpop.f32.mrf.mxu1  ;;  %v16085_v51 = vld [vmem:[#allocation2 + $0x164] sm:$0xf] }
 0x371   :  { %v4354_v5 = vadd.f32 %v15692_v27, %v18234_v38  ;;  %18236 = vst [vmem:[#allocation137_spill] sm:$0xff] %v16076_v29  ;;  %v8185_v26 = vsel %vm13824_vm2, %v11799_v7, %v8184_v6  ;;  %v4357_v27 = vadd.f32 %v15701_v61, %v18237_v62  ;;  %v8201_v23 = vshrl.u32 %v16061_v50, 16  ;;  %v16087_v38 = vld [vmem:[#allocation2 + $0x168] sm:$0xf]  ;;  %13133 = vmatmul.mubr.bf16.gmra.mxu0 %v11902_v54  ;;  %v16091_v7 = vpop.f32.mrf.mxu0  ;;  %v18239_v53 = vld [vmem:[#allocation23_spill] sm:$0xff]  ;;  %v18240_v29 = vld [vmem:[#allocation170_spill] sm:$0xff] }
 0x372   :  { %18235 = vst [vmem:[#allocation138_spill] sm:$0xff] %v16072_v36  ;;  %13053 = vmatmul.mubr.bf16.gmra.mxu1 %v11846_v35  ;;  %v8194_v24 = vsel %vm13824_vm2, %v8186_v57, %v8193_v14  ;;  %v11800_v42 = vrot.slane %v8196_v47, 11  ;;  %v8204_v37 = vshll.u32 %v16061_v50, 16  ;;  %v8210_v52 = vshrl.u32 %v16067_v48, 16  ;;  %v18241_v36 = vld [vmem:[#allocation66_spill] sm:$0xff] }
 0x373   :  { %v11847_v28 = vcombine.low %v8185_v26, %v8194_v24  ;;  %v8203_v3 = vrot.slane %v8201_v23, 7  ;;  %v11903_v57 = vcombine.low %v16015_v55, %v16020_v45  ;;  %v16096_v61 = vadd.f32 %v15745_v20, %v4354_v5  ;;  %v16101_v47 = vpop.f32.mrf.mxu0  ;;  %v16103_v26 = vpop.f32.mrf.mxu1 }
 0x374   :  { %v8218_v13 = vshrl.u32 %v7779_v19, 16  ;;  %v8212_v35 = vrot.slane %v8210_v52, 7  ;;  %v8213_v6 = vshll.u32 %v16067_v48, 16  ;;  %v8223_v14 = vshrl.u32 %v16085_v51, 16 }
 0x375   :  { %18238 = vst [vmem:[#allocation140_spill] sm:$0xff] %v16096_v61  ;;  %13056 = vmatprep.mubr.bf16.mxu1 %v11847_v28  ;;  %v8232_v54 = vshrl.u32 %v16087_v38, 16  ;;  %v8206_v24 = vor.u32 %v8204_v37, %v8203_v3  ;;  %v8208_v62 = vrot.slane %v8203_v3, 4  ;;  %13136 = vmatprep.mubr.bf16.mxu0 %v11903_v57  ;;  %v8226_v20 = vshll.u32 %v16085_v51, 16  ;;  %v16107_v28 = vpop.f32.mrf.mxu0  ;;  %v16109_v52 = vpop.f32.mrf.mxu1 }
 0x376   :  { %v11801_v55 = vrot.slane %v8218_v13, 11  ;;  %v8215_v45 = vor.u32 %v8213_v6, %v8212_v35  ;;  %v8225_v5 = vrot.slane %v8223_v14, 7  ;;  %v8235_v23 = vshll.u32 %v16087_v38, 16  ;;  %v7782_v13 = vld [vmem:[#allocation2 + $0x170] sm:$0x8] }
 0x377   :  { %v8234_v19 = vrot.slane %v8232_v54, 7  ;;  %v16113_v61 = vadd.f32 %v18240_v29, %v18239_v53  ;;  %v6252_v37 = vadd.f32 %v15734_v9, %v18241_v36  ;;  %v8207_v3 = vsel %vm13824_vm2, %v11800_v42, %v8206_v24  ;;  %v16126_v53 = vld [vmem:[#allocation2 + $0x178] sm:$0xf]  ;;  %v16128_v29 = vpop.f32.mrf.mxu0  ;;  %v16130_v9 = vpop.f32.mrf.mxu1  ;;  %v18244_v36 = vld [vmem:[#allocation169_spill] sm:$0xff] }
 0x378   :  { %v16120_v57 = vadd.f32 %v15762_v11, %v4357_v27  ;;  %v8216_v35 = vsel %vm13824_vm2, %v8208_v62, %v8215_v45  ;;  %v8228_v6 = vor.u32 %v8226_v20, %v8225_v5  ;;  %v8230_v14 = vrot.slane %v8225_v5, 4  ;;  %18243 = vst [vmem:[#allocation144_spill] sm:$0xff] %v16128_v29  ;;  %v18247_v45 = vld [vmem:[#allocation68_spill] sm:$0xff] }
 0x379   :  { %v8237_v54 = vor.u32 %v8235_v23, %v8234_v19  ;;  %v16134_v42 = vadd.f32 %v18244_v36, %v15979_v10  ;;  %v11848_v11 = vcombine.low %v8207_v3, %v8216_v35  ;;  %v16137_v27 = vadd.f32 %v15806_v31, %v6252_v37  ;;  %v7785_v23 = vld [vmem:[#allocation2 + $0x180] sm:$0x8]  ;;  %v16147_v10 = vld [vmem:[#allocation2 + $0x184] sm:$0xf]  ;;  %v16149_v3 = vpop.f32.mrf.mxu1  ;;  %v16154_v37 = vld [vmem:[#allocation2 + $0x188] sm:$0xf] }
 0x37a   :  { %18242 = vst [vmem:[#allocation141_spill] sm:$0xff] %v16120_v57  ;;  %v11904_v24 = vcombine.low %v16061_v50, %v16067_v48  ;;  %v8229_v62 = vsel %vm13824_vm2, %v11801_v55, %v8228_v6  ;;  %v6250_v5 = vadd.f32 %v15756_v39, %v18247_v45  ;;  %v8240_v19 = vshrl.u32 %v7782_v13, 16  ;;  %18248 = vst [vmem:[#allocation145_spill] sm:$0xff] %v16149_v3 }
 0x37b   :  { %18245 = vst [vmem:[#allocation143_spill] sm:$0xff] %v16134_v42  ;;  %18246 = vst [vmem:[#allocation146_spill] sm:$0xff] %v16137_v27  ;;  %v8238_v20 = vsel %vm13824_vm2, %v8230_v14, %v8237_v54  ;;  %13057 = vmatmul.mubr.bf16.gmra.mxu1 %v11848_v11  ;;  %v8245_v50 = vshrl.u32 %v16124_v58, 16  ;;  %v8248_v48 = vshll.u32 %v16124_v58, 16  ;;  %v8254_v55 = vshrl.u32 %v16126_v53, 16  ;;  %v18254_v27 = vld [vmem:[#allocation173_spill] sm:$0xff] }
 0x37c   :  { %v11849_v31 = vcombine.low %v8229_v62, %v8238_v20  ;;  %13137 = vmatmul.mubr.bf16.gmra.mxu0 %v11904_v24  ;;  %v11802_v35 = vrot.slane %v8240_v19, 11  ;;  %v8257_v39 = vshll.u32 %v16126_v53, 16  ;;  %v11905_v13 = vcombine.low %v16085_v51, %v16087_v38  ;;  %v18250_v62 = vld [vmem:[#allocation34_spill] sm:$0xff]  ;;  %v18251_v20 = vld [vmem:[#allocation172_spill] sm:$0xff]  ;;  %v18252_v19 = vld [vmem:[#allocation75_spill] sm:$0xff] }
 0x37d   :  { %v16160_v6 = vadd.f32 %v15826_v0, %v6250_v5  ;;  %v16162_v14 = vpop.f32.mrf.mxu0  ;;  %v8247_v54 = vrot.slane %v8245_v50, 7  ;;  %v8256_v36 = vrot.slane %v8254_v55, 7  ;;  %v8262_v11 = vshrl.u32 %v7785_v23, 16  ;;  %v16175_v5 = vpop.f32.mrf.mxu1 }
 0x37e   :  { %13060 = vmatprep.mubr.bf16.mxu1 %v11849_v31  ;;  %v8267_v24 = vshrl.u32 %v16147_v10, 16  ;;  %v16167_v45 = vadd.f32 %v18251_v20, %v18250_v62  ;;  %v6253_v3 = vadd.f32 %v15765_v41, %v18252_v19  ;;  %13140 = vmatprep.mubr.bf16.mxu0 %v11905_v13  ;;  %v8270_v51 = vshll.u32 %v16147_v10, 16  ;;  %v7788_v41 = vld [vmem:[#allocation2 + $0x190] sm:$0x8] }
 0x37f   :  { %18249 = vst [vmem:[#allocation148_spill] sm:$0xff] %v16160_v6  ;;  %v8276_v0 = vshrl.u32 %v16154_v37, 16  ;;  %v16173_v38 = vpop.f32.mrf.mxu0  ;;  %v8250_v31 = vor.u32 %v8248_v48, %v8247_v54  ;;  %v8252_v23 = vrot.slane %v8247_v54, 4  ;;  %v8259_v50 = vor.u32 %v8257_v39, %v8256_v36  ;;  %v16183_v19 = vpop.f32.mrf.mxu1  ;;  %v18255_v48 = vld [vmem:[#allocation74_spill] sm:$0xff] }
 0x380   :  { %v8279_v55 = vshll.u32 %v16154_v37, 16  ;;  %v11803_v29 = vrot.slane %v8262_v11, 11  ;;  %v8269_v62 = vrot.slane %v8267_v24, 7  ;;  %v16179_v6 = vadd.f32 %v15835_v34, %v6253_v3  ;;  %v16195_v34 = vld [vmem:[#allocation2 + $0x194] sm:$0xf] }
 0x381   :  { %v8278_v20 = vrot.slane %v8276_v0, 7  ;;  %v16181_v13 = vpop.f32.mrf.mxu0  ;;  %v16187_v57 = vadd.f32 %v18254_v27, %v16037_v15  ;;  %v6256_v39 = vadd.f32 %v15795_v44, %v18255_v48  ;;  %v8251_v54 = vsel %vm13824_vm2, %v11802_v35, %v8250_v31  ;;  %v16201_v15 = vpop.f32.mrf.mxu1 }
 0x382   :  { %18253 = vst [vmem:[#allocation149_spill] sm:$0xff] %v16179_v6  ;;  %v8260_v36 = vsel %vm13824_vm2, %v8252_v23, %v8259_v50  ;;  %v8272_v11 = vor.u32 %v8270_v51, %v8269_v62  ;;  %v8274_v24 = vrot.slane %v8269_v62, 4  ;;  %v16197_v6 = vld [vmem:[#allocation2 + $0x198] sm:$0xf]  ;;  %v6254_v44 = vadd.f32 %v15808_v63, %v15595_v49  ;;  %v7791_v23 = vld [vmem:[#allocation2 + $0x1a0] sm:$0x8] }
 0x383   :  { %v11850_v3 = vcombine.low %v8251_v54, %v8260_v36  ;;  %v8281_v0 = vor.u32 %v8279_v55, %v8278_v20  ;;  %v16199_v42 = vpop.f32.mrf.mxu0  ;;  %v16206_v27 = vadd.f32 %v15878_v33, %v6256_v39  ;;  %v11906_v35 = vcombine.low %v16124_v58, %v16126_v53  ;;  %v18258_v55 = vld [vmem:[#allocation76_spill] sm:$0xff]  ;;  %v18259_v62 = vld [vmem:[#allocation105_spill] sm:$0xff]  ;;  %v16217_v63 = vld [vmem:[#allocation2 + $0x1a4] sm:$0xf] }
 0x384   :  { %18256 = vst [vmem:[#allocation152_spill] sm:$0xff] %v16199_v42  ;;  %v8284_v31 = vshrl.u32 %v7788_v41, 16  ;;  %v8273_v51 = vsel %vm13824_vm2, %v11803_v29, %v8272_v11  ;;  %v6257_v20 = vadd.f32 %v18259_v62, %v18258_v55  ;;  %v8289_v49 = vshrl.u32 %v16195_v34, 16  ;;  %v16219_v33 = vld [vmem:[#allocation2 + $0x1a8] sm:$0xf]  ;;  %v16230_v11 = vpop.f32.mrf.mxu1  ;;  %v18265_v42 = vld [vmem:[#allocation107_spill] sm:$0xff] }
 0x385   :  { %18257 = vst [vmem:[#allocation151_spill] sm:$0xff] %v16206_v27  ;;  %13061 = vmatmul.mubr.bf16.gmra.mxu1 %v11850_v3  ;;  %v8282_v50 = vsel %vm13824_vm2, %v8274_v24, %v8281_v0  ;;  %13141 = vmatmul.mubr.bf16.gmra.mxu0 %v11906_v35  ;;  %v8292_v53 = vshll.u32 %v16195_v34, 16  ;;  %v8298_v41 = vshrl.u32 %v16197_v6, 16  ;;  %v11907_v39 = vcombine.low %v16147_v10, %v16154_v37  ;;  %v16228_v3 = vpop.f32.mrf.mxu0 }
 0x386   :  { %v11851_v48 = vcombine.low %v8273_v51, %v8282_v50  ;;  %v11804_v58 = vrot.slane %v8284_v31, 11  ;;  %v8291_v29 = vrot.slane %v8289_v49, 7  ;;  %v16226_v54 = vadd.f32 %v15893_v2, %v6254_v44  ;;  %18261 = vst [vmem:[#allocation153_spill] sm:$0xff] %v16230_v11  ;;  %v18262_v49 = vld [vmem:[#allocation29_spill] sm:$0xff]  ;;  %v18264_v11 = vld [vmem:[#allocation83_spill] sm:$0xff] }
 0x387   :  { %v8306_v36 = vshrl.u32 %v7791_v23, 16  ;;  %v8300_v24 = vrot.slane %v8298_v41, 7  ;;  %v8301_v0 = vshll.u32 %v16197_v6, 16  ;;  %v8311_v35 = vshrl.u32 %v16217_v63, 16  ;;  %13144 = vmatprep.mubr.bf16.mxu0 %v11907_v39  ;;  %v16236_v37 = vpop.f32.mrf.mxu0  ;;  %v7794_v39 = vld [vmem:[#allocation2 + $0x1b0] sm:$0x8] }
 0x388   :  { %18260 = vst [vmem:[#allocation154_spill] sm:$0xff] %v16226_v54  ;;  %13064 = vmatprep.mubr.bf16.mxu1 %v11851_v48  ;;  %v8320_v31 = vshrl.u32 %v16219_v33, 16  ;;  %v8294_v51 = vor.u32 %v8292_v53, %v8291_v29  ;;  %v8296_v50 = vrot.slane %v8291_v29, 4  ;;  %v8314_v2 = vshll.u32 %v16217_v63, 16  ;;  %v18263_v48 = vld [vmem:[#allocation176_spill] sm:$0xff] }
 0x389   :  { %v11805_v10 = vrot.slane %v8306_v36, 11  ;;  %v8303_v44 = vor.u32 %v8301_v0, %v8300_v24  ;;  %v8313_v23 = vrot.slane %v8311_v35, 7  ;;  %v8323_v62 = vshll.u32 %v16219_v33, 16  ;;  %v16250_v36 = vpop.f32.mrf.mxu0  ;;  %v16252_v24 = vpop.f32.mrf.mxu1 }
 0x38a   :  { %v8322_v55 = vrot.slane %v8320_v31, 7  ;;  %v16241_v41 = vadd.f32 %v18263_v48, %v18262_v49  ;;  %v6260_v54 = vadd.f32 %v18265_v42, %v18264_v11  ;;  %v8295_v53 = vsel %vm13824_vm2, %v11804_v58, %v8294_v51  ;;  %v16256_v48 = vld [vmem:[#allocation2 + $0x1b4] sm:$0xf]  ;;  %v16258_v42 = vld [vmem:[#allocation2 + $0x1b8] sm:$0xf]  ;;  %v18267_v58 = vld [vmem:[#allocation175_spill] sm:$0xff] }
 0x38b   :  { %v16248_v29 = vadd.f32 %v15910_v46, %v6257_v20  ;;  %v8304_v0 = vsel %vm13824_vm2, %v8296_v50, %v8303_v44  ;;  %v8316_v35 = vor.u32 %v8314_v2, %v8313_v23  ;;  %v8318_v31 = vrot.slane %v8313_v23, 4  ;;  %v16271_v50 = vpop.f32.mrf.mxu1  ;;  %v18271_v23 = vld [vmem:[#allocation82_spill] sm:$0xff] }
 0x38c   :  { %v8325_v49 = vor.u32 %v8323_v62, %v8322_v55  ;;  %v16262_v11 = vadd.f32 %v18267_v58, %v16113_v61  ;;  %v11852_v46 = vcombine.low %v8295_v53, %v8304_v0  ;;  %v16265_v20 = vadd.f32 %v15953_v25, %v6260_v54  ;;  %v7797_v62 = vld [vmem:[#allocation2 + $0x1c0] sm:$0x8]  ;;  %v16279_v25 = vld [vmem:[#allocation2 + $0x1c4] sm:$0xf] }
 0x38d   :  { %18266 = vst [vmem:[#allocation156_spill] sm:$0xff] %v16248_v29  ;;  %v11908_v51 = vcombine.low %v16195_v34, %v16197_v6  ;;  %v16269_v29 = vpop.f32.mrf.mxu0  ;;  %v8317_v2 = vsel %vm13824_vm2, %v11805_v10, %v8316_v35  ;;  %v6258_v61 = vadd.f32 %v15861_v1, %v18271_v23  ;;  %v8328_v55 = vshrl.u32 %v7794_v39, 16  ;;  %v16284_v10 = vld [vmem:[#allocation2 + $0x1c8] sm:$0xf]  ;;  %v16286_v0 = vpop.f32.mrf.mxu1  ;;  %v18274_v23 = vld [vmem:[#allocation178_spill] sm:$0xff] }
 0x38e   :  { %18268 = vst [vmem:[#allocation157_spill] sm:$0xff] %v16262_v11  ;;  %18269 = vst [vmem:[#allocation160_spill] sm:$0xff] %v16265_v20  ;;  %v8326_v44 = vsel %vm13824_vm2, %v8318_v31, %v8325_v49  ;;  %13065 = vmatmul.mubr.bf16.gmra.mxu1 %v11852_v46  ;;  %v8333_v6 = vshrl.u32 %v16256_v48, 16  ;;  %v8336_v34 = vshll.u32 %v16256_v48, 16  ;;  %v8342_v53 = vshrl.u32 %v16258_v42, 16  ;;  %v18279_v11 = vld [vmem:[#allocation84_spill] sm:$0xff] }
 0x38f   :  { %18270 = vst [vmem:[#allocation159_spill] sm:$0xff] %v16269_v29  ;;  %v11853_v54 = vcombine.low %v8317_v2, %v8326_v44  ;;  %13145 = vmatmul.mubr.bf16.gmra.mxu0 %v11908_v51  ;;  %v11806_v35 = vrot.slane %v8328_v55, 11  ;;  %v8345_v1 = vshll.u32 %v16258_v42, 16  ;;  %v11909_v39 = vcombine.low %v16217_v63, %v16219_v33  ;;  %v16295_v2 = vpop.f32.mrf.mxu0  ;;  %v18273_v44 = vld [vmem:[#allocation36_spill] sm:$0xff]  ;;  %v18275_v55 = vld [vmem:[#allocation89_spill] sm:$0xff]  ;;  %v16305_v33 = vpop.f32.mrf.mxu1 }
 0x390   :  { %v16292_v31 = vadd.f32 %v15964_v43, %v6258_v61  ;;  %v8335_v49 = vrot.slane %v8333_v6, 7  ;;  %v8344_v58 = vrot.slane %v8342_v53, 7  ;;  %v8350_v46 = vshrl.u32 %v7797_v62, 16  ;;  %18276 = vst [vmem:[#allocation161_spill] sm:$0xff] %v16305_v33  ;;  %v18280_v33 = vld [vmem:[#allocation116_spill] sm:$0xff] }
 0x391   :  { %13068 = vmatprep.mubr.bf16.mxu1 %v11853_v54  ;;  %v8355_v51 = vshrl.u32 %v16279_v25, 16  ;;  %v16299_v29 = vadd.f32 %v18274_v23, %v18273_v44  ;;  %v6261_v20 = vadd.f32 %v15880_v17, %v18275_v55  ;;  %13148 = vmatprep.mubr.bf16.mxu0 %v11909_v39  ;;  %v8358_v63 = vshll.u32 %v16279_v25, 16  ;;  %v16308_v53 = vpop.f32.mrf.mxu0  ;;  %v7800_v17 = vld [vmem:[#allocation2 + $0x1d0] sm:$0x8] }
 0x392   :  { %18272 = vst [vmem:[#allocation162_spill] sm:$0xff] %v16292_v31  ;;  %v8364_v43 = vshrl.u32 %v16284_v10, 16  ;;  %v8338_v61 = vor.u32 %v8336_v34, %v8335_v49  ;;  %v8340_v62 = vrot.slane %v8335_v49, 4  ;;  %v8347_v54 = vor.u32 %v8345_v1, %v8344_v58  ;;  %v18278_v39 = vld [vmem:[#allocation177_spill] sm:$0xff] }
 0x393   :  { %v8367_v6 = vshll.u32 %v16284_v10, 16  ;;  %v11807_v31 = vrot.slane %v8350_v46, 11  ;;  %v8357_v44 = vrot.slane %v8355_v51, 7  ;;  %v16311_v27 = vadd.f32 %v15972_v12, %v6261_v20  ;;  %v16323_v58 = vld [vmem:[#allocation2 + $0x1d4] sm:$0xf]  ;;  %v16325_v46 = vpop.f32.mrf.mxu0 }
 0x394   :  { %v8366_v23 = vrot.slane %v8364_v43, 7  ;;  %v16315_v55 = vadd.f32 %v18278_v39, %v16167_v45  ;;  %v6264_v34 = vadd.f32 %v18280_v33, %v18279_v11  ;;  %v8339_v1 = vsel %vm13824_vm2, %v11806_v35, %v8338_v61  ;;  %v16329_v45 = vpop.f32.mrf.mxu1  ;;  %v18281_v39 = vld [vmem:[#allocation86_spill] sm:$0xff]  ;;  %v18282_v11 = vld [vmem:[#allocation119_spill] sm:$0xff] }
 0x395   :  { %18277 = vst [vmem:[#allocation164_spill] sm:$0xff] %v16311_v27  ;;  %v8348_v49 = vsel %vm13824_vm2, %v8340_v62, %v8347_v54  ;;  %v8360_v20 = vor.u32 %v8358_v63, %v8357_v44  ;;  %v8362_v51 = vrot.slane %v8357_v44, 4  ;;  %v16327_v27 = vld [vmem:[#allocation2 + $0x1d8] sm:$0xf]  ;;  %v6262_v33 = vadd.f32 %v18282_v11, %v18281_v39  ;;  %v7803_v54 = vld [vmem:[#allocation2 + $0x1e0] sm:$0x8] }
 0x396   :  { %v11854_v12 = vcombine.low %v8339_v1, %v8348_v49  ;;  %v8369_v43 = vor.u32 %v8367_v6, %v8366_v23  ;;  %v16334_v35 = vadd.f32 %v16022_v4, %v6264_v34  ;;  %v11910_v61 = vcombine.low %v16256_v48, %v16258_v42  ;;  %v18284_v44 = vld [vmem:[#allocation93_spill] sm:$0xff]  ;;  %v16345_v49 = vld [vmem:[#allocation2 + $0x1e4] sm:$0xf]  ;;  %v16347_v4 = vld [vmem:[#allocation2 + $0x1e8] sm:$0xf]  ;;  %v16349_v34 = vpop.f32.mrf.mxu1 }
 0x397   :  { %v8372_v62 = vshrl.u32 %v7800_v17, 16  ;;  %v8361_v63 = vsel %vm13824_vm2, %v11807_v31, %v8360_v20  ;;  %v6265_v23 = vadd.f32 %v15933_v40, %v18284_v44  ;;  %v8377_v1 = vshrl.u32 %v16323_v58, 16 }
 0x398   :  { %18283 = vst [vmem:[#allocation53_spill] sm:$0xff] %v16334_v35  ;;  %13069 = vmatmul.mubr.bf16.gmra.mxu1 %v11854_v12  ;;  %v8370_v6 = vsel %vm13824_vm2, %v8362_v51, %v8369_v43  ;;  %13149 = vmatmul.mubr.bf16.gmra.mxu0 %v11910_v61  ;;  %v8380_v17 = vshll.u32 %v16323_v58, 16  ;;  %v8386_v31 = vshrl.u32 %v16327_v27, 16  ;;  %v16353_v12 = vpop.f32.mrf.mxu0  ;;  %v11911_v40 = vcombine.low %v16279_v25, %v16284_v10  ;;  %v16360_v39 = vpop.f32.mrf.mxu1 }
 0x399   :  { %v11855_v48 = vcombine.low %v8361_v63, %v8370_v6  ;;  %v11808_v42 = vrot.slane %v8372_v62, 11  ;;  %18285 = vst [vmem:[#allocation77_spill] sm:$0xff] %v16353_v12  ;;  %v8379_v20 = vrot.slane %v8377_v1, 7  ;;  %v16358_v51 = vadd.f32 %v16031_v60, %v6262_v33  ;;  %18287 = vst [vmem:[#allocation59_spill] sm:$0xff] %v16360_v39  ;;  %v18291_v39 = vld [vmem:[#allocation97_spill] sm:$0xff] }
 0x39a   :  { %v8394_v43 = vshrl.u32 %v7803_v54, 16  ;;  %v8388_v11 = vrot.slane %v8386_v31, 7  ;;  %v8389_v61 = vshll.u32 %v16327_v27, 16  ;;  %v8399_v62 = vshrl.u32 %v16345_v49, 16  ;;  %13152 = vmatprep.mubr.bf16.mxu0 %v11911_v40  ;;  %v16367_v12 = vpop.f32.mrf.mxu0  ;;  %v18289_v31 = vld [vmem:[#allocation38_spill] sm:$0xff] }
 0x39b   :  { %18286 = vst [vmem:[#allocation165_spill] sm:$0xff] %v16358_v51  ;;  %13072 = vmatprep.mubr.bf16.mxu1 %v11855_v48  ;;  %v8408_v63 = vshrl.u32 %v16347_v4, 16  ;;  %v8382_v6 = vor.u32 %v8380_v17, %v8379_v20  ;;  %v8384_v44 = vrot.slane %v8379_v20, 4  ;;  %v8402_v25 = vshll.u32 %v16345_v49, 16  ;;  %v16369_v48 = vpop.f32.mrf.mxu1  ;;  %v18290_v51 = vld [vmem:[#allocation14_spill] sm:$0xff] }
 0x39c   :  { %v11809_v1 = vrot.slane %v8394_v43, 11  ;;  %v8391_v10 = vor.u32 %v8389_v61, %v8388_v11  ;;  %v8401_v60 = vrot.slane %v8399_v62, 7  ;;  %v8411_v54 = vshll.u32 %v16347_v4, 16  ;;  %18288 = vst [vmem:[#allocation81_spill] sm:$0xff] %v16369_v48  ;;  %v7806_v43 = vld [vmem:[#allocation2 + $0x1f0] sm:$0x8] }
 0x39d   :  { %v8410_v33 = vrot.slane %v8408_v63, 7  ;;  %v16373_v35 = vadd.f32 %v18290_v51, %v18289_v31  ;;  %v6268_v17 = vadd.f32 %v15966_v21, %v18291_v39  ;;  %v8383_v20 = vsel %vm13824_vm2, %v11808_v42, %v8382_v6  ;;  %v16384_v48 = vld [vmem:[#allocation2 + $0x1f4] sm:$0xf]  ;;  %v16386_v51 = vld [vmem:[#allocation2 + $0x1f8] sm:$0xf]  ;;  %v18293_v31 = vld [vmem:[#allocation20_spill] sm:$0xff] }
 0x39e   :  { %v16380_v40 = vadd.f32 %v16044_v32, %v6265_v23  ;;  %v8392_v11 = vsel %vm13824_vm2, %v8384_v44, %v8391_v10  ;;  %v8404_v61 = vor.u32 %v8402_v25, %v8401_v60  ;;  %v8406_v62 = vrot.slane %v8401_v60, 4  ;;  %v18295_v44 = vld [vmem:[#allocation98_spill] sm:$0xff]  ;;  %v7809_v60 = vld [vmem:[#allocation2 + $0x200] sm:$0x8] }
 0x39f   :  { %v8413_v63 = vor.u32 %v8411_v54, %v8410_v33  ;;  %v16390_v21 = vadd.f32 %v18293_v31, %v16241_v41  ;;  %v11856_v39 = vcombine.low %v8383_v20, %v8392_v11  ;;  %v16393_v42 = vadd.f32 %v16091_v7, %v6268_v17  ;;  %v16403_v41 = vld [vmem:[#allocation2 + $0x204] sm:$0xf]  ;;  %v16405_v33 = vpop.f32.mrf.mxu0  ;;  %v16407_v7 = vpop.f32.mrf.mxu1  ;;  %v16412_v17 = vld [vmem:[#allocation2 + $0x208] sm:$0xf] }
 0x3a0   :  { %18292 = vst [vmem:[#allocation26_spill] sm:$0xff] %v16380_v40  ;;  %v11912_v32 = vcombine.low %v16323_v58, %v16327_v27  ;;  %v8405_v23 = vsel %vm13824_vm2, %v11809_v1, %v8404_v61  ;;  %v6266_v25 = vadd.f32 %v15974_v30, %v18295_v44  ;;  %v8416_v10 = vshrl.u32 %v7806_v43, 16  ;;  %v18300_v44 = vld [vmem:[#allocation92_spill] sm:$0xff] }
 0x3a1   :  { %18294 = vst [vmem:[#allocation168_spill] sm:$0xff] %v16393_v42  ;;  %v8414_v6 = vsel %vm13824_vm2, %v8406_v62, %v8413_v63  ;;  %13073 = vmatmul.mubr.bf16.gmra.mxu1 %v11856_v39  ;;  %v8421_v27 = vshrl.u32 %v16384_v48, 16  ;;  %v8424_v58 = vshll.u32 %v16384_v48, 16  ;;  %v8430_v1 = vshrl.u32 %v16386_v51, 16  ;;  %v16420_v61 = vpop.f32.mrf.mxu1  ;;  %v18302_v40 = vld [vmem:[#allocation100_spill] sm:$0xff] }
 0x3a2   :  { %v11857_v54 = vcombine.low %v8405_v23, %v8414_v6  ;;  %13153 = vmatmul.mubr.bf16.gmra.mxu0 %v11912_v32  ;;  %v11810_v30 = vrot.slane %v8416_v10, 11  ;;  %v8433_v20 = vshll.u32 %v16386_v51, 16  ;;  %v11913_v43 = vcombine.low %v16345_v49, %v16347_v4  ;;  %18297 = vst [vmem:[#allocation167_spill] sm:$0xff] %v16420_v61  ;;  %v18298_v32 = vld [vmem:[#allocation42_spill] sm:$0xff]  ;;  %v18299_v23 = vld [vmem:[#allocation19_spill] sm:$0xff]  ;;  %v16431_v4 = vpop.f32.mrf.mxu0 }
 0x3a3   :  { %v16418_v11 = vadd.f32 %v16101_v47, %v6266_v25  ;;  %v8423_v62 = vrot.slane %v8421_v27, 7  ;;  %v8432_v63 = vrot.slane %v8430_v1, 7  ;;  %v8438_v31 = vshrl.u32 %v7809_v60, 16  ;;  %v16433_v25 = vpop.f32.mrf.mxu1 }
 0x3a4   :  { %13076 = vmatprep.mubr.bf16.mxu1 %v11857_v54  ;;  %v8443_v39 = vshrl.u32 %v16403_v41, 16  ;;  %v16425_v6 = vadd.f32 %v18299_v23, %v18298_v32  ;;  %v6269_v10 = vadd.f32 %v15990_v16, %v18300_v44  ;;  %13156 = vmatprep.mubr.bf16.mxu0 %v11913_v43  ;;  %v8446_v49 = vshll.u32 %v16403_v41, 16  ;;  %v7812_v16 = vld [vmem:[#allocation2 + $0x210] sm:$0x8]  ;;  %v18301_v43 = vld [vmem:[#allocation22_spill] sm:$0xff] }
 0x3a5   :  { %18296 = vst [vmem:[#allocation54_spill] sm:$0xff] %v16418_v11  ;;  %v8452_v47 = vshrl.u32 %v16412_v17, 16  ;;  %v8426_v54 = vor.u32 %v8424_v58, %v8423_v62  ;;  %v8428_v60 = vrot.slane %v8423_v62, 4  ;;  %v8435_v27 = vor.u32 %v8433_v20, %v8432_v63  ;;  %v16449_v62 = vld [vmem:[#allocation2 + $0x214] sm:$0xf]  ;;  %v16451_v63 = vpop.f32.mrf.mxu1 }
 0x3a6   :  { %v8455_v1 = vshll.u32 %v16412_v17, 16  ;;  %v11811_v11 = vrot.slane %v8438_v31, 11  ;;  %v8445_v32 = vrot.slane %v8443_v39, 7  ;;  %v16437_v42 = vadd.f32 %v16107_v28, %v6269_v10  ;;  %18303 = vst [vmem:[#allocation65_spill] sm:$0xff] %v16451_v63 }
 0x3a7   :  { %v8454_v23 = vrot.slane %v8452_v47, 7  ;;  %v16441_v44 = vadd.f32 %v18301_v43, %v16299_v29  ;;  %v6272_v61 = vadd.f32 %v16033_v56, %v18302_v40  ;;  %v8427_v58 = vsel %vm13824_vm2, %v11810_v30, %v8426_v54  ;;  %v16453_v47 = vld [vmem:[#allocation2 + $0x218] sm:$0xf]  ;;  %v16455_v29 = vpop.f32.mrf.mxu0  ;;  %v18305_v43 = vld [vmem:[#allocation101_spill] sm:$0xff] }
 0x3a8   :  { %v8436_v20 = vsel %vm13824_vm2, %v8428_v60, %v8435_v27  ;;  %v8448_v31 = vor.u32 %v8446_v49, %v8445_v32  ;;  %v8450_v39 = vrot.slane %v8445_v32, 4  ;;  %18304 = vst [vmem:[#allocation62_spill] sm:$0xff] %v16455_v29  ;;  %v6270_v56 = vadd.f32 %v16046_v8, %v18305_v43  ;;  %v7815_v60 = vld [vmem:[#allocation2 + $0x220] sm:$0x8]  ;;  %v18311_v29 = vld [vmem:[#allocation108_spill] sm:$0xff] }
 0x3a9   :  { %v11858_v28 = vcombine.low %v8427_v58, %v8436_v20  ;;  %v8457_v10 = vor.u32 %v8455_v1, %v8454_v23  ;;  %v16460_v40 = vadd.f32 %v16162_v14, %v6272_v61  ;;  %v11914_v30 = vcombine.low %v16384_v48, %v16386_v51  ;;  %v18307_v1 = vld [vmem:[#allocation104_spill] sm:$0xff]  ;;  %v16471_v23 = vld [vmem:[#allocation2 + $0x224] sm:$0xf] }
 0x3aa   :  { %v8460_v54 = vshrl.u32 %v7812_v16, 16  ;;  %v8449_v49 = vsel %vm13824_vm2, %v11811_v11, %v8448_v31  ;;  %v6273_v32 = vadd.f32 %v16065_v22, %v18307_v1  ;;  %v8465_v8 = vshrl.u32 %v16449_v62, 16  ;;  %v16473_v14 = vld [vmem:[#allocation2 + $0x228] sm:$0xf]  ;;  %v16477_v11 = vpop.f32.mrf.mxu1  ;;  %v16484_v31 = vpop.f32.mrf.mxu0 }
 0x3ab   :  { %18306 = vst [vmem:[#allocation69_spill] sm:$0xff] %v16460_v40  ;;  %13077 = vmatmul.mubr.bf16.gmra.mxu1 %v11858_v28  ;;  %v8458_v27 = vsel %vm13824_vm2, %v8450_v39, %v8457_v10  ;;  %13157 = vmatmul.mubr.bf16.gmra.mxu0 %v11914_v30  ;;  %v8468_v51 = vshll.u32 %v16449_v62, 16  ;;  %v8474_v16 = vshrl.u32 %v16453_v47, 16  ;;  %v11915_v20 = vcombine.low %v16403_v41, %v16412_v17 }
 0x3ac   :  { %v11859_v61 = vcombine.low %v8449_v49, %v8458_v27  ;;  %v11812_v48 = vrot.slane %v8460_v54, 11  ;;  %v8467_v58 = vrot.slane %v8465_v8, 7  ;;  %v16482_v22 = vadd.f32 %v16173_v38, %v6270_v56  ;;  %v16489_v54 = vpop.f32.mrf.mxu1 }
 0x3ad   :  { %v8482_v28 = vshrl.u32 %v7815_v60, 16  ;;  %v8476_v39 = vrot.slane %v8474_v16, 7  ;;  %v8477_v10 = vshll.u32 %v16453_v47, 16  ;;  %v8487_v43 = vshrl.u32 %v16471_v23, 16  ;;  %13160 = vmatprep.mubr.bf16.mxu0 %v11915_v20  ;;  %v18310_v16 = vld [vmem:[#allocation28_spill] sm:$0xff] }
 0x3ae   :  { %18308 = vst [vmem:[#allocation23_spill] sm:$0xff] %v16482_v22  ;;  %13080 = vmatprep.mubr.bf16.mxu1 %v11859_v61  ;;  %v8496_v30 = vshrl.u32 %v16473_v14, 16  ;;  %v8470_v49 = vor.u32 %v8468_v51, %v8467_v58  ;;  %v8472_v27 = vrot.slane %v8467_v58, 4  ;;  %v8490_v38 = vshll.u32 %v16471_v23, 16  ;;  %v16493_v8 = vpop.f32.mrf.mxu1  ;;  %v18309_v61 = vld [vmem:[#allocation37_spill] sm:$0xff] }
 0x3af   :  { %v11813_v41 = vrot.slane %v8482_v28, 11  ;;  %v8479_v17 = vor.u32 %v8477_v10, %v8476_v39  ;;  %v8489_v56 = vrot.slane %v8487_v43, 7  ;;  %v8499_v1 = vshll.u32 %v16473_v14, 16  ;;  %v7818_v20 = vld [vmem:[#allocation2 + $0x230] sm:$0x8]  ;;  %v16506_v28 = vpop.f32.mrf.mxu0 }
 0x3b0   :  { %v8498_v60 = vrot.slane %v8496_v30, 7  ;;  %v16497_v63 = vadd.f32 %v18310_v16, %v18309_v61  ;;  %v6276_v22 = vadd.f32 %v16103_v26, %v18311_v29  ;;  %v8471_v51 = vsel %vm13824_vm2, %v11812_v48, %v8470_v49  ;;  %v16510_v61 = vld [vmem:[#allocation2 + $0x234] sm:$0xf]  ;;  %v16512_v16 = vld [vmem:[#allocation2 + $0x238] sm:$0xf]  ;;  %v16523_v49 = vpop.f32.mrf.mxu1 }
 0x3b1   :  { %v16504_v58 = vadd.f32 %v16181_v13, %v6273_v32  ;;  %v8480_v39 = vsel %vm13824_vm2, %v8472_v27, %v8479_v17  ;;  %v8492_v10 = vor.u32 %v8490_v38, %v8489_v56  ;;  %v8494_v43 = vrot.slane %v8489_v56, 4  ;;  %v18313_v26 = vld [vmem:[#allocation21_spill] sm:$0xff]  ;;  %18315 = vst [vmem:[#allocation169_spill] sm:$0xff] %v16523_v49 }
 0x3b2   :  { %v8501_v30 = vor.u32 %v8499_v1, %v8498_v60  ;;  %v16516_v29 = vadd.f32 %v18313_v26, %v16373_v35  ;;  %v11860_v48 = vcombine.low %v8471_v51, %v8480_v39  ;;  %v16519_v13 = vadd.f32 %v16228_v3, %v6276_v22  ;;  %v18316_v17 = vld [vmem:[#allocation109_spill] sm:$0xff]  ;;  %v9681_v60 = vld [vmem:[#allocation2 + $0x24] sm:$0xf]  ;;  %v9682_v1 = vld [vmem:[#allocation2 + $0x28] sm:$0xf] }
 0x3b3   :  { %18312 = vst [vmem:[#allocation170_spill] sm:$0xff] %v16504_v58  ;;  %v11916_v32 = vcombine.low %v16449_v62, %v16453_v47  ;;  %v8493_v27 = vsel %vm13824_vm2, %v11813_v41, %v8492_v10  ;;  %v6274_v56 = vadd.f32 %v16109_v52, %v18316_v17  ;;  %v8504_v35 = vshrl.u32 %v7818_v20, 16  ;;  %v9683_v51 = vld [vmem:[#allocation2 + $0x2c] sm:$0x1]  ;;  %v16534_v41 = vpop.f32.mrf.mxu0 }
 0x3b4   :  { %18314 = vst [vmem:[#allocation66_spill] sm:$0xff] %v16519_v13  ;;  %v8502_v38 = vsel %vm13824_vm2, %v8494_v43, %v8501_v30  ;;  %13081 = vmatmul.mubr.bf16.gmra.mxu1 %v11860_v48  ;;  %v8509_v22 = vshrl.u32 %v16510_v61, 16  ;;  %v8512_v62 = vshll.u32 %v16510_v61, 16  ;;  %v8518_v47 = vshrl.u32 %v16512_v16, 16 }
 0x3b5   :  { %v11861_v3 = vcombine.low %v8493_v27, %v8502_v38  ;;  %13161 = vmatmul.mubr.bf16.gmra.mxu0 %v11916_v32  ;;  %v11814_v39 = vrot.slane %v8504_v35, 11  ;;  %v8521_v10 = vshll.u32 %v16512_v16, 16  ;;  %v11917_v52 = vcombine.low %v16471_v23, %v16473_v14  ;;  %v16542_v32 = vpop.f32.mrf.mxu1  ;;  %v18318_v27 = vld [vmem:[#allocation112_spill] sm:$0xff] }
 0x3b6   :  { %v16540_v20 = vadd.f32 %v16236_v37, %v6274_v56  ;;  %v8511_v43 = vrot.slane %v8509_v22, 7  ;;  %v8520_v30 = vrot.slane %v8518_v47, 7  ;;  %v9778_v26 = vshrl.u32 %v9681_v60, 16  ;;  %v16546_v37 = vpop.f32.mrf.mxu0  ;;  %v18321_v22 = vld [vmem:[#allocation27_spill] sm:$0xff] }
 0x3b7   :  { %13084 = vmatprep.mubr.bf16.mxu1 %v11861_v3  ;;  %v9781_v48 = vshll.u32 %v9681_v60, 16  ;;  %v6277_v38 = vadd.f32 %v16130_v9, %v18318_v27  ;;  %13164 = vmatprep.mubr.bf16.mxu0 %v11917_v52  ;;  %v9787_v17 = vshll.u32 %v9682_v1, 16  ;;  %v9791_v35 = vshrl.u32 %v9682_v1, 16  ;;  %18319 = vst [vmem:[#allocation34_spill] sm:$0xff] %v16546_v37  ;;  %v16548_v56 = vpop.f32.mrf.mxu1  ;;  %v18320_v3 = vld [vmem:[#allocation44_spill] sm:$0xff]  ;;  %v18322_v9 = vld [vmem:[#allocation113_spill] sm:$0xff] }
 0x3b8   :  { %18317 = vst [vmem:[#allocation68_spill] sm:$0xff] %v16540_v20  ;;  %v9797_v49 = vshll.u32 %v9683_v51, 16  ;;  %v8514_v13 = vor.u32 %v8512_v62, %v8511_v43  ;;  %v8516_v58 = vrot.slane %v8511_v43, 4  ;;  %v8523_v23 = vor.u32 %v8521_v10, %v8520_v30  ;;  %v9684_v10 = vld [vmem:[#allocation2 + $0x34] sm:$0xf] }
 0x3b9   :  { %v9780_v14 = vrot.slane %v9778_v26, 4  ;;  %v16552_v60 = vadd.f32 %v18321_v22, %v18320_v3  ;;  %v9783_v47 = vrot.slane %v9781_v48, 5  ;;  %v9789_v20 = vrot.slane %v9787_v17, 5  ;;  %v16563_v43 = vpop.f32.mrf.mxu1  ;;  %v9685_v17 = vld [vmem:[#allocation2 + $0x38] sm:$0xf] }
 0x3ba   :  { %v9793_v40 = vrot.slane %v9791_v35, 4  ;;  %v6280_v52 = vadd.f32 %v16175_v5, %v18322_v9  ;;  %v8515_v1 = vsel %vm13824_vm2, %v11814_v39, %v8514_v13  ;;  %v8524_v62 = vsel %vm13824_vm2, %v8516_v58, %v8523_v23  ;;  %v9686_v35 = vld [vmem:[#allocation2 + $0x3c] sm:$0x1]  ;;  %v18323_v5 = vld [vmem:[#allocation31_spill] sm:$0xff]  ;;  %v16576_v39 = vpop.f32.mrf.mxu0  ;;  %v9688_v9 = vld [vmem:[#allocation2 + $0x48] sm:$0xf] }
 0x3bb   :  { %v16561_v51 = vadd.f32 %v16250_v36, %v6277_v38  ;;  %v11862_v30 = vcombine.low %v8515_v1, %v8524_v62  ;;  %v9784_v26 = vor.u32 %v9783_v47, %v9780_v14  ;;  %v9799_v27 = vrot.slane %v9797_v49, 5  ;;  %v18324_v13 = vld [vmem:[#allocation115_spill] sm:$0xff]  ;;  %v16578_v22 = vpop.f32.mrf.mxu1 }
 0x3bc   :  { %v9794_v48 = vor.u32 %v9793_v40, %v9789_v20  ;;  %v16567_v3 = vadd.f32 %v18323_v5, %v16425_v6  ;;  %v6278_v59 = vadd.f32 %v16183_v19, %v18324_v13  ;;  %v16572_v58 = vadd.f32 %v16295_v2, %v6280_v52  ;;  %v9687_v14 = vld [vmem:[#allocation2 + $0x44] sm:$0xf]  ;;  %18325 = vst [vmem:[#allocation172_spill] sm:$0xff] %v16578_v22 }
 0x3bd   :  { %v11918_v36 = vcombine.low %v16510_v61, %v16512_v16  ;;  %13085 = vmatmul.mubr.bf16.gmra.mxu1 %v11862_v30  ;;  %v9785_v40 = vrot.slane %v9784_v26, 4  ;;  %v9802_v38 = vshrl.u32 %v9684_v10, 16  ;;  %v9805_v23 = vshll.u32 %v9684_v10, 16  ;;  %v9689_v10 = vld [vmem:[#allocation2 + $0x4c] sm:$0x1] }
 0x3be   :  { %v9795_v49 = vrot.slane %v9794_v48, 4  ;;  %v9811_v6 = vshll.u32 %v9685_v17, 16  ;;  %v9815_v47 = vshrl.u32 %v9685_v17, 16  ;;  %v9821_v19 = vshll.u32 %v9686_v35, 16  ;;  %v16589_v35 = vpop.f32.mrf.mxu0 }
 0x3bf   :  { %13165 = vmatmul.mubr.bf16.gmra.mxu0 %v11918_v36  ;;  %v16581_v2 = vadd.f32 %v16308_v53, %v6278_v59  ;;  %v9790_v61 = vsel %vm14360_vm5, %v9785_v40, %v9789_v20  ;;  %v9804_v1 = vrot.slane %v9802_v38, 4  ;;  %v9807_v62 = vrot.slane %v9805_v23, 5 }
 0x3c0   :  { %v9800_v16 = vsel %vm14360_vm5, %v9795_v49, %v9799_v27  ;;  %v6281_v26 = vadd.f32 %v16201_v15, %v15921_v18  ;;  %v9813_v48 = vrot.slane %v9811_v6, 5  ;;  %v9817_v17 = vrot.slane %v9815_v47, 4  ;;  %v18327_v15 = vld [vmem:[#allocation128_spill] sm:$0xff] }
 0x3c1   :  { %v11943_v30 = vcombine.low %v9790_v61, %v9800_v16  ;;  %v9808_v53 = vor.u32 %v9807_v62, %v9804_v1  ;;  %v9826_v5 = vshrl.u32 %v9687_v14, 16  ;;  %v9829_v13 = vshll.u32 %v9687_v14, 16  ;;  %v16591_v36 = vpop.f32.mrf.mxu1  ;;  %v9690_v62 = vld [vmem:[#allocation2 + $0x54] sm:$0xf] }
 0x3c2   :  { %v9835_v59 = vshll.u32 %v9688_v9, 16  ;;  %v9818_v20 = vor.u32 %v9817_v17, %v9813_v48  ;;  %v9823_v27 = vrot.slane %v9821_v19, 5  ;;  %v9839_v40 = vshrl.u32 %v9688_v9, 16  ;;  %v18328_v19 = vld [vmem:[#allocation46_spill] sm:$0xff]  ;;  %v18329_v9 = vld [vmem:[#allocation43_spill] sm:$0xff] }
 0x3c3   :  { %13184 = vmatprep.mubr.bf16.mxu1 %v11943_v30  ;;  %v9845_v49 = vshll.u32 %v9689_v10, 16  ;;  %v9809_v38 = vrot.slane %v9808_v53, 4  ;;  %v9828_v23 = vrot.slane %v9826_v5, 4  ;;  %v9831_v61 = vrot.slane %v9829_v13, 5  ;;  %v16593_v18 = vpop.f32.mrf.mxu1  ;;  %v16600_v30 = vpop.f32.mrf.mxu0  ;;  %v18330_v17 = vld [vmem:[#allocation39_spill] sm:$0xff] }
 0x3c4   :  { %v9837_v16 = vrot.slane %v9835_v59, 5  ;;  %v6284_v6 = vadd.f32 %v16252_v24, %v18327_v15  ;;  %v9819_v47 = vrot.slane %v9818_v20, 4  ;;  %v9841_v1 = vrot.slane %v9839_v40, 4  ;;  %v9691_v59 = vld [vmem:[#allocation2 + $0x58] sm:$0xf] }
 0x3c5   :  { %v16598_v14 = vadd.f32 %v16325_v46, %v6281_v26  ;;  %v16604_v10 = vadd.f32 %v18329_v9, %v18328_v19  ;;  %v16608_v53 = vadd.f32 %v18330_v17, %v16497_v63  ;;  %v9832_v5 = vor.u32 %v9831_v61, %v9828_v23  ;;  %v9692_v40 = vld [vmem:[#allocation2 + $0x5c] sm:$0x1]  ;;  %v16617_v15 = vpop.f32.mrf.mxu1  ;;  %v18331_v63 = vld [vmem:[#allocation136_spill] sm:$0xff]  ;;  %v16621_v37 = vpop.f32.mrf.mxu0 }
 0x3c6   :  { %v9847_v13 = vrot.slane %v9845_v49, 5  ;;  %v9814_v24 = vsel %vm14360_vm5, %v9809_v38, %v9813_v48  ;;  %v9824_v46 = vsel %vm14360_vm5, %v9819_v47, %v9823_v27  ;;  %v9842_v26 = vor.u32 %v9841_v1, %v9837_v16  ;;  %v9693_v38 = vld [vmem:[#allocation2 + $0x64] sm:$0xf]  ;;  %18332 = vst [vmem:[#allocation75_spill] sm:$0xff] %v16621_v37  ;;  %v9694_v1 = vld [vmem:[#allocation2 + $0x68] sm:$0xf] }
 0x3c7   :  { %v16615_v20 = vadd.f32 %v16367_v12, %v6284_v6  ;;  %v11944_v19 = vcombine.low %v9814_v24, %v9824_v46  ;;  %v9833_v9 = vrot.slane %v9832_v5, 4  ;;  %v6282_v23 = vadd.f32 %v16271_v50, %v18331_v63  ;;  %v16630_v46 = vpop.f32.mrf.mxu1 }
 0x3c8   :  { %v9850_v49 = vshrl.u32 %v9690_v62, 16  ;;  %v9843_v61 = vrot.slane %v9842_v26, 4  ;;  %v9853_v17 = vshll.u32 %v9690_v62, 16  ;;  %v9859_v22 = vshll.u32 %v9691_v59, 16  ;;  %18334 = vst [vmem:[#allocation74_spill] sm:$0xff] %v16630_v46 }
 0x3c9   :  { %v9863_v48 = vshrl.u32 %v9691_v59, 16  ;;  %13185 = vmatmul.mubr.bf16.vlgmr.msra.gmra.mxu1 %v11944_v19  ;;  %v9838_v12 = vsel %vm14360_vm5, %v9833_v9, %v9837_v16  ;;  %v9869_v6 = vshll.u32 %v9692_v40, 16  ;;  %v16626_v47 = vadd.f32 %v16405_v33, %v6282_v23  ;;  %v9695_v59 = vld [vmem:[#allocation2 + $0x6c] sm:$0x1]  ;;  %v16632_v33 = vpop.f32.mrf.mxu0  ;;  %v18335_v23 = vld [vmem:[#allocation143_spill] sm:$0xff] }
 0x3ca   :  { %v9852_v27 = vrot.slane %v9850_v49, 4  ;;  %v9848_v50 = vsel %vm14360_vm5, %v9843_v61, %v9847_v13  ;;  %v9855_v5 = vrot.slane %v9853_v17, 5  ;;  %v9861_v62 = vrot.slane %v9859_v22, 5 }
 0x3cb   :  { %18333 = vst [vmem:[#allocation173_spill] sm:$0xff] %v16626_v47  ;;  %v9865_v24 = vrot.slane %v9863_v48, 4  ;;  %v11945_v26 = vcombine.low %v9838_v12, %v9848_v50  ;;  %v9871_v19 = vrot.slane %v9869_v6, 5  ;;  %v9874_v63 = vshrl.u32 %v9693_v38, 16 }
 0x3cc   :  { %v9877_v37 = vshll.u32 %v9693_v38, 16  ;;  %v9856_v16 = vor.u32 %v9855_v5, %v9852_v27  ;;  %v9883_v40 = vshll.u32 %v9694_v1, 16  ;;  %v9887_v49 = vshrl.u32 %v9694_v1, 16  ;;  %v16636_v6 = vpop.f32.mrf.mxu1  ;;  %v18336_v38 = vld [vmem:[#allocation45_spill] sm:$0xff]  ;;  %v18337_v27 = vld [vmem:[#allocation52_spill] sm:$0xff] }
 0x3cd   :  { %v9866_v9 = vor.u32 %v9865_v24, %v9861_v62  ;;  %13188 = vmatprep.mubr.bf16.mxu1 %v11945_v26  ;;  %v6285_v13 = vadd.f32 %v16286_v0, %v18335_v23  ;;  %v9876_v61 = vrot.slane %v9874_v63, 4  ;;  %v9893_v17 = vshll.u32 %v9695_v59, 16  ;;  %v9696_v0 = vld [vmem:[#allocation2 + $0x74] sm:$0xf]  ;;  %v18487_v52 = vld [vmem:[#allocation75_spill] sm:$0xff] }
 0x3ce   :  { %v9879_v22 = vrot.slane %v9877_v37, 5  ;;  %v9857_v48 = vrot.slane %v9856_v16, 4  ;;  %v9885_v46 = vrot.slane %v9883_v40, 5  ;;  %v9889_v12 = vrot.slane %v9887_v49, 4  ;;  %v9697_v16 = vld [vmem:[#allocation2 + $0x78] sm:$0xf]  ;;  %v16651_v40 = vpop.f32.mrf.mxu0 }
 0x3cf   :  { %v9867_v47 = vrot.slane %v9866_v9, 4  ;;  %v16640_v50 = vadd.f32 %v18337_v27, %v18336_v38  ;;  %v6288_v1 = vadd.f32 %v16329_v45, %v16187_v57  ;;  %v16645_v24 = vadd.f32 %v16431_v4, %v6285_v13  ;;  %v9698_v9 = vld [vmem:[#allocation2 + $0x7c] sm:$0x1]  ;;  %v9700_v27 = vld [vmem:[#allocation2 + $0x88] sm:$0xf] }
 0x3d0   :  { %v9880_v5 = vor.u32 %v9879_v22, %v9876_v61  ;;  %v9862_v37 = vsel %vm14360_vm5, %v9857_v48, %v9861_v62  ;;  %v9890_v26 = vor.u32 %v9889_v12, %v9885_v46  ;;  %v9895_v63 = vrot.slane %v9893_v17, 5  ;;  %v18338_v49 = vld [vmem:[#allocation50_spill] sm:$0xff]  ;;  %v18340_v62 = vld [vmem:[#allocation157_spill] sm:$0xff]  ;;  %v9699_v22 = vld [vmem:[#allocation2 + $0x84] sm:$0xf]  ;;  %v16662_v17 = vpop.f32.mrf.mxu1 }
 0x3d1   :  { %v9872_v59 = vsel %vm14360_vm5, %v9867_v47, %v9871_v19  ;;  %v16655_v57 = vadd.f32 %v18338_v49, %v16552_v60  ;;  %v16658_v23 = vadd.f32 %v16484_v31, %v6288_v1  ;;  %v6286_v61 = vadd.f32 %v16349_v34, %v18340_v62 }
 0x3d2   :  { %v11946_v45 = vcombine.low %v9862_v37, %v9872_v59  ;;  %v9881_v4 = vrot.slane %v9880_v5, 4  ;;  %v9891_v13 = vrot.slane %v9890_v26, 4  ;;  %v9898_v47 = vshrl.u32 %v9696_v0, 16  ;;  %v16671_v37 = vpop.f32.mrf.mxu0  ;;  %v18342_v26 = vld [vmem:[#allocation59_spill] sm:$0xff] }
 0x3d3   :  { %18339 = vst [vmem:[#allocation76_spill] sm:$0xff] %v16658_v23  ;;  %v9901_v19 = vshll.u32 %v9696_v0, 16  ;;  %v9907_v60 = vshll.u32 %v9697_v16, 16  ;;  %v9911_v12 = vshrl.u32 %v9697_v16, 16  ;;  %v9917_v38 = vshll.u32 %v9698_v9, 16  ;;  %v16675_v23 = vpop.f32.mrf.mxu1 }
 0x3d4   :  { %13189 = vmatmul.mubr.bf16.gmra.mxu1 %v11946_v45  ;;  %v9886_v48 = vsel %vm14360_vm5, %v9881_v4, %v9885_v46  ;;  %v9896_v31 = vsel %vm14360_vm5, %v9891_v13, %v9895_v63  ;;  %v9900_v1 = vrot.slane %v9898_v47, 4  ;;  %v16669_v34 = vadd.f32 %v16506_v28, %v6286_v61  ;;  %v9701_v0 = vld [vmem:[#allocation2 + $0x8c] sm:$0x1] }
 0x3d5   :  { %v9903_v5 = vrot.slane %v9901_v19, 5  ;;  %v11947_v59 = vcombine.low %v9886_v48, %v9896_v31  ;;  %v6289_v49 = vadd.f32 %v18342_v26, %v16315_v55  ;;  %v9909_v46 = vrot.slane %v9907_v60, 5  ;;  %v16677_v31 = vpop.f32.mrf.mxu0 }
 0x3d6   :  { %18341 = vst [vmem:[#allocation105_spill] sm:$0xff] %v16669_v34  ;;  %v9913_v45 = vrot.slane %v9911_v12, 4  ;;  %v9922_v9 = vshrl.u32 %v9699_v22, 16  ;;  %v9925_v4 = vshll.u32 %v9699_v22, 16  ;;  %v9931_v62 = vshll.u32 %v9700_v27, 16  ;;  %18343 = vst [vmem:[#allocation29_spill] sm:$0xff] %v16677_v31 }
 0x3d7   :  { %v9904_v16 = vor.u32 %v9903_v5, %v9900_v1  ;;  %13192 = vmatprep.mubr.bf16.mxu1 %v11947_v59  ;;  %v9919_v13 = vrot.slane %v9917_v38, 5  ;;  %v9935_v28 = vshrl.u32 %v9700_v27, 16  ;;  %v9941_v61 = vshll.u32 %v9701_v0, 16  ;;  %v9702_v1 = vld [vmem:[#allocation2 + $0x94] sm:$0xf]  ;;  %v18344_v5 = vld [vmem:[#allocation47_spill] sm:$0xff] }
 0x3d8   :  { %v9914_v63 = vor.u32 %v9913_v45, %v9909_v46  ;;  %v9924_v19 = vrot.slane %v9922_v9, 4  ;;  %v9927_v34 = vrot.slane %v9925_v4, 5  ;;  %v9933_v48 = vrot.slane %v9931_v62, 5  ;;  %v18345_v59 = vld [vmem:[#allocation57_spill] sm:$0xff]  ;;  %v16692_v9 = vpop.f32.mrf.mxu1  ;;  %v9704_v4 = vld [vmem:[#allocation2 + $0x9c] sm:$0x1] }
 0x3d9   :  { %v9905_v47 = vrot.slane %v9904_v16, 4  ;;  %v6292_v55 = vadd.f32 %v16407_v7, %v16390_v21  ;;  %v9937_v12 = vrot.slane %v9935_v28, 4  ;;  %v16682_v22 = vadd.f32 %v16534_v41, %v6289_v49  ;;  %v18346_v27 = vld [vmem:[#allocation61_spill] sm:$0xff]  ;;  %v9703_v16 = vld [vmem:[#allocation2 + $0x98] sm:$0xf]  ;;  %18347 = vst [vmem:[#allocation176_spill] sm:$0xff] %v16692_v9 }
 0x3da   :  { %v9915_v60 = vrot.slane %v9914_v63, 4  ;;  %v16686_v38 = vadd.f32 %v18345_v59, %v18344_v5  ;;  %v16690_v0 = vadd.f32 %v18346_v27, %v16604_v10  ;;  %v9928_v26 = vor.u32 %v9927_v34, %v9924_v19  ;;  %v18348_v10 = vld [vmem:[#allocation167_spill] sm:$0xff]  ;;  %v16710_v27 = vpop.f32.mrf.mxu1 }
 0x3db   :  { %v9943_v45 = vrot.slane %v9941_v61, 5  ;;  %v9910_v21 = vsel %vm14360_vm5, %v9905_v47, %v9909_v46  ;;  %v9938_v41 = vor.u32 %v9937_v12, %v9933_v48  ;;  %v16699_v49 = vadd.f32 %v16576_v39, %v6292_v55  ;;  %v16703_v61 = vpop.f32.mrf.mxu0  ;;  %v9705_v47 = vld [vmem:[#allocation2 + $0xa4] sm:$0xf]  ;;  %v9706_v12 = vld [vmem:[#allocation2 + $0xa8] sm:$0xf] }
 0x3dc   :  { %v9920_v7 = vsel %vm14360_vm5, %v9915_v60, %v9919_v13  ;;  %v9929_v63 = vrot.slane %v9928_v26, 4  ;;  %v6290_v34 = vadd.f32 %v18348_v10, %v16441_v44  ;;  %v9946_v28 = vshrl.u32 %v9702_v1, 16 }
 0x3dd   :  { %v11948_v62 = vcombine.low %v9910_v21, %v9920_v7  ;;  %v9939_v19 = vrot.slane %v9938_v41, 4  ;;  %v9949_v5 = vshll.u32 %v9702_v1, 16  ;;  %v9955_v59 = vshll.u32 %v9703_v16, 16 }
 0x3de   :  { %v9959_v46 = vshrl.u32 %v9703_v16, 16  ;;  %v9934_v13 = vsel %vm14360_vm5, %v9929_v63, %v9933_v48  ;;  %v9948_v39 = vrot.slane %v9946_v28, 4  ;;  %v9965_v55 = vshll.u32 %v9704_v4, 16  ;;  %v9707_v16 = vld [vmem:[#allocation2 + $0xac] sm:$0x1]  ;;  %v16714_v48 = vpop.f32.mrf.mxu0 }
 0x3df   :  { %13193 = vmatmul.mubr.bf16.gmra.mxu1 %v11948_v62  ;;  %v16708_v60 = vadd.f32 %v16589_v35, %v6290_v34  ;;  %v9944_v44 = vsel %vm14360_vm5, %v9939_v19, %v9943_v45  ;;  %v9951_v26 = vrot.slane %v9949_v5, 5  ;;  %v9957_v1 = vrot.slane %v9955_v59, 5  ;;  %v16718_v5 = vpop.f32.mrf.mxu1 }
 0x3e0   :  { %v9961_v21 = vrot.slane %v9959_v46, 4  ;;  %v11949_v7 = vcombine.low %v9934_v13, %v9944_v44  ;;  %v9967_v41 = vrot.slane %v9965_v55, 5  ;;  %v9970_v62 = vshrl.u32 %v9705_v47, 16 }
 0x3e1   :  { %v9973_v10 = vshll.u32 %v9705_v47, 16  ;;  %v9952_v4 = vor.u32 %v9951_v26, %v9948_v39  ;;  %v9979_v35 = vshll.u32 %v9706_v12, 16  ;;  %v9983_v34 = vshrl.u32 %v9706_v12, 16  ;;  %v18349_v47 = vld [vmem:[#allocation60_spill] sm:$0xff] }
 0x3e2   :  { %v9962_v63 = vor.u32 %v9961_v21, %v9957_v1  ;;  %13196 = vmatprep.mubr.bf16.mxu1 %v11949_v7  ;;  %v6293_v28 = vadd.f32 %v16433_v25, %v16516_v29  ;;  %v9972_v9 = vrot.slane %v9970_v62, 4  ;;  %v9989_v19 = vshll.u32 %v9707_v16, 16  ;;  %v9708_v25 = vld [vmem:[#allocation2 + $0xb4] sm:$0xf]  ;;  %v16727_v29 = vpop.f32.mrf.mxu0 }
 0x3e3   :  { %v9975_v45 = vrot.slane %v9973_v10, 5  ;;  %v9953_v59 = vrot.slane %v9952_v4, 4  ;;  %v9981_v13 = vrot.slane %v9979_v35, 5  ;;  %v9985_v55 = vrot.slane %v9983_v34, 4  ;;  %v9709_v10 = vld [vmem:[#allocation2 + $0xb8] sm:$0xf] }
 0x3e4   :  { %v9963_v46 = vrot.slane %v9962_v63, 4  ;;  %v5688_v44 = vadd.f32 %v18349_v47, %v16640_v50  ;;  %v6296_v39 = vadd.f32 %v16477_v11, %v16567_v3  ;;  %v16725_v26 = vadd.f32 %v16600_v30, %v6293_v28  ;;  %v9710_v50 = vld [vmem:[#allocation2 + $0xbc] sm:$0x1]  ;;  %v16738_v30 = vpop.f32.mrf.mxu1  ;;  %v9711_v34 = vld [vmem:[#allocation2 + $0xc4] sm:$0xf] }
 0x3e5   :  { %v9976_v12 = vor.u32 %v9975_v45, %v9972_v9  ;;  %v9958_v21 = vsel %vm14360_vm5, %v9953_v59, %v9957_v1  ;;  %v9986_v7 = vor.u32 %v9985_v55, %v9981_v13  ;;  %v9991_v62 = vrot.slane %v9989_v19, 5 }
 0x3e6   :  { %18350 = vst [vmem:[#allocation83_spill] sm:$0xff] %v16725_v26  ;;  %v9968_v16 = vsel %vm14360_vm5, %v9963_v46, %v9967_v41  ;;  %v6294_v11 = vadd.f32 %v16489_v54, %v16608_v53  ;;  %v16736_v3 = vadd.f32 %v16632_v33, %v6296_v39  ;;  %v6300_v1 = vadd.f32 %v16542_v32, %v16690_v0  ;;  %v9712_v54 = vld [vmem:[#allocation2 + $0xc8] sm:$0xf]  ;;  %v16744_v53 = vpop.f32.mrf.mxu0  ;;  %v9713_v0 = vld [vmem:[#allocation2 + $0xcc] sm:$0x1] }
 0x3e7   :  { %v11950_v4 = vcombine.low %v9958_v21, %v9968_v16  ;;  %v9977_v63 = vrot.slane %v9976_v12, 4  ;;  %v9987_v9 = vrot.slane %v9986_v7, 4  ;;  %v9994_v35 = vshrl.u32 %v9708_v25, 16  ;;  %18352 = vst [vmem:[#allocation175_spill] sm:$0xff] %v16744_v53 }
 0x3e8   :  { %18351 = vst [vmem:[#allocation107_spill] sm:$0xff] %v16736_v3  ;;  %v9997_v41 = vshll.u32 %v9708_v25, 16  ;;  %v10003_v45 = vshll.u32 %v9709_v10, 16  ;;  %v10007_v19 = vshrl.u32 %v9709_v10, 16  ;;  %v10013_v59 = vshll.u32 %v9710_v50, 16  ;;  %v16753_v25 = vpop.f32.mrf.mxu1 }
 0x3e9   :  { %13197 = vmatmul.mubr.bf16.gmra.mxu1 %v11950_v4  ;;  %v9982_v28 = vsel %vm14360_vm5, %v9977_v63, %v9981_v13  ;;  %v9992_v33 = vsel %vm14360_vm5, %v9987_v9, %v9991_v62  ;;  %v9996_v46 = vrot.slane %v9994_v35, 4  ;;  %v16749_v32 = vadd.f32 %v16651_v40, %v6294_v11  ;;  %18354 = vst [vmem:[#allocation36_spill] sm:$0xff] %v16753_v25  ;;  %v16755_v40 = vpop.f32.mrf.mxu0 }
 0x3ea   :  { %v9999_v55 = vrot.slane %v9997_v41, 5  ;;  %v11951_v47 = vcombine.low %v9982_v28, %v9992_v33  ;;  %v6297_v39 = vadd.f32 %v16493_v8, %v16655_v57  ;;  %v10005_v13 = vrot.slane %v10003_v45, 5  ;;  %v18355_v8 = vld [vmem:[#allocation67_spill] sm:$0xff] }
 0x3eb   :  { %18353 = vst [vmem:[#allocation82_spill] sm:$0xff] %v16749_v32  ;;  %v10009_v12 = vrot.slane %v10007_v19, 4  ;;  %v10018_v16 = vshrl.u32 %v9711_v34, 16  ;;  %v10021_v7 = vshll.u32 %v9711_v34, 16  ;;  %v10027_v10 = vshll.u32 %v9712_v54, 16 }
 0x3ec   :  { %v10000_v21 = vor.u32 %v9999_v55, %v9996_v46  ;;  %13200 = vmatprep.mubr.bf16.mxu1 %v11951_v47  ;;  %v10015_v50 = vrot.slane %v10013_v59, 5  ;;  %v10031_v4 = vshrl.u32 %v9712_v54, 16  ;;  %v10037_v63 = vshll.u32 %v9713_v0, 16  ;;  %v9714_v34 = vld [vmem:[#allocation2 + $0xd4] sm:$0xf] }
 0x3ed   :  { %v10010_v62 = vor.u32 %v10009_v12, %v10005_v13  ;;  %v10020_v9 = vrot.slane %v10018_v16, 4  ;;  %v10023_v35 = vrot.slane %v10021_v7, 5  ;;  %v10029_v41 = vrot.slane %v10027_v10, 5  ;;  %v9715_v0 = vld [vmem:[#allocation2 + $0xd8] sm:$0xf] }
 0x3ee   :  { %v10001_v11 = vrot.slane %v10000_v21, 4  ;;  %v5691_v57 = vadd.f32 %v18355_v8, %v16686_v38  ;;  %v10033_v45 = vrot.slane %v10031_v4, 4  ;;  %v16760_v19 = vadd.f32 %v16671_v37, %v6297_v39  ;;  %v16762_v33 = vpop.f32.mrf.mxu1  ;;  %v9716_v39 = vld [vmem:[#allocation2 + $0xdc] sm:$0x1]  ;;  %v16773_v21 = vpop.f32.mrf.mxu0  ;;  %v9718_v8 = vld [vmem:[#allocation2 + $0xe8] sm:$0xf] }
 0x3ef   :  { %v10011_v28 = vrot.slane %v10010_v62, 4  ;;  %v10024_v54 = vor.u32 %v10023_v35, %v10020_v9  ;;  %v10039_v46 = vrot.slane %v10037_v63, 5  ;;  %v6298_v55 = vadd.f32 %v16548_v56, %v5688_v44  ;;  %v18358_v10 = vld [vmem:[#allocation122_spill] sm:$0xff] }
 0x3f0   :  { %18356 = vst [vmem:[#allocation178_spill] sm:$0xff] %v16760_v19  ;;  %v10006_v59 = vsel %vm14360_vm5, %v10001_v11, %v10005_v13  ;;  %v10034_v38 = vor.u32 %v10033_v45, %v10029_v41  ;;  %v6301_v12 = vadd.f32 %v16563_v43, %v5691_v57  ;;  %v16771_v37 = vadd.f32 %v16703_v61, %v6300_v1  ;;  %v16775_v16 = vpop.f32.mrf.mxu1  ;;  %v9717_v11 = vld [vmem:[#allocation2 + $0xe4] sm:$0xf] }
 0x3f1   :  { %v10016_v47 = vsel %vm14360_vm5, %v10011_v28, %v10015_v50  ;;  %v10025_v7 = vrot.slane %v10024_v54, 4  ;;  %v6304_v56 = vadd.f32 %v16591_v36, %v18358_v10  ;;  %v10042_v44 = vshrl.u32 %v9714_v34, 16 }
 0x3f2   :  { %18357 = vst [vmem:[#allocation89_spill] sm:$0xff] %v16771_v37  ;;  %v11952_v13 = vcombine.low %v10006_v59, %v10016_v47  ;;  %v10035_v62 = vrot.slane %v10034_v38, 4  ;;  %v10045_v4 = vshll.u32 %v9714_v34, 16  ;;  %v10051_v50 = vshll.u32 %v9715_v0, 16  ;;  %v16779_v43 = vpop.f32.mrf.mxu1  ;;  %v9719_v34 = vld [vmem:[#allocation2 + $0xec] sm:$0x1]  ;;  %v16788_v59 = vpop.f32.mrf.mxu0 }
 0x3f3   :  { %v10055_v63 = vshrl.u32 %v9715_v0, 16  ;;  %v10030_v61 = vsel %vm14360_vm5, %v10025_v7, %v10029_v41  ;;  %v10044_v1 = vrot.slane %v10042_v44, 4  ;;  %v10061_v9 = vshll.u32 %v9716_v39, 16  ;;  %v18361_v44 = vld [vmem:[#allocation124_spill] sm:$0xff] }
 0x3f4   :  { %13201 = vmatmul.mubr.bf16.gmra.mxu1 %v11952_v13  ;;  %v16784_v35 = vadd.f32 %v16714_v48, %v6298_v55  ;;  %v10040_v36 = vsel %vm14360_vm5, %v10035_v62, %v10039_v46  ;;  %v10047_v57 = vrot.slane %v10045_v4, 5  ;;  %v10053_v28 = vrot.slane %v10051_v50, 5  ;;  %v16790_v54 = vpop.f32.mrf.mxu1 }
 0x3f5   :  { %v10057_v45 = vrot.slane %v10055_v63, 4  ;;  %18360 = vst [vmem:[#allocation84_spill] sm:$0xff] %v16790_v54  ;;  %v11953_v0 = vcombine.low %v10030_v61, %v10040_v36  ;;  %v10063_v47 = vrot.slane %v10061_v9, 5  ;;  %v10066_v41 = vshrl.u32 %v9717_v11, 16  ;;  %v16794_v54 = vpop.f32.mrf.mxu0  ;;  %v18364_v9 = vld [vmem:[#allocation123_spill] sm:$0xff] }
 0x3f6   :  { %18359 = vst [vmem:[#allocation177_spill] sm:$0xff] %v16784_v35  ;;  %v10069_v38 = vshll.u32 %v9717_v11, 16  ;;  %v10048_v39 = vor.u32 %v10047_v57, %v10044_v1  ;;  %v10075_v48 = vshll.u32 %v9718_v8, 16  ;;  %v10079_v55 = vshrl.u32 %v9718_v8, 16  ;;  %18362 = vst [vmem:[#allocation116_spill] sm:$0xff] %v16794_v54 }
 0x3f7   :  { %v10058_v13 = vor.u32 %v10057_v45, %v10053_v28  ;;  %13204 = vmatprep.mubr.bf16.mxu1 %v11953_v0  ;;  %v10068_v7 = vrot.slane %v10066_v41, 4  ;;  %v10085_v46 = vshll.u32 %v9719_v34, 16  ;;  %v6302_v62 = vadd.f32 %v16593_v18, %v18361_v44  ;;  %v9720_v36 = vld [vmem:[#allocation2 + $0xf4] sm:$0xf]  ;;  %v9721_v0 = vld [vmem:[#allocation2 + $0xf8] sm:$0xf] }
 0x3f8   :  { %v10071_v10 = vrot.slane %v10069_v38, 5  ;;  %v10049_v4 = vrot.slane %v10048_v39, 4  ;;  %v10077_v63 = vrot.slane %v10075_v48, 5  ;;  %v10081_v25 = vrot.slane %v10079_v55, 4  ;;  %v16796_v61 = vpop.f32.mrf.mxu1  ;;  %v9722_v41 = vld [vmem:[#allocation2 + $0xfc] sm:$0x1] }
 0x3f9   :  { %v10059_v50 = vrot.slane %v10058_v13, 4  ;;  %v16799_v1 = vadd.f32 %v16727_v29, %v6301_v12  ;;  %v6305_v8 = vadd.f32 %v16617_v15, %v18364_v9  ;;  %v10087_v34 = vrot.slane %v10085_v46, 5  ;;  %v18366_v15 = vld [vmem:[#allocation130_spill] sm:$0xff]  ;;  %v9725_v9 = vld [vmem:[#allocation2 + $0x10c] sm:$0x1] }
 0x3fa   :  { %v10072_v11 = vor.u32 %v10071_v10, %v10068_v7  ;;  %v10054_v57 = vsel %vm14360_vm5, %v10049_v4, %v10053_v28  ;;  %v10082_v45 = vor.u32 %v10081_v25, %v10077_v63  ;;  %v16807_v38 = vpop.f32.mrf.mxu1  ;;  %v16810_v29 = vadd.f32 %v16755_v40, %v6304_v56  ;;  %v9723_v7 = vld [vmem:[#allocation2 + $0x104] sm:$0xf]  ;;  %v13002_v10 = vpop.f32.mrf.mxu0  ;;  %v9748_v35 = vld [vmem:[#allocation2 + $0x1a8] sm:$0xf] }
 0x3fb   :  { %18363 = vst [vmem:[#allocation86_spill] sm:$0xff] %v16799_v1  ;;  %v10064_v18 = vsel %vm14360_vm5, %v10059_v50, %v10063_v47  ;;  %v6308_v48 = vadd.f32 %v16636_v6, %v18366_v15  ;;  %v10090_v55 = vshrl.u32 %v9720_v36, 16  ;;  %v10093_v28 = vshll.u32 %v9720_v36, 16  ;;  %v9724_v50 = vld [vmem:[#allocation2 + $0x108] sm:$0xf] }
 0x3fc   :  { %v11954_v39 = vcombine.low %v10054_v57, %v10064_v18  ;;  %v10073_v13 = vrot.slane %v10072_v11, 4  ;;  %18365 = vst [vmem:[#allocation119_spill] sm:$0xff] %v16810_v29  ;;  %v10083_v12 = vrot.slane %v10082_v45, 4  ;;  %v16814_v47 = vpop.f32.mrf.mxu1  ;;  %v10099_v46 = vshll.u32 %v9721_v0, 16  ;;  %v7629_v15 = vpop.f32.mrf.mxu0 }
 0x3fd   :  { %v10103_v44 = vshrl.u32 %v9721_v0, 16  ;;  %v10109_v4 = vshll.u32 %v9722_v41, 16  ;;  %v10092_v56 = vrot.slane %v10090_v55, 4  ;;  %v10095_v11 = vrot.slane %v10093_v28, 5  ;;  %v18369_v55 = vld [vmem:[#allocation132_spill] sm:$0xff] }
 0x3fe   :  { %13205 = vmatmul.mubr.bf16.gmra.mxu1 %v11954_v39  ;;  %v10078_v25 = vsel %vm14360_vm5, %v10073_v13, %v10077_v63  ;;  %v10088_v40 = vsel %vm14360_vm5, %v10083_v12, %v10087_v34  ;;  %v16821_v6 = vadd.f32 %v16773_v21, %v6302_v62  ;;  %v16823_v36 = vpop.f32.mrf.mxu1  ;;  %v10101_v18 = vrot.slane %v10099_v46, 5 }
 0x3ff   :  { %18368 = vst [vmem:[#allocation38_spill] sm:$0xff] %v16823_v36  ;;  %v11955_v57 = vcombine.low %v10078_v25, %v10088_v40  ;;  %v10105_v45 = vrot.slane %v10103_v44, 4  ;;  %v10111_v39 = vrot.slane %v10109_v4, 5  ;;  %v10096_v63 = vor.u32 %v10095_v11, %v10092_v56  ;;  %v18371_v11 = vld [vmem:[#allocation133_spill] sm:$0xff] }
 0x400   :  { %18367 = vst [vmem:[#allocation93_spill] sm:$0xff] %v16821_v6  ;;  %v10114_v13 = vshrl.u32 %v9723_v7, 16  ;;  %v10117_v0 = vshll.u32 %v9723_v7, 16  ;;  %v10123_v41 = vshll.u32 %v9724_v50, 16  ;;  %v10127_v34 = vshrl.u32 %v9724_v50, 16 }
 0x401   :  { %13208 = vmatprep.mubr.bf16.mxu1 %v11955_v57  ;;  %v10106_v54 = vor.u32 %v10105_v45, %v10101_v18  ;;  %v10133_v12 = vshll.u32 %v9725_v9, 16  ;;  %v6306_v21 = vadd.f32 %v16662_v17, %v18369_v55  ;;  %v10097_v62 = vrot.slane %v10096_v63, 4  ;;  %v9726_v7 = vld [vmem:[#allocation2 + $0x114] sm:$0xf]  ;;  %v9727_v9 = vld [vmem:[#allocation2 + $0x118] sm:$0xf]  ;;  %v13003_v57 = vpop.f32.mrf.mxu0 }
 0x402   :  { %v10116_v28 = vrot.slane %v10114_v13, 4  ;;  %v10119_v6 = vrot.slane %v10117_v0, 5  ;;  %v10125_v36 = vrot.slane %v10123_v41, 5  ;;  %v10129_v44 = vrot.slane %v10127_v34, 4  ;;  %v18373_v0 = vld [vmem:[#allocation138_spill] sm:$0xff] }
 0x403   :  { %v16827_v25 = vpop.f32.mrf.mxu1  ;;  %v10107_v46 = vrot.slane %v10106_v54, 4  ;;  %v16830_v4 = vadd.f32 %v16788_v59, %v6305_v8  ;;  %v10135_v56 = vrot.slane %v10133_v12, 5  ;;  %v6309_v50 = vadd.f32 %v16675_v23, %v18371_v11  ;;  %v9728_v59 = vld [vmem:[#allocation2 + $0x11c] sm:$0x1] }
 0x404   :  { %v10120_v40 = vor.u32 %v10119_v6, %v10116_v28  ;;  %v10102_v45 = vsel %vm14360_vm5, %v10097_v62, %v10101_v18  ;;  %v10130_v63 = vor.u32 %v10129_v44, %v10125_v36  ;;  %v16840_v13 = vadd.f32 %v13002_v10, %v6308_v48  ;;  %v9729_v18 = vld [vmem:[#allocation2 + $0x144] sm:$0xf]  ;;  %v16850_v44 = vpop.f32.mrf.mxu0 }
 0x405   :  { %18370 = vst [vmem:[#allocation14_spill] sm:$0xff] %v16830_v4  ;;  %v16834_v17 = vpop.f32.mrf.mxu1  ;;  %v10112_v54 = vsel %vm14360_vm5, %v10107_v46, %v10111_v39  ;;  %v6312_v41 = vadd.f32 %v16710_v27, %v18373_v0  ;;  %v10138_v23 = vshrl.u32 %v9726_v7, 16  ;;  %v10141_v55 = vshll.u32 %v9726_v7, 16  ;;  %v9730_v46 = vld [vmem:[#allocation2 + $0x148] sm:$0xf]  ;;  %18375 = vst [vmem:[#allocation98_spill] sm:$0xff] %v16850_v44 }
 0x406   :  { %18372 = vst [vmem:[#allocation97_spill] sm:$0xff] %v16840_v13  ;;  %v11956_v8 = vcombine.low %v10102_v45, %v10112_v54  ;;  %v10121_v6 = vrot.slane %v10120_v40, 4  ;;  %v10131_v12 = vrot.slane %v10130_v63, 4  ;;  %v10147_v28 = vshll.u32 %v9727_v9, 16  ;;  %v9731_v54 = vld [vmem:[#allocation2 + $0x14c] sm:$0x1] }
 0x407   :  { %v16844_v34 = vpop.f32.mrf.mxu1  ;;  %v10151_v11 = vshrl.u32 %v9727_v9, 16  ;;  %v10140_v48 = vrot.slane %v10138_v23, 4  ;;  %v10157_v10 = vshll.u32 %v9728_v59, 16  ;;  %v16848_v62 = vadd.f32 %v7629_v15, %v6306_v21  ;;  %v18377_v13 = vld [vmem:[#allocation140_spill] sm:$0xff] }
 0x408   :  { %13209 = vmatmul.mubr.bf16.gmra.mxu1 %v11956_v8  ;;  %v10126_v39 = vsel %vm14360_vm5, %v10121_v6, %v10125_v36  ;;  %v10136_v40 = vsel %vm14360_vm5, %v10131_v12, %v10135_v56  ;;  %v10143_v7 = vrot.slane %v10141_v55, 5  ;;  %v10149_v45 = vrot.slane %v10147_v28, 5  ;;  %v13006_v12 = vpop.f32.mrf.mxu0 }
 0x409   :  { %18374 = vst [vmem:[#allocation20_spill] sm:$0xff] %v16848_v62  ;;  %v16852_v27 = vpop.f32.mrf.mxu1  ;;  %v10153_v9 = vrot.slane %v10151_v11, 4  ;;  %v11957_v63 = vcombine.low %v10126_v39, %v10136_v40  ;;  %v10159_v8 = vrot.slane %v10157_v10, 5  ;;  %v10162_v0 = vshrl.u32 %v9729_v18, 16 }
 0x40a   :  { %18376 = vst [vmem:[#allocation42_spill] sm:$0xff] %v16852_v27  ;;  %v10165_v36 = vshll.u32 %v9729_v18, 16  ;;  %v10144_v6 = vor.u32 %v10143_v7, %v10140_v48  ;;  %v10171_v15 = vshll.u32 %v9730_v46, 16  ;;  %v10175_v21 = vshrl.u32 %v9730_v46, 16  ;;  %v18379_v46 = vld [vmem:[#allocation141_spill] sm:$0xff] }
 0x40b   :  { %v10154_v59 = vor.u32 %v10153_v9, %v10149_v45  ;;  %13212 = vmatprep.mubr.bf16.mxu1 %v11957_v63  ;;  %v10164_v44 = vrot.slane %v10162_v0, 4  ;;  %v10181_v62 = vshll.u32 %v9731_v54, 16  ;;  %v6310_v56 = vadd.f32 %v16718_v5, %v18377_v13  ;;  %v9732_v7 = vld [vmem:[#allocation2 + $0x154] sm:$0xf]  ;;  %v9733_v63 = vld [vmem:[#allocation2 + $0x158] sm:$0xf] }
 0x40c   :  { %v16856_v23 = vpop.f32.mrf.mxu1  ;;  %v10167_v27 = vrot.slane %v10165_v36, 5  ;;  %v10145_v55 = vrot.slane %v10144_v6, 4  ;;  %v10173_v11 = vrot.slane %v10171_v15, 5  ;;  %v10177_v39 = vrot.slane %v10175_v21, 4  ;;  %v9734_v0 = vld [vmem:[#allocation2 + $0x15c] sm:$0x1] }
 0x40d   :  { %v10155_v28 = vrot.slane %v10154_v59, 4  ;;  %v16862_v48 = vadd.f32 %v13003_v57, %v6309_v50  ;;  %v6313_v40 = vadd.f32 %v16738_v30, %v18379_v46  ;;  %v10183_v54 = vrot.slane %v10181_v62, 5  ;;  %v7645_v57 = vpop.f32.mrf.mxu0  ;;  %v18381_v30 = vld [vmem:[#allocation146_spill] sm:$0xff]  ;;  %v9735_v21 = vld [vmem:[#allocation2 + $0x164] sm:$0xf] }
 0x40e   :  { %v16860_v10 = vpop.f32.mrf.mxu1  ;;  %v10168_v18 = vor.u32 %v10167_v27, %v10164_v44  ;;  %v10150_v9 = vsel %vm14360_vm5, %v10145_v55, %v10149_v45  ;;  %v10178_v13 = vor.u32 %v10177_v39, %v10173_v11  ;;  %v16872_v50 = vadd.f32 %v13006_v12, %v6312_v41  ;;  %v9736_v41 = vld [vmem:[#allocation2 + $0x168] sm:$0xf] }
 0x40f   :  { %18378 = vst [vmem:[#allocation19_spill] sm:$0xff] %v16862_v48  ;;  %v10160_v5 = vsel %vm14360_vm5, %v10155_v28, %v10159_v8  ;;  %v16876_v59 = vadd.f32 %v16762_v33, %v18381_v30  ;;  %v10186_v45 = vshrl.u32 %v9732_v7, 16  ;;  %v10189_v15 = vshll.u32 %v9732_v7, 16 }
 0x410   :  { %v16870_v36 = vpop.f32.mrf.mxu1  ;;  %v11958_v6 = vcombine.low %v10150_v9, %v10160_v5  ;;  %v10169_v44 = vrot.slane %v10168_v18, 4  ;;  %18380 = vst [vmem:[#allocation92_spill] sm:$0xff] %v16872_v50  ;;  %v10179_v27 = vrot.slane %v10178_v13, 4  ;;  %v10195_v55 = vshll.u32 %v9733_v63, 16  ;;  %v9737_v9 = vld [vmem:[#allocation2 + $0x16c] sm:$0x1] }
 0x411   :  { %18382 = vst [vmem:[#allocation22_spill] sm:$0xff] %v16876_v59  ;;  %v10199_v28 = vshrl.u32 %v9733_v63, 16  ;;  %v10205_v39 = vshll.u32 %v9734_v0, 16  ;;  %v10188_v18 = vrot.slane %v10186_v45, 4  ;;  %v10191_v46 = vrot.slane %v10189_v15, 5 }
 0x412   :  { %v16878_v8 = vpop.f32.mrf.mxu1  ;;  %13213 = vmatmul.mubr.bf16.gmra.mxu1 %v11958_v6  ;;  %v10174_v62 = vsel %vm14360_vm5, %v10169_v44, %v10173_v11  ;;  %v10184_v12 = vsel %vm14360_vm5, %v10179_v27, %v10183_v54  ;;  %v16884_v33 = vadd.f32 %v7645_v57, %v6310_v56  ;;  %v10197_v5 = vrot.slane %v10195_v55, 5  ;;  %v13007_v44 = vpop.f32.mrf.mxu0  ;;  %v18385_v27 = vld [vmem:[#allocation148_spill] sm:$0xff] }
 0x413   :  { %18383 = vst [vmem:[#allocation100_spill] sm:$0xff] %v16878_v8  ;;  %v11959_v7 = vcombine.low %v10174_v62, %v10184_v12  ;;  %v10201_v13 = vrot.slane %v10199_v28, 4  ;;  %v10207_v30 = vrot.slane %v10205_v39, 5  ;;  %v10192_v6 = vor.u32 %v10191_v46, %v10188_v18  ;;  %v18387_v28 = vld [vmem:[#allocation13_spill] sm:$0xff] }
 0x414   :  { %18384 = vst [vmem:[#allocation101_spill] sm:$0xff] %v16884_v33  ;;  %v10210_v8 = vshrl.u32 %v9735_v21, 16  ;;  %v10213_v59 = vshll.u32 %v9735_v21, 16  ;;  %v10219_v11 = vshll.u32 %v9736_v41, 16  ;;  %v10223_v50 = vshrl.u32 %v9736_v41, 16  ;;  %v18388_v21 = vld [vmem:[#allocation16_spill] sm:$0xff]  ;;  %v16972_v37 = vpop.f32.mrf.mxu0 }
 0x415   :  { %v16886_v63 = vpop.f32.mrf.mxu1  ;;  %13216 = vmatprep.mubr.bf16.mxu1 %v11959_v7  ;;  %v10202_v0 = vor.u32 %v10201_v13, %v10197_v5  ;;  %v10229_v54 = vshll.u32 %v9737_v9, 16  ;;  %v16890_v56 = vadd.f32 %v16775_v16, %v18385_v27  ;;  %v10193_v57 = vrot.slane %v10192_v6, 4  ;;  %v9738_v41 = vld [vmem:[#allocation2 + $0x174] sm:$0xf]  ;;  %v18391_v7 = vld [vmem:[#allocation24_spill] sm:$0xff]  ;;  %18414 = vst [vmem:[#allocation44_spill] sm:$0xff] %v16972_v37 }
 0x416   :  { %v10212_v45 = vrot.slane %v10210_v8, 4  ;;  %v10215_v15 = vrot.slane %v10213_v59, 5  ;;  %v10221_v62 = vrot.slane %v10219_v11, 5  ;;  %v16896_v39 = vadd.f32 %v18388_v21, %v18387_v28  ;;  %v18390_v9 = vld [vmem:[#allocation17_spill] sm:$0xff]  ;;  %v18393_v6 = vld [vmem:[#allocation32_spill] sm:$0xff] }
 0x417   :  { %18386 = vst [vmem:[#allocation104_spill] sm:$0xff] %v16890_v56  ;;  %v16892_v55 = vpop.f32.mrf.mxu1  ;;  %v10203_v12 = vrot.slane %v10202_v0, 4  ;;  %v10225_v18 = vrot.slane %v10223_v50, 4  ;;  %v16898_v46 = vadd.f32 %v13007_v44, %v6313_v40  ;;  %v16902_v13 = vadd.f32 %v18391_v7, %v18390_v9  ;;  %v18392_v16 = vld [vmem:[#allocation25_spill] sm:$0xff]  ;;  %v9739_v28 = vld [vmem:[#allocation2 + $0x178] sm:$0xf] }
 0x418   :  { %v16906_v8 = vadd.f32 %v18393_v6, %v18392_v16  ;;  %v10216_v59 = vor.u32 %v10215_v15, %v10212_v45  ;;  %v18394_v11 = vld [vmem:[#allocation149_spill] sm:$0xff]  ;;  %v10198_v40 = vsel %vm14360_vm5, %v10193_v57, %v10197_v5  ;;  %v10231_v0 = vrot.slane %v10229_v54, 5  ;;  %v9740_v9 = vld [vmem:[#allocation2 + $0x17c] sm:$0x1]  ;;  %v18396_v6 = vld [vmem:[#allocation151_spill] sm:$0xff] }
 0x419   :  { %18389 = vst [vmem:[#allocation37_spill] sm:$0xff] %v16898_v46  ;;  %v16910_v27 = vadd.f32 %v16779_v43, %v18394_v11  ;;  %v16912_v21 = vpop.f32.mrf.mxu1  ;;  %v10208_v50 = vsel %vm14360_vm5, %v10203_v12, %v10207_v30  ;;  %v10226_v44 = vor.u32 %v10225_v18, %v10221_v62  ;;  %v16920_v45 = vadd.f32 %v16796_v61, %v18396_v6  ;;  %v9741_v5 = vld [vmem:[#allocation2 + $0x184] sm:$0xf]  ;;  %v18398_v57 = vld [vmem:[#allocation33_spill] sm:$0xff]  ;;  %v18399_v33 = vld [vmem:[#allocation40_spill] sm:$0xff] }
 0x41a   :  { %v11960_v7 = vcombine.low %v10198_v40, %v10208_v50  ;;  %v10217_v16 = vrot.slane %v10216_v59, 4  ;;  %v10234_v43 = vshrl.u32 %v9738_v41, 16  ;;  %v10243_v56 = vshll.u32 %v9739_v28, 16  ;;  %v9742_v61 = vld [vmem:[#allocation2 + $0x188] sm:$0xf] }
 0x41b   :  { %18395 = vst [vmem:[#allocation28_spill] sm:$0xff] %v16910_v27  ;;  %18397 = vst [vmem:[#allocation108_spill] sm:$0xff] %v16920_v45  ;;  %v16922_v15 = vpop.f32.mrf.mxu1  ;;  %v10227_v11 = vrot.slane %v10226_v44, 4  ;;  %v10237_v27 = vshll.u32 %v9738_v41, 16  ;;  %v10247_v46 = vshrl.u32 %v9739_v28, 16  ;;  %v16926_v30 = vadd.f32 %v18399_v33, %v18398_v57 }
 0x41c   :  { %13217 = vmatmul.mubr.bf16.gmra.mxu1 %v11960_v7  ;;  %v10222_v54 = vsel %vm14360_vm5, %v10217_v16, %v10221_v62  ;;  %v10236_v12 = vrot.slane %v10234_v43, 4  ;;  %v10253_v18 = vshll.u32 %v9740_v9, 16  ;;  %v10245_v50 = vrot.slane %v10243_v56, 5  ;;  %v9743_v44 = vld [vmem:[#allocation2 + $0x18c] sm:$0x1] }
 0x41d   :  { %v10232_v59 = vsel %vm14360_vm5, %v10227_v11, %v10231_v0  ;;  %v10239_v40 = vrot.slane %v10237_v27, 5  ;;  %v10249_v41 = vrot.slane %v10247_v46, 4  ;;  %v10258_v33 = vshrl.u32 %v9741_v5, 16  ;;  %v18400_v27 = vld [vmem:[#allocation154_spill] sm:$0xff] }
 0x41e   :  { %v11961_v6 = vcombine.low %v10222_v54, %v10232_v59  ;;  %v10255_v45 = vrot.slane %v10253_v18, 5  ;;  %v10261_v57 = vshll.u32 %v9741_v5, 16  ;;  %v10267_v4 = vshll.u32 %v9742_v61, 16  ;;  %v18402_v5 = vld [vmem:[#allocation41_spill] sm:$0xff] }
 0x41f   :  { %v16932_v28 = vpop.f32.mrf.mxu1  ;;  %v10240_v7 = vor.u32 %v10239_v40, %v10236_v12  ;;  %v10250_v48 = vor.u32 %v10249_v41, %v10245_v50  ;;  %v10271_v62 = vshrl.u32 %v9742_v61, 16  ;;  %v10260_v9 = vrot.slane %v10258_v33, 4  ;;  %v18403_v12 = vld [vmem:[#allocation48_spill] sm:$0xff]  ;;  %v18404_v61 = vld [vmem:[#allocation49_spill] sm:$0xff]  ;;  %v18405_v41 = vld [vmem:[#allocation55_spill] sm:$0xff] }
 0x420   :  { %13220 = vmatprep.mubr.bf16.mxu1 %v11961_v6  ;;  %v10263_v43 = vrot.slane %v10261_v57, 5  ;;  %v10277_v0 = vshll.u32 %v9743_v44, 16  ;;  %v16938_v56 = vadd.f32 %v16807_v38, %v18400_v27  ;;  %v10269_v54 = vrot.slane %v10267_v4, 5  ;;  %v18406_v44 = vld [vmem:[#allocation156_spill] sm:$0xff]  ;;  %v9744_v38 = vld [vmem:[#allocation2 + $0x194] sm:$0xf] }
 0x421   :  { %v16934_v16 = vpop.f32.mrf.mxu1  ;;  %v10241_v46 = vrot.slane %v10240_v7, 4  ;;  %v10251_v11 = vrot.slane %v10250_v48, 4  ;;  %v10273_v18 = vrot.slane %v10271_v62, 4  ;;  %v16944_v40 = vadd.f32 %v18403_v12, %v18402_v5  ;;  %v9745_v27 = vld [vmem:[#allocation2 + $0x198] sm:$0xf] }
 0x422   :  { %18401 = vst [vmem:[#allocation21_spill] sm:$0xff] %v16938_v56  ;;  %v16948_v6 = vadd.f32 %v18405_v41, %v18404_v61  ;;  %v10264_v33 = vor.u32 %v10263_v43, %v10260_v9  ;;  %v16952_v57 = vadd.f32 %v16814_v47, %v18406_v44  ;;  %v10279_v62 = vrot.slane %v10277_v0, 5  ;;  %v9746_v5 = vld [vmem:[#allocation2 + $0x19c] sm:$0x1]  ;;  %v18408_v61 = vld [vmem:[#allocation56_spill] sm:$0xff]  ;;  %v18409_v41 = vld [vmem:[#allocation63_spill] sm:$0xff] }
 0x423   :  { %v16940_v59 = vpop.f32.mrf.mxu1  ;;  %v10246_v4 = vsel %vm14360_vm5, %v10241_v46, %v10245_v50  ;;  %v10256_v48 = vsel %vm14360_vm5, %v10251_v11, %v10255_v45  ;;  %v10274_v7 = vor.u32 %v10273_v18, %v10269_v54  ;;  %v16962_v9 = vadd.f32 %v18409_v41, %v18408_v61  ;;  %v18410_v47 = vld [vmem:[#allocation134_spill] sm:$0xff]  ;;  %v18411_v50 = vld [vmem:[#allocation160_spill] sm:$0xff]  ;;  %v9747_v11 = vld [vmem:[#allocation2 + $0x1a4] sm:$0xf] }
 0x424   :  { %18407 = vst [vmem:[#allocation109_spill] sm:$0xff] %v16952_v57  ;;  %v4311_v43 = vadd.f32 %v18410_v47, %v16896_v39  ;;  %v11962_v44 = vcombine.low %v10246_v4, %v10256_v48  ;;  %v10265_v57 = vrot.slane %v10264_v33, 4  ;;  %v16968_v46 = vadd.f32 %v16827_v25, %v18411_v50  ;;  %v18413_v18 = vld [vmem:[#allocation142_spill] sm:$0xff] }
 0x425   :  { %v16958_v12 = vpop.f32.mrf.mxu1  ;;  %v10275_v56 = vrot.slane %v10274_v7, 4  ;;  %v10282_v45 = vshrl.u32 %v9744_v38, 16  ;;  %v10285_v0 = vshll.u32 %v9744_v38, 16  ;;  %v4315_v29 = vadd.f32 %v18413_v18, %v16902_v13  ;;  %v9749_v38 = vld [vmem:[#allocation2 + $0x1ac] sm:$0x1] }
 0x426   :  { %18412 = vst [vmem:[#allocation112_spill] sm:$0xff] %v16968_v46  ;;  %13221 = vmatmul.mubr.bf16.gmra.mxu1 %v11962_v44  ;;  %v10291_v1 = vshll.u32 %v9745_v27, 16  ;;  %v10295_v61 = vshrl.u32 %v9745_v27, 16  ;;  %v10301_v41 = vshll.u32 %v9746_v5, 16  ;;  %v10270_v39 = vsel %vm14360_vm5, %v10265_v57, %v10269_v54 }
 0x427   :  { %v10280_v25 = vsel %vm14360_vm5, %v10275_v56, %v10279_v62  ;;  %v10284_v33 = vrot.slane %v10282_v45, 4  ;;  %v10287_v4 = vrot.slane %v10285_v0, 5  ;;  %v10306_v5 = vshrl.u32 %v9747_v11, 16  ;;  %v18415_v56 = vld [vmem:[#allocation162_spill] sm:$0xff]  ;;  %v16986_v45 = vpop.f32.mrf.mxu0 }
 0x428   :  { %v16978_v48 = vpop.f32.mrf.mxu1  ;;  %v11963_v7 = vcombine.low %v10270_v39, %v10280_v25  ;;  %v10293_v13 = vrot.slane %v10291_v1, 5  ;;  %v10297_v47 = vrot.slane %v10295_v61, 4  ;;  %v10303_v44 = vrot.slane %v10301_v41, 5  ;;  %18417 = vst [vmem:[#allocation113_spill] sm:$0xff] %v16986_v45  ;;  %v18419_v25 = vld [vmem:[#allocation71_spill] sm:$0xff] }
 0x429   :  { %v10288_v27 = vor.u32 %v10287_v4, %v10284_v33  ;;  %v10309_v50 = vshll.u32 %v9747_v11, 16  ;;  %v10315_v18 = vshll.u32 %v9748_v35, 16  ;;  %v10319_v57 = vshrl.u32 %v9748_v35, 16  ;;  %v18418_v11 = vld [vmem:[#allocation64_spill] sm:$0xff] }
 0x42a   :  { %v16980_v46 = vpop.f32.mrf.mxu1  ;;  %13224 = vmatprep.mubr.bf16.mxu1 %v11963_v7  ;;  %v10298_v54 = vor.u32 %v10297_v47, %v10293_v13  ;;  %v10325_v37 = vshll.u32 %v9749_v38, 16  ;;  %v16984_v62 = vadd.f32 %v16834_v17, %v18415_v56  ;;  %v10308_v1 = vrot.slane %v10306_v5, 4  ;;  %v18420_v4 = vld [vmem:[#allocation72_spill] sm:$0xff]  ;;  %v18421_v7 = vld [vmem:[#allocation79_spill] sm:$0xff]  ;;  %v9750_v17 = vld [vmem:[#allocation2 + $0x1b4] sm:$0xf] }
 0x42b   :  { %v10289_v0 = vrot.slane %v10288_v27, 4  ;;  %v10311_v61 = vrot.slane %v10309_v50, 5  ;;  %v10317_v41 = vrot.slane %v10315_v18, 5  ;;  %v16992_v33 = vadd.f32 %v18419_v25, %v18418_v11  ;;  %v18422_v56 = vld [vmem:[#allocation139_spill] sm:$0xff]  ;;  %v18424_v18 = vld [vmem:[#allocation164_spill] sm:$0xff] }
 0x42c   :  { %18416 = vst [vmem:[#allocation27_spill] sm:$0xff] %v16984_v62  ;;  %v16988_v39 = vpop.f32.mrf.mxu1  ;;  %v16996_v35 = vadd.f32 %v18421_v7, %v18420_v4  ;;  %v10299_v38 = vrot.slane %v10298_v54, 4  ;;  %v10321_v47 = vrot.slane %v10319_v57, 4  ;;  %v16999_v62 = vadd.f32 %v18422_v56, %v4311_v43  ;;  %v18423_v27 = vld [vmem:[#allocation147_spill] sm:$0xff]  ;;  %v9751_v11 = vld [vmem:[#allocation2 + $0x1b8] sm:$0xf]  ;;  %v17014_v56 = vpop.f32.mrf.mxu0 }
 0x42d   :  { %v17002_v5 = vadd.f32 %v18423_v27, %v4315_v29  ;;  %v10312_v50 = vor.u32 %v10311_v61, %v10308_v1  ;;  %v17006_v45 = vadd.f32 %v16844_v34, %v18424_v18  ;;  %v10294_v4 = vsel %vm14360_vm5, %v10289_v0, %v10293_v13  ;;  %v9752_v7 = vld [vmem:[#allocation2 + $0x1bc] sm:$0x1]  ;;  %18426 = vst [vmem:[#allocation115_spill] sm:$0xff] %v17014_v56  ;;  %v18427_v61 = vld [vmem:[#allocation53_spill] sm:$0xff]  ;;  %v9753_v13 = vld [vmem:[#allocation2 + $0x1c4] sm:$0xf] }
 0x42e   :  { %v17008_v25 = vpop.f32.mrf.mxu1  ;;  %v10304_v54 = vsel %vm14360_vm5, %v10299_v38, %v10303_v44  ;;  %v10322_v57 = vor.u32 %v10321_v47, %v10317_v41  ;;  %v10327_v43 = vrot.slane %v10325_v37, 5  ;;  %v17018_v34 = vadd.f32 %v16856_v23, %v18427_v61  ;;  %v18429_v44 = vld [vmem:[#allocation150_spill] sm:$0xff] }
 0x42f   :  { %18425 = vst [vmem:[#allocation31_spill] sm:$0xff] %v17006_v45  ;;  %v11964_v29 = vcombine.low %v10294_v4, %v10304_v54  ;;  %v10313_v1 = vrot.slane %v10312_v50, 4  ;;  %v10330_v27 = vshrl.u32 %v9750_v17, 16  ;;  %v10333_v45 = vshll.u32 %v9750_v17, 16  ;;  %v9754_v4 = vld [vmem:[#allocation2 + $0x1c8] sm:$0xf] }
 0x430   :  { %18428 = vst [vmem:[#allocation4_spill] sm:$0xff] %v17018_v34  ;;  %v10323_v18 = vrot.slane %v10322_v57, 4  ;;  %v10339_v53 = vshll.u32 %v9751_v11, 16  ;;  %v10343_v19 = vshrl.u32 %v9751_v11, 16  ;;  %v4319_v37 = vadd.f32 %v18429_v44, %v16906_v8  ;;  %v9755_v11 = vld [vmem:[#allocation2 + $0x1cc] sm:$0x1]  ;;  %v17030_v34 = vpop.f32.mrf.mxu0 }
 0x431   :  { %13225 = vmatmul.mubr.bf16.gmra.mxu1 %v11964_v29  ;;  %v10318_v38 = vsel %vm14360_vm5, %v10313_v1, %v10317_v41  ;;  %v10332_v47 = vrot.slane %v10330_v27, 4  ;;  %v10349_v50 = vshll.u32 %v9752_v7, 16  ;;  %v10335_v54 = vrot.slane %v10333_v45, 5  ;;  %18430 = vst [vmem:[#allocation128_spill] sm:$0xff] %v17030_v34 }
 0x432   :  { %v17020_v0 = vpop.f32.mrf.mxu1  ;;  %v10328_v23 = vsel %vm14360_vm5, %v10323_v18, %v10327_v43  ;;  %v10341_v17 = vrot.slane %v10339_v53, 5  ;;  %v10345_v57 = vrot.slane %v10343_v19, 4  ;;  %v10354_v29 = vshrl.u32 %v9753_v13, 16  ;;  %v18431_v19 = vld [vmem:[#allocation165_spill] sm:$0xff] }
 0x433   :  { %v11965_v56 = vcombine.low %v10318_v38, %v10328_v23  ;;  %v10351_v8 = vrot.slane %v10349_v50, 5  ;;  %v10357_v44 = vshll.u32 %v9753_v13, 16  ;;  %v10336_v32 = vor.u32 %v10335_v54, %v10332_v47  ;;  %v18433_v13 = vld [vmem:[#allocation155_spill] sm:$0xff] }
 0x434   :  { %v17028_v61 = vpop.f32.mrf.mxu1  ;;  %v10346_v41 = vor.u32 %v10345_v57, %v10341_v17  ;;  %v10363_v1 = vshll.u32 %v9754_v4, 16  ;;  %v10367_v7 = vshrl.u32 %v9754_v4, 16  ;;  %v10356_v43 = vrot.slane %v10354_v29, 4  ;;  %v18434_v4 = vld [vmem:[#allocation158_spill] sm:$0xff] }
 0x435   :  { %13228 = vmatprep.mubr.bf16.mxu1 %v11965_v56  ;;  %v10359_v45 = vrot.slane %v10357_v44, 5  ;;  %v10373_v53 = vshll.u32 %v9755_v11, 16  ;;  %v17036_v18 = vadd.f32 %v16860_v10, %v18431_v19  ;;  %v10337_v3 = vrot.slane %v10336_v32, 4  ;;  %v17045_v56 = vpop.f32.mrf.mxu0  ;;  %v18436_v11 = vld [vmem:[#allocation26_spill] sm:$0xff]  ;;  %v9756_v10 = vld [vmem:[#allocation2 + $0x1d4] sm:$0xf] }
 0x436   :  { %v17032_v27 = vpop.f32.mrf.mxu1  ;;  %v10347_v34 = vrot.slane %v10346_v41, 4  ;;  %v10365_v38 = vrot.slane %v10363_v1, 5  ;;  %v10369_v50 = vrot.slane %v10367_v7, 4  ;;  %v17041_v47 = vadd.f32 %v18433_v13, %v4319_v37  ;;  %18435 = vst [vmem:[#allocation43_spill] sm:$0xff] %v17045_v56  ;;  %v9757_v1 = vld [vmem:[#allocation2 + $0x1d8] sm:$0xf] }
 0x437   :  { %18432 = vst [vmem:[#allocation46_spill] sm:$0xff] %v17036_v18  ;;  %v4323_v54 = vadd.f32 %v18434_v4, %v16926_v30  ;;  %v10360_v57 = vor.u32 %v10359_v45, %v10356_v43  ;;  %v17049_v29 = vadd.f32 %v16870_v36, %v18436_v11  ;;  %v10342_v32 = vsel %vm14360_vm5, %v10337_v3, %v10341_v17  ;;  %v9758_v7 = vld [vmem:[#allocation2 + $0x1dc] sm:$0x1]  ;;  %v18438_v19 = vld [vmem:[#allocation163_spill] sm:$0xff]  ;;  %v18440_v11 = vld [vmem:[#allocation168_spill] sm:$0xff] }
 0x438   :  { %v17038_v23 = vpop.f32.mrf.mxu1  ;;  %v10352_v44 = vsel %vm14360_vm5, %v10347_v34, %v10351_v8  ;;  %v10370_v41 = vor.u32 %v10369_v50, %v10365_v38  ;;  %v10375_v37 = vrot.slane %v10373_v53, 5  ;;  %v18439_v43 = vld [vmem:[#allocation166_spill] sm:$0xff]  ;;  %v10378_v3 = vshrl.u32 %v9756_v10, 16  ;;  %v9759_v34 = vld [vmem:[#allocation2 + $0x1e4] sm:$0xf]  ;;  %v18442_v53 = vld [vmem:[#allocation129_spill] sm:$0xff] }
 0x439   :  { %18437 = vst [vmem:[#allocation39_spill] sm:$0xff] %v17049_v29  ;;  %v17056_v30 = vadd.f32 %v18438_v19, %v4323_v54  ;;  %v4327_v45 = vadd.f32 %v18439_v43, %v16944_v40  ;;  %v11966_v13 = vcombine.low %v10342_v32, %v10352_v44  ;;  %v10361_v36 = vrot.slane %v10360_v57, 4  ;;  %v17068_v54 = vpop.f32.mrf.mxu0  ;;  %v9760_v57 = vld [vmem:[#allocation2 + $0x1e8] sm:$0xf]  ;;  %v9761_v43 = vld [vmem:[#allocation2 + $0x1ec] sm:$0x1] }
 0x43a   :  { %v10371_v4 = vrot.slane %v10370_v41, 4  ;;  %v17062_v29 = vadd.f32 %v16886_v63, %v18440_v11  ;;  %v10381_v17 = vshll.u32 %v9756_v10, 16  ;;  %v6267_v50 = vadd.f32 %v18442_v53, %v16999_v62  ;;  %18443 = vst [vmem:[#allocation143_spill] sm:$0xff] %v17068_v54 }
 0x43b   :  { %v17064_v8 = vpop.f32.mrf.mxu1  ;;  %13229 = vmatmul.mubr.bf16.gmra.mxu1 %v11966_v13  ;;  %v10387_v19 = vshll.u32 %v9757_v1, 16  ;;  %v10391_v40 = vshrl.u32 %v9757_v1, 16  ;;  %v10397_v32 = vshll.u32 %v9758_v7, 16  ;;  %v10366_v44 = vsel %vm14360_vm5, %v10361_v36, %v10365_v38  ;;  %v17078_v31 = vpop.f32.mrf.mxu0 }
 0x43c   :  { %18441 = vst [vmem:[#allocation136_spill] sm:$0xff] %v17062_v29  ;;  %v10376_v63 = vsel %vm14360_vm5, %v10371_v4, %v10375_v37  ;;  %v10380_v10 = vrot.slane %v10378_v3, 4  ;;  %v10383_v41 = vrot.slane %v10381_v17, 5  ;;  %v10402_v54 = vshrl.u32 %v9759_v34, 16  ;;  %18444 = vst [vmem:[#allocation45_spill] sm:$0xff] %v17078_v31  ;;  %v18445_v4 = vld [vmem:[#allocation54_spill] sm:$0xff] }
 0x43d   :  { %v17074_v11 = vpop.f32.mrf.mxu1  ;;  %v11967_v29 = vcombine.low %v10366_v44, %v10376_v63  ;;  %v10389_v62 = vrot.slane %v10387_v19, 5  ;;  %v10393_v53 = vrot.slane %v10391_v40, 4  ;;  %v10399_v18 = vrot.slane %v10397_v32, 5 }
 0x43e   :  { %v10384_v13 = vor.u32 %v10383_v41, %v10380_v10  ;;  %v10405_v1 = vshll.u32 %v9759_v34, 16  ;;  %v10411_v7 = vshll.u32 %v9760_v57, 16  ;;  %v10415_v37 = vshrl.u32 %v9760_v57, 16  ;;  %v18447_v34 = vld [vmem:[#allocation171_spill] sm:$0xff]  ;;  %v18448_v10 = vld [vmem:[#allocation144_spill] sm:$0xff]  ;;  %v18449_v57 = vld [vmem:[#allocation174_spill] sm:$0xff] }
 0x43f   :  { %v17076_v56 = vpop.f32.mrf.mxu1  ;;  %13232 = vmatprep.mubr.bf16.mxu1 %v11967_v29  ;;  %v10394_v38 = vor.u32 %v10393_v53, %v10389_v62  ;;  %v10421_v36 = vshll.u32 %v9761_v43, 16  ;;  %v17082_v3 = vadd.f32 %v16892_v55, %v18445_v4  ;;  %v10404_v19 = vrot.slane %v10402_v54, 4  ;;  %v9762_v53 = vld [vmem:[#allocation2 + $0x1f4] sm:$0xf] }
 0x440   :  { %v10385_v17 = vrot.slane %v10384_v13, 4  ;;  %v10407_v40 = vrot.slane %v10405_v1, 5  ;;  %v10413_v32 = vrot.slane %v10411_v7, 5  ;;  %v17087_v63 = vadd.f32 %v18447_v34, %v4327_v45  ;;  %v9763_v13 = vld [vmem:[#allocation2 + $0x1f8] sm:$0xf]  ;;  %v17096_v1 = vpop.f32.mrf.mxu0 }
 0x441   :  { %18446 = vst [vmem:[#allocation52_spill] sm:$0xff] %v17082_v3  ;;  %v17084_v44 = vpop.f32.mrf.mxu1  ;;  %v7677_v41 = vadd.f32 %v18448_v10, %v6267_v50  ;;  %v10395_v31 = vrot.slane %v10394_v38, 4  ;;  %v10417_v29 = vrot.slane %v10415_v37, 4  ;;  %v4331_v43 = vadd.f32 %v18449_v57, %v16948_v6  ;;  %v9764_v6 = vld [vmem:[#allocation2 + $0x1fc] sm:$0x1] }
 0x442   :  { %v10408_v26 = vor.u32 %v10407_v40, %v10404_v19  ;;  %v10423_v55 = vrot.slane %v10421_v36, 5  ;;  %v17094_v54 = vadd.f32 %v16912_v21, %v16437_v42  ;;  %v10390_v45 = vsel %vm14360_vm5, %v10385_v17, %v10389_v62  ;;  %v18452_v42 = vld [vmem:[#allocation69_spill] sm:$0xff]  ;;  %v9765_v10 = vld [vmem:[#allocation2 + $0x204] sm:$0xf]  ;;  %v9766_v57 = vld [vmem:[#allocation2 + $0x208] sm:$0xf] }
 0x443   :  { %v10400_v50 = vsel %vm14360_vm5, %v10395_v31, %v10399_v18  ;;  %v10418_v7 = vor.u32 %v10417_v29, %v10413_v32  ;;  %v17103_v38 = vadd.f32 %v16922_v15, %v7677_v41  ;;  %v17109_v21 = vadd.f32 %v16932_v28, %v18452_v42  ;;  %v18454_v15 = vld [vmem:[#allocation137_spill] sm:$0xff]  ;;  %v17117_v28 = vpop.f32.mrf.mxu0 }
 0x444   :  { %18450 = vst [vmem:[#allocation50_spill] sm:$0xff] %v17094_v54  ;;  %v11968_v36 = vcombine.low %v10390_v45, %v10400_v50  ;;  %v10409_v4 = vrot.slane %v10408_v26, 4  ;;  %v10426_v19 = vshrl.u32 %v9762_v53, 16  ;;  %v10429_v34 = vshll.u32 %v9762_v53, 16  ;;  %18455 = vst [vmem:[#allocation47_spill] sm:$0xff] %v17117_v28 }
 0x445   :  { %18451 = vst [vmem:[#allocation157_spill] sm:$0xff] %v17103_v38  ;;  %v17105_v37 = vpop.f32.mrf.mxu1  ;;  %18453 = vst [vmem:[#allocation59_spill] sm:$0xff] %v17109_v21  ;;  %v10419_v40 = vrot.slane %v10418_v7, 4  ;;  %v10435_v62 = vshll.u32 %v9763_v13, 16  ;;  %v10439_v17 = vshrl.u32 %v9763_v13, 16  ;;  %v6271_v18 = vadd.f32 %v18454_v15, %v17002_v5 }
 0x446   :  { %13233 = vmatmul.mubr.bf16.gmra.mxu1 %v11968_v36  ;;  %v10414_v41 = vsel %vm14360_vm5, %v10409_v4, %v10413_v32  ;;  %v10428_v26 = vrot.slane %v10426_v19, 4  ;;  %v10445_v29 = vshll.u32 %v9764_v6, 16  ;;  %v10431_v45 = vrot.slane %v10429_v34, 5  ;;  %v9767_v7 = vld [vmem:[#allocation2 + $0x20c] sm:$0x1] }
 0x447   :  { %v17111_v31 = vpop.f32.mrf.mxu1  ;;  %v10424_v53 = vsel %vm14360_vm5, %v10419_v40, %v10423_v55  ;;  %v10437_v13 = vrot.slane %v10435_v62, 5  ;;  %v10441_v50 = vrot.slane %v10439_v17, 4  ;;  %v10450_v36 = vshrl.u32 %v9765_v10, 16  ;;  %v18456_v40 = vld [vmem:[#allocation23_spill] sm:$0xff]  ;;  %v17129_v62 = vpop.f32.mrf.mxu0 }
 0x448   :  { %v11969_v21 = vcombine.low %v10414_v41, %v10424_v53  ;;  %v10447_v5 = vrot.slane %v10445_v29, 5  ;;  %v10453_v15 = vshll.u32 %v9765_v10, 16  ;;  %v10432_v38 = vor.u32 %v10431_v45, %v10428_v26  ;;  %18458 = vst [vmem:[#allocation61_spill] sm:$0xff] %v17129_v62  ;;  %v18459_v26 = vld [vmem:[#allocation18_spill] sm:$0xff]  ;;  %v9774_v62 = vld [vmem:[#allocation2 + $0x234] sm:$0xf] }
 0x449   :  { %v17121_v42 = vpop.f32.mrf.mxu1  ;;  %v10442_v32 = vor.u32 %v10441_v50, %v10437_v13  ;;  %v10459_v4 = vshll.u32 %v9766_v57, 16  ;;  %v10463_v6 = vshrl.u32 %v9766_v57, 16  ;;  %v10452_v54 = vrot.slane %v10450_v36, 4  ;;  %v18460_v57 = vld [vmem:[#allocation152_spill] sm:$0xff] }
 0x44a   :  { %13236 = vmatprep.mubr.bf16.mxu1 %v11969_v21  ;;  %v10455_v3 = vrot.slane %v10453_v15, 5  ;;  %v10469_v55 = vshll.u32 %v9767_v7, 16  ;;  %v17127_v34 = vadd.f32 %v16934_v16, %v18456_v40  ;;  %v10433_v17 = vrot.slane %v10432_v38, 4  ;;  %v18461_v21 = vld [vmem:[#allocation170_spill] sm:$0xff]  ;;  %v9768_v7 = vld [vmem:[#allocation2 + $0x214] sm:$0xf] }
 0x44b   :  { %v17123_v19 = vpop.f32.mrf.mxu1  ;;  %v10443_v41 = vrot.slane %v10442_v32, 4  ;;  %v10461_v29 = vrot.slane %v10459_v4, 5  ;;  %v10465_v10 = vrot.slane %v10463_v6, 4  ;;  %v17132_v53 = vadd.f32 %v18459_v26, %v4331_v43  ;;  %v9769_v4 = vld [vmem:[#allocation2 + $0x218] sm:$0xf]  ;;  %v17150_v26 = vpop.f32.mrf.mxu0 }
 0x44c   :  { %18457 = vst [vmem:[#allocation57_spill] sm:$0xff] %v17127_v34  ;;  %v7681_v45 = vadd.f32 %v18460_v57, %v6271_v18  ;;  %v10456_v50 = vor.u32 %v10455_v3, %v10452_v54  ;;  %v17137_v36 = vadd.f32 %v16940_v59, %v18461_v21  ;;  %v10438_v16 = vsel %vm14360_vm5, %v10433_v17, %v10437_v13  ;;  %v9770_v6 = vld [vmem:[#allocation2 + $0x21c] sm:$0x1]  ;;  %v18463_v18 = vld [vmem:[#allocation15_spill] sm:$0xff]  ;;  %v18468_v21 = vld [vmem:[#allocation145_spill] sm:$0xff] }
 0x44d   :  { %v10448_v38 = vsel %vm14360_vm5, %v10443_v41, %v10447_v5  ;;  %v10466_v15 = vor.u32 %v10465_v10, %v10461_v29  ;;  %v10471_v32 = vrot.slane %v10469_v55, 5  ;;  %v4335_v3 = vadd.f32 %v18463_v18, %v16962_v9  ;;  %18465 = vst [vmem:[#allocation67_spill] sm:$0xff] %v17150_v26  ;;  %v18466_v17 = vld [vmem:[#allocation66_spill] sm:$0xff]  ;;  %v9771_v10 = vld [vmem:[#allocation2 + $0x224] sm:$0xf] }
 0x44e   :  { %18462 = vst [vmem:[#allocation167_spill] sm:$0xff] %v17137_v36  ;;  %v17143_v43 = vpop.f32.mrf.mxu1  ;;  %v11970_v54 = vcombine.low %v10438_v16, %v10448_v38  ;;  %v10457_v40 = vrot.slane %v10456_v50, 4  ;;  %v17148_v59 = vadd.f32 %v16958_v12, %v7681_v45  ;;  %v17154_v5 = vadd.f32 %v16978_v48, %v18466_v17  ;;  %v9772_v45 = vld [vmem:[#allocation2 + $0x228] sm:$0xf] }
 0x44f   :  { %v10467_v13 = vrot.slane %v10466_v15, 4  ;;  %v10474_v55 = vshrl.u32 %v9768_v7, 16  ;;  %v10477_v41 = vshll.u32 %v9768_v7, 16  ;;  %v6275_v9 = vadd.f32 %v18468_v21, %v17041_v47  ;;  %v9773_v7 = vld [vmem:[#allocation2 + $0x22c] sm:$0x1] }
 0x450   :  { %18464 = vst [vmem:[#allocation60_spill] sm:$0xff] %v17148_v59  ;;  %18467 = vst [vmem:[#allocation122_spill] sm:$0xff] %v17154_v5  ;;  %v17156_v57 = vpop.f32.mrf.mxu1  ;;  %13237 = vmatmul.mubr.bf16.gmra.mxu1 %v11970_v54  ;;  %v10483_v50 = vshll.u32 %v9769_v4, 16  ;;  %v10487_v16 = vshrl.u32 %v9769_v4, 16  ;;  %v10493_v12 = vshll.u32 %v9770_v6, 16  ;;  %v10462_v38 = vsel %vm14360_vm5, %v10457_v40, %v10461_v29  ;;  %v17166_v54 = vpop.f32.mrf.mxu0 }
 0x451   :  { %v10472_v48 = vsel %vm14360_vm5, %v10467_v13, %v10471_v32  ;;  %v10476_v15 = vrot.slane %v10474_v55, 4  ;;  %v10479_v18 = vrot.slane %v10477_v41, 5  ;;  %18469 = vst [vmem:[#allocation124_spill] sm:$0xff] %v17166_v54  ;;  %v10498_v6 = vshrl.u32 %v9771_v10, 16  ;;  %v18470_v13 = vld [vmem:[#allocation68_spill] sm:$0xff] }
 0x452   :  { %v17164_v17 = vpop.f32.mrf.mxu1  ;;  %v11971_v5 = vcombine.low %v10462_v38, %v10472_v48  ;;  %v10485_v59 = vrot.slane %v10483_v50, 5  ;;  %v10489_v36 = vrot.slane %v10487_v16, 4  ;;  %v10495_v47 = vrot.slane %v10493_v12, 5  ;;  %v18471_v38 = vld [vmem:[#allocation30_spill] sm:$0xff] }
 0x453   :  { %v10480_v4 = vor.u32 %v10479_v18, %v10476_v15  ;;  %v10501_v21 = vshll.u32 %v9771_v10, 16  ;;  %v10507_v34 = vshll.u32 %v9772_v45, 16  ;;  %v10511_v32 = vshrl.u32 %v9772_v45, 16  ;;  %v18472_v15 = vld [vmem:[#allocation159_spill] sm:$0xff]  ;;  %v17180_v45 = vpop.f32.mrf.mxu0 }
 0x454   :  { %v17168_v26 = vpop.f32.mrf.mxu1  ;;  %13240 = vmatprep.mubr.bf16.mxu1 %v11971_v5  ;;  %v10490_v29 = vor.u32 %v10489_v36, %v10485_v59  ;;  %v10517_v40 = vshll.u32 %v9773_v7, 16  ;;  %v17172_v55 = vadd.f32 %v16980_v46, %v18470_v13  ;;  %v10500_v50 = vrot.slane %v10498_v6, 4  ;;  %v18473_v36 = vld [vmem:[#allocation35_spill] sm:$0xff] }
 0x455   :  { %v10481_v41 = vrot.slane %v10480_v4, 4  ;;  %v10503_v16 = vrot.slane %v10501_v21, 5  ;;  %v10509_v12 = vrot.slane %v10507_v34, 5  ;;  %v5681_v48 = vadd.f32 %v18471_v38, %v4335_v3  ;;  %v9775_v34 = vld [vmem:[#allocation2 + $0x238] sm:$0xf] }
 0x456   :  { %v7685_v18 = vadd.f32 %v18472_v15, %v6275_v9  ;;  %v10491_v10 = vrot.slane %v10490_v29, 4  ;;  %v10513_v54 = vrot.slane %v10511_v32, 4  ;;  %v4339_v5 = vadd.f32 %v18473_v36, %v16992_v33  ;;  %v9776_v33 = vld [vmem:[#allocation2 + $0x23c] sm:$0x1] }
 0x457   :  { %v10504_v46 = vor.u32 %v10503_v16, %v10500_v50  ;;  %v10519_v7 = vrot.slane %v10517_v40, 5  ;;  %v17184_v4 = vadd.f32 %v16988_v39, %v16561_v51  ;;  %v10486_v3 = vsel %vm14360_vm5, %v10481_v41, %v10485_v59 }
 0x458   :  { %v17176_v28 = vpop.f32.mrf.mxu1  ;;  %v10496_v9 = vsel %vm14360_vm5, %v10491_v10, %v10495_v47  ;;  %v10514_v6 = vor.u32 %v10513_v54, %v10509_v12  ;;  %v17191_v21 = vadd.f32 %v17008_v25, %v7685_v18  ;;  %v17197_v51 = vadd.f32 %v17020_v0, %v16572_v58  ;;  %v18474_v47 = vld [vmem:[#allocation153_spill] sm:$0xff]  ;;  %v17201_v25 = vpop.f32.mrf.mxu0 }
 0x459   :  { %v11972_v32 = vcombine.low %v10486_v3, %v10496_v9  ;;  %v10505_v40 = vrot.slane %v10504_v46, 4  ;;  %v10522_v39 = vshrl.u32 %v9774_v62, 16  ;;  %v10525_v50 = vshll.u32 %v9774_v62, 16  ;;  %v18475_v46 = vld [vmem:[#allocation77_spill] sm:$0xff] }
 0x45a   :  { %v17193_v29 = vpop.f32.mrf.mxu1  ;;  %v10515_v13 = vrot.slane %v10514_v6, 4  ;;  %v10531_v59 = vshll.u32 %v9775_v34, 16  ;;  %v10535_v41 = vshrl.u32 %v9775_v34, 16  ;;  %v6279_v54 = vadd.f32 %v18474_v47, %v17056_v30  ;;  %v18476_v3 = vld [vmem:[#allocation161_spill] sm:$0xff] }
 0x45b   :  { %13241 = vmatmul.mubr.bf16.gmra.mxu1 %v11972_v32  ;;  %v10510_v38 = vsel %vm14360_vm5, %v10505_v40, %v10509_v12  ;;  %v10524_v15 = vrot.slane %v10522_v39, 4  ;;  %v10541_v18 = vshll.u32 %v9776_v33, 16  ;;  %v10527_v0 = vrot.slane %v10525_v50, 5  ;;  %v18477_v40 = vld [vmem:[#allocation62_spill] sm:$0xff] }
 0x45c   :  { %v13071_v16 = vpop.f32.mrf.mxu1  ;;  %v10520_v58 = vsel %vm14360_vm5, %v10515_v13, %v10519_v7  ;;  %v10533_v10 = vrot.slane %v10531_v59, 5  ;;  %v10537_v62 = vrot.slane %v10535_v41, 4  ;;  %v7689_v34 = vadd.f32 %v18475_v46, %v6279_v54  ;;  %v18478_v13 = vld [vmem:[#allocation81_spill] sm:$0xff]  ;;  %v17221_v59 = vpop.f32.mrf.mxu0 }
 0x45d   :  { %v6283_v30 = vadd.f32 %v18476_v3, %v17087_v63  ;;  %v11973_v9 = vcombine.low %v10510_v38, %v10520_v58  ;;  %v17212_v6 = vadd.f32 %v17028_v61, %v16581_v2  ;;  %v10528_v12 = vor.u32 %v10527_v0, %v10524_v15  ;;  %v18479_v61 = vld [vmem:[#allocation51_spill] sm:$0xff] }
 0x45e   :  { %v8931_v36 = vpop.f32.mrf.mxu1  ;;  %v10538_v32 = vor.u32 %v10537_v62, %v10533_v10  ;;  %v10543_v33 = vrot.slane %v10541_v18, 5  ;;  %v17216_v7 = vadd.f32 %v17032_v27, %v16598_v14  ;;  %v6287_v50 = vadd.f32 %v18478_v13, %v17132_v53  ;;  %v18480_v27 = vld [vmem:[#allocation173_spill] sm:$0xff]  ;;  %v18481_v53 = vld [vmem:[#allocation58_spill] sm:$0xff]  ;;  %v18484_v62 = vld [vmem:[#allocation76_spill] sm:$0xff] }
 0x45f   :  { %v7693_v39 = vadd.f32 %v18477_v40, %v6283_v30  ;;  %13244 = vmatprep.mubr.bf16.mxu1 %v11973_v9  ;;  %v17224_v63 = vadd.f32 %v17038_v23, %v7689_v34  ;;  %v17228_v2 = vadd.f32 %v17064_v8, %v16615_v20  ;;  %v5685_v41 = vadd.f32 %v18479_v61, %v4339_v5  ;;  %v18482_v18 = vld [vmem:[#allocation34_spill] sm:$0xff]  ;;  %v18483_v8 = vld [vmem:[#allocation65_spill] sm:$0xff]  ;;  %v18489_v40 = vld [vmem:[#allocation80_spill] sm:$0xff] }
 0x460   :  { %v10529_v47 = vrot.slane %v10528_v12, 4  ;;  %v10539_v14 = vrot.slane %v10538_v32, 4  ;;  %v17233_v54 = vadd.f32 %v17074_v11, %v18480_v27  ;;  %v4343_v15 = vadd.f32 %v18481_v53, %v16996_v35  ;;  %v18485_v34 = vld [vmem:[#allocation73_spill] sm:$0xff]  ;;  %v18493_v61 = vld [vmem:[#allocation172_spill] sm:$0xff] }
 0x461   :  { %v13074_v38 = vpop.f32.mrf.mxu1  ;;  %v7697_v58 = vadd.f32 %v18482_v18, %v6287_v50  ;;  %v17240_v23 = vadd.f32 %v17076_v56, %v16645_v24  ;;  %v17243_v20 = vadd.f32 %v17084_v44, %v7693_v39  ;;  %v6291_v5 = vadd.f32 %v18483_v8, %v5681_v48  ;;  %v17255_v24 = vpop.f32.mrf.mxu0  ;;  %v18486_v44 = vld [vmem:[#allocation105_spill] sm:$0xff]  ;;  %v18490_v39 = vld [vmem:[#allocation87_spill] sm:$0xff] }
 0x462   :  { %v10534_v0 = vsel %vm14360_vm5, %v10529_v47, %v10533_v10  ;;  %v10544_v11 = vsel %vm14360_vm5, %v10539_v14, %v10543_v33  ;;  %v17252_v35 = vadd.f32 %v17105_v37, %v18484_v62  ;;  %v5689_v3 = vadd.f32 %v18485_v34, %v4343_v15  ;;  %v18488_v9 = vld [vmem:[#allocation169_spill] sm:$0xff]  ;;  %v18497_v15 = vld [vmem:[#allocation70_spill] sm:$0xff] }
 0x463   :  { %v8944_v46 = vpop.f32.mrf.mxu1  ;;  %v11974_v56 = vcombine.low %v10534_v0, %v10544_v11  ;;  %v17259_v30 = vadd.f32 %v17111_v31, %v18486_v44  ;;  %v17263_v48 = vadd.f32 %v17121_v42, %v16682_v22  ;;  %v7701_v10 = vadd.f32 %v18487_v52, %v6291_v5  ;;  %v18491_v42 = vld [vmem:[#allocation83_spill] sm:$0xff]  ;;  %v18492_v50 = vld [vmem:[#allocation29_spill] sm:$0xff]  ;;  %v17293_v27 = vpop.f32.mrf.mxu0  ;;  %v18504_v62 = vld [vmem:[#allocation86_spill] sm:$0xff] }
 0x464   :  { %v6295_v12 = vadd.f32 %v18488_v9, %v5685_v41  ;;  %v17268_v37 = vadd.f32 %v17123_v19, %v7697_v58  ;;  %v17272_v32 = vadd.f32 %v17143_v43, %v16699_v49  ;;  %v2902_v31 = vadd.f32 %v18490_v39, %v18489_v40  ;;  %v18494_v43 = vld [vmem:[#allocation107_spill] sm:$0xff]  ;;  %v18500_v5 = vld [vmem:[#allocation89_spill] sm:$0xff]  ;;  %v18510_v9 = vld [vmem:[#allocation74_spill] sm:$0xff] }
 0x465   :  { %v13075_v33 = vpop.f32.mrf.mxu1  ;;  %13245 = vmatmul.mubr.bf16.gmra.mxu1 %v11974_v56  ;;  %v17278_v22 = vadd.f32 %v17156_v57, %v16708_v60  ;;  %v17282_v13 = vadd.f32 %v17164_v17, %v18491_v42  ;;  %v6299_v41 = vadd.f32 %v18493_v61, %v5689_v3  ;;  %v17287_v49 = vadd.f32 %v17168_v26, %v7701_v10  ;;  %v18495_v60 = vld [vmem:[#allocation82_spill] sm:$0xff]  ;;  %v18498_v58 = vld [vmem:[#allocation175_spill] sm:$0xff]  ;;  %v17321_v10 = vpop.f32.mrf.mxu0  ;;  %v18513_v39 = vld [vmem:[#allocation116_spill] sm:$0xff] }
 0x466   :  { %v7705_v19 = vadd.f32 %v18492_v50, %v6295_v12  ;;  %v17291_v47 = vadd.f32 %v17176_v28, %v18494_v43  ;;  %v17297_v57 = vadd.f32 %v17193_v29, %v18495_v60  ;;  %v18496_v17 = vld [vmem:[#allocation178_spill] sm:$0xff]  ;;  %v4347_v18 = vadd.f32 %v18497_v15, %v2902_v31  ;;  %v18502_v28 = vld [vmem:[#allocation177_spill] sm:$0xff]  ;;  %v18508_v44 = vld [vmem:[#allocation119_spill] sm:$0xff] }
 0x467   :  { %v8947_v14 = vpop.f32.mrf.mxu1  ;;  %v17300_v53 = vadd.f32 %v13071_v16, %v18496_v17  ;;  %v7709_v8 = vadd.f32 %v18498_v58, %v6299_v41  ;;  %v17307_v0 = vadd.f32 %v13074_v38, %v18500_v5  ;;  %v17310_v11 = vadd.f32 %v8944_v46, %v18502_v28  ;;  %v18506_v3 = vld [vmem:[#allocation78_spill] sm:$0xff]  ;;  %v18511_v12 = vld [vmem:[#allocation93_spill] sm:$0xff]  ;;  %v17331_v50 = vpop.f32.mrf.mxu0  ;;  %v18516_v61 = vld [vmem:[#allocation88_spill] sm:$0xff] }
 0x468   :  { %v17304_v26 = vadd.f32 %v8931_v36, %v7705_v19  ;;  %v17313_v34 = vadd.f32 %v13075_v33, %v18504_v62  ;;  %v5693_v56 = vadd.f32 %v18506_v3, %v4347_v18  ;;  %v18514_v31 = vld [vmem:[#allocation14_spill] sm:$0xff]  ;;  %v18517_v41 = vld [vmem:[#allocation95_spill] sm:$0xff]  ;;  %v18519_v60 = vld [vmem:[#allocation85_spill] sm:$0xff] }
 0x469   :  { %18501 = vst [vmem:[#allocation130_spill] sm:$0xff] %v17307_v0  ;;  %18503 = vst [vmem:[#allocation132_spill] sm:$0xff] %v17310_v11  ;;  %v17316_v16 = vadd.f32 %v8947_v14, %v7709_v8  ;;  %v2918_v43 = vadd.f32 %v18517_v41, %v18516_v61  ;;  %v17338_v15 = vpop.f32.mrf.mxu0  ;;  %v18520_v58 = vld [vmem:[#allocation91_spill] sm:$0xff]  ;;  %v18521_v5 = vld [vmem:[#allocation97_spill] sm:$0xff] }
 0x46a   :  { %18499 = vst [vmem:[#allocation123_spill] sm:$0xff] %v17304_v26  ;;  %18505 = vst [vmem:[#allocation133_spill] sm:$0xff] %v17313_v34  ;;  %v6303_v38 = vadd.f32 %v18510_v9, %v5693_v56  ;;  %v18524_v56 = vld [vmem:[#allocation20_spill] sm:$0xff]  ;;  %v18586_v26 = vld [vmem:[#allocation131_spill] sm:$0xff] }
 0x46b   :  { %v13078_v29 = vpop.f32.mrf.mxu1  ;;  %18507 = vst [vmem:[#allocation138_spill] sm:$0xff] %v17316_v16  ;;  %v4351_v17 = vadd.f32 %v18519_v60, %v2918_v43  ;;  %v18532_v43 = vld [vmem:[#allocation90_spill] sm:$0xff]  ;;  %v18559_v16 = vld [vmem:[#allocation43_spill] sm:$0xff] }
 0x46c   :  { %v17319_v52 = vadd.f32 %v13078_v29, %v18508_v44  ;;  %v7713_v33 = vadd.f32 %v18513_v39, %v6303_v38  ;;  %v18523_v29 = vld [vmem:[#allocation176_spill] sm:$0xff]  ;;  %v18526_v38 = vld [vmem:[#allocation98_spill] sm:$0xff] }
 0x46d   :  { %v8960_v36 = vpop.f32.mrf.mxu1  ;;  %v5697_v8 = vadd.f32 %v18520_v58, %v4351_v17  ;;  %v18533_v58 = vld [vmem:[#allocation99_spill] sm:$0xff] }
 0x46e   :  { %18509 = vst [vmem:[#allocation140_spill] sm:$0xff] %v17319_v52  ;;  %v17325_v40 = vadd.f32 %v8960_v36, %v18511_v12  ;;  %v17348_v36 = vpop.f32.mrf.mxu0  ;;  %v18558_v52 = vld [vmem:[#allocation111_spill] sm:$0xff] }
 0x46f   :  { %v13079_v46 = vpop.f32.mrf.mxu1  ;;  %v6307_v3 = vadd.f32 %v18523_v29, %v5697_v8 }
 0x470   :  { %18512 = vst [vmem:[#allocation141_spill] sm:$0xff] %v17325_v40  ;;  %v17329_v42 = vadd.f32 %v13079_v46, %v18514_v31  ;;  %v18527_v46 = vld [vmem:[#allocation19_spill] sm:$0xff]  ;;  %v18530_v31 = vld [vmem:[#allocation102_spill] sm:$0xff]  ;;  %v17359_v17 = vpop.f32.mrf.mxu0 }
 0x471   :  { %v8963_v19 = vpop.f32.mrf.mxu1  ;;  %v7717_v12 = vadd.f32 %v18526_v38, %v6307_v3  ;;  %v18536_v3 = vld [vmem:[#allocation36_spill] sm:$0xff]  ;;  %v18537_v38 = vld [vmem:[#allocation101_spill] sm:$0xff] }
 0x472   :  { %18515 = vst [vmem:[#allocation146_spill] sm:$0xff] %v17329_v42  ;;  %v17335_v14 = vadd.f32 %v8963_v19, %v7713_v33  ;;  %v18529_v33 = vld [vmem:[#allocation96_spill] sm:$0xff] }
 0x473   :  { %v2934_v19 = vadd.f32 %v18530_v31, %v18529_v33  ;;  %v18539_v33 = vld [vmem:[#allocation5_spill] sm:$0xff]  ;;  %v18540_v31 = vld [vmem:[#allocation6_spill] sm:$0xff] }
 0x474   :  { %18518 = vst [vmem:[#allocation148_spill] sm:$0xff] %v17335_v14  ;;  %v13082_v18 = vpop.f32.mrf.mxu1 }
 0x475   :  { %v17342_v28 = vadd.f32 %v13082_v18, %v18521_v5  ;;  %v4355_v60 = vadd.f32 %v18532_v43, %v2934_v19  ;;  %v18534_v5 = vld [vmem:[#allocation92_spill] sm:$0xff]  ;;  %v2694_v19 = vadd.f32 %v18540_v31, %v18539_v33 }
 0x476   :  { %v8976_v62 = vpop.f32.mrf.mxu1 }
 0x477   :  { %18522 = vst [vmem:[#allocation13_spill] sm:$0xff] %v17342_v28  ;;  %v17346_v44 = vadd.f32 %v8976_v62, %v18524_v56  ;;  %v5701_v8 = vadd.f32 %v18533_v58, %v4355_v60 }
 0x478   :  { %v13083_v9 = vpop.f32.mrf.mxu1 }
 0x479   :  { %18525 = vst [vmem:[#allocation16_spill] sm:$0xff] %v17346_v44  ;;  %v17352_v39 = vadd.f32 %v13083_v9, %v18527_v46  ;;  %v6311_v56 = vadd.f32 %v18536_v3, %v5701_v8  ;;  %v17366_v9 = vpop.f32.mrf.mxu0  ;;  %v18546_v3 = vld [vmem:[#allocation110_spill] sm:$0xff]  ;;  %v18549_v44 = vld [vmem:[#allocation113_spill] sm:$0xff] }
 0x47a   :  { %v8979_v61 = vpop.f32.mrf.mxu1 }
 0x47b   :  { %18528 = vst [vmem:[#allocation17_spill] sm:$0xff] %v17352_v39  ;;  %v17356_v41 = vadd.f32 %v8979_v61, %v7717_v12  ;;  %v18541_v61 = vld [vmem:[#allocation44_spill] sm:$0xff] }
 0x47c   :  { %v7721_v43 = vadd.f32 %v18541_v61, %v6311_v56  ;;  %v18552_v61 = vld [vmem:[#allocation115_spill] sm:$0xff] }
 0x47d   :  { %18531 = vst [vmem:[#allocation24_spill] sm:$0xff] %v17356_v41  ;;  %v13086_v18 = vpop.f32.mrf.mxu1  ;;  %v18542_v41 = vld [vmem:[#allocation37_spill] sm:$0xff] }
 0x47e   :  { %v17363_v62 = vadd.f32 %v13086_v18, %v18534_v5  ;;  %v18544_v18 = vld [vmem:[#allocation103_spill] sm:$0xff]  ;;  %v17378_v5 = vpop.f32.mrf.mxu0 }
 0x47f   :  { %v8992_v29 = vpop.f32.mrf.mxu1  ;;  %v4295_v58 = vadd.f32 %v18544_v18, %v2694_v19  ;;  %v18551_v19 = vld [vmem:[#allocation104_spill] sm:$0xff]  ;;  %v18553_v18 = vld [vmem:[#allocation7_spill] sm:$0xff] }
 0x480   :  { %18535 = vst [vmem:[#allocation25_spill] sm:$0xff] %v17363_v62  ;;  %v17369_v46 = vadd.f32 %v8992_v29, %v18537_v38  ;;  %v18547_v29 = vld [vmem:[#allocation94_spill] sm:$0xff]  ;;  %v17386_v33 = vpop.f32.mrf.mxu0 }
 0x481   :  { %v13087_v12 = vpop.f32.mrf.mxu1  ;;  %v5641_v62 = vadd.f32 %v18546_v3, %v4295_v58  ;;  %v18554_v58 = vld [vmem:[#allocation8_spill] sm:$0xff] }
 0x482   :  { %18538 = vst [vmem:[#allocation32_spill] sm:$0xff] %v17369_v46  ;;  %v17375_v39 = vadd.f32 %v13087_v12, %v18542_v41  ;;  %v18548_v46 = vld [vmem:[#allocation22_spill] sm:$0xff]  ;;  %v17391_v41 = vld [vmem:[%s17833_s4] ss:$0 sm:$0xff]  ;;  %v17401_v14 = vpop.f32.mrf.mxu0 }
 0x483   :  { %v8995_v60 = vpop.f32.mrf.mxu1  ;;  %v6251_v38 = vadd.f32 %v18547_v29, %v5641_v62  ;;  %v9619_v28 = vadd.f32 %v18549_v44, %v18548_v46  ;;  %v18550_v12 = vld [vmem:[#allocation106_spill] sm:$0xff]  ;;  %v2710_v62 = vadd.f32 %v18554_v58, %v18553_v18  ;;  %v18555_v29 = vld [vmem:[#allocation84_spill] sm:$0xff]  ;;  %v18560_v58 = vld [vmem:[#allocation117_spill] sm:$0xff] }
 0x484   :  { %18543 = vst [vmem:[#allocation149_spill] sm:$0xff] %v17375_v39  ;;  %v17380_v8 = vadd.f32 %v8995_v60, %v7721_v43  ;;  %v9617_v43 = vadd.f32 %v18552_v61, %v18551_v19  ;;  %v18556_v46 = vld [vmem:[#allocation28_spill] sm:$0xff] }
 0x485   :  { %v7661_v31 = vadd.f32 %v18550_v12, %v6251_v38  ;;  %v4299_v38 = vadd.f32 %v18558_v52, %v2710_v62 }
 0x486   :  { %18545 = vst [vmem:[#allocation151_spill] sm:$0xff] %v17380_v8  ;;  %v18557_v8 = vld [vmem:[#allocation128_spill] sm:$0xff] }
 0x487   :  { %v9008_v44 = vadd.f32 %v18555_v29, %v7661_v31  ;;  %v9620_v39 = vadd.f32 %v18557_v8, %v18556_v46  ;;  %v5645_v31 = vadd.f32 %v18560_v58, %v4299_v38  ;;  %v17408_v29 = vpop.f32.mrf.mxu0  ;;  %v18564_v46 = vld [vmem:[#allocation118_spill] sm:$0xff] }
 0x489   :  { %v13186_v56 = vpop.f32.mrf.mxu1  ;;  %v9618_v19 = vadd.f32 %v18559_v16, %v9008_v44  ;;  %v18562_v16 = vld [vmem:[#allocation108_spill] sm:$0xff] }
 0x48a   :  { %v11029_v60 = vadd.f32 %v13186_v56, %v9619_v28 }
 0x48b   :  { %v10772_v3 = vpop.f32.mrf.mxu1 }
 0x48c   :  { %v11100_v42 = vadd.f32 %v17391_v41, %v11029_v60  ;;  %v11027_v40 = vadd.f32 %v10772_v3, %v9617_v43  ;;  %v18561_v60 = vld [vmem:[#allocation3_spill] sm:$0xff] }
 0x48d   :  { %v13187_v12 = vpop.f32.mrf.mxu1  ;;  %v6255_v62 = vadd.f32 %v18561_v60, %v5645_v31  ;;  %v18567_v31 = vld [vmem:[#allocation38_spill] sm:$0xff] }
 0x48e   :  { %v11164_v28 = vmax.f32 %v11100_v42, 0.0  ;;  %v11098_v56 = vadd.f32 %v17391_v41, %v11027_v40  ;;  %v11030_v61 = vadd.f32 %v13187_v12, %v9620_v39  ;;  %v18563_v42 = vld [vmem:[#allocation143_spill] sm:$0xff]  ;;  %v18565_v12 = vld [vmem:[#allocation21_spill] sm:$0xff] }
 0x48f   :  { %v10775_v18 = vpop.f32.mrf.mxu1  ;;  %v9623_v3 = vadd.f32 %v18563_v42, %v18562_v16  ;;  %v7665_v38 = vadd.f32 %v18564_v46, %v6255_v62  ;;  %v18569_v16 = vld [vmem:[#allocation9_spill] sm:$0xff]  ;;  %v18570_v42 = vld [vmem:[#allocation10_spill] sm:$0xff] }
 0x490   :  { %11228 = vst [vmem:[%s17834_s5 + $0x10] sm:$0xff] %v11164_v28  ;;  %v11162_v8 = vmax.f32 %v11098_v56, 0.0  ;;  %v11101_v43 = vadd.f32 %v17391_v41, %v11030_v61  ;;  %v11028_v52 = vadd.f32 %v10775_v18, %v9618_v19  ;;  %v18566_v28 = vld [vmem:[#allocation45_spill] sm:$0xff]  ;;  %v17424_v61 = vpop.f32.mrf.mxu0  ;;  %v2726_v46 = vadd.f32 %v18570_v42, %v18569_v16 }
 0x491   :  { %v9621_v56 = vadd.f32 %v18566_v28, %v18565_v12 }
 0x492   :  { %11226 = vst [vmem:[%s17834_s5] sm:$0xff] %v11162_v8  ;;  %v11165_v40 = vmax.f32 %v11101_v43, 0.0  ;;  %v11099_v39 = vadd.f32 %v17391_v41, %v11028_v52  ;;  %v9012_v8 = vadd.f32 %v18567_v31, %v7665_v38  ;;  %v18568_v43 = vld [vmem:[#allocation109_spill] sm:$0xff] }
 0x493   :  { %v9624_v52 = vadd.f32 %v17096_v1, %v18568_v43  ;;  %v18572_v1 = vld [vmem:[#allocation120_spill] sm:$0xff] }
 0x494   :  { %v13190_v44 = vpop.f32.mrf.mxu1  ;;  %11229 = vst [vmem:[%s17834_s5 + $0x18] sm:$0xff] %v11165_v40  ;;  %v11163_v19 = vmax.f32 %v11099_v39, 0.0  ;;  %v18571_v40 = vld [vmem:[#allocation47_spill] sm:$0xff]  ;;  %v4303_v31 = vadd.f32 %v18572_v1, %v2726_v46  ;;  %v18575_v46 = vld [vmem:[#allocation112_spill] sm:$0xff] }
 0x495   :  { %v11033_v18 = vadd.f32 %v13190_v44, %v9623_v3  ;;  %v9622_v39 = vadd.f32 %v18571_v40, %v9012_v8  ;;  %v17439_v3 = vpop.f32.mrf.mxu0  ;;  %v18578_v1 = vld [vmem:[#allocation27_spill] sm:$0xff] }
 0x496   :  { %v10788_v58 = vpop.f32.mrf.mxu1  ;;  %11227 = vst [vmem:[%s17834_s5 + $0x8] sm:$0xff] %v11163_v19 }
 0x497   :  { %v11104_v60 = vadd.f32 %v17391_v41, %v11033_v18  ;;  %v11031_v62 = vadd.f32 %v10788_v58, %v9621_v56  ;;  %v18573_v58 = vld [vmem:[#allocation125_spill] sm:$0xff]  ;;  %v17448_v8 = vpop.f32.mrf.mxu0 }
 0x498   :  { %v13191_v12 = vpop.f32.mrf.mxu1  ;;  %v5649_v16 = vadd.f32 %v18573_v58, %v4303_v31  ;;  %v18579_v31 = vld [vmem:[#allocation67_spill] sm:$0xff]  ;;  %v18581_v58 = vld [vmem:[#allocation12_spill] sm:$0xff] }
 0x499   :  { %v11168_v44 = vmax.f32 %v11104_v60, 0.0  ;;  %v11102_v38 = vadd.f32 %v17391_v41, %v11031_v62  ;;  %v11034_v28 = vadd.f32 %v13191_v12, %v9624_v52  ;;  %v18574_v62 = vld [vmem:[#allocation114_spill] sm:$0xff]  ;;  %v18576_v12 = vld [vmem:[#allocation61_spill] sm:$0xff]  ;;  %v17465_v34 = vpop.f32.mrf.mxu0 }
 0x49a   :  { %v10791_v43 = vpop.f32.mrf.mxu1  ;;  %v6259_v42 = vadd.f32 %v18574_v62, %v5649_v16  ;;  %v9627_v40 = vadd.f32 %v18576_v12, %v18575_v46  ;;  %v18582_v62 = vld [vmem:[#allocation42_spill] sm:$0xff]  ;;  %v18584_v46 = vld [vmem:[#allocation124_spill] sm:$0xff] }
 0x49b   :  { %11232 = vst [vmem:[%s17834_s5 + $0x30] sm:$0xff] %v11168_v44  ;;  %v11166_v56 = vmax.f32 %v11102_v38, 0.0  ;;  %v11105_v19 = vadd.f32 %v17391_v41, %v11034_v28  ;;  %v11032_v18 = vadd.f32 %v10791_v43, %v9622_v39  ;;  %v18577_v38 = vld [vmem:[#allocation126_spill] sm:$0xff]  ;;  %v9625_v43 = vadd.f32 %v18579_v31, %v18578_v1  ;;  %v18585_v1 = vld [vmem:[#allocation127_spill] sm:$0xff]  ;;  %v17477_v0 = vpop.f32.mrf.mxu0 }
 0x49c   :  { %v7669_v28 = vadd.f32 %v18577_v38, %v6259_v42 }
 0x49d   :  { %11230 = vst [vmem:[%s17834_s5 + $0x20] sm:$0xff] %v11166_v56  ;;  %v11169_v52 = vmax.f32 %v11105_v19, 0.0  ;;  %v11103_v60 = vadd.f32 %v17391_v41, %v11032_v18  ;;  %v18580_v19 = vld [vmem:[#allocation11_spill] sm:$0xff] }
 0x49e   :  { %v2742_v18 = vadd.f32 %v18581_v58, %v18580_v19 }
 0x49f   :  { %11233 = vst [vmem:[%s17834_s5 + $0x38] sm:$0xff] %v11169_v52  ;;  %v11167_v39 = vmax.f32 %v11103_v60, 0.0  ;;  %v13194_v44 = vpop.f32.mrf.mxu1  ;;  %v9016_v52 = vadd.f32 %v18582_v62, %v7669_v28  ;;  %v18583_v60 = vld [vmem:[#allocation31_spill] sm:$0xff] }
 0x4a0   :  { %v11037_v56 = vadd.f32 %v13194_v44, %v9627_v40  ;;  %v9628_v12 = vadd.f32 %v18584_v46, %v18583_v60  ;;  %v4307_v40 = vadd.f32 %v18585_v1, %v2742_v18  ;;  %v17491_v46 = vpop.f32.mrf.mxu0  ;;  %v18590_v1 = vld [vmem:[#allocation46_spill] sm:$0xff] }
 0x4a1   :  { %11231 = vst [vmem:[%s17834_s5 + $0x28] sm:$0xff] %v11167_v39  ;;  %v10804_v16 = vpop.f32.mrf.mxu1  ;;  %v9626_v31 = vadd.f32 %v17180_v45, %v9016_v52  ;;  %v18588_v45 = vld [vmem:[#allocation4_spill] sm:$0xff] }
 0x4a2   :  { %v11108_v42 = vadd.f32 %v17391_v41, %v11037_v56  ;;  %v11035_v38 = vadd.f32 %v10804_v16, %v9625_v43  ;;  %v5653_v28 = vadd.f32 %v18586_v26, %v4307_v40  ;;  %v18587_v16 = vld [vmem:[#allocation121_spill] sm:$0xff]  ;;  %v9631_v52 = vadd.f32 %v17201_v25, %v18588_v45 }
 0x4a3   :  { %v13195_v44 = vpop.f32.mrf.mxu1 }
 0x4a4   :  { %v11172_v19 = vmax.f32 %v11108_v42, 0.0  ;;  %v11106_v58 = vadd.f32 %v17391_v41, %v11035_v38  ;;  %v11038_v11 = vadd.f32 %v13195_v44, %v9628_v12  ;;  %v6263_v62 = vadd.f32 %v18587_v16, %v5653_v28  ;;  %v18589_v42 = vld [vmem:[#allocation135_spill] sm:$0xff] }
 0x4a5   :  { %v10807_v39 = vpop.f32.mrf.mxu1 }
 0x4a6   :  { %11236 = vst [vmem:[%s17834_s5 + $0x50] sm:$0xff] %v11172_v19  ;;  %v11170_v56 = vmax.f32 %v11106_v58, 0.0  ;;  %v11109_v43 = vadd.f32 %v17391_v41, %v11038_v11  ;;  %v11036_v18 = vadd.f32 %v10807_v39, %v9626_v31  ;;  %v7673_v38 = vadd.f32 %v18589_v42, %v6263_v62  ;;  %v18591_v31 = vld [vmem:[#allocation100_spill] sm:$0xff]  ;;  %v18592_v58 = vld [vmem:[#allocation39_spill] sm:$0xff] }
 0x4a7   :  { %v9629_v11 = vadd.f32 %v17221_v59, %v18590_v1  ;;  %v9632_v39 = vadd.f32 %v17255_v24, %v18592_v58  ;;  %v17506_v59 = vpop.f32.mrf.mxu0 }
 0x4a8   :  { %11234 = vst [vmem:[%s17834_s5 + $0x40] sm:$0xff] %v11170_v56  ;;  %v11173_v60 = vmax.f32 %v11109_v43, 0.0  ;;  %v11107_v26 = vadd.f32 %v17391_v41, %v11036_v18  ;;  %v9020_v19 = vadd.f32 %v18591_v31, %v7673_v38  ;;  %v18593_v38 = vld [vmem:[#allocation136_spill] sm:$0xff] }
 0x4a9   :  { %v13198_v12 = vpop.f32.mrf.mxu1  ;;  %v9635_v1 = vadd.f32 %v17321_v10, %v18593_v38 }
 0x4aa   :  { %11237 = vst [vmem:[%s17834_s5 + $0x58] sm:$0xff] %v11173_v60  ;;  %v11171_v25 = vmax.f32 %v11107_v26, 0.0  ;;  %v11041_v40 = vadd.f32 %v13198_v12, %v9631_v52  ;;  %v9630_v18 = vadd.f32 %v17293_v27, %v9020_v19  ;;  %v17514_v12 = vpop.f32.mrf.mxu0 }
 0x4ab   :  { %v10820_v44 = vpop.f32.mrf.mxu1 }
 0x4ac   :  { %11235 = vst [vmem:[%s17834_s5 + $0x48] sm:$0xff] %v11171_v25  ;;  %v11112_v28 = vadd.f32 %v17391_v41, %v11041_v40  ;;  %v11039_v56 = vadd.f32 %v10820_v44, %v9629_v11  ;;  %v18594_v40 = vld [vmem:[#allocation52_spill] sm:$0xff]  ;;  %v17527_v31 = vpop.f32.mrf.mxu0 }
 0x4ad   :  { %v13199_v43 = vpop.f32.mrf.mxu1  ;;  %v9633_v44 = vadd.f32 %v17331_v50, %v18594_v40 }
 0x4ae   :  { %v11176_v16 = vmax.f32 %v11112_v28, 0.0  ;;  %v11110_v62 = vadd.f32 %v17391_v41, %v11039_v56  ;;  %v11042_v45 = vadd.f32 %v13199_v43, %v9632_v39  ;;  %v18595_v39 = vld [vmem:[#allocation50_spill] sm:$0xff] }
 0x4af   :  { %v10823_v52 = vpop.f32.mrf.mxu1  ;;  %v9636_v10 = vadd.f32 %v17338_v15, %v18595_v39 }
 0x4b0   :  { %11240 = vst [vmem:[%s17834_s5 + $0x70] sm:$0xff] %v11176_v16  ;;  %v11174_v24 = vmax.f32 %v11110_v62, 0.0  ;;  %v11113_v60 = vadd.f32 %v17391_v41, %v11042_v45  ;;  %v11040_v26 = vadd.f32 %v10823_v52, %v9630_v18  ;;  %v18596_v18 = vld [vmem:[#allocation157_spill] sm:$0xff]  ;;  %v17537_v62 = vpop.f32.mrf.mxu0 }
 0x4b1   :  { %v9634_v16 = vadd.f32 %v17348_v36, %v18596_v18 }
 0x4b2   :  { %11238 = vst [vmem:[%s17834_s5 + $0x60] sm:$0xff] %v11174_v24  ;;  %v11177_v27 = vmax.f32 %v11113_v60, 0.0  ;;  %v11111_v42 = vadd.f32 %v17391_v41, %v11040_v26  ;;  %v17546_v38 = vpop.f32.mrf.mxu0 }
 0x4b4   :  { %11241 = vst [vmem:[%s17834_s5 + $0x78] sm:$0xff] %v11177_v27  ;;  %v11175_v11 = vmax.f32 %v11111_v42, 0.0  ;;  %v13202_v25 = vpop.f32.mrf.mxu1  ;;  %v18597_v27 = vld [vmem:[#allocation59_spill] sm:$0xff] }
 0x4b5   :  { %v11045_v19 = vadd.f32 %v13202_v25, %v9635_v1  ;;  %v9639_v42 = vadd.f32 %v17359_v17, %v18597_v27  ;;  %v18598_v25 = vld [vmem:[#allocation57_spill] sm:$0xff]  ;;  %v18601_v27 = vld [vmem:[#allocation122_spill] sm:$0xff] }
 0x4b6   :  { %11239 = vst [vmem:[%s17834_s5 + $0x68] sm:$0xff] %v11175_v11  ;;  %v10836_v58 = vpop.f32.mrf.mxu1  ;;  %v9637_v40 = vadd.f32 %v17366_v9, %v18598_v25  ;;  %v9641_v25 = vadd.f32 %v17408_v29, %v17172_v55 }
 0x4b7   :  { %v11116_v28 = vadd.f32 %v17391_v41, %v11045_v19  ;;  %v11043_v56 = vadd.f32 %v10836_v58, %v9633_v44  ;;  %v18599_v58 = vld [vmem:[#allocation167_spill] sm:$0xff] }
 0x4b8   :  { %v13203_v43 = vpop.f32.mrf.mxu1  ;;  %v9640_v39 = vadd.f32 %v17378_v5, %v18599_v58 }
 0x4b9   :  { %v11180_v50 = vmax.f32 %v11116_v28, 0.0  ;;  %v11114_v45 = vadd.f32 %v17391_v41, %v11043_v56  ;;  %v11046_v52 = vadd.f32 %v13203_v43, %v9636_v10  ;;  %v17559_v10 = vpop.f32.mrf.mxu0  ;;  %v18600_v43 = vld [vmem:[#allocation60_spill] sm:$0xff] }
 0x4ba   :  { %v10839_v24 = vpop.f32.mrf.mxu1  ;;  %v9638_v18 = vadd.f32 %v17386_v33, %v18600_v43 }
 0x4bb   :  { %11244 = vst [vmem:[%s17834_s5 + $0x90] sm:$0xff] %v11180_v50  ;;  %v11178_v60 = vmax.f32 %v11114_v45, 0.0  ;;  %v11117_v15 = vadd.f32 %v17391_v41, %v11046_v52  ;;  %v11044_v26 = vadd.f32 %v10839_v24, %v9634_v16  ;;  %v17568_v24 = vpop.f32.mrf.mxu0 }
 0x4bd   :  { %11242 = vst [vmem:[%s17834_s5 + $0x80] sm:$0xff] %v11178_v60  ;;  %v11181_v36 = vmax.f32 %v11117_v15, 0.0  ;;  %v11115_v1 = vadd.f32 %v17391_v41, %v11044_v26 }
 0x4be   :  { %v13206_v11 = vpop.f32.mrf.mxu1 }
 0x4bf   :  { %11245 = vst [vmem:[%s17834_s5 + $0x98] sm:$0xff] %v11181_v36  ;;  %v11179_v44 = vmax.f32 %v11115_v1, 0.0  ;;  %v11049_v19 = vadd.f32 %v13206_v11, %v9639_v42  ;;  %v9643_v42 = vadd.f32 %v17401_v14, %v18601_v27  ;;  %v17580_v36 = vpop.f32.mrf.mxu0  ;;  %v9644_v14 = vadd.f32 %v17424_v61, %v17184_v4 }
 0x4c0   :  { %v10852_v17 = vpop.f32.mrf.mxu1 }
 0x4c1   :  { %11243 = vst [vmem:[%s17834_s5 + $0x88] sm:$0xff] %v11179_v44  ;;  %v11120_v28 = vadd.f32 %v17391_v41, %v11049_v19  ;;  %v11047_v56 = vadd.f32 %v10852_v17, %v9637_v40  ;;  %v17593_v58 = vpop.f32.mrf.mxu0 }
 0x4c2   :  { %v13207_v9 = vpop.f32.mrf.mxu1 }
 0x4c3   :  { %v11184_v16 = vmax.f32 %v11120_v28, 0.0  ;;  %v11118_v50 = vadd.f32 %v17391_v41, %v11047_v56  ;;  %v11050_v45 = vadd.f32 %v13207_v9, %v9640_v39  ;;  %v9642_v28 = vadd.f32 %v17439_v3, %v17191_v21 }
 0x4c4   :  { %v10855_v52 = vpop.f32.mrf.mxu1 }
 0x4c5   :  { %11248 = vst [vmem:[%s17834_s5 + $0xb0] sm:$0xff] %v11184_v16  ;;  %v11182_v5 = vmax.f32 %v11118_v50, 0.0  ;;  %v11121_v60 = vadd.f32 %v17391_v41, %v11050_v45  ;;  %v11048_v15 = vadd.f32 %v10855_v52, %v9638_v18  ;;  %v17602_v18 = vpop.f32.mrf.mxu0  ;;  %v9647_v16 = vadd.f32 %v17448_v8, %v17197_v51 }
 0x4c6   :  { %v9645_v45 = vadd.f32 %v17465_v34, %v17212_v6  ;;  %v9648_v8 = vadd.f32 %v17477_v0, %v17216_v7  ;;  %v9646_v34 = vadd.f32 %v17491_v46, %v17224_v63 }
 0x4c7   :  { %11246 = vst [vmem:[%s17834_s5 + $0xa0] sm:$0xff] %v11182_v5  ;;  %v11185_v33 = vmax.f32 %v11121_v60, 0.0  ;;  %v11119_v26 = vadd.f32 %v17391_v41, %v11048_v15  ;;  %v17615_v60 = vpop.f32.mrf.mxu0 }
 0x4c8   :  { %v13210_v11 = vpop.f32.mrf.mxu1 }
 0x4c9   :  { %11249 = vst [vmem:[%s17834_s5 + $0xb8] sm:$0xff] %v11185_v33  ;;  %v11183_v1 = vmax.f32 %v11119_v26, 0.0  ;;  %v11053_v40 = vadd.f32 %v13210_v11, %v9643_v42 }
 0x4ca   :  { %v10868_v44 = vpop.f32.mrf.mxu1 }
 0x4cb   :  { %11247 = vst [vmem:[%s17834_s5 + $0xa8] sm:$0xff] %v11183_v1  ;;  %v11124_v19 = vadd.f32 %v17391_v41, %v11053_v40  ;;  %v11051_v17 = vadd.f32 %v10868_v44, %v9641_v25  ;;  %v17626_v1 = vpop.f32.mrf.mxu0  ;;  %v9651_v40 = vadd.f32 %v17506_v59, %v17228_v2  ;;  %v9652_v2 = vadd.f32 %v17527_v31, %v17240_v23 }
 0x4cc   :  { %v13211_v39 = vpop.f32.mrf.mxu1 }
 0x4cd   :  { %v11188_v56 = vmax.f32 %v11124_v19, 0.0  ;;  %v11122_v55 = vadd.f32 %v17391_v41, %v11051_v17  ;;  %v11054_v29 = vadd.f32 %v13211_v39, %v9644_v14  ;;  %v17638_v44 = vpop.f32.mrf.mxu0  ;;  %v9649_v17 = vadd.f32 %v17514_v12, %v17233_v54 }
 0x4ce   :  { %v10871_v9 = vpop.f32.mrf.mxu1 }
 0x4cf   :  { %11252 = vst [vmem:[%s17834_s5 + $0xd0] sm:$0xff] %v11188_v56  ;;  %v11186_v43 = vmax.f32 %v11122_v55, 0.0  ;;  %v11125_v4 = vadd.f32 %v17391_v41, %v11054_v29  ;;  %v11052_v61 = vadd.f32 %v10871_v9, %v9642_v28  ;;  %v17650_v59 = vpop.f32.mrf.mxu0  ;;  %v9650_v9 = vadd.f32 %v17537_v62, %v17243_v20 }
 0x4d1   :  { %11250 = vst [vmem:[%s17834_s5 + $0xc0] sm:$0xff] %v11186_v43  ;;  %v11189_v21 = vmax.f32 %v11125_v4, 0.0  ;;  %v11123_v3 = vadd.f32 %v17391_v41, %v11052_v61  ;;  %v17656_v61 = vpop.f32.mrf.mxu0 }
 0x4d2   :  { %v13214_v50 = vpop.f32.mrf.mxu1 }
 0x4d3   :  { %11253 = vst [vmem:[%s17834_s5 + $0xd8] sm:$0xff] %v11189_v21  ;;  %v11187_v52 = vmax.f32 %v11123_v3, 0.0  ;;  %v11057_v5 = vadd.f32 %v13214_v50, %v9647_v16  ;;  %v9655_v21 = vadd.f32 %v17546_v38, %v17252_v35  ;;  %v9653_v50 = vadd.f32 %v17559_v10, %v17259_v30 }
 0x4d4   :  { %v10884_v51 = vpop.f32.mrf.mxu1  ;;  %v9656_v38 = vadd.f32 %v17568_v24, %v17263_v48  ;;  %v9654_v10 = vadd.f32 %v17580_v36, %v17268_v37 }
 0x4d5   :  { %11251 = vst [vmem:[%s17834_s5 + $0xc8] sm:$0xff] %v11187_v52  ;;  %v11128_v15 = vadd.f32 %v17391_v41, %v11057_v5  ;;  %v11055_v33 = vadd.f32 %v10884_v51, %v9645_v45  ;;  %v17670_v45 = vpop.f32.mrf.mxu0 }
 0x4d6   :  { %v13215_v6 = vpop.f32.mrf.mxu1 }
 0x4d7   :  { %v11192_v26 = vmax.f32 %v11128_v15, 0.0  ;;  %v11126_v27 = vadd.f32 %v17391_v41, %v11055_v33  ;;  %v11058_v42 = vadd.f32 %v13215_v6, %v9648_v8  ;;  %v17683_v15 = vpop.f32.mrf.mxu0 }
 0x4d8   :  { %v10887_v11 = vpop.f32.mrf.mxu1 }
 0x4d9   :  { %11256 = vst [vmem:[%s17834_s5 + $0xf0] sm:$0xff] %v11192_v26  ;;  %v11190_v7 = vmax.f32 %v11126_v27, 0.0  ;;  %v11129_v0 = vadd.f32 %v17391_v41, %v11058_v42  ;;  %v11056_v25 = vadd.f32 %v10887_v11, %v9646_v34  ;;  %v9554_v42 = vpop.f32.mrf.mxu0  ;;  %v9659_v11 = vadd.f32 %v17593_v58, %v17272_v32 }
 0x4db   :  { %11254 = vst [vmem:[%s17834_s5 + $0xe0] sm:$0xff] %v11190_v7  ;;  %v11193_v63 = vmax.f32 %v11129_v0, 0.0  ;;  %v11127_v46 = vadd.f32 %v17391_v41, %v11056_v25  ;;  %v9657_v25 = vadd.f32 %v17602_v18, %v17278_v22 }
 0x4dc   :  { %v13218_v19 = vpop.f32.mrf.mxu1 }
 0x4dd   :  { %11257 = vst [vmem:[%s17834_s5 + $0xf8] sm:$0xff] %v11193_v63  ;;  %v11191_v14 = vmax.f32 %v11127_v46, 0.0  ;;  %v11061_v39 = vadd.f32 %v13218_v19, %v9651_v40  ;;  %v13155_v46 = vpop.f32.mrf.mxu0 }
 0x4de   :  { %v10900_v28 = vpop.f32.mrf.mxu1 }
 0x4df   :  { %11255 = vst [vmem:[%s17834_s5 + $0xe8] sm:$0xff] %v11191_v14  ;;  %v11132_v56 = vadd.f32 %v17391_v41, %v11061_v39  ;;  %v11059_v55 = vadd.f32 %v10900_v28, %v9649_v17  ;;  %v9660_v14 = vadd.f32 %v17615_v60, %v17282_v13  ;;  %v9658_v17 = vadd.f32 %v17626_v1, %v17287_v49  ;;  %v9557_v28 = vpop.f32.mrf.mxu0 }
 0x4e0   :  { %v13219_v29 = vpop.f32.mrf.mxu1 }
 0x4e1   :  { %v11196_v43 = vmax.f32 %v11132_v56, 0.0  ;;  %v11130_v54 = vadd.f32 %v17391_v41, %v11059_v55  ;;  %v11062_v12 = vadd.f32 %v13219_v29, %v9652_v2  ;;  %v9663_v55 = vadd.f32 %v17638_v44, %v17291_v47  ;;  %v13158_v29 = vpop.f32.mrf.mxu0 }
 0x4e2   :  { %v10903_v4 = vpop.f32.mrf.mxu1  ;;  %v9664_v47 = vadd.f32 %v17656_v61, %v17300_v53 }
 0x4e3   :  { %11260 = vst [vmem:[%s17834_s5 + $0x110] sm:$0xff] %v11196_v43  ;;  %v11194_v23 = vmax.f32 %v11130_v54, 0.0  ;;  %v11133_v31 = vadd.f32 %v17391_v41, %v11062_v12  ;;  %v11060_v16 = vadd.f32 %v10903_v4, %v9650_v9  ;;  %v9661_v43 = vadd.f32 %v17650_v59, %v17297_v57  ;;  %v18602_v57 = vld [vmem:[#allocation123_spill] sm:$0xff] }
 0x4e4   :  { %v9662_v59 = vadd.f32 %v17670_v45, %v18602_v57 }
 0x4e5   :  { %11258 = vst [vmem:[%s17834_s5 + $0x100] sm:$0xff] %v11194_v23  ;;  %v11197_v20 = vmax.f32 %v11133_v31, 0.0  ;;  %v11131_v62 = vadd.f32 %v17391_v41, %v11060_v16  ;;  %v9570_v31 = vpop.f32.mrf.mxu0 }
 0x4e6   :  { %v13222_v3 = vpop.f32.mrf.mxu1 }
 0x4e7   :  { %11261 = vst [vmem:[%s17834_s5 + $0x118] sm:$0xff] %v11197_v20  ;;  %v11195_v52 = vmax.f32 %v11131_v62, 0.0  ;;  %v11065_v5 = vadd.f32 %v13222_v3, %v9655_v21 }
 0x4e8   :  { %v10916_v35 = vpop.f32.mrf.mxu1 }
 0x4e9   :  { %11259 = vst [vmem:[%s17834_s5 + $0x108] sm:$0xff] %v11195_v52  ;;  %v11136_v51 = vadd.f32 %v17391_v41, %v11065_v5  ;;  %v11063_v8 = vadd.f32 %v10916_v35, %v9653_v50  ;;  %v13159_v52 = vpop.f32.mrf.mxu0  ;;  %v18603_v35 = vld [vmem:[#allocation130_spill] sm:$0xff] }
 0x4ea   :  { %v13223_v30 = vpop.f32.mrf.mxu1 }
 0x4eb   :  { %v11200_v33 = vmax.f32 %v11136_v51, 0.0  ;;  %v11134_v6 = vadd.f32 %v17391_v41, %v11063_v8  ;;  %v11066_v34 = vadd.f32 %v13223_v30, %v9656_v38  ;;  %v9667_v38 = vadd.f32 %v17683_v15, %v18603_v35  ;;  %v18604_v30 = vld [vmem:[#allocation132_spill] sm:$0xff] }
 0x4ec   :  { %v10919_v26 = vpop.f32.mrf.mxu1 }
 0x4ed   :  { %11264 = vst [vmem:[%s17834_s5 + $0x130] sm:$0xff] %v11200_v33  ;;  %v11198_v48 = vmax.f32 %v11134_v6, 0.0  ;;  %v11137_v24 = vadd.f32 %v17391_v41, %v11066_v34  ;;  %v11064_v27 = vadd.f32 %v10919_v26, %v9654_v10  ;;  %v9665_v10 = vadd.f32 %v9554_v42, %v18604_v30  ;;  %v9573_v33 = vpop.f32.mrf.mxu0  ;;  %v18605_v26 = vld [vmem:[#allocation133_spill] sm:$0xff] }
 0x4ef   :  { %11262 = vst [vmem:[%s17834_s5 + $0x120] sm:$0xff] %v11198_v48  ;;  %v11201_v37 = vmax.f32 %v11137_v24, 0.0  ;;  %v11135_v36 = vadd.f32 %v17391_v41, %v11064_v27  ;;  %v9668_v48 = vadd.f32 %v13155_v46, %v18605_v26 }
 0x4f1   :  { %11265 = vst [vmem:[%s17834_s5 + $0x138] sm:$0xff] %v11201_v37  ;;  %v11199_v7 = vmax.f32 %v11135_v36, 0.0  ;;  %v13226_v0 = vpop.f32.mrf.mxu1  ;;  %v18606_v37 = vld [vmem:[#allocation138_spill] sm:$0xff] }
 0x4f2   :  { %v11069_v63 = vadd.f32 %v13226_v0, %v9659_v11  ;;  %v9666_v36 = vadd.f32 %v9557_v28, %v18606_v37  ;;  %v13162_v11 = vpop.f32.mrf.mxu0 }
 0x4f3   :  { %11263 = vst [vmem:[%s17834_s5 + $0x128] sm:$0xff] %v11199_v7  ;;  %v10932_v40 = vpop.f32.mrf.mxu1 }
 0x4f4   :  { %v11140_v32 = vadd.f32 %v17391_v41, %v11069_v63  ;;  %v11067_v58 = vadd.f32 %v10932_v40, %v9657_v25 }
 0x4f5   :  { %v13227_v19 = vpop.f32.mrf.mxu1 }
 0x4f6   :  { %v11204_v39 = vmax.f32 %v11140_v32, 0.0  ;;  %v11138_v22 = vadd.f32 %v17391_v41, %v11067_v58  ;;  %v11070_v18 = vadd.f32 %v13227_v19, %v9660_v14  ;;  %v18607_v14 = vld [vmem:[#allocation140_spill] sm:$0xff]  ;;  %v9586_v58 = vpop.f32.mrf.mxu0 }
 0x4f7   :  { %v10935_v2 = vpop.f32.mrf.mxu1  ;;  %v9671_v32 = vadd.f32 %v13158_v29, %v18607_v14 }
 0x4f8   :  { %11268 = vst [vmem:[%s17834_s5 + $0x150] sm:$0xff] %v11204_v39  ;;  %v11202_v56 = vmax.f32 %v11138_v22, 0.0  ;;  %v11141_v13 = vadd.f32 %v17391_v41, %v11070_v18  ;;  %v11068_v60 = vadd.f32 %v10935_v2, %v9658_v17  ;;  %v18608_v22 = vld [vmem:[#allocation141_spill] sm:$0xff] }
 0x4f9   :  { %v9669_v18 = vadd.f32 %v9570_v31, %v18608_v22 }
 0x4fa   :  { %11266 = vst [vmem:[%s17834_s5 + $0x140] sm:$0xff] %v11202_v56  ;;  %v11205_v49 = vmax.f32 %v11141_v13, 0.0  ;;  %v11139_v1 = vadd.f32 %v17391_v41, %v11068_v60  ;;  %v18609_v13 = vld [vmem:[#allocation146_spill] sm:$0xff] }
 0x4fb   :  { %v13230_v9 = vpop.f32.mrf.mxu1  ;;  %v9672_v60 = vadd.f32 %v13159_v52, %v18609_v13 }
 0x4fc   :  { %11269 = vst [vmem:[%s17834_s5 + $0x158] sm:$0xff] %v11205_v49  ;;  %v11203_v54 = vmax.f32 %v11139_v1, 0.0  ;;  %v11073_v12 = vadd.f32 %v13230_v9, %v9663_v55  ;;  %v13163_v55 = vpop.f32.mrf.mxu0  ;;  %v18610_v9 = vld [vmem:[#allocation148_spill] sm:$0xff] }
 0x4fd   :  { %v10948_v4 = vpop.f32.mrf.mxu1 }
 0x4fe   :  { %11267 = vst [vmem:[%s17834_s5 + $0x148] sm:$0xff] %v11203_v54  ;;  %v11144_v44 = vadd.f32 %v17391_v41, %v11073_v12  ;;  %v11071_v23 = vadd.f32 %v10948_v4, %v9661_v43  ;;  %v9670_v43 = vadd.f32 %v9573_v33, %v18610_v9 }
 0x4ff   :  { %v13231_v16 = vpop.f32.mrf.mxu1 }
 0x500   :  { %v11208_v21 = vmax.f32 %v11144_v44, 0.0  ;;  %v11142_v20 = vadd.f32 %v17391_v41, %v11071_v23  ;;  %v11074_v62 = vadd.f32 %v13231_v16, %v9664_v47  ;;  %v9589_v44 = vpop.f32.mrf.mxu0 }
 0x501   :  { %v10951_v3 = vpop.f32.mrf.mxu1 }
 0x502   :  { %11272 = vst [vmem:[%s17834_s5 + $0x170] sm:$0xff] %v11208_v21  ;;  %v11206_v53 = vmax.f32 %v11142_v20, 0.0  ;;  %v11145_v61 = vadd.f32 %v17391_v41, %v11074_v62  ;;  %v11072_v50 = vadd.f32 %v10951_v3, %v9662_v59  ;;  %v18611_v21 = vld [vmem:[#allocation13_spill] sm:$0xff]  ;;  %v13166_v62 = vpop.f32.mrf.mxu0 }
 0x503   :  { %v9675_v20 = vadd.f32 %v13162_v11, %v18611_v21 }
 0x504   :  { %11270 = vst [vmem:[%s17834_s5 + $0x160] sm:$0xff] %v11206_v53  ;;  %v11209_v5 = vmax.f32 %v11145_v61, 0.0  ;;  %v11143_v45 = vadd.f32 %v17391_v41, %v11072_v50  ;;  %v18612_v61 = vld [vmem:[#allocation16_spill] sm:$0xff] }
 0x505   :  { %v9673_v50 = vadd.f32 %v9586_v58, %v18612_v61  ;;  %v18617_v58 = vld [vmem:[#allocation149_spill] sm:$0xff] }
 0x506   :  { %11273 = vst [vmem:[%s17834_s5 + $0x178] sm:$0xff] %v11209_v5  ;;  %v11207_v51 = vmax.f32 %v11143_v45, 0.0  ;;  %v13234_v8 = vpop.f32.mrf.mxu1  ;;  %v18613_v45 = vld [vmem:[#allocation17_spill] sm:$0xff] }
 0x507   :  { %v11077_v6 = vadd.f32 %v13234_v8, %v9667_v38  ;;  %v9676_v35 = vadd.f32 %v13163_v55, %v18613_v45  ;;  %v9602_v8 = vpop.f32.mrf.mxu0 }
 0x508   :  { %11271 = vst [vmem:[%s17834_s5 + $0x168] sm:$0xff] %v11207_v51  ;;  %v10964_v34 = vpop.f32.mrf.mxu1 }
 0x509   :  { %v11148_v24 = vadd.f32 %v17391_v41, %v11077_v6  ;;  %v11075_v15 = vadd.f32 %v10964_v34, %v9665_v10  ;;  %v18614_v10 = vld [vmem:[#allocation24_spill] sm:$0xff]  ;;  %v13167_v37 = vpop.f32.mrf.mxu0 }
 0x50a   :  { %v13235_v27 = vpop.f32.mrf.mxu1  ;;  %v9674_v33 = vadd.f32 %v9589_v44, %v18614_v10 }
 0x50b   :  { %v11212_v7 = vmax.f32 %v11148_v24, 0.0  ;;  %v11146_v0 = vadd.f32 %v17391_v41, %v11075_v15  ;;  %v11078_v42 = vadd.f32 %v13235_v27, %v9668_v48  ;;  %v9605_v14 = vpop.f32.mrf.mxu0 }
 0x50c   :  { %v10967_v25 = vpop.f32.mrf.mxu1 }
 0x50d   :  { %11276 = vst [vmem:[%s17834_s5 + $0x190] sm:$0xff] %v11212_v7  ;;  %v11210_v63 = vmax.f32 %v11146_v0, 0.0  ;;  %v11149_v40 = vadd.f32 %v17391_v41, %v11078_v42  ;;  %v11076_v46 = vadd.f32 %v10967_v25, %v9666_v36  ;;  %v18615_v36 = vld [vmem:[#allocation25_spill] sm:$0xff]  ;;  %v18616_v25 = vld [vmem:[#allocation32_spill] sm:$0xff] }
 0x50e   :  { %v9679_v11 = vadd.f32 %v13166_v62, %v18615_v36 }
 0x50f   :  { %11274 = vst [vmem:[%s17834_s5 + $0x180] sm:$0xff] %v11210_v63  ;;  %v11213_v19 = vmax.f32 %v11149_v40, 0.0  ;;  %v11147_v17 = vadd.f32 %v17391_v41, %v11076_v46  ;;  %v9677_v63 = vadd.f32 %v9602_v8, %v18616_v25 }
 0x510   :  { %v13238_v39 = vpop.f32.mrf.mxu1 }
 0x511   :  { %11277 = vst [vmem:[%s17834_s5 + $0x198] sm:$0xff] %v11213_v19  ;;  %v11211_v28 = vmax.f32 %v11147_v17, 0.0  ;;  %v11081_v2 = vadd.f32 %v13238_v39, %v9671_v32  ;;  %v9680_v19 = vadd.f32 %v13167_v37, %v18617_v58 }
 0x512   :  { %v10980_v56 = vpop.f32.mrf.mxu1 }
 0x513   :  { %11275 = vst [vmem:[%s17834_s5 + $0x188] sm:$0xff] %v11211_v28  ;;  %v11152_v49 = vadd.f32 %v17391_v41, %v11081_v2  ;;  %v11079_v1 = vadd.f32 %v10980_v56, %v9669_v18  ;;  %v18618_v18 = vld [vmem:[#allocation151_spill] sm:$0xff] }
 0x514   :  { %v13239_v29 = vpop.f32.mrf.mxu1  ;;  %v9678_v28 = vadd.f32 %v9605_v14, %v18618_v18 }
 0x515   :  { %v11216_v54 = vmax.f32 %v11152_v49, 0.0  ;;  %v11150_v12 = vadd.f32 %v17391_v41, %v11079_v1  ;;  %v11082_v4 = vadd.f32 %v13239_v29, %v9672_v60 }
 0x516   :  { %v10983_v47 = vpop.f32.mrf.mxu1 }
 0x517   :  { %11280 = vst [vmem:[%s17834_s5 + $0x1b0] sm:$0xff] %v11216_v54  ;;  %v11214_v23 = vmax.f32 %v11150_v12, 0.0  ;;  %v11153_v31 = vadd.f32 %v17391_v41, %v11082_v4  ;;  %v11080_v16 = vadd.f32 %v10983_v47, %v9670_v43 }
 0x519   :  { %11278 = vst [vmem:[%s17834_s5 + $0x1a0] sm:$0xff] %v11214_v23  ;;  %v11217_v57 = vmax.f32 %v11153_v31, 0.0  ;;  %v11151_v59 = vadd.f32 %v17391_v41, %v11080_v16 }
 0x51b   :  { %11281 = vst [vmem:[%s17834_s5 + $0x1b8] sm:$0xff] %v11217_v57  ;;  %v11215_v3 = vmax.f32 %v11151_v59, 0.0  ;;  %v13242_v53 = vpop.f32.mrf.mxu1 }
 0x51c   :  { %v11085_v52 = vadd.f32 %v13242_v53, %v9675_v20 }
 0x51d   :  { %11279 = vst [vmem:[%s17834_s5 + $0x1a8] sm:$0xff] %v11215_v3  ;;  %v10996_v5 = vpop.f32.mrf.mxu1 }
 0x51e   :  { %v11156_v38 = vadd.f32 %v17391_v41, %v11085_v52  ;;  %v11083_v51 = vadd.f32 %v10996_v5, %v9673_v50 }
 0x51f   :  { %v13243_v30 = vpop.f32.mrf.mxu1 }
 0x520   :  { %v11220_v6 = vmax.f32 %v11156_v38, 0.0  ;;  %v11154_v34 = vadd.f32 %v17391_v41, %v11083_v51  ;;  %v11086_v26 = vadd.f32 %v13243_v30, %v9676_v35 }
 0x521   :  { %v10999_v48 = vpop.f32.mrf.mxu1 }
 0x522   :  { %11284 = vst [vmem:[%s17834_s5 + $0x1d0] sm:$0xff] %v11220_v6  ;;  %v11218_v24 = vmax.f32 %v11154_v34, 0.0  ;;  %v11157_v15 = vadd.f32 %v17391_v41, %v11086_v26  ;;  %v11084_v27 = vadd.f32 %v10999_v48, %v9674_v33 }
 0x524   :  { %11282 = vst [vmem:[%s17834_s5 + $0x1c0] sm:$0xff] %v11218_v24  ;;  %v11221_v7 = vmax.f32 %v11157_v15, 0.0  ;;  %v11155_v0 = vadd.f32 %v17391_v41, %v11084_v27 }
 0x525   :  { %v13246_v42 = vpop.f32.mrf.mxu1 }
 0x526   :  { %11285 = vst [vmem:[%s17834_s5 + $0x1d8] sm:$0xff] %v11221_v7  ;;  %v11219_v40 = vmax.f32 %v11155_v0, 0.0  ;;  %v11089_v46 = vadd.f32 %v13246_v42, %v9679_v11 }
 0x527   :  { %v11012_v32 = vpop.f32.mrf.mxu1 }
 0x528   :  { %11283 = vst [vmem:[%s17834_s5 + $0x1c8] sm:$0xff] %v11219_v40  ;;  %v11160_v17 = vadd.f32 %v17391_v41, %v11089_v46  ;;  %v11087_v39 = vadd.f32 %v11012_v32, %v9677_v63 }
 0x529   :  { %v13247_v22 = vpop.f32.mrf.mxu1 }
 0x52a   :  { %v11224_v2 = vmax.f32 %v11160_v17, 0.0  ;;  %v11158_v56 = vadd.f32 %v17391_v41, %v11087_v39  ;;  %v11090_v13 = vadd.f32 %v13247_v22, %v9680_v19 }
 0x52b   :  { %v11015_v60 = vpop.f32.mrf.mxu1 }
 0x52c   :  { %11288 = vst [vmem:[%s17834_s5 + $0x1f0] sm:$0xff] %v11224_v2  ;;  %v11222_v55 = vmax.f32 %v11158_v56, 0.0  ;;  %v11161_v49 = vadd.f32 %v17391_v41, %v11090_v13  ;;  %v11088_v1 = vadd.f32 %v11015_v60, %v9678_v28 }
 0x52e   :  { %11286 = vst [vmem:[%s17834_s5 + $0x1e0] sm:$0xff] %v11222_v55  ;;  %v11225_v29 = vmax.f32 %v11161_v49, 0.0  ;;  %v11159_v9 = vadd.f32 %v17391_v41, %v11088_v1 }
 0x530   :  { %11289 = vst [vmem:[%s17834_s5 + $0x1f8] sm:$0xff] %v11225_v29  ;;  %v11223_v43 = vmax.f32 %v11159_v9, 0.0 }
 0x532   :  { %11287 = vst [vmem:[%s17834_s5 + $0x1e8] sm:$0xff] %v11223_v43 }

</bundles_post_ra>
